<compile_context>
chip_gen: v7x
topology: tpu7x:2x2x1
jax: 0.10.0
libtpu: 0.0.40
codegen_flags: <defaults>
</compile_context>

<pallas_src>
import functools

import jax
import jax.numpy as jnp
from jax import lax
from jax.experimental import pallas as pl
from jax.experimental.pallas import tpu as pltpu

BN_EPS = 1e-5  # PyTorch BatchNorm2d default


# -----------------------------------------------------------------------------
# Device-aware VMEM sizing (v7x: 64 MiB physical per TC; v5e/v6e: 128 MiB).
# -----------------------------------------------------------------------------
@functools.lru_cache(maxsize=None)
def _vmem_caps():
    cap = 64 * 1024 * 1024
    try:
        info = pltpu.get_tpu_info()
        cap = int(getattr(info, "vmem_capacity_bytes", cap)) or cap
    except Exception:
        pass
    limit = min(cap * 3 // 4, 100 * 1024 * 1024)   # scoped limit handed to Mosaic
    budget = int(limit * 0.85)                     # planning budget for tile picking
    return limit, budget


def _single_buffered(block_shape, index_map):
    """BlockSpec for grid-invariant operands (weights): no double-buffering."""
    if hasattr(pl, "Buffered"):
        try:
            return pl.BlockSpec(block_shape, index_map,
                                pipeline_mode=pl.Buffered(1))
        except Exception:
            pass
    return pl.BlockSpec(block_shape, index_map)


# -----------------------------------------------------------------------------
# Haar DWT2 / IDWT2 glue (plain JAX, NHWC, spatial axes (-3, -2)).
# For even spatial sizes this matches pywt 'haar' up to the labelling of the
# detail subbands, which is irrelevant here because the same conv/BN/ReLU is
# applied to each subband and our idwt is the exact inverse of our dwt.
# TODO(synk): the DWT butterfly / IDWT interleave could be fused into the
# Pallas kernels to shave one more HBM pass each; kept in XLA glue here where
# they fuse with the adjacent elementwise/copy ops.
# -----------------------------------------------------------------------------
def haar_dwt2_nhwc(x):
    N, H, W, C = x.shape
    xr = x.reshape(N, H // 2, 2, W // 2, 2, C)
    x00 = xr[:, :, 0, :, 0, :]
    x01 = xr[:, :, 0, :, 1, :]
    x10 = xr[:, :, 1, :, 0, :]
    x11 = xr[:, :, 1, :, 1, :]
    cA = (x00 + x01 + x10 + x11) * 0.5
    cH = (x00 + x01 - x10 - x11) * 0.5
    cV = (x00 - x01 + x10 - x11) * 0.5
    cD = (x00 - x01 - x10 + x11) * 0.5
    return cA, cH, cV, cD


def haar_idwt2_nhwc(cA, cH, cV, cD):
    x00 = (cA + cH + cV + cD) * 0.5
    x01 = (cA + cH - cV - cD) * 0.5
    x10 = (cA - cH + cV - cD) * 0.5
    x11 = (cA - cH - cV + cD) * 0.5
    N, Hh, Wh, C = cA.shape
    top = jnp.stack([x00, x01], axis=3)           # (N, Hh, Wh, 2, C)
    bot = jnp.stack([x10, x11], axis=3)
    out = jnp.stack([top, bot], axis=2)           # (N, Hh, 2, Wh, 2, C)
    return out.reshape(N, 2 * Hh, 2 * Wh, C)      # single-pass interleave


# -----------------------------------------------------------------------------
# Kernel A (phase 1): per-subband 1x1 conv (bias=False), tiled over rows.
# grid = (4 subbands, row-tiles), both parallel.  Emits bf16 pre-BN activations
# and per-tile f32 (sum, sum-of-squares) partials for the two-phase BatchNorm.
# -----------------------------------------------------------------------------
def _subband_conv_kernel(x_ref, w_ref, z_ref, st_ref):
    z = jnp.dot(x_ref[0], w_ref[...], preferred_element_type=jnp.float32)
    s1 = jnp.sum(z, axis=0, keepdims=True)          # (1, Cout)
    s2 = jnp.sum(z * z, axis=0, keepdims=True)      # (1, Cout)
    st_ref[0, 0] = jnp.concatenate([s1, s2], axis=0)
    z_ref[0] = z.astype(z_ref.dtype)


def subband_conv_phase1(sub_bf16, w_t, tile_rows):
    S, P, Cin = sub_bf16.shape
    Cout = w_t.shape[1]
    n_pt = P // tile_rows
    limit, _ = _vmem_caps()
    return pl.pallas_call(
        _subband_conv_kernel,
        out_shape=(
            jax.ShapeDtypeStruct((S, P, Cout), jnp.bfloat16),
            jax.ShapeDtypeStruct((S, n_pt, 2, Cout), jnp.float32),
        ),
        grid_spec=pltpu.PrefetchScalarGridSpec(
            num_scalar_prefetch=0,
            grid=(S, n_pt),
            in_specs=[
                pl.BlockSpec((1, tile_rows, Cin), lambda s, p: (s, p, 0)),
                _single_buffered((Cin, Cout), lambda s, p: (0, 0)),
            ],
            out_specs=[
                pl.BlockSpec((1, tile_rows, Cout), lambda s, p: (s, p, 0)),
                pl.BlockSpec((1, 1, 2, Cout), lambda s, p: (s, p, 0, 0)),
            ],
        ),
        compiler_params=pltpu.CompilerParams(
            dimension_semantics=("parallel", "parallel"),
            vmem_limit_bytes=limit,
        ),
    )(sub_bf16, w_t)


def _choose_tile_rows(P, cin, cout, budget, target=8192):
    def need(tp):
        return (2 * tp * cin * 2          # bf16 input tile, double-buffered
                + 2 * tp * cout * 2       # bf16 output tile, double-buffered
                + 2 * tp * cout * 4       # f32 matmul / sum-sq temporaries
                + cin * cout * 2)         # bf16 weight
    for d in range(min(P, target), 0, -1):
        if P % d == 0 and (d % 8 == 0 or d == P) and need(d) <= budget:
            return d
    return P


# -----------------------------------------------------------------------------
# Kernel B (phase 1): 3x3 conv (pad=1, no bias — cancelled by training-mode BN)
# over the 512-channel concat of [rimg0, rimg1], tiled over (batch, H-tile),
# both parallel.  9 taps with K=512 accumulate into a VMEM f32 scratch buffer
# (first tap writes, the rest +=).  Per tile: 3 dx-shifted slabs; the dy taps
# are sublane-aligned leading-dim slices of each slab.  Emits the bf16 conv
# output tile plus per-tile (sum, sum-of-squares) BN partials.
# TODO(synk): if the dx slab relayout copies show up at very large tiles,
# switch to computing over the padded width with aligned taps + a column mask.
# -----------------------------------------------------------------------------
def _convw_kernel(x_ref, w_ref, z_ref, st_ref, acc_ref, *, tH, W, Cin, Cout):
    x = x_ref[0]                                    # (tH+2, W+2, Cin) bf16
    rows = tH * W
    for dx in range(3):
        slab = x[:, dx:dx + W, :].reshape((tH + 2) * W, Cin)
        for dy in range(3):
            lo = dy * W
            tap = jnp.dot(slab[lo:lo + rows, :], w_ref[3 * dy + dx],
                          preferred_element_type=jnp.float32)
            if dx == 0 and dy == 0:
                acc_ref[...] = tap                  # init from first tap
            else:
                acc_ref[...] += tap                 # accumulate in VMEM, not vregs
    acc = acc_ref[...]
    s1 = jnp.sum(acc, axis=0, keepdims=True)
    s2 = jnp.sum(acc * acc, axis=0, keepdims=True)
    st_ref[0] = jnp.concatenate([s1, s2], axis=0)   # (2, Cout) f32 partials
    z_ref[0] = acc.reshape(tH, W, Cout).astype(z_ref.dtype)


def convw_phase1(x_tiles, w9, N, H, W, tH):
    n_ht = H // tH
    Cin = x_tiles.shape[-1]
    Cout = w9.shape[-1]
    limit, _ = _vmem_caps()
    kernel = functools.partial(_convw_kernel, tH=tH, W=W, Cin=Cin, Cout=Cout)
    return pl.pallas_call(
        kernel,
        out_shape=(
            jax.ShapeDtypeStruct((N, H, W, Cout), jnp.bfloat16),
            jax.ShapeDtypeStruct((N * n_ht, 2, Cout), jnp.float32),
        ),
        grid_spec=pltpu.PrefetchScalarGridSpec(
            num_scalar_prefetch=0,
            grid=(N, n_ht),
            in_specs=[
                pl.BlockSpec((1, tH + 2, W + 2, Cin),
                             lambda n, t: (n * n_ht + t, 0, 0, 0)),
                _single_buffered((9, Cin, Cout), lambda n, t: (0, 0, 0)),
            ],
            out_specs=[
                pl.BlockSpec((1, tH, W, Cout), lambda n, t: (n, t, 0, 0)),
                pl.BlockSpec((1, 2, Cout), lambda n, t: (n * n_ht + t, 0, 0)),
            ],
            scratch_shapes=[pltpu.VMEM((tH * W, Cout), jnp.float32)],
        ),
        compiler_params=pltpu.CompilerParams(
            dimension_semantics=("parallel", "parallel"),
            vmem_limit_bytes=limit,
        ),
    )(x_tiles, w9)


def _choose_tile_h(N, H, W, cin, cout, budget):
    def need(th):
        return (2 * (th + 2) * (W + 2) * cin * 2    # bf16 input tile, double-buffered
                + 2 * th * W * cout * 2             # bf16 z out, double-buffered
                + th * W * cout * 4                 # f32 scratch accumulator
                + (th + 2) * W * cin * 2            # dx slab temporary
                + th * W * cout * 4                 # tap result temporary
                + 9 * cin * cout * 2)               # bf16 weights (single-buffered)
    cands = [d for d in range(H, 0, -1) if H % d == 0]
    if N == 1 and len(cands) > 1:
        cands = cands[1:]        # keep >=2 H-tiles so both v7x TensorCores get work
    for d in cands:
        if need(d) <= budget:
            return d
    return cands[-1]


def pad_and_tile(x_nhwc_bf16, tH):
    """Zero-pad spatially by 1.  If tH < H, build duplicated-halo H-tiles from
    three strided/reshaped views + one concat (no Python loop over tiles)."""
    N, H, W, C = x_nhwc_bf16.shape
    xp = jnp.pad(x_nhwc_bf16, ((0, 0), (1, 1), (1, 1), (0, 0)))
    n_ht = H // tH
    if n_ht == 1:
        return xp                                             # (N, H+2, W+2, C)
    core = xp[:, 1:H + 1].reshape(N, n_ht, tH, W + 2, C)
    top = xp[:, 0:H:tH][:, :, None]                           # (N, n_ht, 1, W+2, C)
    bot = xp[:, tH + 1:H + 2:tH][:, :, None]
    tiles = jnp.concatenate([top, core, bot], axis=2)         # (N, n_ht, tH+2, W+2, C)
    return tiles.reshape(N * n_ht, tH + 2, W + 2, C)


# -----------------------------------------------------------------------------
# Parameters.
# -----------------------------------------------------------------------------
def init_params(key, in_channels, out_channels):
    # convW is hard-coded Conv2d(512, 256, ...) => in_channels + out_channels == 512
    assert in_channels + out_channels == 512
    k1, k2 = jax.random.split(key, 2)
    # conv_layer: Conv2d(in, out, k=1, bias=False) -> weight (out, in, 1, 1)
    w1 = jax.random.normal(k1, (out_channels, in_channels), jnp.float32)
    w1 = w1 * (1.0 / jnp.sqrt(in_channels))
    gamma1 = jnp.ones((1, out_channels), jnp.float32)   # BatchNorm2d default init
    beta1 = jnp.zeros((1, out_channels), jnp.float32)
    # convW: Conv2d(512, 256, k=3, pad=1).  Bias not materialised: training-mode
    # BatchNorm right after the conv cancels it exactly.
    wW_oihw = jax.random.normal(k2, (256, 512, 3, 3), jnp.float32)
    wW_oihw = wW_oihw * (1.0 / jnp.sqrt(512 * 9))
    wW_hwio = jnp.transpose(wW_oihw, (2, 3, 1, 0))      # (3, 3, 512, 256)
    gammaW = jnp.ones((1, 256), jnp.float32)
    betaW = jnp.zeros((1, 256), jnp.float32)
    # TODO(synk): optional fp8 (v7x) / int8 (v5e/v6e) weight quantisation of wW9
    # with per-channel scales folded into the BN scale, gated on accuracy.
    return dict(
        w1_t=jnp.transpose(w1).astype(jnp.bfloat16),             # (Cin, Cout) bf16
        gamma1=gamma1, beta1=beta1,
        wW9=wW_hwio.reshape(9, 512, 256).astype(jnp.bfloat16),   # (9, 512, 256) bf16
        gammaW=gammaW, betaW=betaW,
    )


# -----------------------------------------------------------------------------
# Forward.
# -----------------------------------------------------------------------------
def wavelet_transform_unit_forward(x, params):
    # x: (N, Cin, H, W) float32 (module API); internally everything is NHWC.
    N, Cin, H, W = x.shape
    assert H % 2 == 0 and W % 2 == 0, "Haar dwt2 needs even spatial dims"
    Cout1 = params["w1_t"].shape[1]
    CinW, CoutW = params["wW9"].shape[1], params["wW9"].shape[2]
    _, budget = _vmem_caps()

    x_nhwc = jnp.transpose(x, (0, 2, 3, 1))            # single entry transpose

    # --- branch 0: dwt2 -> per-subband conv1x1 + BN(batch stats) + ReLU -> idwt2
    cA, cH_, cV, cD = haar_dwt2_nhwc(x_nhwc)
    Hh, Wh = H // 2, W // 2
    P = N * Hh * Wh
    sub = jnp.stack([cA, cH_, cV, cD], axis=0).reshape(4, P, Cin).astype(jnp.bfloat16)

    tP = _choose_tile_rows(P, Cin, Cout1, budget)
    z1, st1 = subband_conv_phase1(sub, params["w1_t"], tP)

    # Finalise per-subband BatchNorm batch statistics (training mode, shared
    # gamma/beta, each subband normalised with its own batch stats).
    s1 = jnp.sum(st1, axis=1)                           # (4, 2, Cout1)
    mean1 = s1[:, 0, :] / P
    var1 = jnp.maximum(s1[:, 1, :] / P - mean1 * mean1, 0.0)
    scale1 = params["gamma1"] * lax.rsqrt(var1 + BN_EPS)          # (4, Cout1)
    shift1 = params["beta1"] - mean1 * scale1                     # (4, Cout1)

    # BN apply + ReLU + idwt2 + concat + pad stay in plain jnp: XLA fuses this
    # elementwise/copy chain into ~one HBM pass feeding the 3x3-conv kernel.
    y = jnp.maximum(z1.astype(jnp.float32) * scale1[:, None, :] + shift1[:, None, :], 0.0)
    y = y.reshape(4, N, Hh, Wh, Cout1)
    rimg0 = haar_idwt2_nhwc(y[0], y[1], y[2], y[3])     # (N, H, W, Cout1) f32

    # --- branch 1: wavedec2(level=3) + 3x idwt2 == perfect Haar round trip ----
    # Replaced by the identity (differs from the float round trip only by
    # rounding noise).
    rimg1 = x_nhwc

    # --- cat + convW(3x3, K=512) + bnW(batch stats) + ReLU --------------------
    xcat = jnp.concatenate([rimg0.astype(jnp.bfloat16),
                            rimg1.astype(jnp.bfloat16)], axis=-1)  # (N, H, W, 512)
    tH = _choose_tile_h(N, H, W, CinW, CoutW, budget)
    x_tiles = pad_and_tile(xcat, tH)
    z2, st2 = convw_phase1(x_tiles, params["wW9"], N, H, W, tH)

    # Finalise BatchNorm batch statistics over all (N, H, W) positions.
    cnt = float(N * H * W)
    s2 = jnp.sum(st2, axis=0)                           # (2, CoutW)
    meanW = s2[0] / cnt
    varW = jnp.maximum(s2[1] / cnt - meanW * meanW, 0.0)
    scaleW = params["gammaW"][0] * lax.rsqrt(varW + BN_EPS)        # (CoutW,)
    shiftW = params["betaW"][0] - meanW * scaleW

    # BN + ReLU in jnp: XLA fuses it into the exit transpose (single pass over z2).
    out_nhwc = jnp.maximum(z2.astype(jnp.float32) * scaleW + shiftW, 0.0)
    return jnp.transpose(out_nhwc, (0, 3, 1, 2))        # single exit transpose

# TODO(synk): BatchNorm running_mean/running_var state updates (a training-time
# side effect of the PyTorch module) are not reproduced; only the training-mode
# forward output (batch statistics) is computed.  Dropping the convW bias and
# rimg1 == x are only valid under training-mode (batch-stat) BatchNorm.


if __name__ == "__main__":
    key = jax.random.PRNGKey(0)
    k_x, k_p = jax.random.split(key)

    # convW forces in_channels + out_channels == 512
    in_channels, out_channels = 256, 256
    N, H, W = 2, 16, 16

    x = jax.random.normal(k_x, (N, in_channels, H, W), jnp.float32)
    params = init_params(k_p, in_channels, out_channels)

    fwd = jax.jit(wavelet_transform_unit_forward)
    out = jax.block_until_ready(fwd(x, params))

    assert out.shape == (N, 256, H, W), out.shape
    assert bool(jnp.all(jnp.isfinite(out)))
    print("KERNEL_OK")
</pallas_src>

<mosaic_0001>
module attributes {stable_mosaic.version = 11 : i64} {
  func.func @_subband_conv_kernel(%arg0: i32, %arg1: i32, %arg2: memref<1x128x256xbf16, #tpu.memory_space<vmem>>, %arg3: memref<256x256xbf16, #tpu.memory_space<vmem>>, %arg4: memref<1x128x256xbf16, #tpu.memory_space<vmem>>, %arg5: memref<1x1x2x256xf32, #tpu.memory_space<vmem>>) attributes {dimension_semantics = [#tpu.dimension_semantics<parallel>, #tpu.dimension_semantics<parallel>], iteration_bounds = array<i64: 4, 1>, scalar_prefetch = 0 : i64, scratch_operands = 0 : i64, tpu.core_type = #tpu.core_type<tc>, window_params = [{transform_indices = @transform_0, window_bounds = array<i64: 1, 128, 256>}, {pipeline_mode = #tpu.pipeline_mode<synchronous>, transform_indices = @transform_1, window_bounds = array<i64: 256, 256>}, {transform_indices = @transform_2, window_bounds = array<i64: 1, 128, 256>}, {transform_indices = @transform_3, window_bounds = array<i64: 1, 1, 2, 256>}]} {
    %c0 = arith.constant 0 : index
    %c0_0 = arith.constant 0 : index
    %c0_1 = arith.constant 0 : index
    %0 = vector.load %arg2[%c0, %c0_0, %c0_1] : memref<1x128x256xbf16, #tpu.memory_space<vmem>>, vector<1x128x256xbf16>
    %1 = vector.shape_cast %0 : vector<1x128x256xbf16> to vector<128x256xbf16>
    %c0_2 = arith.constant 0 : index
    %c0_3 = arith.constant 0 : index
    %2 = vector.load %arg3[%c0_2, %c0_3] : memref<256x256xbf16, #tpu.memory_space<vmem>>, vector<256x256xbf16>
    %cst = arith.constant dense<0.000000e+00> : vector<128x256xf32>
    %3 = tpu.matmul %1, %2, %cst {dimension_numbers = #tpu.dot_dimension_numbers<[1], [0], [0], [1], [0, 0, 1, 1], [], []>} : vector<128x256xbf16>, vector<256x256xbf16>, vector<128x256xf32> -> vector<128x256xf32>
    %cst_4 = arith.constant dense<0.000000e+00> : vector<256xf32>
    %4 = vector.multi_reduction <add>, %3, %cst_4 [0] : vector<128x256xf32> to vector<256xf32>
    %5 = vector.shape_cast %4 : vector<256xf32> to vector<1x256xf32>
    %6 = arith.mulf %3, %3 : vector<128x256xf32>
    %cst_5 = arith.constant dense<0.000000e+00> : vector<256xf32>
    %7 = vector.multi_reduction <add>, %6, %cst_5 [0] : vector<128x256xf32> to vector<256xf32>
    %8 = vector.shape_cast %7 : vector<256xf32> to vector<1x256xf32>
    %9 = tpu.concatenate %5, %8 in 0 : vector<1x256xf32>, vector<1x256xf32> -> vector<2x256xf32>
    %c0_6 = arith.constant 0 : index
    %c0_7 = arith.constant 0 : index
    %c0_8 = arith.constant 0 : index
    %c0_9 = arith.constant 0 : index
    %10 = vector.load %arg5[%c0_6, %c0_7, %c0_8, %c0_9] : memref<1x1x2x256xf32, #tpu.memory_space<vmem>>, vector<1x1x2x256xf32>
    %11 = vector.shape_cast %10 : vector<1x1x2x256xf32> to vector<2x256xf32>
    %12 = vector.shape_cast %9 : vector<2x256xf32> to vector<1x1x2x256xf32>
    tpu.vector_store %arg5[%c0_6, %c0_7, %c0_8, %c0_9], %12 {strides = array<i32>} : memref<1x1x2x256xf32, #tpu.memory_space<vmem>>, vector<1x1x2x256xf32>,
    %13 = arith.truncf %3 : vector<128x256xf32> to vector<128x256xbf16>
    %c0_10 = arith.constant 0 : index
    %c0_11 = arith.constant 0 : index
    %c0_12 = arith.constant 0 : index
    %14 = vector.load %arg4[%c0_10, %c0_11, %c0_12] : memref<1x128x256xbf16, #tpu.memory_space<vmem>>, vector<1x128x256xbf16>
    %15 = vector.shape_cast %14 : vector<1x128x256xbf16> to vector<128x256xbf16>
    %16 = vector.shape_cast %13 : vector<128x256xbf16> to vector<1x128x256xbf16>
    tpu.vector_store %arg4[%c0_10, %c0_11, %c0_12], %16 {strides = array<i32>} : memref<1x128x256xbf16, #tpu.memory_space<vmem>>, vector<1x128x256xbf16>,
    return
  }
  func.func @transform_0(%arg0: i32, %arg1: i32) -> (i32, i32, i32) {
    %c0_i32 = arith.constant 0 : i32
    %c0_i32_0 = arith.constant 0 : i32
    return %arg0, %arg1, %c0_i32 : i32, i32, i32
  }
  func.func @transform_1(%arg0: i32, %arg1: i32) -> (i32, i32) {
    %c0_i32 = arith.constant 0 : i32
    %c0_i32_0 = arith.constant 0 : i32
    %c0_i32_1 = arith.constant 0 : i32
    return %c0_i32, %c0_i32_0 : i32, i32
  }
  func.func @transform_2(%arg0: i32, %arg1: i32) -> (i32, i32, i32) {
    %c0_i32 = arith.constant 0 : i32
    %c0_i32_0 = arith.constant 0 : i32
    return %arg0, %arg1, %c0_i32 : i32, i32, i32
  }
  func.func @transform_3(%arg0: i32, %arg1: i32) -> (i32, i32, i32, i32) {
    %c0_i32 = arith.constant 0 : i32
    %c0_i32_0 = arith.constant 0 : i32
    %c0_i32_1 = arith.constant 0 : i32
    return %arg0, %arg1, %c0_i32, %c0_i32_0 : i32, i32, i32, i32
  }
}

module attributes {stable_mosaic.version = 11 : i64} {
  func.func @_convw_kernel(%arg0: i32, %arg1: i32, %arg2: memref<1x18x18x512xbf16, #tpu.memory_space<vmem>>, %arg3: memref<9x512x256xbf16, #tpu.memory_space<vmem>>, %arg4: memref<1x16x16x256xbf16, #tpu.memory_space<vmem>>, %arg5: memref<1x2x256xf32, #tpu.memory_space<vmem>>, %arg6: memref<256x256xf32, #tpu.memory_space<vmem>>) attributes {dimension_semantics = [#tpu.dimension_semantics<parallel>, #tpu.dimension_semantics<parallel>], iteration_bounds = array<i64: 2, 1>, scalar_prefetch = 0 : i64, scratch_operands = 1 : i64, tpu.core_type = #tpu.core_type<tc>, window_params = [{transform_indices = @transform_0, window_bounds = array<i64: 1, 18, 18, 512>}, {pipeline_mode = #tpu.pipeline_mode<synchronous>, transform_indices = @transform_1, window_bounds = array<i64: 9, 512, 256>}, {transform_indices = @transform_2, window_bounds = array<i64: 1, 16, 16, 256>}, {transform_indices = @transform_3, window_bounds = array<i64: 1, 2, 256>}]} {
    %c0 = arith.constant 0 : index
    %c0_0 = arith.constant 0 : index
    %c0_1 = arith.constant 0 : index
    %c0_2 = arith.constant 0 : index
    %0 = vector.load %arg2[%c0, %c0_0, %c0_1, %c0_2] : memref<1x18x18x512xbf16, #tpu.memory_space<vmem>>, vector<1x18x18x512xbf16>
    %1 = vector.shape_cast %0 : vector<1x18x18x512xbf16> to vector<18x18x512xbf16>
    %2 = vector.extract_strided_slice %1 {offsets = [0, 0, 0], sizes = [18, 16, 512], strides = [1, 1, 1]} : vector<18x18x512xbf16> to vector<18x16x512xbf16>
    %3 = vector.shape_cast %2 : vector<18x16x512xbf16> to vector<288x512xbf16>
    %4 = vector.extract_strided_slice %3 {offsets = [0, 0], sizes = [256, 512], strides = [1, 1]} : vector<288x512xbf16> to vector<256x512xbf16>
    %c0_3 = arith.constant 0 : index
    %c0_4 = arith.constant 0 : index
    %c0_5 = arith.constant 0 : index
    %5 = vector.load %arg3[%c0_3, %c0_4, %c0_5] : memref<9x512x256xbf16, #tpu.memory_space<vmem>>, vector<1x512x256xbf16>
    %6 = vector.shape_cast %5 : vector<1x512x256xbf16> to vector<512x256xbf16>
    %cst = arith.constant dense<0.000000e+00> : vector<256x256xf32>
    %7 = tpu.matmul %4, %6, %cst {dimension_numbers = #tpu.dot_dimension_numbers<[1], [0], [0], [1], [0, 0, 1, 1], [], []>} : vector<256x512xbf16>, vector<512x256xbf16>, vector<256x256xf32> -> vector<256x256xf32>
    %c0_6 = arith.constant 0 : index
    %c0_7 = arith.constant 0 : index
    %8 = vector.load %arg6[%c0_6, %c0_7] : memref<256x256xf32, #tpu.memory_space<vmem>>, vector<256x256xf32>
    tpu.vector_store %arg6[%c0_6, %c0_7], %7 {strides = array<i32>} : memref<256x256xf32, #tpu.memory_space<vmem>>, vector<256x256xf32>,
    %9 = vector.extract_strided_slice %3 {offsets = [16, 0], sizes = [256, 512], strides = [1, 1]} : vector<288x512xbf16> to vector<256x512xbf16>
    %c3 = arith.constant 3 : index
    %c0_8 = arith.constant 0 : index
    %c0_9 = arith.constant 0 : index
    %10 = vector.load %arg3[%c3, %c0_8, %c0_9] : memref<9x512x256xbf16, #tpu.memory_space<vmem>>, vector<1x512x256xbf16>
    %11 = vector.shape_cast %10 : vector<1x512x256xbf16> to vector<512x256xbf16>
    %cst_10 = arith.constant dense<0.000000e+00> : vector<256x256xf32>
    %12 = tpu.matmul %9, %11, %cst_10 {dimension_numbers = #tpu.dot_dimension_numbers<[1], [0], [0], [1], [0, 0, 1, 1], [], []>} : vector<256x512xbf16>, vector<512x256xbf16>, vector<256x256xf32> -> vector<256x256xf32>
    %c0_11 = arith.constant 0 : index
    %c0_12 = arith.constant 0 : index
    %13 = vector.load %arg6[%c0_11, %c0_12] : memref<256x256xf32, #tpu.memory_space<vmem>>, vector<256x256xf32>
    %14 = arith.addf %13, %12 : vector<256x256xf32>
    %c0_13 = arith.constant 0 : index
    %c0_14 = arith.constant 0 : index
    %15 = vector.load %arg6[%c0_13, %c0_14] : memref<256x256xf32, #tpu.memory_space<vmem>>, vector<256x256xf32>
    tpu.vector_store %arg6[%c0_13, %c0_14], %14 {strides = array<i32>} : memref<256x256xf32, #tpu.memory_space<vmem>>, vector<256x256xf32>,
    %16 = vector.extract_strided_slice %3 {offsets = [32, 0], sizes = [256, 512], strides = [1, 1]} : vector<288x512xbf16> to vector<256x512xbf16>
    %c6 = arith.constant 6 : index
    %c0_15 = arith.constant 0 : index
    %c0_16 = arith.constant 0 : index
    %17 = vector.load %arg3[%c6, %c0_15, %c0_16] : memref<9x512x256xbf16, #tpu.memory_space<vmem>>, vector<1x512x256xbf16>
    %18 = vector.shape_cast %17 : vector<1x512x256xbf16> to vector<512x256xbf16>
    %cst_17 = arith.constant dense<0.000000e+00> : vector<256x256xf32>
    %19 = tpu.matmul %16, %18, %cst_17 {dimension_numbers = #tpu.dot_dimension_numbers<[1], [0], [0], [1], [0, 0, 1, 1], [], []>} : vector<256x512xbf16>, vector<512x256xbf16>, vector<256x256xf32> -> vector<256x256xf32>
    %c0_18 = arith.constant 0 : index
    %c0_19 = arith.constant 0 : index
    %20 = vector.load %arg6[%c0_18, %c0_19] : memref<256x256xf32, #tpu.memory_space<vmem>>, vector<256x256xf32>
    %21 = arith.addf %20, %19 : vector<256x256xf32>
    %c0_20 = arith.constant 0 : index
    %c0_21 = arith.constant 0 : index
    %22 = vector.load %arg6[%c0_20, %c0_21] : memref<256x256xf32, #tpu.memory_space<vmem>>, vector<256x256xf32>
    tpu.vector_store %arg6[%c0_20, %c0_21], %21 {strides = array<i32>} : memref<256x256xf32, #tpu.memory_space<vmem>>, vector<256x256xf32>,
    %23 = vector.extract_strided_slice %1 {offsets = [0, 1, 0], sizes = [18, 16, 512], strides = [1, 1, 1]} : vector<18x18x512xbf16> to vector<18x16x512xbf16>
    %24 = vector.shape_cast %23 : vector<18x16x512xbf16> to vector<288x512xbf16>
    %25 = vector.extract_strided_slice %24 {offsets = [0, 0], sizes = [256, 512], strides = [1, 1]} : vector<288x512xbf16> to vector<256x512xbf16>
    %c1 = arith.constant 1 : index
    %c0_22 = arith.constant 0 : index
    %c0_23 = arith.constant 0 : index
    %26 = vector.load %arg3[%c1, %c0_22, %c0_23] : memref<9x512x256xbf16, #tpu.memory_space<vmem>>, vector<1x512x256xbf16>
    %27 = vector.shape_cast %26 : vector<1x512x256xbf16> to vector<512x256xbf16>
    %cst_24 = arith.constant dense<0.000000e+00> : vector<256x256xf32>
    %28 = tpu.matmul %25, %27, %cst_24 {dimension_numbers = #tpu.dot_dimension_numbers<[1], [0], [0], [1], [0, 0, 1, 1], [], []>} : vector<256x512xbf16>, vector<512x256xbf16>, vector<256x256xf32> -> vector<256x256xf32>
    %c0_25 = arith.constant 0 : index
    %c0_26 = arith.constant 0 : index
    %29 = vector.load %arg6[%c0_25, %c0_26] : memref<256x256xf32, #tpu.memory_space<vmem>>, vector<256x256xf32>
    %30 = arith.addf %29, %28 : vector<256x256xf32>
    %c0_27 = arith.constant 0 : index
    %c0_28 = arith.constant 0 : index
    %31 = vector.load %arg6[%c0_27, %c0_28] : memref<256x256xf32, #tpu.memory_space<vmem>>, vector<256x256xf32>
    tpu.vector_store %arg6[%c0_27, %c0_28], %30 {strides = array<i32>} : memref<256x256xf32, #tpu.memory_space<vmem>>, vector<256x256xf32>,
    %32 = vector.extract_strided_slice %24 {offsets = [16, 0], sizes = [256, 512], strides = [1, 1]} : vector<288x512xbf16> to vector<256x512xbf16>
    %c4 = arith.constant 4 : index
    %c0_29 = arith.constant 0 : index
    %c0_30 = arith.constant 0 : index
    %33 = vector.load %arg3[%c4, %c0_29, %c0_30] : memref<9x512x256xbf16, #tpu.memory_space<vmem>>, vector<1x512x256xbf16>
    %34 = vector.shape_cast %33 : vector<1x512x256xbf16> to vector<512x256xbf16>
    %cst_31 = arith.constant dense<0.000000e+00> : vector<256x256xf32>
    %35 = tpu.matmul %32, %34, %cst_31 {dimension_numbers = #tpu.dot_dimension_numbers<[1], [0], [0], [1], [0, 0, 1, 1], [], []>} : vector<256x512xbf16>, vector<512x256xbf16>, vector<256x256xf32> -> vector<256x256xf32>
    %c0_32 = arith.constant 0 : index
    %c0_33 = arith.constant 0 : index
    %36 = vector.load %arg6[%c0_32, %c0_33] : memref<256x256xf32, #tpu.memory_space<vmem>>, vector<256x256xf32>
    %37 = arith.addf %36, %35 : vector<256x256xf32>
    %c0_34 = arith.constant 0 : index
    %c0_35 = arith.constant 0 : index
    %38 = vector.load %arg6[%c0_34, %c0_35] : memref<256x256xf32, #tpu.memory_space<vmem>>, vector<256x256xf32>
    tpu.vector_store %arg6[%c0_34, %c0_35], %37 {strides = array<i32>} : memref<256x256xf32, #tpu.memory_space<vmem>>, vector<256x256xf32>,
    %39 = vector.extract_strided_slice %24 {offsets = [32, 0], sizes = [256, 512], strides = [1, 1]} : vector<288x512xbf16> to vector<256x512xbf16>
    %c7 = arith.constant 7 : index
    %c0_36 = arith.constant 0 : index
    %c0_37 = arith.constant 0 : index
    %40 = vector.load %arg3[%c7, %c0_36, %c0_37] : memref<9x512x256xbf16, #tpu.memory_space<vmem>>, vector<1x512x256xbf16>
    %41 = vector.shape_cast %40 : vector<1x512x256xbf16> to vector<512x256xbf16>
    %cst_38 = arith.constant dense<0.000000e+00> : vector<256x256xf32>
    %42 = tpu.matmul %39, %41, %cst_38 {dimension_numbers = #tpu.dot_dimension_numbers<[1], [0], [0], [1], [0, 0, 1, 1], [], []>} : vector<256x512xbf16>, vector<512x256xbf16>, vector<256x256xf32> -> vector<256x256xf32>
    %c0_39 = arith.constant 0 : index
    %c0_40 = arith.constant 0 : index
    %43 = vector.load %arg6[%c0_39, %c0_40] : memref<256x256xf32, #tpu.memory_space<vmem>>, vector<256x256xf32>
    %44 = arith.addf %43, %42 : vector<256x256xf32>
    %c0_41 = arith.constant 0 : index
    %c0_42 = arith.constant 0 : index
    %45 = vector.load %arg6[%c0_41, %c0_42] : memref<256x256xf32, #tpu.memory_space<vmem>>, vector<256x256xf32>
    tpu.vector_store %arg6[%c0_41, %c0_42], %44 {strides = array<i32>} : memref<256x256xf32, #tpu.memory_space<vmem>>, vector<256x256xf32>,
    %46 = vector.extract_strided_slice %1 {offsets = [0, 2, 0], sizes = [18, 16, 512], strides = [1, 1, 1]} : vector<18x18x512xbf16> to vector<18x16x512xbf16>
    %47 = vector.shape_cast %46 : vector<18x16x512xbf16> to vector<288x512xbf16>
    %48 = vector.extract_strided_slice %47 {offsets = [0, 0], sizes = [256, 512], strides = [1, 1]} : vector<288x512xbf16> to vector<256x512xbf16>
    %c2 = arith.constant 2 : index
    %c0_43 = arith.constant 0 : index
    %c0_44 = arith.constant 0 : index
    %49 = vector.load %arg3[%c2, %c0_43, %c0_44] : memref<9x512x256xbf16, #tpu.memory_space<vmem>>, vector<1x512x256xbf16>
    %50 = vector.shape_cast %49 : vector<1x512x256xbf16> to vector<512x256xbf16>
    %cst_45 = arith.constant dense<0.000000e+00> : vector<256x256xf32>
    %51 = tpu.matmul %48, %50, %cst_45 {dimension_numbers = #tpu.dot_dimension_numbers<[1], [0], [0], [1], [0, 0, 1, 1], [], []>} : vector<256x512xbf16>, vector<512x256xbf16>, vector<256x256xf32> -> vector<256x256xf32>
    %c0_46 = arith.constant 0 : index
    %c0_47 = arith.constant 0 : index
    %52 = vector.load %arg6[%c0_46, %c0_47] : memref<256x256xf32, #tpu.memory_space<vmem>>, vector<256x256xf32>
    %53 = arith.addf %52, %51 : vector<256x256xf32>
    %c0_48 = arith.constant 0 : index
    %c0_49 = arith.constant 0 : index
    %54 = vector.load %arg6[%c0_48, %c0_49] : memref<256x256xf32, #tpu.memory_space<vmem>>, vector<256x256xf32>
    tpu.vector_store %arg6[%c0_48, %c0_49], %53 {strides = array<i32>} : memref<256x256xf32, #tpu.memory_space<vmem>>, vector<256x256xf32>,
    %55 = vector.extract_strided_slice %47 {offsets = [16, 0], sizes = [256, 512], strides = [1, 1]} : vector<288x512xbf16> to vector<256x512xbf16>
    %c5 = arith.constant 5 : index
    %c0_50 = arith.constant 0 : index
    %c0_51 = arith.constant 0 : index
    %56 = vector.load %arg3[%c5, %c0_50, %c0_51] : memref<9x512x256xbf16, #tpu.memory_space<vmem>>, vector<1x512x256xbf16>
    %57 = vector.shape_cast %56 : vector<1x512x256xbf16> to vector<512x256xbf16>
    %cst_52 = arith.constant dense<0.000000e+00> : vector<256x256xf32>
    %58 = tpu.matmul %55, %57, %cst_52 {dimension_numbers = #tpu.dot_dimension_numbers<[1], [0], [0], [1], [0, 0, 1, 1], [], []>} : vector<256x512xbf16>, vector<512x256xbf16>, vector<256x256xf32> -> vector<256x256xf32>
    %c0_53 = arith.constant 0 : index
    %c0_54 = arith.constant 0 : index
    %59 = vector.load %arg6[%c0_53, %c0_54] : memref<256x256xf32, #tpu.memory_space<vmem>>, vector<256x256xf32>
    %60 = arith.addf %59, %58 : vector<256x256xf32>
    %c0_55 = arith.constant 0 : index
    %c0_56 = arith.constant 0 : index
    %61 = vector.load %arg6[%c0_55, %c0_56] : memref<256x256xf32, #tpu.memory_space<vmem>>, vector<256x256xf32>
    tpu.vector_store %arg6[%c0_55, %c0_56], %60 {strides = array<i32>} : memref<256x256xf32, #tpu.memory_space<vmem>>, vector<256x256xf32>,
    %62 = vector.extract_strided_slice %47 {offsets = [32, 0], sizes = [256, 512], strides = [1, 1]} : vector<288x512xbf16> to vector<256x512xbf16>
    %c8 = arith.constant 8 : index
    %c0_57 = arith.constant 0 : index
    %c0_58 = arith.constant 0 : index
    %63 = vector.load %arg3[%c8, %c0_57, %c0_58] : memref<9x512x256xbf16, #tpu.memory_space<vmem>>, vector<1x512x256xbf16>
    %64 = vector.shape_cast %63 : vector<1x512x256xbf16> to vector<512x256xbf16>
    %cst_59 = arith.constant dense<0.000000e+00> : vector<256x256xf32>
    %65 = tpu.matmul %62, %64, %cst_59 {dimension_numbers = #tpu.dot_dimension_numbers<[1], [0], [0], [1], [0, 0, 1, 1], [], []>} : vector<256x512xbf16>, vector<512x256xbf16>, vector<256x256xf32> -> vector<256x256xf32>
    %c0_60 = arith.constant 0 : index
    %c0_61 = arith.constant 0 : index
    %66 = vector.load %arg6[%c0_60, %c0_61] : memref<256x256xf32, #tpu.memory_space<vmem>>, vector<256x256xf32>
    %67 = arith.addf %66, %65 : vector<256x256xf32>
    %c0_62 = arith.constant 0 : index
    %c0_63 = arith.constant 0 : index
    %68 = vector.load %arg6[%c0_62, %c0_63] : memref<256x256xf32, #tpu.memory_space<vmem>>, vector<256x256xf32>
    tpu.vector_store %arg6[%c0_62, %c0_63], %67 {strides = array<i32>} : memref<256x256xf32, #tpu.memory_space<vmem>>, vector<256x256xf32>,
    %c0_64 = arith.constant 0 : index
    %c0_65 = arith.constant 0 : index
    %69 = vector.load %arg6[%c0_64, %c0_65] : memref<256x256xf32, #tpu.memory_space<vmem>>, vector<256x256xf32>
    %cst_66 = arith.constant dense<0.000000e+00> : vector<256xf32>
    %70 = vector.multi_reduction <add>, %69, %cst_66 [0] : vector<256x256xf32> to vector<256xf32>
    %71 = vector.shape_cast %70 : vector<256xf32> to vector<1x256xf32>
    %72 = arith.mulf %69, %69 : vector<256x256xf32>
    %cst_67 = arith.constant dense<0.000000e+00> : vector<256xf32>
    %73 = vector.multi_reduction <add>, %72, %cst_67 [0] : vector<256x256xf32> to vector<256xf32>
    %74 = vector.shape_cast %73 : vector<256xf32> to vector<1x256xf32>
    %75 = tpu.concatenate %71, %74 in 0 : vector<1x256xf32>, vector<1x256xf32> -> vector<2x256xf32>
    %c0_68 = arith.constant 0 : index
    %c0_69 = arith.constant 0 : index
    %c0_70 = arith.constant 0 : index
    %76 = vector.load %arg5[%c0_68, %c0_69, %c0_70] : memref<1x2x256xf32, #tpu.memory_space<vmem>>, vector<1x2x256xf32>
    %77 = vector.shape_cast %76 : vector<1x2x256xf32> to vector<2x256xf32>
    %78 = vector.shape_cast %75 : vector<2x256xf32> to vector<1x2x256xf32>
    tpu.vector_store %arg5[%c0_68, %c0_69, %c0_70], %78 {strides = array<i32>} : memref<1x2x256xf32, #tpu.memory_space<vmem>>, vector<1x2x256xf32>,
    %79 = vector.shape_cast %69 : vector<256x256xf32> to vector<16x16x256xf32>
    %80 = arith.truncf %79 : vector<16x16x256xf32> to vector<16x16x256xbf16>
    %c0_71 = arith.constant 0 : index
    %c0_72 = arith.constant 0 : index
    %c0_73 = arith.constant 0 : index
    %c0_74 = arith.constant 0 : index
    %81 = vector.load %arg4[%c0_71, %c0_72, %c0_73, %c0_74] : memref<1x16x16x256xbf16, #tpu.memory_space<vmem>>, vector<1x16x16x256xbf16>
    %82 = vector.shape_cast %81 : vector<1x16x16x256xbf16> to vector<16x16x256xbf16>
    %83 = vector.shape_cast %80 : vector<16x16x256xbf16> to vector<1x16x16x256xbf16>
    tpu.vector_store %arg4[%c0_71, %c0_72, %c0_73, %c0_74], %83 {strides = array<i32>} : memref<1x16x16x256xbf16, #tpu.memory_space<vmem>>, vector<1x16x16x256xbf16>,
    return
  }
  func.func @transform_0(%arg0: i32, %arg1: i32) -> (i32, i32, i32, i32) {
    %c1_i32 = arith.constant 1 : i32
    %0 = arith.muli %arg0, %c1_i32 : i32
    %1 = arith.addi %0, %arg1 : i32
    %c0_i32 = arith.constant 0 : i32
    %c0_i32_0 = arith.constant 0 : i32
    %c0_i32_1 = arith.constant 0 : i32
    %c0_i32_2 = arith.constant 0 : i32
    return %1, %c0_i32, %c0_i32_0, %c0_i32_1 : i32, i32, i32, i32
  }
  func.func @transform_1(%arg0: i32, %arg1: i32) -> (i32, i32, i32) {
    %c0_i32 = arith.constant 0 : i32
    %c0_i32_0 = arith.constant 0 : i32
    %c0_i32_1 = arith.constant 0 : i32
    %c0_i32_2 = arith.constant 0 : i32
    return %c0_i32, %c0_i32_0, %c0_i32_1 : i32, i32, i32
  }
  func.func @transform_2(%arg0: i32, %arg1: i32) -> (i32, i32, i32, i32) {
    %c0_i32 = arith.constant 0 : i32
    %c0_i32_0 = arith.constant 0 : i32
    %c0_i32_1 = arith.constant 0 : i32
    return %arg0, %arg1, %c0_i32, %c0_i32_0 : i32, i32, i32, i32
  }
  func.func @transform_3(%arg0: i32, %arg1: i32) -> (i32, i32, i32) {
    %c1_i32 = arith.constant 1 : i32
    %0 = arith.muli %arg0, %c1_i32 : i32
    %1 = arith.addi %0, %arg1 : i32
    %c0_i32 = arith.constant 0 : i32
    %c0_i32_0 = arith.constant 0 : i32
    %c0_i32_1 = arith.constant 0 : i32
    return %1, %c0_i32, %c0_i32_0 : i32, i32, i32
  }
}

</mosaic_0001>

<bundles_post_ra>
// kernel: wavelet_transform_unit_forward.2
= control target key start
LH: loop header
LB: loop body
LE: loop exit
PB: predicated region body
PF: predicated region fallthrough
CT: control target
= control target key end

     0   :  { %s1300_s12 = smov 0   ;;  %s1302_s13 = smov 0   ;;  %s1558_s0 = inlined_call_operand.vmem [shape: bf16[4,128,256], index: 0, kind: input, shape index: {}]   ;;  %s1559_s1 = inlined_call_operand.vmem [shape: bf16[256,256], index: 1, kind: input, shape index: {}]   ;;  %s1560_s2 = inlined_call_operand.vmem [shape: bf16[4,128,256], index: 2, kind: output, shape index: {0}]   ;;  %s1561_s3 = inlined_call_operand.vmem [shape: f32[4,1,2,256], index: 3, kind: output, shape index: {1}]  }
   0x1   :  { %s1304_s14 = smov 0  }
   0x2 LB: > { %s26_s15 = sadd.s32 1, %s1274_s13  ;;  %p1035_p0 = scmp.ge.s32.totalorder %s1278_s14, 1  ;;  %s1278_s14 = sphi %s1304_s14, %s14_s14   ;;  %s1274_s13 = sphi %s1302_s13, %s1563_s13   ;;  %s1270_s12 = sphi %s1300_s12, %s1562_s12  }
   0x3   : > { %p28_p1 = scmp.ge.s32.totalorder %s26_s15, 4  ;;  %p164_p2 = scmp.lt.s32.totalorder %s1278_s14, 5 }
   0x5   : > { %s1565_s15 = smov (%p28_p1, %s26_s15), 0  ;;  %p165_p3 = pnand %p1035_p0, %p164_p2 }
   0x6   : > { %v1184_v0 = vld [vmem:[%s1559_s1 + $0x4] ss:$8 sps:$4 sm:$0xff] (!%p165_p3)   ;;  %v1186_v1 = vld [vmem:[%s1559_s1] ss:$8 sps:$4 sm:$0xff] (!%p165_p3)   ;;  %v1187_v2 = vld [vmem:[%s1559_s1 + $0x14] ss:$8 sps:$4 sm:$0xff] (!%p165_p3)  }
   0x7   : > { %168 = sbr.rel (%p165_p3) target bundleno = 346 (0x15a), region = 28  ;;  %526 = vmatprep.subr.bf16.mxu0 (!%p165_p3), %v1184_v0  ;;  %1128 = vmatprep.subr.bf16.mxu1 (!%p165_p3), %v1184_v0  ;;  %v1189_v3 = vld [vmem:[%s1559_s1 + $0x10] ss:$8 sps:$4 sm:$0xff] (!%p165_p3)   ;;  %v1190_v4 = vld [vmem:[%s1559_s1 + $0x24] ss:$8 sps:$4 sm:$0xff] (!%p165_p3)   ;;  %p208_p4 = scmp.lt.s32.totalorder (!%p165_p3), %s1270_s12, 3 }
   0x8   : > { %527 = vmatpush1.bf16.msra.mxu0 (!%p165_p3), %v1186_v1  ;;  %1144 = vmatpush1.bf16.msra.mxu1 (!%p165_p3), %v1186_v1  ;;  %v1192_v5 = vld [vmem:[%s1559_s1 + $0x20] ss:$8 sps:$4 sm:$0xff] (!%p165_p3)   ;;  %v1193_v6 = vld [vmem:[%s1559_s1 + $0x34] ss:$8 sps:$4 sm:$0xff] (!%p165_p3)   ;;  %v1195_v7 = vld [vmem:[%s1559_s1 + $0x30] ss:$8 sps:$4 sm:$0xff] (!%p165_p3)  }
   0x9   : > { %528 = vmatprep.subr.bf16.mxu0 (!%p165_p3), %v1187_v2  ;;  %1129 = vmatprep.subr.bf16.mxu1 (!%p165_p3), %v1187_v2  ;;  %v1196_v8 = vld [vmem:[%s1559_s1 + $0x44] ss:$8 sps:$4 sm:$0xff] (!%p165_p3)   ;;  %v1198_v9 = vld [vmem:[%s1559_s1 + $0x40] ss:$8 sps:$4 sm:$0xff] (!%p165_p3)   ;;  %v1199_v10 = vld [vmem:[%s1559_s1 + $0x54] ss:$8 sps:$4 sm:$0xff] (!%p165_p3)  }
   0xa   : > { %v1201_v11 = vld [vmem:[%s1559_s1 + $0x50] ss:$8 sps:$4 sm:$0xff] (!%p165_p3)   ;;  %v1202_v12 = vld [vmem:[%s1559_s1 + $0x64] ss:$8 sps:$4 sm:$0xff] (!%p165_p3)   ;;  %v1204_v14 = vld [vmem:[%s1559_s1 + $0x60] ss:$8 sps:$4 sm:$0xff] (!%p165_p3)  }
   0xb   : > { %v1205_v15 = vld [vmem:[%s1559_s1 + $0x74] ss:$8 sps:$4 sm:$0xff] (!%p165_p3)   ;;  %v1207_v17 = vld [vmem:[%s1559_s1 + $0x70] ss:$8 sps:$4 sm:$0xff] (!%p165_p3)   ;;  %v1208_v18 = vld [vmem:[%s1559_s1 + $0x84] ss:$8 sps:$4 sm:$0xff] (!%p165_p3)  }
   0xc   : > { %529 = vmatpush1.bf16.msra.mxu0 (!%p165_p3), %v1189_v3  ;;  %1145 = vmatpush1.bf16.msra.mxu1 (!%p165_p3), %v1189_v3  ;;  %v1210_v19 = vld [vmem:[%s1559_s1 + $0x80] ss:$8 sps:$4 sm:$0xff] (!%p165_p3)   ;;  %v1211_v20 = vld [vmem:[%s1559_s1 + $0x94] ss:$8 sps:$4 sm:$0xff] (!%p165_p3)   ;;  %v1213_v21 = vld [vmem:[%s1559_s1 + $0x90] ss:$8 sps:$4 sm:$0xff] (!%p165_p3)  }
   0xd   : > { %530 = vmatprep.subr.bf16.mxu0 (!%p165_p3), %v1190_v4  ;;  %1130 = vmatprep.subr.bf16.mxu1 (!%p165_p3), %v1190_v4  ;;  %v1214_v22 = vld [vmem:[%s1559_s1 + $0xa4] ss:$8 sps:$4 sm:$0xff] (!%p165_p3)   ;;  %v1216_v23 = vld [vmem:[%s1559_s1 + $0xa0] ss:$8 sps:$4 sm:$0xff] (!%p165_p3)   ;;  %v1217_v24 = vld [vmem:[%s1559_s1 + $0xb4] ss:$8 sps:$4 sm:$0xff] (!%p165_p3)  }
   0xe   : > { %s1567_s12 = smov (!%p208_p4, %s1270_s12), 3  ;;  %v1219_v25 = vld [vmem:[%s1559_s1 + $0xb0] ss:$8 sps:$4 sm:$0xff]   ;;  %v1220_v26 = vld [vmem:[%s1559_s1 + $0xc4] ss:$8 sps:$4 sm:$0xff]   ;;  %vm755_vm0 = vcmask 1040384  }
   0xf   : > { %s1109_s11 = sshll.u32 %s1567_s12, 7  ;;  %v1222_v27 = vld [vmem:[%s1559_s1 + $0xc0] ss:$8 sps:$4 sm:$0xff]   ;;  %v1223_v28 = vld [vmem:[%s1559_s1 + $0xd4] ss:$8 sps:$4 sm:$0xff]  }
  0x10   : > { %531 = vmatpush1.bf16.msra.mxu0 %v1192_v5  ;;  %1146 = vmatpush1.bf16.msra.mxu1 %v1192_v5  ;;  %s1366_s20 = scalar_lea.vmem %s1558_s0, %s1109_s11  ;;  %v1225_v29 = vld [vmem:[%s1559_s1 + $0xd0] ss:$8 sps:$4 sm:$0xff]   ;;  %v1226_v30 = vld [vmem:[%s1559_s1 + $0xe4] ss:$8 sps:$4 sm:$0xff]   ;;  %v1228_v31 = vld [vmem:[%s1559_s1 + $0xe0] ss:$8 sps:$4 sm:$0xff]   ;;  %s1451_s21 = scalar_lea.vmem %s1560_s2, %s1109_s11 }
  0x11   : > { %532 = vmatprep.subr.bf16.mxu0 %v1193_v6  ;;  %1131 = vmatprep.subr.bf16.mxu1 %v1193_v6  ;;  %v1234_v13 = vld [vmem:[%s1366_s20 + $0x4] ss:$8 sps:$4 sm:$0xff]   ;;  %v1229_v32 = vld [vmem:[%s1559_s1 + $0xf4] ss:$8 sps:$4 sm:$0xff]   ;;  %v1231_v33 = vld [vmem:[%s1559_s1 + $0xf0] ss:$8 sps:$4 sm:$0xff]  }
  0x12   : > { %558 = vmatprep.mubr.bf16.mxu0 %v1234_v13  ;;  %v1240_v16 = vld [vmem:[%s1366_s20 + $0x44] ss:$8 sps:$4 sm:$0xff]   ;;  %v1232_v34 = vld [vmem:[%s1366_s20] ss:$8 sps:$4 sm:$0xff]   ;;  %v1235_v36 = vld [vmem:[%s1366_s20 + $0x14] ss:$8 sps:$4 sm:$0xff]  }
  0x13   : > { %598 = vmatprep.mubr.bf16.mxu1 %v1240_v16  ;;  %v1238_v35 = vld [vmem:[%s1366_s20 + $0x40] ss:$8 sps:$4 sm:$0xff]   ;;  %v1244_v37 = vld [vmem:[%s1366_s20 + $0x54] ss:$8 sps:$4 sm:$0xff]   ;;  %v1237_v38 = vld [vmem:[%s1366_s20 + $0x10] ss:$8 sps:$4 sm:$0xff]  }
  0x14   : > { %533 = vmatpush1.bf16.msra.mxu0 %v1195_v7  ;;  %1147 = vmatpush1.bf16.msra.mxu1 %v1195_v7  ;;  %v1246_v39 = vld [vmem:[%s1366_s20 + $0x50] ss:$8 sps:$4 sm:$0xff]   ;;  %v1241_v40 = vld [vmem:[%s1366_s20 + $0x24] ss:$8 sps:$4 sm:$0xff]   ;;  %v1243_v42 = vld [vmem:[%s1366_s20 + $0x20] ss:$8 sps:$4 sm:$0xff]  }
  0x15   : > { %534 = vmatprep.subr.bf16.mxu0 %v1196_v8  ;;  %1132 = vmatprep.subr.bf16.mxu1 %v1196_v8  ;;  %v1250_v41 = vld [vmem:[%s1366_s20 + $0x64] ss:$8 sps:$4 sm:$0xff]   ;;  %v1252_v43 = vld [vmem:[%s1366_s20 + $0x60] ss:$8 sps:$4 sm:$0xff]   ;;  %v1247_v44 = vld [vmem:[%s1366_s20 + $0x34] ss:$8 sps:$4 sm:$0xff]  }
  0x16   : > { %v1253_v45 = vld [vmem:[%s1366_s20 + $0x74] ss:$8 sps:$4 sm:$0xff]   ;;  %v1249_v46 = vld [vmem:[%s1366_s20 + $0x30] ss:$8 sps:$4 sm:$0xff]   ;;  %s1111_s11 = sshll.u32 %s1567_s12, 2 }
  0x17   : > { %v1255_v47 = vld [vmem:[%s1366_s20 + $0x70] ss:$8 sps:$4 sm:$0xff]   ;;  %s237_s23 = scalar_lea.vmem %s1561_s3, %s1111_s11 }
  0x18   : > { %535 = vmatpush1.bf16.msra.mxu0 %v1198_v9  ;;  %1148 = vmatpush1.bf16.msra.mxu1 %v1198_v9 }
  0x19   : > { %536 = vmatprep.subr.bf16.mxu0 %v1199_v10  ;;  %1133 = vmatprep.subr.bf16.mxu1 %v1199_v10 }
  0x1c   : > { %537 = vmatpush1.bf16.msra.mxu0 %v1201_v11  ;;  %1149 = vmatpush1.bf16.msra.mxu1 %v1201_v11 }
  0x1d   : > { %538 = vmatprep.subr.bf16.mxu0 %v1202_v12  ;;  %1134 = vmatprep.subr.bf16.mxu1 %v1202_v12 }
  0x20   : > { %539 = vmatpush1.bf16.msra.mxu0 %v1204_v14  ;;  %1150 = vmatpush1.bf16.msra.mxu1 %v1204_v14 }
  0x21   : > { %540 = vmatprep.subr.bf16.mxu0 %v1205_v15  ;;  %1135 = vmatprep.subr.bf16.mxu1 %v1205_v15 }
  0x24   : > { %541 = vmatpush1.bf16.msra.mxu0 %v1207_v17  ;;  %1151 = vmatpush1.bf16.msra.mxu1 %v1207_v17 }
  0x25   : > { %542 = vmatprep.subr.bf16.mxu0 %v1208_v18  ;;  %1136 = vmatprep.subr.bf16.mxu1 %v1208_v18 }
  0x28   : > { %543 = vmatpush1.bf16.msra.mxu0 %v1210_v19  ;;  %1152 = vmatpush1.bf16.msra.mxu1 %v1210_v19 }
  0x29   : > { %544 = vmatprep.subr.bf16.mxu0 %v1211_v20  ;;  %1137 = vmatprep.subr.bf16.mxu1 %v1211_v20 }
  0x2c   : > { %545 = vmatpush1.bf16.msra.mxu0 %v1213_v21  ;;  %1153 = vmatpush1.bf16.msra.mxu1 %v1213_v21 }
  0x2d   : > { %546 = vmatprep.subr.bf16.mxu0 %v1214_v22  ;;  %1138 = vmatprep.subr.bf16.mxu1 %v1214_v22 }
  0x30   : > { %547 = vmatpush1.bf16.msra.mxu0 %v1216_v23  ;;  %1154 = vmatpush1.bf16.msra.mxu1 %v1216_v23 }
  0x31   : > { %548 = vmatprep.subr.bf16.mxu0 %v1217_v24  ;;  %1139 = vmatprep.subr.bf16.mxu1 %v1217_v24 }
  0x34   : > { %549 = vmatpush1.bf16.msra.mxu0 %v1219_v25  ;;  %1155 = vmatpush1.bf16.msra.mxu1 %v1219_v25 }
  0x35   : > { %550 = vmatprep.subr.bf16.mxu0 %v1220_v26  ;;  %1140 = vmatprep.subr.bf16.mxu1 %v1220_v26 }
  0x38   : > { %551 = vmatpush1.bf16.msra.mxu0 %v1222_v27  ;;  %1156 = vmatpush1.bf16.msra.mxu1 %v1222_v27 }
  0x39   : > { %552 = vmatprep.subr.bf16.mxu0 %v1223_v28  ;;  %1141 = vmatprep.subr.bf16.mxu1 %v1223_v28 }
  0x3c   : > { %553 = vmatpush1.bf16.msra.mxu0 %v1225_v29  ;;  %1157 = vmatpush1.bf16.msra.mxu1 %v1225_v29 }
  0x3d   : > { %554 = vmatprep.subr.bf16.mxu0 %v1226_v30  ;;  %1142 = vmatprep.subr.bf16.mxu1 %v1226_v30 }
  0x40   : > { %555 = vmatpush1.bf16.msra.mxu0 %v1228_v31  ;;  %1158 = vmatpush1.bf16.msra.mxu1 %v1228_v31 }
  0x41   : > { %556 = vmatprep.subr.bf16.mxu0 %v1229_v32  ;;  %1143 = vmatprep.subr.bf16.mxu1 %v1229_v32 }
  0x44   : > { %557 = vmatpush1.bf16.msra.mxu0 %v1231_v33  ;;  %1159 = vmatpush1.bf16.msra.mxu1 %v1231_v33 }
  0x47   : > { %559 = vmatmul.mubr.bf16.vlgmr.msra.gmra.mrb[0].mxu0 %v1232_v34  ;;  %599 = vmatmul.mubr.bf16.vlgmr.msra.gmra.mrb[0].mxu1 %v1238_v35 }
  0x48   : > { %568 = vmatprep.mubr.bf16.mxu0 %v1235_v36  ;;  %608 = vmatprep.mubr.bf16.mxu1 %v1244_v37 }
  0x4f   : > { %569 = vmatmul.mubr.bf16.gmra.mrb[4].mxu0 %v1237_v38  ;;  %609 = vmatmul.mubr.bf16.gmra.mrb[4].mxu1 %v1246_v39 }
  0x50   : > { %578 = vmatprep.mubr.bf16.mxu0 %v1241_v40  ;;  %618 = vmatprep.mubr.bf16.mxu1 %v1250_v41 }
  0x57   : > { %579 = vmatmul.mubr.bf16.gmra.mrb[8].mxu0 %v1243_v42  ;;  %619 = vmatmul.mubr.bf16.gmra.mrb[8].mxu1 %v1252_v43 }
  0x58   : > { %588 = vmatprep.mubr.bf16.mxu0 %v1247_v44  ;;  %628 = vmatprep.mubr.bf16.mxu1 %v1253_v45 }
  0x5f   : > { %589 = vmatmul.mubr.bf16.gmra.mrb[12].mxu0 %v1249_v46  ;;  %629 = vmatmul.mubr.bf16.gmra.mrb[12].mxu1 %v1255_v47 }
 0x11a   : > { %v560_v48 = vpop.f32.mrb[0].mxu0  ;;  %v1444_v49 = vpop.f32.mrb[0].mxu1 }
 0x11b   : > { %v562_v50 = vpop.f32.mrb[1].mxu0  ;;  %v1453_v51 = vpop.f32.mrb[1].mxu1  ;;  %v681_v56 = vmul.f32 %v560_v48, %v560_v48 }
 0x11c   : > { %v1112_v52 = vpack.c.bf16 %v562_v50, %v560_v48  ;;  %v564_v53 = vpop.f32.mrb[2].mxu0  ;;  %v1120_v54 = vpack.c.bf16 %v1453_v51, %v1444_v49  ;;  %v1457_v55 = vpop.f32.mrb[2].mxu1  ;;  %v682_v61 = vmul.f32 %v562_v50, %v562_v50 }
 0x11d   : > { %v639_v57 = vadd.f32 %v564_v53, %v560_v48  ;;  %v683_v58 = vmul.f32 %v564_v53, %v564_v53  ;;  %v566_v59 = vpop.f32.mrb[3].mxu0  ;;  %v1459_v60 = vpop.f32.mrb[3].mxu1 }
 0x11e   : > { %866 = vst [vmem:[%s1451_s21] sm:$0xff] %v1112_v52  ;;  %v660_v62 = vadd.f32 %v566_v59, %v562_v50  ;;  %v684_v63 = vmul.f32 %v566_v59, %v566_v59  ;;  %v1113_v0 = vpack.c.bf16 %v566_v59, %v564_v53  ;;  %874 = vst [vmem:[%s1451_s21 + $0x40] sm:$0xff] %v1120_v54 }
 0x11f   : > { %v713_v1 = vadd.f32 %v683_v58, %v681_v56  ;;  %v1121_v2 = vpack.c.bf16 %v1459_v60, %v1457_v55 }
 0x120   : > { %v734_v3 = vadd.f32 %v684_v63, %v682_v61  ;;  %867 = vst [vmem:[%s1451_s21 + $0x8] sm:$0xff] %v1113_v0 }
 0x121   : > { %875 = vst [vmem:[%s1451_s21 + $0x48] sm:$0xff] %v1121_v2 }
 0x122   : > { %v570_v4 = vpop.f32.mrb[4].mxu0  ;;  %v1467_v5 = vpop.f32.mrb[4].mxu1 }
 0x123   : > { %v640_v6 = vadd.f32 %v639_v57, %v570_v4  ;;  %v685_v7 = vmul.f32 %v570_v4, %v570_v4  ;;  %v572_v8 = vpop.f32.mrb[5].mxu0  ;;  %v1469_v9 = vpop.f32.mrb[5].mxu1 }
 0x124   : > { %v661_v10 = vadd.f32 %v660_v62, %v572_v8  ;;  %v686_v11 = vmul.f32 %v572_v8, %v572_v8  ;;  %v1114_v12 = vpack.c.bf16 %v572_v8, %v570_v4  ;;  %v574_v13 = vpop.f32.mrb[6].mxu0  ;;  %v1471_v14 = vpop.f32.mrb[6].mxu1  ;;  %v1122_v19 = vpack.c.bf16 %v1469_v9, %v1467_v5 }
 0x125   : > { %v714_v15 = vadd.f32 %v713_v1, %v685_v7  ;;  %v641_v16 = vadd.f32 %v640_v6, %v574_v13  ;;  %v687_v17 = vmul.f32 %v574_v13, %v574_v13  ;;  %v576_v18 = vpop.f32.mrb[7].mxu0  ;;  %v1475_v20 = vpop.f32.mrb[7].mxu1 }
 0x126   : > { %v735_v21 = vadd.f32 %v734_v3, %v686_v11  ;;  %868 = vst [vmem:[%s1451_s21 + $0x10] sm:$0xff] %v1114_v12  ;;  %v662_v22 = vadd.f32 %v661_v10, %v576_v18  ;;  %v688_v23 = vmul.f32 %v576_v18, %v576_v18  ;;  %v1115_v24 = vpack.c.bf16 %v576_v18, %v574_v13 }
 0x127   : > { %v715_v25 = vadd.f32 %v714_v15, %v687_v17  ;;  %876 = vst [vmem:[%s1451_s21 + $0x50] sm:$0xff] %v1122_v19  ;;  %v1123_v26 = vpack.c.bf16 %v1475_v20, %v1471_v14  ;;  %v698_v19 = vmul.f32 %v1453_v51, %v1453_v51 }
 0x128   : > { %v736_v27 = vadd.f32 %v735_v21, %v688_v23  ;;  %869 = vst [vmem:[%s1451_s21 + $0x18] sm:$0xff] %v1115_v24  ;;  %v699_v24 = vmul.f32 %v1457_v55, %v1457_v55 }
 0x129   : > { %877 = vst [vmem:[%s1451_s21 + $0x58] sm:$0xff] %v1123_v26 }
 0x12a   : > { %v580_v28 = vpop.f32.mrb[8].mxu0  ;;  %v1483_v29 = vpop.f32.mrb[8].mxu1 }
 0x12b   : > { %v642_v30 = vadd.f32 %v641_v16, %v580_v28  ;;  %v689_v31 = vmul.f32 %v580_v28, %v580_v28  ;;  %v582_v32 = vpop.f32.mrb[9].mxu0  ;;  %v1485_v33 = vpop.f32.mrb[9].mxu1  ;;  %v697_v16 = vmul.f32 %v1444_v49, %v1444_v49 }
 0x12c   : > { %v663_v34 = vadd.f32 %v662_v22, %v582_v32  ;;  %v690_v35 = vmul.f32 %v582_v32, %v582_v32  ;;  %v1116_v36 = vpack.c.bf16 %v582_v32, %v580_v28  ;;  %v584_v37 = vpop.f32.mrb[10].mxu0  ;;  %v1487_v38 = vpop.f32.mrb[10].mxu1  ;;  %v1124_v43 = vpack.c.bf16 %v1485_v33, %v1483_v29 }
 0x12d   : > { %v716_v39 = vadd.f32 %v715_v25, %v689_v31  ;;  %v643_v40 = vadd.f32 %v642_v30, %v584_v37  ;;  %v691_v41 = vmul.f32 %v584_v37, %v584_v37  ;;  %v586_v42 = vpop.f32.mrb[11].mxu0  ;;  %v1491_v44 = vpop.f32.mrb[11].mxu1  ;;  %v701_v30 = vmul.f32 %v1467_v5, %v1467_v5 }
 0x12e   : > { %v737_v45 = vadd.f32 %v736_v27, %v690_v35  ;;  %870 = vst [vmem:[%s1451_s21 + $0x20] sm:$0xff] %v1116_v36  ;;  %v664_v46 = vadd.f32 %v663_v34, %v586_v42  ;;  %v692_v47 = vmul.f32 %v586_v42, %v586_v42  ;;  %v1117_v48 = vpack.c.bf16 %v586_v42, %v584_v37 }
 0x12f   : > { %v717_v50 = vadd.f32 %v716_v39, %v691_v41  ;;  %878 = vst [vmem:[%s1451_s21 + $0x60] sm:$0xff] %v1124_v43  ;;  %v1125_v52 = vpack.c.bf16 %v1491_v44, %v1487_v38  ;;  %v700_v27 = vmul.f32 %v1459_v60, %v1459_v60  ;;  %v702_v32 = vmul.f32 %v1469_v9, %v1469_v9 }
 0x130   : > { %v738_v53 = vadd.f32 %v737_v45, %v692_v47  ;;  %871 = vst [vmem:[%s1451_s21 + $0x28] sm:$0xff] %v1117_v48  ;;  %v703_v35 = vmul.f32 %v1471_v14, %v1471_v14  ;;  %v704_v37 = vmul.f32 %v1475_v20, %v1475_v20  ;;  %v705_v41 = vmul.f32 %v1483_v29, %v1483_v29 }
 0x131   : > { %879 = vst [vmem:[%s1451_s21 + $0x68] sm:$0xff] %v1125_v52  ;;  %v706_v43 = vmul.f32 %v1485_v33, %v1485_v33  ;;  %v707_v47 = vmul.f32 %v1487_v38, %v1487_v38 }
 0x132   : > { %v590_v54 = vpop.f32.mrb[12].mxu0  ;;  %v1499_v56 = vpop.f32.mrb[12].mxu1 }
 0x133   : > { %v644_v57 = vadd.f32 %v643_v40, %v590_v54  ;;  %v693_v58 = vmul.f32 %v590_v54, %v590_v54  ;;  %v592_v59 = vpop.f32.mrb[13].mxu0  ;;  %v632_v61 = vpop.f32.mrb[13].mxu1 }
 0x134   : > { %v665_v62 = vadd.f32 %v664_v46, %v592_v59  ;;  %v694_v63 = vmul.f32 %v592_v59, %v592_v59  ;;  %v1118_v0 = vpack.c.bf16 %v592_v59, %v590_v54  ;;  %v594_v1 = vpop.f32.mrb[14].mxu0  ;;  %v634_v2 = vpop.f32.mrb[14].mxu1  ;;  %v1126_v8 = vpack.c.bf16 %v632_v61, %v1499_v56 }
 0x135   : > { %v718_v3 = vadd.f32 %v717_v50, %v693_v58  ;;  %v645_v4 = vadd.f32 %v644_v57, %v594_v1  ;;  %v695_v6 = vmul.f32 %v594_v1, %v594_v1  ;;  %v596_v7 = vpop.f32.mrb[15].mxu0  ;;  %v636_v10 = vpop.f32.mrb[15].mxu1  ;;  %v710_v52 = vmul.f32 %v632_v61, %v632_v61 }
 0x136   : > { %v739_v11 = vadd.f32 %v738_v53, %v694_v63  ;;  %872 = vst [vmem:[%s1451_s21 + $0x30] sm:$0xff] %v1118_v0  ;;  %v666_v12 = vadd.f32 %v665_v62, %v596_v7  ;;  %v696_v13 = vmul.f32 %v596_v7, %v596_v7  ;;  %v1119_v15 = vpack.c.bf16 %v596_v7, %v594_v1 }
 0x137   : > { %v646_v17 = vadd.f32 %v645_v4, %v1444_v49  ;;  %v719_v18 = vadd.f32 %v718_v3, %v695_v6  ;;  %880 = vst [vmem:[%s1451_s21 + $0x70] sm:$0xff] %v1126_v8  ;;  %v1127_v23 = vpack.c.bf16 %v636_v10, %v634_v2  ;;  %v711_v62 = vmul.f32 %v634_v2, %v634_v2 }
 0x138   : > { %v667_v21 = vadd.f32 %v666_v12, %v1453_v51  ;;  %v740_v22 = vadd.f32 %v739_v11, %v696_v13  ;;  %873 = vst [vmem:[%s1451_s21 + $0x38] sm:$0xff] %v1119_v15  ;;  %v712_v0 = vmul.f32 %v636_v10, %v636_v10 }
 0x139   : > { %v647_v25 = vadd.f32 %v646_v17, %v1457_v55  ;;  %v720_v26 = vadd.f32 %v719_v18, %v697_v16  ;;  %881 = vst [vmem:[%s1451_s21 + $0x78] sm:$0xff] %v1127_v23 }
 0x13a   : > { %v668_v49 = vadd.f32 %v667_v21, %v1459_v60  ;;  %v741_v28 = vadd.f32 %v740_v22, %v698_v19 }
 0x13b   : > { %v721_v51 = vadd.f32 %v720_v26, %v699_v24  ;;  %v648_v31 = vadd.f32 %v647_v25, %v1467_v5 }
 0x13c   : > { %v742_v34 = vadd.f32 %v741_v28, %v700_v27  ;;  %v669_v55 = vadd.f32 %v668_v49, %v1469_v9 }
 0x13d   : > { %v649_v36 = vadd.f32 %v648_v31, %v1471_v14  ;;  %v722_v60 = vadd.f32 %v721_v51, %v701_v30 }
 0x13e   : > { %v670_v39 = vadd.f32 %v669_v55, %v1475_v20  ;;  %v743_v40 = vadd.f32 %v742_v34, %v702_v32  ;;  %v709_v20 = vmul.f32 %v1499_v56, %v1499_v56 }
 0x13f   : > { %v650_v5 = vadd.f32 %v649_v36, %v1483_v29  ;;  %v723_v42 = vadd.f32 %v722_v60, %v703_v35  ;;  %v708_v29 = vmul.f32 %v1491_v44, %v1491_v44 }
 0x140   : > { %v671_v9 = vadd.f32 %v670_v39, %v1485_v33  ;;  %v744_v45 = vadd.f32 %v743_v40, %v704_v37 }
 0x141   : > { %v724_v14 = vadd.f32 %v723_v42, %v705_v41  ;;  %v651_v46 = vadd.f32 %v650_v5, %v1487_v38 }
 0x142   : > { %v745_v48 = vadd.f32 %v744_v45, %v706_v43  ;;  %v672_v50 = vadd.f32 %v671_v9, %v1491_v44 }
 0x143   : > { %v725_v53 = vadd.f32 %v724_v14, %v707_v47  ;;  %v652_v33 = vadd.f32 %v651_v46, %v1499_v56 }
 0x144   : > { %v746_v54 = vadd.f32 %v745_v48, %v708_v29  ;;  %v673_v57 = vadd.f32 %v672_v50, %v632_v61 }
 0x145   : > { %v726_v58 = vadd.f32 %v725_v53, %v709_v20  ;;  %v653_v59 = vadd.f32 %v652_v33, %v634_v2 }
 0x146   : > { %v747_v63 = vadd.f32 %v746_v54, %v710_v52  ;;  %v674_v38 = vadd.f32 %v673_v57, %v636_v10 }
 0x147   : > { %v654_v1 = vrot.slane %v653_v59, 4  ;;  %v727_v3 = vadd.f32 %v726_v58, %v711_v62 }
 0x148   : > { %v675_v4 = vrot.slane %v674_v38, 4  ;;  %v748_v6 = vadd.f32 %v747_v63, %v712_v0 }
 0x149   : > { %v655_v7 = vadd.f32 %v654_v1, %v653_v59  ;;  %v728_v8 = vrot.slane %v727_v3, 4 }
 0x14a   : > { %v676_v11 = vadd.f32 %v675_v4, %v674_v38  ;;  %v749_v44 = vrot.slane %v748_v6, 4 }
 0x14b   : > { %v656_v12 = vrot.slane %v655_v7, 2  ;;  %v729_v13 = vadd.f32 %v728_v8, %v727_v3 }
 0x14c   : > { %v677_v56 = vrot.slane %v676_v11, 2  ;;  %v750_v15 = vadd.f32 %v749_v44, %v748_v6 }
 0x14d   : > { %v657_v61 = vadd.f32 %v656_v12, %v655_v7  ;;  %v730_v16 = vrot.slane %v729_v13, 2 }
 0x14e   : > { %v678_v17 = vadd.f32 %v677_v56, %v676_v11  ;;  %v751_v2 = vrot.slane %v750_v15, 2 }
 0x14f   : > { %v658_v18 = vrot.slane %v657_v61, 1  ;;  %v731_v19 = vadd.f32 %v730_v16, %v729_v13 }
 0x150   : > { %v679_v10 = vrot.slane %v678_v17, 1  ;;  %v752_v21 = vadd.f32 %v751_v2, %v750_v15 }
 0x151   : > { %v732_v22 = vrot.slane %v731_v19, 1  ;;  %v659_v24 = vadd.f32 %v658_v18, %v657_v61 }
 0x152   : > { %v753_v23 = vrot.slane %v752_v21, 1  ;;  %v680_v26 = vadd.f32 %v679_v10, %v678_v17 }
 0x153   : > { %v733_v25 = vadd.f32 %v732_v22, %v731_v19 }
 0x154   : > { %v754_v27 = vadd.f32 %v753_v23, %v752_v21 }
 0x155   : > { %v756_v49 = vsel %vm755_vm0, %v659_v24, %v733_v25 }
 0x156   : > { %v757_v28 = vsel %vm755_vm0, %v680_v26, %v754_v27 }
 0x157   : > { %v760_v30 = vcombine.low %v756_v49, %v757_v28 }
 0x159   : > { %1090 = vst.sshfl [vmem:[%s237_s23] sm:$0x33 pattern:$0x76325410] %v760_v30 }
 0x15a PF: > { %s14_s14 = sadd.s32 1, %s1278_s14   ;;  %s1562_s12 = smov %s1274_s13 }
 0x15b   : > { %p11_p5 = scmp.ge.s32.totalorder %s14_s14, 6   ;;  %s1563_s13 = smov %s1565_s15 }
 0x15d   :  { %13 = sbr.rel (!%p11_p5) target bundleno = 2 (0x2), region = 70 }

// kernel: wavelet_transform_unit_forward.3
= control target key start
LH: loop header
LB: loop body
LE: loop exit
PB: predicated region body
PF: predicated region fallthrough
CT: control target
= control target key end

     0   :  { %s15283_s12 = smov 0   ;;  %s15285_s13 = smov 0   ;;  %s18742_s0 = inlined_call_operand.vmem [shape: bf16[2,18,18,512], index: 0, kind: input, shape index: {}]   ;;  %s18743_s1 = inlined_call_operand.vmem [shape: bf16[9,512,256], index: 1, kind: input, shape index: {}]   ;;  %s18744_s2 = inlined_call_operand.vmem [shape: bf16[2,16,16,256], index: 2, kind: output, shape index: {0}]   ;;  %s18745_s3 = inlined_call_operand.vmem [shape: f32[2,2,256], index: 3, kind: output, shape index: {1}]  }
   0x1   :  { %s15287_s14 = smov 0  }
   0x2 LB: > { %s26_s15 = sadd.s32 1, %s15257_s13  ;;  %p11603_p0 = scmp.ge.s32.totalorder %s15261_s14, 1  ;;  %s15261_s14 = sphi %s15287_s14, %s14_s14   ;;  %s15257_s13 = sphi %s15285_s13, %s19346_s13   ;;  %s15253_s12 = sphi %s15283_s12, %s19345_s12  }
   0x3   : > { %p28_p1 = scmp.ge.s32.totalorder %s26_s15, 2  ;;  %p160_p2 = scmp.lt.s32.totalorder %s15261_s14, 3 }
   0x5   : > { %s19348_s15 = smov (%p28_p1, %s26_s15), 0  ;;  %p161_p3 = pnand %p11603_p0, %p160_p2 }
   0x7   : > { %164 = sbr.rel (%p161_p3) target bundleno = 1461 (0x5b5), region = 28 }
   0xe   : > { %v14131_v0 = vld [vmem:[%s18743_s1 + $0x4] ss:$8 sps:$4 sm:$0xff]   ;;  %v14135_v2 = vld [vmem:[%s18743_s1] ss:$8 sps:$4 sm:$0xff]   ;;  %v14137_v4 = vld [vmem:[%s18743_s1 + $0x14] ss:$8 sps:$4 sm:$0xff]  }
   0xf   : > { %v14133_v1 = vld [vmem:[%s18743_s1 + $0x904] ss:$8 sps:$4 sm:$0xff]   ;;  %1033 = vmatprep.subr.bf16.mxu1 %v14131_v0  ;;  %v14136_v3 = vld [vmem:[%s18743_s1 + $0x900] ss:$8 sps:$4 sm:$0xff]   ;;  %v14139_v5 = vld [vmem:[%s18743_s1 + $0x914] ss:$8 sps:$4 sm:$0xff]  }
  0x10   : > { %6129 = vmatprep.subr.bf16.mxu0 %v14133_v1  ;;  %1034 = vmatpush1.bf16.msra.mxu1 %v14135_v2  ;;  %v14141_v6 = vld [vmem:[%s18743_s1 + $0x10] ss:$8 sps:$4 sm:$0xff]   ;;  %v14143_v8 = vld [vmem:[%s18743_s1 + $0x24] ss:$8 sps:$4 sm:$0xff]   ;;  %v14147_v10 = vld [vmem:[%s18743_s1 + $0x20] ss:$8 sps:$4 sm:$0xff]  }
  0x11   : > { %6130 = vmatpush1.bf16.msra.mxu0 %v14136_v3  ;;  %1035 = vmatprep.subr.bf16.mxu1 %v14137_v4  ;;  %v14142_v7 = vld [vmem:[%s18743_s1 + $0x910] ss:$8 sps:$4 sm:$0xff]   ;;  %v14145_v9 = vld [vmem:[%s18743_s1 + $0x924] ss:$8 sps:$4 sm:$0xff]   ;;  %v14148_v11 = vld [vmem:[%s18743_s1 + $0x920] ss:$8 sps:$4 sm:$0xff]  }
  0x12   : > { %6131 = vmatprep.subr.bf16.mxu0 %v14139_v5  ;;  %v14149_v12 = vld [vmem:[%s18743_s1 + $0x34] ss:$8 sps:$4 sm:$0xff]   ;;  %v14153_v14 = vld [vmem:[%s18743_s1 + $0x30] ss:$8 sps:$4 sm:$0xff]   ;;  %v14155_v16 = vld [vmem:[%s18743_s1 + $0x44] ss:$8 sps:$4 sm:$0xff]  }
  0x13   : > { %v14151_v13 = vld [vmem:[%s18743_s1 + $0x934] ss:$8 sps:$4 sm:$0xff]   ;;  %v14154_v15 = vld [vmem:[%s18743_s1 + $0x930] ss:$8 sps:$4 sm:$0xff]   ;;  %v14157_v17 = vld [vmem:[%s18743_s1 + $0x944] ss:$8 sps:$4 sm:$0xff]  }
  0x14   : > { %1036 = vmatpush1.bf16.msra.mxu1 %v14141_v6  ;;  %v14159_v18 = vld [vmem:[%s18743_s1 + $0x40] ss:$8 sps:$4 sm:$0xff]   ;;  %v14161_v20 = vld [vmem:[%s18743_s1 + $0x54] ss:$8 sps:$4 sm:$0xff]   ;;  %v14165_v22 = vld [vmem:[%s18743_s1 + $0x50] ss:$8 sps:$4 sm:$0xff]  }
  0x15   : > { %6132 = vmatpush1.bf16.msra.mxu0 %v14142_v7  ;;  %1037 = vmatprep.subr.bf16.mxu1 %v14143_v8  ;;  %v14160_v19 = vld [vmem:[%s18743_s1 + $0x940] ss:$8 sps:$4 sm:$0xff]   ;;  %v14163_v21 = vld [vmem:[%s18743_s1 + $0x954] ss:$8 sps:$4 sm:$0xff]   ;;  %v14166_v23 = vld [vmem:[%s18743_s1 + $0x950] ss:$8 sps:$4 sm:$0xff]  }
  0x16   : > { %6133 = vmatprep.subr.bf16.mxu0 %v14145_v9  ;;  %v14167_v24 = vld [vmem:[%s18743_s1 + $0x64] ss:$8 sps:$4 sm:$0xff]   ;;  %v14171_v26 = vld [vmem:[%s18743_s1 + $0x60] ss:$8 sps:$4 sm:$0xff]   ;;  %v14173_v28 = vld [vmem:[%s18743_s1 + $0x74] ss:$8 sps:$4 sm:$0xff]  }
  0x17   : > { %v14169_v25 = vld [vmem:[%s18743_s1 + $0x964] ss:$8 sps:$4 sm:$0xff]   ;;  %v14172_v27 = vld [vmem:[%s18743_s1 + $0x960] ss:$8 sps:$4 sm:$0xff]   ;;  %v14175_v29 = vld [vmem:[%s18743_s1 + $0x974] ss:$8 sps:$4 sm:$0xff]  }
  0x18   : > { %1038 = vmatpush1.bf16.msra.mxu1 %v14147_v10  ;;  %v14177_v30 = vld [vmem:[%s18743_s1 + $0x70] ss:$8 sps:$4 sm:$0xff]   ;;  %v14179_v32 = vld [vmem:[%s18743_s1 + $0x84] ss:$8 sps:$4 sm:$0xff]   ;;  %p197_p4 = scmp.lt.s32.totalorder %s15253_s12, 1  ;;  %v18994_v7 = vmov 0 }
  0x19   : > { %6134 = vmatpush1.bf16.msra.mxu0 %v14148_v11  ;;  %1039 = vmatprep.subr.bf16.mxu1 %v14149_v12  ;;  %v14178_v31 = vld [vmem:[%s18743_s1 + $0x970] ss:$8 sps:$4 sm:$0xff]   ;;  %v14181_v33 = vld [vmem:[%s18743_s1 + $0x984] ss:$8 sps:$4 sm:$0xff]   ;;  %v14183_v34 = vld [vmem:[%s18743_s1 + $0x80] ss:$8 sps:$4 sm:$0xff]  }
  0x1a   : > { %6135 = vmatprep.subr.bf16.mxu0 %v14151_v13  ;;  %v14184_v35 = vld [vmem:[%s18743_s1 + $0x980] ss:$8 sps:$4 sm:$0xff]   ;;  %v14185_v36 = vld [vmem:[%s18743_s1 + $0x94] ss:$8 sps:$4 sm:$0xff]   ;;  %s19350_s12 = smov (!%p197_p4, %s15253_s12), 1  ;;  %vm7529_vm3 = vcmask 1042432  }
  0x1b   : > { %v14187_v37 = vld [vmem:[%s18743_s1 + $0x994] ss:$8 sps:$4 sm:$0xff]   ;;  %v14189_v38 = vld [vmem:[%s18743_s1 + $0x90] ss:$8 sps:$4 sm:$0xff]   ;;  %v14191_v40 = vld [vmem:[%s18743_s1 + $0xa4] ss:$8 sps:$4 sm:$0xff]  }
  0x1c   : > { %1040 = vmatpush1.bf16.msra.mxu1 %v14153_v14  ;;  %v14190_v39 = vld [vmem:[%s18743_s1 + $0x990] ss:$8 sps:$4 sm:$0xff]   ;;  %s14106_s29 = smul.u32 864, %s19350_s12  ;;  %v14193_v41 = vld [vmem:[%s18743_s1 + $0x9a4] ss:$8 sps:$4 sm:$0xff]   ;;  %vm7530_vm4 = vcmask 1046532  }
  0x1d   : > { %6136 = vmatpush1.bf16.msra.mxu0 %v14154_v15  ;;  %1041 = vmatprep.subr.bf16.mxu1 %v14155_v16  ;;  %v14195_v42 = vld [vmem:[%s18743_s1 + $0xa0] ss:$8 sps:$4 sm:$0xff]   ;;  %v14197_v44 = vld [vmem:[%s18743_s1 + $0xb4] ss:$8 sps:$4 sm:$0xff]   ;;  %v14201_v46 = vld [vmem:[%s18743_s1 + $0xb0] ss:$8 sps:$4 sm:$0xff]  }
  0x1e   : > { %6137 = vmatprep.subr.bf16.mxu0 %v14157_v17  ;;  %v14196_v43 = vld [vmem:[%s18743_s1 + $0x9a0] ss:$8 sps:$4 sm:$0xff]   ;;  %s15446_s17 = scalar_lea.vmem %s18742_s0, %s14106_s29  ;;  %v14199_v45 = vld [vmem:[%s18743_s1 + $0x9b4] ss:$8 sps:$4 sm:$0xff]   ;;  %v14202_v47 = vld [vmem:[%s18743_s1 + $0x9b0] ss:$8 sps:$4 sm:$0xff]  }
  0x1f   : > { %v15458_v48 = vld [vmem:[%s15446_s17] sm:$0xff]  ;;  %v15464_v50 = vld [vmem:[%s15446_s17 + $0x10] sm:$0xff]  ;;  %v228_v51 = vld [vmem:[%s15446_s17 + $0x38] sm:$0xff]  ;;  %vm3449_vm0 = vsmask.f32 3328  ;;  %vm11237_vm6 = vcmask 1040384  }
  0x20   : > { %1042 = vmatpush1.bf16.msra.mxu1 %v14159_v18  ;;  %v14203_v49 = vld [vmem:[%s18743_s1 + $0xc4] ss:$8 sps:$4 sm:$0xff]   ;;  %v11610_v53 = vcombine.high %v15458_v48, %v15464_v50  ;;  %v232_v54 = vld [vmem:[%s15446_s17 + $0x58] sm:$0x11]  ;;  %v3515_v55 = vshrl.u32 %v228_v51, 16  ;;  %v3518_v56 = vshll.u32 %v228_v51, 16  ;;  %vm16937_vm5 = vmor %vm7529_vm3, %vm7530_vm4 }
  0x21   : > { %6138 = vmatpush1.bf16.msra.mxu0 %v14160_v19  ;;  %1043 = vmatprep.subr.bf16.mxu1 %v14161_v20  ;;  %v230_v52 = vld [vmem:[%s15446_s17 + $0x48] sm:$0xff]  ;;  %v3544_v60 = vshll.u32 %v232_v54, 16  ;;  %vm3450_vm1 = vsmask.f32 7440  ;;  %v14209_v3 = vld [vmem:[%s18743_s1 + $0xd4] ss:$8 sps:$4 sm:$0xff]  }
  0x22   : > { %6139 = vmatprep.subr.bf16.mxu0 %v14163_v21  ;;  %v3524_v57 = vshll.u32 %v230_v52, 16  ;;  %v14205_v58 = vld [vmem:[%s18743_s1 + $0x9c4] ss:$8 sps:$4 sm:$0xff]   ;;  %v3538_v59 = vshrl.u32 %v230_v52, 16  ;;  %1065 = vmatprep.mubr.bf16.mxu1 %v11610_v53  ;;  %v3517_v61 = vrot.slane %v3515_v55, 4  ;;  %v3520_v62 = vrot.slane %v3518_v56, 5  ;;  %vm15489_vm2 = vmor %vm3449_vm0, %vm3450_vm1 }
  0x23   : > { %v14207_v0 = vld [vmem:[%s18743_s1 + $0xc0] ss:$8 sps:$4 sm:$0xff]   ;;  %v14211_v4 = vld [vmem:[%s18743_s1 + $0x9d4] ss:$8 sps:$4 sm:$0xff]   ;;  %v18995_v7 = vsel %vm15489_vm2, 4294967295, %v18994_v7  ;;  %v3546_v9 = vrot.slane %v3544_v60, 5 }
  0x24   : > { %1044 = vmatpush1.bf16.msra.mxu1 %v14165_v22  ;;  %v3526_v63 = vrot.slane %v3524_v57, 5  ;;  %v14208_v1 = vld [vmem:[%s18743_s1 + $0x9c0] ss:$8 sps:$4 sm:$0xff]   ;;  %v3540_v2 = vrot.slane %v3538_v59, 4  ;;  %v3521_v5 = vor.u32 %v3520_v62, %v3517_v61  ;;  %18996 = vst [vmem:[#allocation3_spill] sm:$0xff] %v18995_v7  ;;  %v236_v10 = vld [vmem:[%s15446_s17 + $0x78] sm:$0xff] }
  0x25   : > { %6140 = vmatpush1.bf16.msra.mxu0 %v14166_v23  ;;  %1045 = vmatprep.subr.bf16.mxu1 %v14167_v24  ;;  %v234_v6 = vld [vmem:[%s15446_s17 + $0x68] sm:$0xff]  ;;  %v3572_v14 = vshll.u32 %v236_v10, 16  ;;  %v3586_v15 = vshrl.u32 %v236_v10, 16  ;;  %v14213_v20 = vld [vmem:[%s18743_s1 + $0xd0] ss:$8 sps:$4 sm:$0xff]   ;;  %v229_v57 = vld [vmem:[%s15446_s17 + $0x40] sm:$0xff] }
  0x26   : > { %6141 = vmatprep.subr.bf16.mxu0 %v14169_v25  ;;  %v3541_v8 = vor.u32 %v3540_v2, %v3526_v63  ;;  %v3563_v11 = vshrl.u32 %v234_v6, 16  ;;  %v3566_v12 = vshll.u32 %v234_v6, 16  ;;  %v3522_v13 = vrot.slane %v3521_v5, 4  ;;  %v238_v17 = vld [vmem:[%s15446_s17 + $0x88] sm:$0x11]  ;;  %v15539_v55 = vld [vmem:[%s15446_s17 + $0x30] sm:$0xff] }
  0x27   : > { %v14214_v21 = vld [vmem:[%s18743_s1 + $0x9d0] ss:$8 sps:$4 sm:$0xff]   ;;  %v3574_v23 = vrot.slane %v3572_v14, 5  ;;  %v3588_v24 = vrot.slane %v3586_v15, 4  ;;  %v14215_v25 = vld [vmem:[%s18743_s1 + $0xe4] ss:$8 sps:$4 sm:$0xff]   ;;  %v11609_v6 = vcombine.low %v15458_v48, %v15464_v50  ;;  %v15562_v10 = vcombine.high %v15539_v55, %v229_v57 }
  0x28   : > { %1046 = vmatpush1.bf16.msra.mxu1 %v14171_v26  ;;  %v3542_v16 = vrot.slane %v3541_v8, 4  ;;  %v3565_v18 = vrot.slane %v3563_v11, 4  ;;  %v3568_v19 = vrot.slane %v3566_v12, 5  ;;  %v3527_v22 = vsel %vm15489_vm2, %v3522_v13, %v3526_v63  ;;  %v14217_v26 = vld [vmem:[%s18743_s1 + $0x9e4] ss:$8 sps:$4 sm:$0xff]   ;;  %v248_v60 = vld [vmem:[%s15446_s17 + $0xd8] sm:$0xff] }
  0x29   : > { %6142 = vmatpush1.bf16.msra.mxu0 %v14172_v27  ;;  %1047 = vmatprep.subr.bf16.mxu1 %v14173_v28  ;;  %v14219_v28 = vld [vmem:[%s18743_s1 + $0xe0] ss:$8 sps:$4 sm:$0xff]   ;;  %v14231_v54 = vld [vmem:[%s18743_s1 + $0x104] ss:$8 sps:$4 sm:$0xff]   ;;  %v3682_v2 = vshrl.u32 %v248_v60, 16  ;;  %s12985_s27 = sshll.u32 %s19350_s12, 2 }
  0x2a   : > { %6143 = vmatprep.subr.bf16.mxu0 %v14175_v29  ;;  %v3547_v27 = vsel %vm15489_vm2, %v3542_v16, %v3546_v9  ;;  %v14220_v29 = vld [vmem:[%s18743_s1 + $0x9e0] ss:$8 sps:$4 sm:$0xff]   ;;  %v14234_v63 = vld [vmem:[%s18743_s1 + $0xe04] ss:$8 sps:$4 sm:$0xff]   ;;  %v14239_v11 = vld [vmem:[%s18743_s1 + $0x114] ss:$8 sps:$4 sm:$0xff]   ;;  %s219_s30 = scalar_lea.vmem %s18745_s3, %s12985_s27 }
  0x2b   : > { %v246_v56 = vld [vmem:[%s15446_s17 + $0xc8] sm:$0xff]  ;;  %v15551_v5 = vcombine.low %v3527_v22, %v3547_v27  ;;  %v14242_v48 = vld [vmem:[%s18743_s1 + $0xe14] ss:$8 sps:$4 sm:$0xff]   ;;  %v14611_v7 = vld [vmem:[%s18743_s1 + $0xc50] ss:$8 sps:$4 sm:$0xff]  }
  0x2c   : > { %1048 = vmatpush1.bf16.msra.mxu1 %v14177_v30  ;;  %v15517_v30 = vcombine.high %v3527_v22, %v3547_v27  ;;  %v3659_v61 = vshrl.u32 %v246_v56, 16  ;;  %v3662_v62 = vshll.u32 %v246_v56, 16  ;;  %v14229_v8 = vld [vmem:[%s18743_s1 + $0x100] ss:$8 sps:$4 sm:$0xff]   ;;  %v14237_v22 = vld [vmem:[%s18743_s1 + $0x110] ss:$8 sps:$4 sm:$0xff]  }
  0x2d   : > { %6144 = vmatpush1.bf16.msra.mxu0 %v14178_v31  ;;  %1049 = vmatprep.subr.bf16.mxu1 %v14179_v32  ;;  %v3569_v31 = vor.u32 %v3568_v19, %v3565_v18  ;;  %v3589_v32 = vor.u32 %v3588_v24, %v3574_v23  ;;  %18998 = vst [vmem:[#allocation5_spill] sm:$0xff] %v15551_v5  ;;  %v14232_v9 = vld [vmem:[%s18743_s1 + $0xe00] ss:$8 sps:$4 sm:$0xff]   ;;  %v3684_v19 = vrot.slane %v3682_v2, 4  ;;  %v14258_v56 = vld [vmem:[%s18743_s1 + $0xe34] ss:$8 sps:$4 sm:$0xff]  }
  0x2e   : > { %6145 = vmatprep.subr.bf16.mxu0 %v14181_v33  ;;  %18997 = vst [vmem:[#allocation4_spill] sm:$0xff] %v15517_v30  ;;  %v3592_v33 = vshll.u32 %v238_v17, 16  ;;  %6161 = vmatprep.mubr.bf16.mxu0 %v15517_v30  ;;  %v250_v13 = vld [vmem:[%s15446_s17 + $0xe8] sm:$0x11]  ;;  %v3661_v14 = vrot.slane %v3659_v61, 4  ;;  %v3664_v15 = vrot.slane %v3662_v62, 5 }
  0x2f   : > { %v3590_v51 = vrot.slane %v3589_v32, 4  ;;  %v3688_v24 = vshll.u32 %v250_v13, 16  ;;  %v14253_v62 = vld [vmem:[%s18743_s1 + $0x130] ss:$8 sps:$4 sm:$0xff]  }
  0x30   : > { %1050 = vmatpush1.bf16.msra.mxu1 %v14183_v34  ;;  %v240_v34 = vld [vmem:[%s15446_s17 + $0x98] sm:$0xff]  ;;  %v3594_v52 = vrot.slane %v3592_v33, 5  ;;  %v14247_v33 = vld [vmem:[%s18743_s1 + $0x124] ss:$8 sps:$4 sm:$0xff]  }
  0x31   : > { %6146 = vmatpush1.bf16.msra.mxu0 %v14184_v35  ;;  %1051 = vmatprep.subr.bf16.mxu1 %v14185_v36  ;;  %v242_v35 = vld [vmem:[%s15446_s17 + $0xa8] sm:$0xff]  ;;  %v3611_v36 = vshrl.u32 %v240_v34, 16 }
  0x32   : > { %6147 = vmatprep.subr.bf16.mxu0 %v14187_v37  ;;  %v3614_v37 = vshll.u32 %v240_v34, 16  ;;  %v14250_v34 = vld [vmem:[%s18743_s1 + $0xe24] ss:$8 sps:$4 sm:$0xff]  }
  0x34   : > { %1052 = vmatpush1.bf16.msra.mxu1 %v14189_v38  ;;  %v3620_v38 = vshll.u32 %v242_v35, 16 }
  0x35   : > { %6148 = vmatpush1.bf16.msra.mxu0 %v14190_v39  ;;  %1053 = vmatprep.subr.bf16.mxu1 %v14191_v40  ;;  %v14221_v39 = vld [vmem:[%s18743_s1 + $0xf4] ss:$8 sps:$4 sm:$0xff]  }
  0x36   : > { %6149 = vmatprep.subr.bf16.mxu0 %v14193_v41  ;;  %v14223_v40 = vld [vmem:[%s18743_s1 + $0x9f4] ss:$8 sps:$4 sm:$0xff]   ;;  %v3634_v41 = vshrl.u32 %v242_v35, 16 }
  0x38   : > { %1054 = vmatpush1.bf16.msra.mxu1 %v14195_v42  ;;  %v244_v42 = vld [vmem:[%s15446_s17 + $0xb8] sm:$0x11]  ;;  %v3636_v53 = vrot.slane %v3634_v41, 4  ;;  %v14245_v41 = vld [vmem:[%s18743_s1 + $0x120] ss:$8 sps:$4 sm:$0xff]  }
  0x39   : > { %6150 = vmatpush1.bf16.msra.mxu0 %v14196_v43  ;;  %1055 = vmatprep.subr.bf16.mxu1 %v14197_v44  ;;  %v3613_v43 = vrot.slane %v3611_v36, 4  ;;  %v3616_v44 = vrot.slane %v3614_v37, 5  ;;  %v3640_v59 = vshll.u32 %v244_v42, 16  ;;  %v14248_v42 = vld [vmem:[%s18743_s1 + $0xe20] ss:$8 sps:$4 sm:$0xff]  }
  0x3a   : > { %6151 = vmatprep.subr.bf16.mxu0 %v14199_v45  ;;  %v3622_v45 = vrot.slane %v3620_v38, 5  ;;  %v15599_v38 = vcombine.low %v15539_v55, %v229_v57  ;;  %v258_v55 = vld [vmem:[%s15446_s17 + $0x128] sm:$0xff]  ;;  %v260_v57 = vld [vmem:[%s15446_s17 + $0x138] sm:$0xff] }
  0x3b   : > { %v3642_v12 = vrot.slane %v3640_v59, 5  ;;  %v15629_v59 = vld [vmem:[%s15446_s17 + $0xa0] sm:$0xff]  ;;  %v3758_v2 = vshll.u32 %v258_v55, 16 }
  0x3c   : > { %1056 = vmatpush1.bf16.msra.mxu1 %v14201_v46  ;;  %v14225_v46 = vld [vmem:[%s18743_s1 + $0xf0] ss:$8 sps:$4 sm:$0xff]  }
  0x3d   : > { %6152 = vmatpush1.bf16.msra.mxu0 %v14202_v47  ;;  %1057 = vmatprep.subr.bf16.mxu1 %v14203_v49  ;;  %v14226_v47 = vld [vmem:[%s18743_s1 + $0x9f0] ss:$8 sps:$4 sm:$0xff]   ;;  %v3570_v49 = vrot.slane %v3569_v31, 4 }
  0x3e   : > { %6153 = vmatprep.subr.bf16.mxu0 %v14205_v58  ;;  %v3617_v58 = vor.u32 %v3616_v44, %v3613_v43 }
  0x40   : > { %1058 = vmatpush1.bf16.msra.mxu1 %v14207_v0  ;;  %v3637_v0 = vor.u32 %v3636_v53, %v3622_v45  ;;  %v3618_v50 = vrot.slane %v3617_v58, 4  ;;  %v15626_v58 = vld [vmem:[%s15446_s17 + $0x90] sm:$0xff] }
  0x41   : > { %6154 = vmatpush1.bf16.msra.mxu0 %v14208_v1  ;;  %1059 = vmatprep.subr.bf16.mxu1 %v14209_v3  ;;  %v3668_v1 = vshll.u32 %v248_v60, 16  ;;  %v3575_v3 = vsel %vm15489_vm2, %v3570_v49, %v3574_v23  ;;  %v15580_v23 = vld [vmem:[%s15446_s17 + $0x60] sm:$0xff] }
  0x42   : > { %6155 = vmatprep.subr.bf16.mxu0 %v14211_v4  ;;  %v3595_v4 = vsel %vm15489_vm2, %v3590_v51, %v3594_v52  ;;  %v3638_v17 = vrot.slane %v3637_v0, 4  ;;  %v3623_v27 = vsel %vm15489_vm2, %v3618_v50, %v3622_v45  ;;  %v14255_v45 = vld [vmem:[%s18743_s1 + $0x134] ss:$8 sps:$4 sm:$0xff]   ;;  %v3690_v52 = vrot.slane %v3688_v24, 5 }
  0x43   : > { %v15571_v16 = vcombine.high %v3575_v3, %v3595_v4  ;;  %v3670_v18 = vrot.slane %v3668_v1, 5  ;;  %v3755_v1 = vshrl.u32 %v258_v55, 16  ;;  %v268_v55 = vld [vmem:[%s15446_s17 + $0x178] sm:$0x11] }
  0x44   : > { %1060 = vmatpush1.bf16.msra.mxu1 %v14213_v20  ;;  %v252_v20 = vld [vmem:[%s15446_s17 + $0xf8] sm:$0xff]  ;;  %v3643_v32 = vsel %vm15489_vm2, %v3638_v17, %v3642_v12  ;;  %v15656_v12 = vcombine.high %v15626_v58, %v15629_v59  ;;  %v262_v17 = vld [vmem:[%s15446_s17 + $0x148] sm:$0x11] }
  0x45   : > { %6156 = vmatpush1.bf16.msra.mxu0 %v14214_v21  ;;  %1061 = vmatprep.subr.bf16.mxu1 %v14215_v25  ;;  %18999 = vst [vmem:[#allocation6_spill] sm:$0xff] %v15571_v16  ;;  %v254_v21 = vld [vmem:[%s15446_s17 + $0x108] sm:$0xff]  ;;  %v14240_v25 = vld [vmem:[%s18743_s1 + $0xe10] ss:$8 sps:$4 sm:$0xff]   ;;  %v3710_v31 = vshll.u32 %v252_v20, 16  ;;  %v3685_v35 = vor.u32 %v3684_v19, %v3670_v18  ;;  %v15612_v43 = vcombine.high %v3623_v27, %v3643_v32 }
  0x46   : > { %6157 = vmatprep.subr.bf16.mxu0 %v14217_v26  ;;  %v235_v26 = vld [vmem:[%s15446_s17 + $0x70] sm:$0xff]  ;;  %v3716_v36 = vshll.u32 %v254_v21, 16  ;;  %v3730_v37 = vshrl.u32 %v254_v21, 16  ;;  %v15652_v50 = vcombine.low %v3623_v27, %v3643_v32  ;;  %v3760_v21 = vrot.slane %v3758_v2, 5  ;;  %v264_v27 = vld [vmem:[%s15446_s17 + $0x158] sm:$0xff] }
  0x47   : > { %19001 = vst [vmem:[#allocation8_spill] sm:$0xff] %v15612_v43  ;;  %v3712_v49 = vrot.slane %v3710_v31, 5  ;;  %v3686_v51 = vrot.slane %v3685_v35, 4  ;;  %v3784_v31 = vshll.u32 %v262_v17, 16  ;;  %v247_v32 = vld [vmem:[%s15446_s17 + $0xd0] sm:$0xff]  ;;  %v3832_v17 = vshll.u32 %v268_v55, 16 }
  0x48   : > { %1062 = vmatpush1.bf16.msra.mxu1 %v14219_v28  ;;  %v3665_v28 = vor.u32 %v3664_v15, %v3661_v14  ;;  %v3718_v53 = vrot.slane %v3716_v36, 5  ;;  %19002 = vst [vmem:[#allocation9_spill] sm:$0xff] %v15652_v50  ;;  %v14261_v14 = vld [vmem:[%s18743_s1 + $0x140] ss:$8 sps:$4 sm:$0xff]   ;;  %v14269_v35 = vld [vmem:[%s18743_s1 + $0x150] ss:$8 sps:$4 sm:$0xff]  }
  0x49   : > { %6158 = vmatpush1.bf16.msra.mxu0 %v14220_v29  ;;  %1063 = vmatprep.subr.bf16.mxu1 %v14221_v39  ;;  %v3707_v29 = vshrl.u32 %v252_v20, 16  ;;  %v15601_v39 = vcombine.low %v3575_v3, %v3595_v4  ;;  %v3691_v3 = vsel %vm15489_vm2, %v3686_v51, %v3690_v52  ;;  %v14264_v15 = vld [vmem:[%s18743_s1 + $0xe40] ss:$8 sps:$4 sm:$0xff]   ;;  %v3757_v20 = vrot.slane %v3755_v1, 4  ;;  %v272_v1 = vld [vmem:[%s15446_s17 + $0x198] sm:$0xff] }
  0x4a   : > { %6159 = vmatprep.subr.bf16.mxu0 %v14223_v40  ;;  %v15604_v40 = vcombine.high %v15580_v23, %v235_v26  ;;  %v3666_v44 = vrot.slane %v3665_v28, 4  ;;  %v266_v28 = vld [vmem:[%s15446_s17 + $0x168] sm:$0xff]  ;;  %v3803_v36 = vshrl.u32 %v264_v27, 16  ;;  %v15704_v51 = vcombine.low %v15626_v58, %v15629_v59 }
  0x4b   : > { %19000 = vst [vmem:[#allocation7_spill] sm:$0xff] %v15601_v39  ;;  %v14280_v2 = vld [vmem:[%s18743_s1 + $0xe60] ss:$8 sps:$4 sm:$0xff]  }
  0x4c   : > { %1064 = vmatpush1.bf16.msra.mxu1 %v14225_v46  ;;  %v256_v46 = vld [vmem:[%s15446_s17 + $0x118] sm:$0x11]  ;;  %v3671_v61 = vsel %vm15489_vm2, %v3666_v44, %v3670_v18 }
  0x4d   : > { %6160 = vmatpush1.bf16.msra.mxu0 %v14226_v47  ;;  %1226 = vmatprep.subr.bf16.mxu1 %v14231_v54  ;;  %v3709_v47 = vrot.slane %v3707_v29, 4  ;;  %v3732_v54 = vrot.slane %v3730_v37, 4  ;;  %v3736_v60 = vshll.u32 %v256_v46, 16  ;;  %v15665_v18 = vcombine.high %v3671_v61, %v3691_v3  ;;  %v15680_v29 = vld [vmem:[%s15446_s17 + $0xc0] sm:$0xff]  ;;  %v14272_v44 = vld [vmem:[%s18743_s1 + $0xe50] ss:$8 sps:$4 sm:$0xff]  }
  0x4e   : > { %6915 = vmatprep.subr.bf16.mxu0 %v14234_v63  ;;  %v14256_v63 = vld [vmem:[%s18743_s1 + $0xe30] ss:$8 sps:$4 sm:$0xff]   ;;  %v3806_v37 = vshll.u32 %v264_v27, 16  ;;  %v3826_v46 = vshrl.u32 %v266_v28, 16  ;;  %v15706_v52 = vcombine.low %v3671_v61, %v3691_v3  ;;  %v14287_v3 = vld [vmem:[%s18743_s1 + $0x174] ss:$8 sps:$4 sm:$0xff]   ;;  %v15757_v27 = vcombine.low %v15680_v29, %v247_v32 }
  0x4f   : > { %1066 = vmatmul.mubr.bf16.vlgmr.msra.gmra.mrb[0].mxu1 %v11609_v6  ;;  %v3713_v0 = vor.u32 %v3712_v49, %v3709_v47  ;;  %v3733_v4 = vor.u32 %v3732_v54, %v3718_v53  ;;  %v3764_v6 = vshll.u32 %v260_v57, 16  ;;  %v3738_v13 = vrot.slane %v3736_v60, 5  ;;  %19003 = vst [vmem:[#allocation10_spill] sm:$0xff] %v15665_v18  ;;  %v14279_v47 = vld [vmem:[%s18743_s1 + $0x164] ss:$8 sps:$4 sm:$0xff]  }
  0x50   : > { %6162 = vmatmul.mubr.bf16.vlgmr.msra.gmra.mrb[0].mxu0 %v15551_v5  ;;  %1227 = vmatpush1.bf16.msra.mxu1 %v14229_v8  ;;  %v3778_v8 = vshrl.u32 %v260_v57, 16  ;;  %v14282_v49 = vld [vmem:[%s18743_s1 + $0xe64] ss:$8 sps:$4 sm:$0xff]   ;;  %19004 = vst [vmem:[#allocation11_spill] sm:$0xff] %v15706_v52  ;;  %v3786_v54 = vrot.slane %v3784_v31, 5  ;;  %v3828_v61 = vrot.slane %v3826_v46, 4 }
  0x51   : > { %6916 = vmatpush1.bf16.msra.mxu0 %v14232_v9  ;;  %1075 = vmatprep.mubr.bf16.mxu1 %v15562_v10  ;;  %v14263_v9 = vld [vmem:[%s18743_s1 + $0x144] ss:$8 sps:$4 sm:$0xff]   ;;  %v3714_v19 = vrot.slane %v3713_v0, 4  ;;  %v15670_v24 = vrot.slane %v3764_v6, 5  ;;  %v3808_v0 = vrot.slane %v3806_v37, 5  ;;  %v296_v5 = vld [vmem:[%s15446_s17 + $0x258] sm:$0xff] }
  0x52   : > { %6171 = vmatprep.mubr.bf16.mxu0 %v15571_v16  ;;  %1228 = vmatprep.subr.bf16.mxu1 %v14239_v11  ;;  %v14266_v11 = vld [vmem:[%s18743_s1 + $0xe44] ss:$8 sps:$4 sm:$0xff]   ;;  %v14296_v46 = vld [vmem:[%s18743_s1 + $0xe80] ss:$8 sps:$4 sm:$0xff]  }
  0x53   : > { %6917 = vmatprep.subr.bf16.mxu0 %v14242_v48  ;;  %v15650_v48 = vcombine.low %v15580_v23, %v235_v26  ;;  %v3734_v23 = vrot.slane %v3733_v4, 4  ;;  %v14274_v26 = vld [vmem:[%s18743_s1 + $0xe54] ss:$8 sps:$4 sm:$0xff]   ;;  %v270_v57 = vld [vmem:[%s15446_s17 + $0x188] sm:$0xff] }
  0x54   : > { %1229 = vmatpush1.bf16.msra.mxu1 %v14237_v22  ;;  %v14271_v22 = vld [vmem:[%s18743_s1 + $0x154] ss:$8 sps:$4 sm:$0xff]   ;;  %v3851_v6 = vshrl.u32 %v270_v57, 16 }
  0x55   : > { %6918 = vmatpush1.bf16.msra.mxu0 %v14240_v25  ;;  %1230 = vmatprep.subr.bf16.mxu1 %v14247_v33  ;;  %v3780_v25 = vrot.slane %v3778_v8, 4  ;;  %v3719_v33 = vsel %vm15489_vm2, %v3714_v19, %v3718_v53  ;;  %v15709_v53 = vcombine.high %v15680_v29, %v247_v32  ;;  %v14290_v4 = vld [vmem:[%s18743_s1 + $0xe74] ss:$8 sps:$4 sm:$0xff]   ;;  %v3854_v8 = vshll.u32 %v270_v57, 16  ;;  %v14285_v19 = vld [vmem:[%s18743_s1 + $0x170] ss:$8 sps:$4 sm:$0xff]  }
  0x56   : > { %6919 = vmatprep.subr.bf16.mxu0 %v14250_v34  ;;  %v3761_v34 = vor.u32 %v3760_v21, %v3757_v20  ;;  %v3853_v31 = vrot.slane %v3851_v6, 4  ;;  %v15792_v57 = vld [vmem:[%s15446_s17 + $0x120] sm:$0xff] }
  0x57   : > { %1076 = vmatmul.mubr.bf16.gmra.mrb[4].mxu1 %v15599_v38 }
  0x58   : > { %6172 = vmatmul.mubr.bf16.gmra.mrb[4].mxu0 %v15601_v39  ;;  %1085 = vmatprep.mubr.bf16.mxu1 %v15604_v40 }
  0x59   : > { %6181 = vmatprep.mubr.bf16.mxu0 %v15612_v43  ;;  %1231 = vmatpush1.bf16.msra.mxu1 %v14245_v41  ;;  %v3739_v41 = vsel %vm15489_vm2, %v3734_v23, %v3738_v13  ;;  %v15735_v13 = vld [vmem:[%s15446_s17 + $0xf0] sm:$0xff]  ;;  %v274_v23 = vld [vmem:[%s15446_s17 + $0x1a8] sm:$0x11] }
  0x5a   : > { %6920 = vmatpush1.bf16.msra.mxu0 %v14248_v42  ;;  %1232 = vmatprep.subr.bf16.mxu1 %v14255_v45  ;;  %v3781_v42 = vor.u32 %v3780_v25, %v15670_v24  ;;  %v3812_v45 = vshll.u32 %v266_v28, 16  ;;  %v15716_v60 = vcombine.high %v3719_v33, %v3739_v41  ;;  %v14288_v25 = vld [vmem:[%s18743_s1 + $0xe70] ss:$8 sps:$4 sm:$0xff]   ;;  %v14298_v28 = vld [vmem:[%s18743_s1 + $0xe84] ss:$8 sps:$4 sm:$0xff]  }
  0x5b   : > { %6921 = vmatprep.subr.bf16.mxu0 %v14258_v56  ;;  %v14277_v56 = vld [vmem:[%s18743_s1 + $0x160] ss:$8 sps:$4 sm:$0xff]  }
  0x5c   : > { %19005 = vst [vmem:[#allocation12_spill] sm:$0xff] %v15716_v60  ;;  %v3782_v58 = vrot.slane %v3781_v42, 4  ;;  %v15719_v59 = vrot.slane %v3812_v45, 5  ;;  %v14293_v45 = vld [vmem:[%s18743_s1 + $0x180] ss:$8 sps:$4 sm:$0xff]  }
  0x5d   : > { %1233 = vmatpush1.bf16.msra.mxu1 %v14253_v62  ;;  %v3762_v62 = vrot.slane %v3761_v34, 4  ;;  %v3856_v34 = vrot.slane %v3854_v8, 5  ;;  %v14311_v8 = vld [vmem:[%s18743_s1 + $0x1a4] ss:$8 sps:$4 sm:$0xff]  }
  0x5e   : > { %6922 = vmatpush1.bf16.msra.mxu0 %v14256_v63  ;;  %1234 = vmatprep.subr.bf16.mxu1 %v14263_v9  ;;  %v3805_v63 = vrot.slane %v3803_v36, 4  ;;  %v3860_v9 = vshll.u32 %v272_v1, 16  ;;  %v3787_v21 = vsel %vm15489_vm2, %v3782_v58, %v3786_v54  ;;  %v14306_v54 = vld [vmem:[%s18743_s1 + $0xe94] ss:$8 sps:$4 sm:$0xff]  }
  0x5f   : > { %6923 = vmatprep.subr.bf16.mxu0 %v14266_v11  ;;  %1086 = vmatmul.mubr.bf16.gmra.mrb[8].mxu1 %v15650_v48  ;;  %v3874_v11 = vshrl.u32 %v272_v1, 16  ;;  %v3767_v20 = vsel %vm15489_vm2, %v3762_v62, %v15670_v24  ;;  %v15759_v24 = vcombine.low %v3719_v33, %v3739_v41  ;;  %v3834_v33 = vrot.slane %v3832_v17, 5  ;;  %v276_v41 = vld [vmem:[%s15446_s17 + $0x1b8] sm:$0xff]  ;;  %v15795_v62 = vld [vmem:[%s15446_s17 + $0x130] sm:$0xff] }
  0x60   : > { %6182 = vmatmul.mubr.bf16.gmra.mrb[8].mxu0 %v15652_v50  ;;  %1095 = vmatprep.mubr.bf16.mxu1 %v15656_v12  ;;  %v15770_v29 = vcombine.high %v3767_v20, %v3787_v21  ;;  %v3857_v55 = vor.u32 %v3856_v34, %v3853_v31  ;;  %v282_v31 = vld [vmem:[%s15446_s17 + $0x1e8] sm:$0xff] }
  0x61   : > { %6191 = vmatprep.mubr.bf16.mxu0 %v15665_v18  ;;  %1235 = vmatpush1.bf16.msra.mxu1 %v14261_v14  ;;  %v15738_v14 = vld [vmem:[%s15446_s17 + $0x100] sm:$0xff]  ;;  %19006 = vst [vmem:[#allocation13_spill] sm:$0xff] %v15759_v24  ;;  %v3876_v36 = vrot.slane %v3874_v11, 4  ;;  %v15819_v11 = vcombine.high %v15792_v57, %v15795_v62 }
  0x62   : > { %6924 = vmatpush1.bf16.msra.mxu0 %v14264_v15  ;;  %1236 = vmatprep.subr.bf16.mxu1 %v14271_v22  ;;  %v3809_v15 = vor.u32 %v3808_v0, %v3805_v63  ;;  %v3829_v22 = vor.u32 %v3828_v61, %v15719_v59  ;;  %v15768_v37 = vcombine.high %v15735_v13, %v15738_v14  ;;  %v3899_v63 = vshrl.u32 %v276_v41, 16  ;;  %v14309_v34 = vld [vmem:[%s18743_s1 + $0x1a0] ss:$8 sps:$4 sm:$0xff]  }
  0x63   : > { %6925 = vmatprep.subr.bf16.mxu0 %v14274_v26  ;;  %v14295_v26 = vld [vmem:[%s18743_s1 + $0x184] ss:$8 sps:$4 sm:$0xff]   ;;  %19007 = vst [vmem:[#allocation14_spill] sm:$0xff] %v15770_v29  ;;  %v3902_v0 = vshll.u32 %v276_v41, 16  ;;  %v15810_v6 = vcombine.low %v15735_v13, %v15738_v14  ;;  %v3947_v41 = vshrl.u32 %v282_v31, 16 }
  0x64   : > { %v3810_v32 = vrot.slane %v3809_v15, 4  ;;  %v3830_v42 = vrot.slane %v3829_v22, 4  ;;  %v3858_v15 = vrot.slane %v3857_v55, 4  ;;  %v14314_v22 = vld [vmem:[%s18743_s1 + $0xea4] ss:$8 sps:$4 sm:$0xff]  }
  0x65   : > { %1237 = vmatpush1.bf16.msra.mxu1 %v14269_v35  ;;  %v15764_v35 = vrot.slane %v3860_v9, 5  ;;  %v15815_v9 = vcombine.low %v3767_v20, %v3787_v21  ;;  %v284_v20 = vld [vmem:[%s15446_s17 + $0x1f8] sm:$0xff] }
  0x66   : > { %6926 = vmatpush1.bf16.msra.mxu0 %v14272_v44  ;;  %1238 = vmatprep.subr.bf16.mxu1 %v14279_v47  ;;  %v278_v44 = vld [vmem:[%s15446_s17 + $0x1c8] sm:$0xff]  ;;  %v3880_v47 = vshll.u32 %v274_v23, 16  ;;  %v3815_v58 = vsel %vm15489_vm2, %v3810_v32, %v15719_v59  ;;  %v3835_v61 = vsel %vm15489_vm2, %v3830_v42, %v3834_v33  ;;  %v14319_v32 = vld [vmem:[%s18743_s1 + $0x1b4] ss:$8 sps:$4 sm:$0xff]   ;;  %v3950_v42 = vshll.u32 %v282_v31, 16 }
  0x67   : > { %6927 = vmatprep.subr.bf16.mxu0 %v14282_v49  ;;  %1096 = vmatmul.mubr.bf16.gmra.mrb[12].mxu1 %v15704_v51  ;;  %v14303_v49 = vld [vmem:[%s18743_s1 + $0x194] ss:$8 sps:$4 sm:$0xff]   ;;  %v3908_v1 = vshll.u32 %v278_v44, 16  ;;  %19008 = vst [vmem:[#allocation15_spill] sm:$0xff] %v15815_v9  ;;  %v15825_v23 = vcombine.high %v3815_v58, %v3835_v61  ;;  %v286_v31 = vld [vmem:[%s15446_s17 + $0x208] sm:$0x11] }
  0x68   : > { %6192 = vmatmul.mubr.bf16.gmra.mrb[12].mxu0 %v15706_v52  ;;  %1105 = vmatprep.mubr.bf16.mxu1 %v15709_v53  ;;  %v3882_v59 = vrot.slane %v3880_v47, 5  ;;  %v3970_v47 = vshrl.u32 %v284_v20, 16 }
  0x69   : > { %6201 = vmatprep.mubr.bf16.mxu0 %v15716_v60  ;;  %1239 = vmatpush1.bf16.msra.mxu1 %v14277_v56  ;;  %v3877_v56 = vor.u32 %v3876_v36, %v15764_v35  ;;  %19009 = vst [vmem:[#allocation16_spill] sm:$0xff] %v15825_v23  ;;  %v14312_v36 = vld [vmem:[%s18743_s1 + $0xea0] ss:$8 sps:$4 sm:$0xff]  }
  0x6a   : > { %6928 = vmatpush1.bf16.msra.mxu0 %v14280_v2  ;;  %1240 = vmatprep.subr.bf16.mxu1 %v14287_v3  ;;  %v3922_v2 = vshrl.u32 %v278_v44, 16  ;;  %v14301_v3 = vld [vmem:[%s18743_s1 + $0x190] ss:$8 sps:$4 sm:$0xff]  }
  0x6b   : > { %6929 = vmatprep.subr.bf16.mxu0 %v14290_v4  ;;  %v14304_v4 = vld [vmem:[%s18743_s1 + $0xe90] ss:$8 sps:$4 sm:$0xff]   ;;  %v3878_v17 = vrot.slane %v3877_v56, 4 }
  0x6c   : > { %v3924_v21 = vrot.slane %v3922_v2, 4  ;;  %v15845_v44 = vld [vmem:[%s15446_s17 + $0x150] sm:$0xff]  ;;  %v15869_v2 = vcombine.low %v3815_v58, %v3835_v61  ;;  %v14327_v58 = vld [vmem:[%s18743_s1 + $0x1c4] ss:$8 sps:$4 sm:$0xff]  }
  0x6d   : > { %1241 = vmatpush1.bf16.msra.mxu1 %v14285_v19  ;;  %v280_v19 = vld [vmem:[%s15446_s17 + $0x1d8] sm:$0x11]  ;;  %v3883_v55 = vsel %vm15489_vm2, %v3878_v17, %v3882_v59  ;;  %v3952_v59 = vrot.slane %v3950_v42, 5 }
  0x6e   : > { %6930 = vmatpush1.bf16.msra.mxu0 %v14288_v25  ;;  %1242 = vmatprep.subr.bf16.mxu1 %v14295_v26  ;;  %v3901_v25 = vrot.slane %v3899_v63, 4  ;;  %v3904_v26 = vrot.slane %v3902_v0, 5  ;;  %v3928_v33 = vshll.u32 %v280_v19, 16  ;;  %v14320_v0 = vld [vmem:[%s18743_s1 + $0xeb0] ss:$8 sps:$4 sm:$0xff]   ;;  %19010 = vst [vmem:[#allocation17_spill] sm:$0xff] %v15869_v2 }
  0x6f   : > { %6931 = vmatprep.subr.bf16.mxu0 %v14298_v28  ;;  %1106 = vmatmul.mubr.bf16.gmra.mrb[16].mxu1 %v15757_v27  ;;  %v15827_v28 = vrot.slane %v3908_v1, 5  ;;  %v15867_v1 = vcombine.low %v15792_v57, %v15795_v62 }
  0x70   : > { %6202 = vmatmul.mubr.bf16.gmra.mrb[16].mxu0 %v15759_v24  ;;  %1115 = vmatprep.mubr.bf16.mxu1 %v15768_v37  ;;  %v3905_v56 = vor.u32 %v3904_v26, %v3901_v25  ;;  %v290_v25 = vld [vmem:[%s15446_s17 + $0x228] sm:$0xff] }
  0x71   : > { %6211 = vmatprep.mubr.bf16.mxu0 %v15770_v29  ;;  %1243 = vmatpush1.bf16.msra.mxu1 %v14293_v45  ;;  %v3863_v45 = vsel %vm15489_vm2, %v3858_v15, %v15764_v35  ;;  %v3925_v63 = vor.u32 %v3924_v21, %v15827_v28  ;;  %v14317_v35 = vld [vmem:[%s18743_s1 + $0x1b0] ss:$8 sps:$4 sm:$0xff]   ;;  %v15889_v21 = vld [vmem:[%s15446_s17 + $0x180] sm:$0xff]  ;;  %v4004_v42 = vshll.u32 %v290_v25, 16 }
  0x72   : > { %6932 = vmatpush1.bf16.msra.mxu0 %v14296_v46  ;;  %1244 = vmatprep.subr.bf16.mxu1 %v14303_v49  ;;  %v3956_v46 = vshll.u32 %v284_v20, 16  ;;  %v14322_v49 = vld [vmem:[%s18743_s1 + $0xeb4] ss:$8 sps:$4 sm:$0xff]   ;;  %v15876_v17 = vcombine.high %v3863_v45, %v3883_v55  ;;  %v3906_v61 = vrot.slane %v3905_v56, 4  ;;  %v14325_v20 = vld [vmem:[%s18743_s1 + $0x1c0] ss:$8 sps:$4 sm:$0xff]  }
  0x73   : > { %6933 = vmatprep.subr.bf16.mxu0 %v14306_v54  ;;  %v15854_v54 = vld [vmem:[%s15446_s17 + $0x160] sm:$0xff]  ;;  %v3926_v26 = vrot.slane %v3925_v63, 4  ;;  %v3976_v56 = vshll.u32 %v286_v31, 16 }
  0x74   : > { %v15874_v15 = vcombine.high %v15845_v44, %v15854_v54  ;;  %19012 = vst [vmem:[#allocation19_spill] sm:$0xff] %v15876_v17  ;;  %v15878_v19 = vrot.slane %v3956_v46, 5  ;;  %v4018_v46 = vshrl.u32 %v290_v25, 16  ;;  %v3911_v63 = vsel %vm15489_vm2, %v3906_v61, %v15827_v28 }
  0x75   : > { %1245 = vmatpush1.bf16.msra.mxu1 %v14301_v3  ;;  %v3930_v3 = vrot.slane %v3928_v33, 5  ;;  %v15919_v28 = vcombine.low %v3863_v45, %v3883_v55  ;;  %v15927_v61 = vrot.slane %v4004_v42, 5  ;;  %v14338_v45 = vld [vmem:[%s18743_s1 + $0xed4] ss:$8 sps:$4 sm:$0xff]   ;;  %v14341_v42 = vld [vmem:[%s18743_s1 + $0x1e0] ss:$8 sps:$4 sm:$0xff]  }
  0x76   : > { %6934 = vmatpush1.bf16.msra.mxu0 %v14304_v4  ;;  %1246 = vmatprep.subr.bf16.mxu1 %v14311_v8  ;;  %v3949_v4 = vrot.slane %v3947_v41, 4  ;;  %v288_v8 = vld [vmem:[%s15446_s17 + $0x218] sm:$0xff]  ;;  %19011 = vst [vmem:[#allocation18_spill] sm:$0xff] %v15874_v15 }
  0x77   : > { %6935 = vmatprep.subr.bf16.mxu0 %v14314_v22  ;;  %1116 = vmatmul.mubr.bf16.gmra.mrb[20].mxu1 %v15810_v6  ;;  %v3972_v22 = vrot.slane %v3970_v47, 4  ;;  %v3995_v33 = vshrl.u32 %v288_v8, 16  ;;  %v3998_v41 = vshll.u32 %v288_v8, 16  ;;  %v14333_v8 = vld [vmem:[%s18743_s1 + $0x1d0] ss:$8 sps:$4 sm:$0xff]   ;;  %19014 = vst [vmem:[#allocation21_spill] sm:$0xff] %v15919_v28 }
  0x78   : > { %6212 = vmatmul.mubr.bf16.gmra.mrb[20].mxu0 %v15815_v9  ;;  %1125 = vmatprep.mubr.bf16.mxu1 %v15819_v11  ;;  %v3953_v47 = vor.u32 %v3952_v59, %v3949_v4  ;;  %v14335_v4 = vld [vmem:[%s18743_s1 + $0x1d4] ss:$8 sps:$4 sm:$0xff]   ;;  %v15917_v59 = vcombine.low %v15845_v44, %v15854_v54 }
  0x79   : > { %6221 = vmatprep.mubr.bf16.mxu0 %v15825_v23  ;;  %1247 = vmatpush1.bf16.msra.mxu1 %v14309_v34  ;;  %v14328_v34 = vld [vmem:[%s18743_s1 + $0xec0] ss:$8 sps:$4 sm:$0xff]   ;;  %v3997_v25 = vrot.slane %v3995_v33, 4  ;;  %v15937_v33 = vld [vmem:[%s15446_s17 + $0x1b0] sm:$0xff] }
  0x7a   : > { %6936 = vmatpush1.bf16.msra.mxu0 %v14312_v36  ;;  %1248 = vmatprep.subr.bf16.mxu1 %v14319_v32  ;;  %v14330_v36 = vld [vmem:[%s18743_s1 + $0xec4] ss:$8 sps:$4 sm:$0xff]   ;;  %v271_v32 = vld [vmem:[%s15446_s17 + $0x190] sm:$0xff]  ;;  %19013 = vst [vmem:[#allocation20_spill] sm:$0xff] %v15917_v59  ;;  %v3954_v31 = vrot.slane %v3953_v47, 4 }
  0x7b   : > { %6937 = vmatprep.subr.bf16.mxu0 %v14322_v49  ;;  %v3973_v49 = vor.u32 %v3972_v22, %v15878_v19  ;;  %v14336_v22 = vld [vmem:[%s18743_s1 + $0xed0] ss:$8 sps:$4 sm:$0xff]  }
  0x7d   : > { %1249 = vmatpush1.bf16.msra.mxu1 %v14317_v35  ;;  %v3931_v35 = vsel %vm15489_vm2, %v3926_v26, %v3930_v3  ;;  %v15922_v3 = vcombine.high %v15889_v21, %v271_v32  ;;  %v4020_v26 = vrot.slane %v4018_v46, 4  ;;  %v277_v46 = vld [vmem:[%s15446_s17 + $0x1c0] sm:$0xff] }
  0x7e   : > { %6938 = vmatpush1.bf16.msra.mxu0 %v14320_v0  ;;  %1250 = vmatprep.subr.bf16.mxu1 %v14327_v58  ;;  %v292_v0 = vld [vmem:[%s15446_s17 + $0x238] sm:$0x11]  ;;  %v4000_v58 = vrot.slane %v3998_v41, 5  ;;  %v15932_v55 = vcombine.high %v3911_v63, %v3931_v35 }
  0x7f   : > { %1126 = vmatmul.mubr.bf16.gmra.mrb[24].mxu1 %v15867_v1  ;;  %6939 = vmatprep.subr.bf16.mxu0 %v14330_v36  ;;  %19015 = vst [vmem:[#allocation22_spill] sm:$0xff] %v15922_v3  ;;  %v294_v36 = vld [vmem:[%s15446_s17 + $0x248] sm:$0xff]  ;;  %v4024_v41 = vshll.u32 %v292_v0, 16 }
  0x80   : > { %6222 = vmatmul.mubr.bf16.gmra.mrb[24].mxu0 %v15869_v2  ;;  %1135 = vmatprep.mubr.bf16.mxu1 %v15874_v15  ;;  %19016 = vst [vmem:[#allocation23_spill] sm:$0xff] %v15932_v55  ;;  %v4001_v47 = vor.u32 %v4000_v58, %v3997_v25  ;;  %v14343_v0 = vld [vmem:[%s18743_s1 + $0x1e4] ss:$8 sps:$4 sm:$0xff]   ;;  %v4052_v25 = vshll.u32 %v296_v5, 16  ;;  %v4066_v58 = vshrl.u32 %v296_v5, 16  ;;  %v15970_v5 = vcombine.low %v3911_v63, %v3931_v35 }
  0x81   : > { %6231 = vmatprep.mubr.bf16.mxu0 %v15876_v17  ;;  %1251 = vmatpush1.bf16.msra.mxu1 %v14325_v20  ;;  %v3974_v20 = vrot.slane %v3973_v49, 4  ;;  %v4021_v49 = vor.u32 %v4020_v26, %v15927_v61  ;;  %v14344_v26 = vld [vmem:[%s18743_s1 + $0xee0] ss:$8 sps:$4 sm:$0xff]   ;;  %v14351_v63 = vld [vmem:[%s18743_s1 + $0x1f4] ss:$8 sps:$4 sm:$0xff]  }
  0x82   : > { %6940 = vmatpush1.bf16.msra.mxu0 %v14328_v34  ;;  %1252 = vmatprep.subr.bf16.mxu1 %v14335_v4  ;;  %v3978_v34 = vrot.slane %v3976_v56, 5  ;;  %v4043_v56 = vshrl.u32 %v294_v36, 16  ;;  %v3959_v4 = vsel %vm15489_vm2, %v3954_v31, %v15878_v19  ;;  %v15966_v19 = vcombine.high %v15937_v33, %v277_v46  ;;  %19018 = vst [vmem:[#allocation25_spill] sm:$0xff] %v15970_v5  ;;  %v14349_v35 = vld [vmem:[%s18743_s1 + $0x1f0] ss:$8 sps:$4 sm:$0xff]  }
  0x83   : > { %6941 = vmatprep.subr.bf16.mxu0 %v14338_v45  ;;  %v14346_v45 = vld [vmem:[%s18743_s1 + $0xee4] ss:$8 sps:$4 sm:$0xff]   ;;  %v4026_v31 = vrot.slane %v4024_v41, 5 }
  0x84   : > { %19017 = vst [vmem:[#allocation24_spill] sm:$0xff] %v15966_v19 }
  0x85   : > { %1253 = vmatpush1.bf16.msra.mxu1 %v14333_v8  ;;  %v4046_v8 = vshll.u32 %v294_v36, 16  ;;  %v15963_v36 = vcombine.low %v15889_v21, %v271_v32  ;;  %v4054_v32 = vrot.slane %v4052_v25, 5  ;;  %v14359_v25 = vld [vmem:[%s18743_s1 + $0x604] ss:$8 sps:$4 sm:$0xff]  }
  0x86   : > { %6942 = vmatpush1.bf16.msra.mxu0 %v14336_v22  ;;  %v3979_v22 = vsel %vm15489_vm2, %v3974_v20, %v3978_v34  ;;  %1254 = vmatprep.subr.bf16.mxu1 %v14343_v0  ;;  %v300_v20 = vld [vmem:[%s15446_s17 + $0x278] sm:$0xff]  ;;  %v302_v34 = vld [vmem:[%s15446_s17 + $0x288] sm:$0xff]  ;;  %v4045_v0 = vrot.slane %v4043_v56, 4 }
  0x87   : > { %1136 = vmatmul.mubr.bf16.gmra.mrb[28].mxu1 %v15917_v59  ;;  %6943 = vmatprep.subr.bf16.mxu0 %v14346_v45  ;;  %v15972_v30 = vcombine.high %v3959_v4, %v3979_v22  ;;  %v4048_v21 = vrot.slane %v4046_v8, 5  ;;  %v4068_v59 = vrot.slane %v4066_v58, 4  ;;  %v4091_v17 = vshrl.u32 %v300_v20, 16  ;;  %v283_v58 = vld [vmem:[%s15446_s17 + $0x1f0] sm:$0xff] }
  0x88   : > { %6232 = vmatmul.mubr.bf16.gmra.mrb[28].mxu0 %v15919_v28  ;;  %1145 = vmatprep.mubr.bf16.mxu1 %v15922_v3  ;;  %v4022_v3 = vrot.slane %v4021_v49, 4  ;;  %v298_v28 = vld [vmem:[%s15446_s17 + $0x268] sm:$0x11]  ;;  %v4094_v41 = vshll.u32 %v300_v20, 16  ;;  %v4100_v15 = vshll.u32 %v302_v34, 16  ;;  %v4114_v2 = vshrl.u32 %v302_v34, 16 }
  0x89   : > { %6241 = vmatprep.mubr.bf16.mxu0 %v15932_v55  ;;  %1255 = vmatpush1.bf16.msra.mxu1 %v14341_v42  ;;  %19019 = vst [vmem:[#allocation26_spill] sm:$0xff] %v15972_v30  ;;  %v4002_v55 = vrot.slane %v4001_v47, 4  ;;  %v14352_v42 = vld [vmem:[%s18743_s1 + $0xef0] ss:$8 sps:$4 sm:$0xff]   ;;  %v14354_v47 = vld [vmem:[%s18743_s1 + $0xef4] ss:$8 sps:$4 sm:$0xff]   ;;  %v4049_v45 = vor.u32 %v4048_v21, %v4045_v0  ;;  %v4069_v20 = vor.u32 %v4068_v59, %v4054_v32 }
  0x8a   : > { %6944 = vmatpush1.bf16.msra.mxu0 %v14344_v26  ;;  %v281_v49 = vld [vmem:[%s15446_s17 + $0x1e0] sm:$0xff]  ;;  %v4072_v8 = vshll.u32 %v298_v28, 16  ;;  %v4027_v26 = vsel %vm15489_vm2, %v4022_v3, %v4026_v31  ;;  %v4093_v34 = vrot.slane %v4091_v17, 4  ;;  %1256 = vmatprep.subr.bf16.mxu1 %v14351_v63  ;;  %v16007_v3 = vcombine.low %v3959_v4, %v3979_v22  ;;  %v304_v59 = vld [vmem:[%s15446_s17 + $0x298] sm:$0x11]  ;;  %v306_v0 = vld [vmem:[%s15446_s17 + $0x2a8] sm:$0xff] }
  0x8b   : > { %v4007_v56 = vsel %vm15489_vm2, %v4002_v55, %v15927_v61  ;;  %6945 = vmatprep.subr.bf16.mxu0 %v14354_v47  ;;  %v4116_v61 = vrot.slane %v4114_v2, 4  ;;  %v14362_v28 = vld [vmem:[%s18743_s1 + $0xf04] ss:$8 sps:$4 sm:$0xff]   ;;  %v16005_v55 = vcombine.low %v15937_v33, %v277_v46  ;;  %v16010_v17 = vcombine.high %v281_v49, %v283_v58 }
  0x8c   : > { %19021 = vst [vmem:[#allocation28_spill] sm:$0xff] %v16007_v3  ;;  %v16012_v31 = vcombine.high %v4007_v56, %v4027_v26  ;;  %v4050_v2 = vrot.slane %v4049_v45, 4  ;;  %v4070_v21 = vrot.slane %v4069_v20, 4  ;;  %v4120_v33 = vshll.u32 %v304_v59, 16 }
  0x8d   : > { %1257 = vmatpush1.bf16.msra.mxu1 %v14349_v35  ;;  %19020 = vst [vmem:[#allocation27_spill] sm:$0xff] %v16005_v55  ;;  %19022 = vst [vmem:[#allocation29_spill] sm:$0xff] %v16010_v17  ;;  %v4139_v46 = vshrl.u32 %v306_v0, 16  ;;  %v4142_v4 = vshll.u32 %v306_v0, 16  ;;  %v16020_v47 = vcombine.low %v281_v49, %v283_v58  ;;  %v16028_v20 = vcombine.low %v4007_v56, %v4027_v26  ;;  %v295_v26 = vld [vmem:[%s15446_s17 + $0x250] sm:$0xff] }
  0x8e   : > { %6946 = vmatpush1.bf16.msra.mxu0 %v14352_v42  ;;  %1888 = vmatprep.subr.bf16.mxu1 %v14359_v25  ;;  %19023 = vst [vmem:[#allocation30_spill] sm:$0xff] %v16012_v31  ;;  %v4055_v25 = vsel %vm15489_vm2, %v4050_v2, %v4054_v32  ;;  %v314_v32 = vld [vmem:[%s15446_s17 + $0x2e8] sm:$0xff]  ;;  %v293_v2 = vld [vmem:[%s15446_s17 + $0x240] sm:$0xff] }
  0x8f   : > { %1146 = vmatmul.mubr.bf16.gmra.mrb[32].mxu1 %v15963_v36  ;;  %7108 = vmatprep.subr.bf16.mxu0 %v14362_v28  ;;  %19024 = vst [vmem:[#allocation31_spill] sm:$0xff] %v16020_v47  ;;  %19025 = vst [vmem:[#allocation32_spill] sm:$0xff] %v16028_v20  ;;  %v4122_v28 = vrot.slane %v4120_v33, 5  ;;  %v4141_v59 = vrot.slane %v4139_v46, 4  ;;  %v4144_v49 = vrot.slane %v4142_v4, 5  ;;  %v4210_v4 = vshrl.u32 %v314_v32, 16 }
  0x90   : > { %6242 = vmatmul.mubr.bf16.gmra.mrb[32].mxu0 %v15970_v5  ;;  %1155 = vmatprep.mubr.bf16.mxu1 %v15966_v19  ;;  %v4102_v19 = vrot.slane %v4100_v15, 5  ;;  %v308_v15 = vld [vmem:[%s15446_s17 + $0x2b8] sm:$0xff] }
  0x91   : > { %6251 = vmatprep.mubr.bf16.mxu0 %v15972_v30  ;;  %v4096_v30 = vrot.slane %v4094_v41, 5  ;;  %v4074_v41 = vrot.slane %v4072_v8, 5  ;;  %v4148_v22 = vshll.u32 %v308_v15, 16  ;;  %v4162_v42 = vshrl.u32 %v308_v15, 16  ;;  %v287_v8 = vld [vmem:[%s15446_s17 + $0x210] sm:$0xff] }
  0x92   : > { %v4117_v35 = vor.u32 %v4116_v61, %v4102_v19 }
  0x93   : > { %v4097_v63 = vor.u32 %v4096_v30, %v4093_v34  ;;  %v289_v30 = vld [vmem:[%s15446_s17 + $0x220] sm:$0xff]  ;;  %v4075_v45 = vsel %vm15489_vm2, %v4070_v21, %v4074_v41  ;;  %v4150_v58 = vrot.slane %v4148_v22, 5  ;;  %v4164_v0 = vrot.slane %v4162_v42, 4 }
  0x94   : > { %v4118_v61 = vrot.slane %v4117_v35, 4  ;;  %v16030_v15 = vcombine.high %v287_v8, %v289_v30  ;;  %v4145_v41 = vor.u32 %v4144_v49, %v4141_v59  ;;  %v16047_v22 = vcombine.low %v287_v8, %v289_v30  ;;  %v299_v30 = vld [vmem:[%s15446_s17 + $0x270] sm:$0xff] }
  0x95   : > { %v4098_v34 = vrot.slane %v4097_v63, 4  ;;  %v4165_v63 = vor.u32 %v4164_v0, %v4150_v58  ;;  %v16049_v42 = vcombine.low %v4055_v25, %v4075_v45 }
  0x96   : > { %19026 = vst [vmem:[#allocation33_spill] sm:$0xff] %v16030_v15  ;;  %v4123_v21 = vsel %vm15489_vm2, %v4118_v61, %v4122_v28  ;;  %19028 = vst [vmem:[#allocation35_spill] sm:$0xff] %v16047_v22 }
  0x97   : > { %1156 = vmatmul.mubr.bf16.gmra.mrb[36].mxu1 %v16005_v55  ;;  %v4103_v56 = vsel %vm15489_vm2, %v4098_v34, %v4102_v19  ;;  %v4196_v19 = vshll.u32 %v314_v32, 16  ;;  %19029 = vst [vmem:[#allocation36_spill] sm:$0xff] %v16049_v42  ;;  %v16051_v34 = vcombine.high %v293_v2, %v295_v26  ;;  %v4166_v28 = vrot.slane %v4165_v63, 4  ;;  %v320_v32 = vld [vmem:[%s15446_s17 + $0x318] sm:$0xff] }
  0x98   : > { %6252 = vmatmul.mubr.bf16.gmra.mrb[36].mxu0 %v16007_v3  ;;  %1165 = vmatprep.mubr.bf16.mxu1 %v16010_v17  ;;  %v310_v17 = vld [vmem:[%s15446_s17 + $0x2c8] sm:$0x11]  ;;  %v312_v3 = vld [vmem:[%s15446_s17 + $0x2d8] sm:$0xff]  ;;  %v16053_v61 = vcombine.high %v4103_v56, %v4123_v21 }
  0x99   : > { %6261 = vmatprep.mubr.bf16.mxu0 %v16012_v31  ;;  %v16032_v31 = vcombine.high %v4055_v25, %v4075_v45  ;;  %v4168_v35 = vshll.u32 %v310_v17, 16  ;;  %v4187_v33 = vshrl.u32 %v312_v3, 16  ;;  %v4190_v46 = vshll.u32 %v312_v3, 16  ;;  %19030 = vst [vmem:[#allocation37_spill] sm:$0xff] %v16051_v34  ;;  %v301_v25 = vld [vmem:[%s15446_s17 + $0x280] sm:$0xff] }
  0x9a   : > { %19031 = vst [vmem:[#allocation38_spill] sm:$0xff] %v16053_v61  ;;  %v4146_v17 = vrot.slane %v4145_v41, 4  ;;  %v4212_v3 = vrot.slane %v4210_v4, 4  ;;  %v4258_v4 = vshrl.u32 %v320_v32, 16 }
  0x9b   : > { %19027 = vst [vmem:[#allocation34_spill] sm:$0xff] %v16032_v31  ;;  %v4170_v59 = vrot.slane %v4168_v35, 5  ;;  %v4189_v49 = vrot.slane %v4187_v33, 4  ;;  %v4192_v0 = vrot.slane %v4190_v46, 5 }
  0x9c   : > { %v4151_v8 = vsel %vm15489_vm2, %v4146_v17, %v4150_v58  ;;  %v16070_v58 = vcombine.low %v4103_v56, %v4123_v21  ;;  %v16072_v17 = vcombine.high %v299_v30, %v301_v25  ;;  %v15068_v21 = vld [vmem:[%s15446_s17 + $0x70] sm:$0xff] }
  0x9d   : > { %v4171_v45 = vsel %vm15489_vm2, %v4166_v28, %v4170_v59  ;;  %v4193_v41 = vor.u32 %v4192_v0, %v4189_v49  ;;  %v322_v59 = vld [vmem:[%s15446_s17 + $0x328] sm:$0x11]  ;;  %v4260_v0 = vrot.slane %v4258_v4, 4 }
  0x9e   : > { %19033 = vst [vmem:[#allocation40_spill] sm:$0xff] %v16070_v58  ;;  %19034 = vst [vmem:[#allocation41_spill] sm:$0xff] %v16072_v17  ;;  %v4264_v56 = vshll.u32 %v322_v59, 16  ;;  %v16091_v59 = vcombine.low %v4151_v8, %v4171_v45 }
  0x9f   : > { %1166 = vmatmul.mubr.bf16.gmra.mrb[40].mxu1 %v16020_v47 }
  0xa0   : > { %6262 = vmatmul.mubr.bf16.gmra.mrb[40].mxu0 %v16028_v20  ;;  %1175 = vmatprep.mubr.bf16.mxu1 %v16030_v15  ;;  %v316_v15 = vld [vmem:[%s15446_s17 + $0x2f8] sm:$0x11]  ;;  %v318_v20 = vld [vmem:[%s15446_s17 + $0x308] sm:$0xff]  ;;  %19037 = vst [vmem:[#allocation44_spill] sm:$0xff] %v16091_v59 }
  0xa1   : > { %6271 = vmatprep.mubr.bf16.mxu0 %v16032_v31  ;;  %v4198_v31 = vrot.slane %v4196_v19, 5  ;;  %v4216_v35 = vshll.u32 %v316_v15, 16  ;;  %v4235_v33 = vshrl.u32 %v318_v20, 16  ;;  %v4238_v46 = vshll.u32 %v318_v20, 16 }
  0xa2   : > { %v4244_v19 = vshll.u32 %v320_v32, 16  ;;  %v3558_v32 = vshll.u32 %v15068_v21, 16 }
  0xa3   : > { %v4213_v63 = vor.u32 %v4212_v3, %v4198_v31  ;;  %v4218_v28 = vrot.slane %v4216_v35, 5  ;;  %v4237_v15 = vrot.slane %v4235_v33, 4  ;;  %v4240_v49 = vrot.slane %v4238_v46, 5  ;;  %v15067_v3 = vld [vmem:[%s15446_s17 + $0x60] sm:$0xff]  ;;  %v307_v35 = vld [vmem:[%s15446_s17 + $0x2b0] sm:$0xff] }
  0xa4   : > { %v4246_v20 = vrot.slane %v4244_v19, 5 }
  0xa5   : > { %v4241_v19 = vor.u32 %v4240_v49, %v4237_v15 }
  0xa6   : > { %v4261_v4 = vor.u32 %v4260_v0, %v4246_v20 }
  0xa7   : > { %1176 = vmatmul.mubr.bf16.gmra.mrb[44].mxu1 %v16047_v22  ;;  %v4214_v22 = vrot.slane %v4213_v63, 4  ;;  %v305_v63 = vld [vmem:[%s15446_s17 + $0x2a0] sm:$0xff]  ;;  %v4242_v47 = vrot.slane %v4241_v19, 4 }
  0xa8   : > { %6272 = vmatmul.mubr.bf16.gmra.mrb[44].mxu0 %v16049_v42  ;;  %1185 = vmatprep.mubr.bf16.mxu1 %v16051_v34  ;;  %v16068_v42 = vcombine.low %v293_v2, %v295_v26  ;;  %v4194_v34 = vrot.slane %v4193_v41, 4  ;;  %v3549_v2 = vshrl.u32 %v15067_v3, 16  ;;  %v3552_v26 = vshll.u32 %v15067_v3, 16 }
  0xa9   : > { %6281 = vmatprep.mubr.bf16.mxu0 %v16053_v61  ;;  %v16074_v61 = vcombine.high %v4151_v8, %v4171_v45  ;;  %v3576_v41 = vshrl.u32 %v15068_v21, 16  ;;  %v4219_v46 = vsel %vm15489_vm2, %v4214_v22, %v4218_v28  ;;  %v4266_v22 = vrot.slane %v4264_v56, 5  ;;  %v237_v28 = vld [vmem:[%s15446_s17 + $0x80] sm:$0x11]  ;;  %v15069_v8 = vld [vmem:[%s15446_s17 + $0x90] sm:$0xff] }
  0xaa   : > { %19032 = vst [vmem:[#allocation39_spill] sm:$0xff] %v16068_v42  ;;  %v4199_v33 = vsel %vm15489_vm2, %v4194_v34, %v4198_v31  ;;  %v3551_v3 = vrot.slane %v3549_v2, 4  ;;  %v4262_v31 = vrot.slane %v4261_v4, 4  ;;  %v15070_v45 = vld [vmem:[%s15446_s17 + $0xa0] sm:$0xff]  ;;  %v311_v2 = vld [vmem:[%s15446_s17 + $0x2d0] sm:$0xff]  ;;  %v16110_v4 = vcombine.low %v305_v63, %v307_v35 }
  0xab   : > { %19035 = vst [vmem:[#allocation42_spill] sm:$0xff] %v16074_v61  ;;  %v16095_v21 = vcombine.high %v4199_v33, %v4219_v46  ;;  %v3578_v34 = vrot.slane %v3576_v41, 4  ;;  %v3606_v49 = vshll.u32 %v15070_v45, 16  ;;  %v3624_v0 = vshrl.u32 %v15070_v45, 16 }
  0xac   : > { %v4267_v56 = vsel %vm15489_vm2, %v4262_v31, %v4266_v22  ;;  %v3582_v41 = vshll.u32 %v237_v28, 16  ;;  %19040 = vst [vmem:[#allocation47_spill] sm:$0xff] %v16110_v4  ;;  %v243_v22 = vld [vmem:[%s15446_s17 + $0xb0] sm:$0x11] }
  0xad   : > { %19039 = vst [vmem:[#allocation46_spill] sm:$0xff] %v16095_v21 }
  0xae   : > { %v3584_v31 = vrot.slane %v3582_v41, 5 }
  0xaf   : > { %1186 = vmatmul.mubr.bf16.gmra.mrb[48].mxu1 %v16068_v42  ;;  %v3560_v42 = vrot.slane %v3558_v32, 5 }
  0xb0   : > { %6282 = vmatmul.mubr.bf16.gmra.mrb[48].mxu0 %v16070_v58  ;;  %1195 = vmatprep.mubr.bf16.mxu1 %v16072_v17  ;;  %v3554_v17 = vrot.slane %v3552_v26, 5  ;;  %v16089_v58 = vcombine.low %v299_v30, %v301_v25  ;;  %v3597_v30 = vshrl.u32 %v15069_v8, 16  ;;  %v3600_v25 = vshll.u32 %v15069_v8, 16  ;;  %v313_v26 = vld [vmem:[%s15446_s17 + $0x2e0] sm:$0xff] }
  0xb1   : > { %6291 = vmatprep.mubr.bf16.mxu0 %v16074_v61  ;;  %v16093_v61 = vcombine.high %v305_v63, %v307_v35  ;;  %v3579_v32 = vor.u32 %v3578_v34, %v3560_v42  ;;  %v16114_v45 = vcombine.high %v311_v2, %v313_v26  ;;  %v16131_v41 = vcombine.low %v311_v2, %v313_v26 }
  0xb2   : > { %19036 = vst [vmem:[#allocation43_spill] sm:$0xff] %v16089_v58  ;;  %v3555_v15 = vor.u32 %v3554_v17, %v3551_v3  ;;  %v4247_v17 = vsel %vm15489_vm2, %v4242_v47, %v4246_v20  ;;  %v16112_v3 = vcombine.low %v4199_v33, %v4219_v46  ;;  %v3599_v8 = vrot.slane %v3597_v30, 4  ;;  %v15071_v46 = vld [vmem:[%s15446_s17 + $0xc0] sm:$0xff]  ;;  %v224_v30 = vld [vmem:[%s15446_s17 + $0x18] sm:$0xff] }
  0xb3   : > { %19038 = vst [vmem:[#allocation45_spill] sm:$0xff] %v16093_v61  ;;  %19042 = vst [vmem:[#allocation49_spill] sm:$0xff] %v16114_v45  ;;  %v3626_v47 = vrot.slane %v3624_v0, 4  ;;  %v3580_v20 = vrot.slane %v3579_v32, 4  ;;  %v3645_v34 = vshrl.u32 %v15071_v46, 16  ;;  %v3648_v28 = vshll.u32 %v15071_v46, 16 }
  0xb4   : > { %v3556_v19 = vrot.slane %v3555_v15, 4  ;;  %19041 = vst [vmem:[#allocation48_spill] sm:$0xff] %v16112_v3  ;;  %v222_v15 = vld [vmem:[%s15446_s17 + $0x8] sm:$0xff]  ;;  %v15072_v0 = vld [vmem:[%s15446_s17 + $0xd0] sm:$0xff] }
  0xb5   : > { %v3672_v32 = vshrl.u32 %v15072_v0, 16  ;;  %v3650_v46 = vrot.slane %v3648_v28, 5  ;;  %v15074_v28 = vld [vmem:[%s15446_s17 + $0x48] sm:$0xff] }
  0xb6   : > { %v3561_v35 = vsel %vm15489_vm2, %v3556_v19, %v3560_v42  ;;  %v11612_v42 = vcombine.high %v222_v15, %v224_v30 }
  0xb7   : > { %1196 = vmatmul.mubr.bf16.gmra.mrb[52].mxu1 %v16089_v58  ;;  %v3674_v55 = vrot.slane %v3672_v32, 4  ;;  %v14370_v32 = vld [vmem:[%s18743_s1 + $0xf14] ss:$8 sps:$4 sm:$0xff]  }
  0xb8   : > { %6292 = vmatmul.mubr.bf16.gmra.mrb[52].mxu0 %v16091_v59  ;;  %1205 = vmatprep.mubr.bf16.mxu1 %v16093_v61  ;;  %v16116_v61 = vcombine.high %v4247_v17, %v4267_v56  ;;  %v3608_v59 = vrot.slane %v3606_v49, 5  ;;  %v3630_v49 = vshll.u32 %v243_v22, 16 }
  0xb9   : > { %6301 = vmatprep.mubr.bf16.mxu0 %v16095_v21  ;;  %v3602_v21 = vrot.slane %v3600_v25, 5  ;;  %v3585_v25 = vsel %vm15489_vm2, %v3580_v20, %v3584_v31  ;;  %v3696_v20 = vshll.u32 %v15735_v13, 16 }
  0xba   : > { %19043 = vst [vmem:[#allocation50_spill] sm:$0xff] %v16116_v61  ;;  %v3627_v33 = vor.u32 %v3626_v47, %v3608_v59  ;;  %v16135_v19 = vcombine.high %v3561_v35, %v3585_v25  ;;  %v3647_v47 = vrot.slane %v3645_v34, 4  ;;  %v14360_v34 = vld [vmem:[%s18743_s1 + $0xf00] ss:$8 sps:$4 sm:$0xff]  }
  0xbb   : > { %v3603_v63 = vor.u32 %v3602_v21, %v3599_v8  ;;  %v3654_v21 = vshll.u32 %v15072_v0, 16  ;;  %v16133_v8 = vcombine.low %v4247_v17, %v4267_v56  ;;  %v3693_v56 = vshrl.u32 %v15735_v13, 16  ;;  %v15073_v13 = vld [vmem:[%s15446_s17 + $0x38] sm:$0xff] }
  0xbc   : > { %19044 = vst [vmem:[#allocation51_spill] sm:$0xff] %v16135_v19  ;;  %v3651_v26 = vor.u32 %v3650_v46, %v3647_v47  ;;  %v14368_v46 = vld [vmem:[%s18743_s1 + $0xf10] ss:$8 sps:$4 sm:$0xff]  }
  0xbd   : > { %v3656_v58 = vrot.slane %v3654_v21, 5  ;;  %v14367_v21 = vld [vmem:[%s18743_s1 + $0x614] ss:$8 sps:$4 sm:$0xff]  }
  0xbf   : > { %1206 = vmatmul.mubr.bf16.gmra.mrb[56].mxu1 %v16110_v4  ;;  %v249_v4 = vld [vmem:[%s15446_s17 + $0xe0] sm:$0x11]  ;;  %v3675_v22 = vor.u32 %v3674_v55, %v3656_v58 }
  0xc0   : > { %6302 = vmatmul.mubr.bf16.gmra.mrb[56].mxu0 %v16112_v3  ;;  %1215 = vmatprep.mubr.bf16.mxu1 %v16114_v45  ;;  %v3628_v45 = vrot.slane %v3627_v33, 4  ;;  %v3632_v3 = vrot.slane %v3630_v49, 5  ;;  %v3678_v17 = vshll.u32 %v249_v4, 16  ;;  %v3720_v33 = vshrl.u32 %v15738_v14, 16  ;;  %v14357_v4 = vld [vmem:[%s18743_s1 + $0x600] ss:$8 sps:$4 sm:$0xff]  }
  0xc1   : > { %6311 = vmatprep.mubr.bf16.mxu0 %v16116_v61  ;;  %v3604_v61 = vrot.slane %v3603_v63, 4  ;;  %v3702_v63 = vshll.u32 %v15738_v14, 16  ;;  %v16159_v49 = vcombine.high %v15073_v13, %v15074_v28  ;;  %v3695_v14 = vrot.slane %v3693_v56, 4 }
  0xc2   : > { %v3633_v31 = vsel %vm15489_vm2, %v3628_v45, %v3632_v3  ;;  %v3652_v3 = vrot.slane %v3651_v26, 4  ;;  %v255_v45 = vld [vmem:[%s15446_s17 + $0x110] sm:$0x11]  ;;  %v3722_v0 = vrot.slane %v3720_v33, 4  ;;  %v3741_v56 = vshrl.u32 %v15792_v57, 16 }
  0xc3   : > { %v3609_v2 = vsel %vm15489_vm2, %v3604_v61, %v3608_v59  ;;  %v16149_v61 = vcombine.low %v3561_v35, %v3585_v25  ;;  %v11611_v59 = vcombine.low %v222_v15, %v224_v30  ;;  %v3698_v35 = vrot.slane %v3696_v20, 5 }
  0xc4   : > { %v16161_v55 = vcombine.high %v3609_v2, %v3633_v31  ;;  %v3676_v25 = vrot.slane %v3675_v22, 4  ;;  %v3680_v15 = vrot.slane %v3678_v17, 5  ;;  %v3704_v30 = vrot.slane %v3702_v63, 5  ;;  %v14375_v63 = vld [vmem:[%s18743_s1 + $0x624] ss:$8 sps:$4 sm:$0xff]  }
  0xc5   : > { %19045 = vst [vmem:[#allocation52_spill] sm:$0xff] %v16149_v61  ;;  %v3726_v47 = vshll.u32 %v255_v45, 16  ;;  %v3657_v26 = vsel %vm15489_vm2, %v3652_v3, %v3656_v58  ;;  %v3699_v17 = vor.u32 %v3698_v35, %v3695_v14  ;;  %v3744_v20 = vshll.u32 %v15792_v57, 16  ;;  %v14378_v58 = vld [vmem:[%s18743_s1 + $0xf24] ss:$8 sps:$4 sm:$0xff]   ;;  %v15076_v14 = vld [vmem:[%s15446_s17 + $0x78] sm:$0xff] }
  0xc6   : > { %19046 = vst [vmem:[#allocation53_spill] sm:$0xff] %v16161_v55  ;;  %v3681_v22 = vsel %vm15489_vm2, %v3676_v25, %v3680_v15  ;;  %v3723_v33 = vor.u32 %v3722_v0, %v3704_v30  ;;  %v3768_v57 = vshrl.u32 %v15795_v62, 16  ;;  %v16196_v3 = vcombine.low %v3609_v2, %v3633_v31  ;;  %v15075_v45 = vld [vmem:[%s15446_s17 + $0x68] sm:$0xff]  ;;  %v14383_v2 = vld [vmem:[%s18743_s1 + $0x634] ss:$8 sps:$4 sm:$0xff]  }
  0xc7   : > { %1216 = vmatmul.mubr.bf16.gmra.mrb[60].mxu1 %v16131_v41  ;;  %v16200_v35 = vcombine.high %v15075_v45, %v15076_v14  ;;  %v14373_v25 = vld [vmem:[%s18743_s1 + $0x620] ss:$8 sps:$4 sm:$0xff]   ;;  %v14386_v31 = vld [vmem:[%s18743_s1 + $0xf34] ss:$8 sps:$4 sm:$0xff]   ;;  %v3746_v0 = vrot.slane %v3744_v20, 5 }
  0xc8   : > { %6312 = vmatmul.mubr.bf16.gmra.mrb[60].mxu0 %v16133_v8  ;;  %1258 = vmatprep.mubr.bf16.mxu1 %v11612_v42  ;;  %v14365_v42 = vld [vmem:[%s18743_s1 + $0x610] ss:$8 sps:$4 sm:$0xff]   ;;  %19047 = vst [vmem:[#allocation54_spill] sm:$0xff] %v16196_v3  ;;  %v14376_v15 = vld [vmem:[%s18743_s1 + $0xf20] ss:$8 sps:$4 sm:$0xff]  }
  0xc9   : > { %6947 = vmatprep.mubr.bf16.mxu0 %v16135_v19  ;;  %v15082_v19 = vld [vmem:[%s15446_s17 + $0xd8] sm:$0xff] }
  0xcf   : > { %1259 = vmatmul.mubr.bf16.vlgmr.msra.gmra.mrb[0].mxu1 %v11611_v59  ;;  %v3750_v59 = vshll.u32 %v15795_v62, 16  ;;  %v16208_v62 = vcombine.high %v3657_v26, %v3681_v22 }
  0xd0   : > { %6948 = vmatmul.mubr.bf16.vlgmr.msra.gmra.mrb[0].mxu0 %v16149_v61  ;;  %1889 = vmatpush1.bf16.msra.mxu1 %v14357_v4  ;;  %v261_v4 = vld [vmem:[%s15446_s17 + $0x140] sm:$0x11]  ;;  %v15078_v61 = vld [vmem:[%s15446_s17 + $0xa8] sm:$0xff] }
  0xd1   : > { %7109 = vmatpush1.bf16.msra.mxu0 %v14360_v34  ;;  %1268 = vmatprep.mubr.bf16.mxu1 %v16159_v49  ;;  %v16194_v34 = vcombine.low %v15073_v13, %v15074_v28  ;;  %19048 = vst [vmem:[#allocation55_spill] sm:$0xff] %v16208_v62  ;;  %v3700_v13 = vrot.slane %v3699_v17, 4  ;;  %v3743_v28 = vrot.slane %v3741_v56, 4  ;;  %v14384_v17 = vld [vmem:[%s18743_s1 + $0xf30] ss:$8 sps:$4 sm:$0xff]   ;;  %v3774_v56 = vshll.u32 %v261_v4, 16 }
  0xd2   : > { %6957 = vmatprep.mubr.bf16.mxu0 %v16161_v55  ;;  %1890 = vmatprep.subr.bf16.mxu1 %v14367_v21  ;;  %v3724_v21 = vrot.slane %v3723_v33, 4  ;;  %v3752_v55 = vrot.slane %v3750_v59, 5  ;;  %v3789_v33 = vshrl.u32 %v15845_v44, 16  ;;  %v3792_v59 = vshll.u32 %v15845_v44, 16 }
  0xd3   : > { %7110 = vmatprep.subr.bf16.mxu0 %v14370_v32  ;;  %v3728_v32 = vrot.slane %v3726_v47, 5  ;;  %v3705_v47 = vsel %vm15489_vm2, %v3700_v13, %v3704_v30  ;;  %v3747_v20 = vor.u32 %v3746_v0, %v3743_v28  ;;  %v3798_v4 = vshll.u32 %v15854_v54, 16  ;;  %v267_v28 = vld [vmem:[%s15446_s17 + $0x170] sm:$0x11] }
  0xd4   : > { %1891 = vmatpush1.bf16.msra.mxu1 %v14365_v42  ;;  %v3770_v42 = vrot.slane %v3768_v57, 4  ;;  %v3816_v13 = vshrl.u32 %v15854_v54, 16  ;;  %v16241_v0 = vcombine.low %v15075_v45, %v15076_v14  ;;  %v14392_v54 = vld [vmem:[%s18743_s1 + $0xf40] ss:$8 sps:$4 sm:$0xff]   ;;  %v3791_v45 = vrot.slane %v3789_v33, 4 }
  0xd5   : > { %7111 = vmatpush1.bf16.msra.mxu0 %v14368_v46  ;;  %1892 = vmatprep.subr.bf16.mxu1 %v14375_v63  ;;  %v14381_v46 = vld [vmem:[%s18743_s1 + $0x630] ss:$8 sps:$4 sm:$0xff]   ;;  %v14391_v63 = vld [vmem:[%s18743_s1 + $0x644] ss:$8 sps:$4 sm:$0xff]   ;;  %v3729_v30 = vsel %vm15489_vm2, %v3724_v21, %v3728_v32  ;;  %v3794_v14 = vrot.slane %v3792_v59, 5  ;;  %v3800_v32 = vrot.slane %v3798_v4, 5 }
  0xd6   : > { %7112 = vmatprep.subr.bf16.mxu0 %v14378_v58  ;;  %v14394_v58 = vld [vmem:[%s18743_s1 + $0xf44] ss:$8 sps:$4 sm:$0xff]   ;;  %v3771_v57 = vor.u32 %v3770_v42, %v3752_v55  ;;  %19049 = vst [vmem:[#allocation56_spill] sm:$0xff] %v16241_v0  ;;  %v3818_v42 = vrot.slane %v3816_v13, 4 }
  0xd7   : > { %1269 = vmatmul.mubr.bf16.gmra.mrb[4].mxu1 %v16194_v34  ;;  %v14410_v4 = vld [vmem:[%s18743_s1 + $0xf64] ss:$8 sps:$4 sm:$0xff]  }
  0xd8   : > { %6958 = vmatmul.mubr.bf16.gmra.mrb[4].mxu0 %v16196_v3  ;;  %1278 = vmatprep.mubr.bf16.mxu1 %v16200_v35  ;;  %v15077_v3 = vld [vmem:[%s15446_s17 + $0x98] sm:$0xff]  ;;  %v3772_v21 = vrot.slane %v3771_v57, 4  ;;  %v14407_v57 = vld [vmem:[%s18743_s1 + $0x664] ss:$8 sps:$4 sm:$0xff]  }
  0xd9   : > { %6967 = vmatprep.mubr.bf16.mxu0 %v16208_v62  ;;  %1893 = vmatpush1.bf16.msra.mxu1 %v14373_v25  ;;  %v16243_v62 = vcombine.low %v3657_v26, %v3681_v22  ;;  %v16247_v44 = vcombine.high %v15077_v3, %v15078_v61  ;;  %v3776_v25 = vrot.slane %v3774_v56, 5  ;;  %v14399_v26 = vld [vmem:[%s18743_s1 + $0x654] ss:$8 sps:$4 sm:$0xff]   ;;  %v3822_v56 = vshll.u32 %v267_v28, 16 }
  0xda   : > { %7113 = vmatpush1.bf16.msra.mxu0 %v14376_v15  ;;  %1894 = vmatprep.subr.bf16.mxu1 %v14383_v2  ;;  %v14389_v15 = vld [vmem:[%s18743_s1 + $0x640] ss:$8 sps:$4 sm:$0xff]   ;;  %v16255_v2 = vcombine.high %v3705_v47, %v3729_v30  ;;  %v14402_v22 = vld [vmem:[%s18743_s1 + $0xf54] ss:$8 sps:$4 sm:$0xff]  }
  0xdb   : > { %7114 = vmatprep.subr.bf16.mxu0 %v14386_v31  ;;  %19050 = vst [vmem:[#allocation57_spill] sm:$0xff] %v16243_v62  ;;  %19051 = vst [vmem:[#allocation58_spill] sm:$0xff] %v16247_v44  ;;  %v3748_v31 = vrot.slane %v3747_v20, 4  ;;  %v14397_v20 = vld [vmem:[%s18743_s1 + $0x650] ss:$8 sps:$4 sm:$0xff]   ;;  %v3777_v13 = vsel %vm15489_vm2, %v3772_v21, %v3776_v25 }
  0xdc   : > { %19052 = vst [vmem:[#allocation59_spill] sm:$0xff] %v16255_v2  ;;  %v15080_v28 = vld [vmem:[%s15446_s17 + $0x190] sm:$0xff]  ;;  %v14405_v25 = vld [vmem:[%s18743_s1 + $0x660] ss:$8 sps:$4 sm:$0xff]  }
  0xdd   : > { %1895 = vmatpush1.bf16.msra.mxu1 %v14381_v46  ;;  %v14400_v46 = vld [vmem:[%s18743_s1 + $0xf50] ss:$8 sps:$4 sm:$0xff]  }
  0xde   : > { %7115 = vmatpush1.bf16.msra.mxu0 %v14384_v17  ;;  %1896 = vmatprep.subr.bf16.mxu1 %v14391_v63  ;;  %v16275_v17 = vsel %vm15489_vm2, %v3748_v31, %v3752_v55  ;;  %v3795_v63 = vor.u32 %v3794_v14, %v3791_v45  ;;  %v3819_v55 = vor.u32 %v3818_v42, %v3800_v32  ;;  %v3846_v31 = vshll.u32 %v15080_v28, 16  ;;  %v273_v14 = vld [vmem:[%s15446_s17 + $0x1a0] sm:$0x11] }
  0xdf   : > { %7116 = vmatprep.subr.bf16.mxu0 %v14394_v58  ;;  %1279 = vmatmul.mubr.bf16.gmra.mrb[8].mxu1 %v16241_v0  ;;  %v15079_v58 = vld [vmem:[%s15446_s17 + $0x180] sm:$0xff]  ;;  %v3864_v45 = vshrl.u32 %v15080_v28, 16  ;;  %v3824_v0 = vrot.slane %v3822_v56, 5  ;;  %v3870_v56 = vshll.u32 %v273_v14, 16 }
  0xe0   : > { %6968 = vmatmul.mubr.bf16.gmra.mrb[8].mxu0 %v16243_v62  ;;  %1288 = vmatprep.mubr.bf16.mxu1 %v16247_v44  ;;  %v3837_v33 = vshrl.u32 %v15079_v58, 16  ;;  %v3840_v59 = vshll.u32 %v15079_v58, 16  ;;  %v16288_v58 = vcombine.low %v15077_v3, %v15078_v61  ;;  %v15081_v62 = vld [vmem:[%s15446_s17 + $0xc8] sm:$0xff]  ;;  %v3796_v61 = vrot.slane %v3795_v63, 4  ;;  %v14413_v63 = vld [vmem:[%s18743_s1 + $0x670] ss:$8 sps:$4 sm:$0xff]  }
  0xe1   : > { %6977 = vmatprep.mubr.bf16.mxu0 %v16255_v2  ;;  %1897 = vmatpush1.bf16.msra.mxu1 %v14389_v15  ;;  %v16290_v2 = vcombine.low %v3705_v47, %v3729_v30  ;;  %v16294_v44 = vcombine.high %v15081_v62, %v15082_v19  ;;  %v14408_v15 = vld [vmem:[%s18743_s1 + $0xf60] ss:$8 sps:$4 sm:$0xff]   ;;  %v14415_v30 = vld [vmem:[%s18743_s1 + $0x674] ss:$8 sps:$4 sm:$0xff]   ;;  %v3848_v21 = vrot.slane %v3846_v31, 5  ;;  %v3866_v42 = vrot.slane %v3864_v45, 4 }
  0xe2   : > { %7117 = vmatpush1.bf16.msra.mxu0 %v14392_v54  ;;  %1898 = vmatprep.subr.bf16.mxu1 %v14399_v26  ;;  %19053 = vst [vmem:[#allocation60_spill] sm:$0xff] %v16288_v58  ;;  %v16303_v54 = vcombine.high %v16275_v17, %v3777_v13  ;;  %v3839_v3 = vrot.slane %v3837_v33, 4  ;;  %v3842_v47 = vrot.slane %v3840_v59, 5  ;;  %v14418_v26 = vld [vmem:[%s18743_s1 + $0xf74] ss:$8 sps:$4 sm:$0xff]  }
  0xe3   : > { %7118 = vmatprep.subr.bf16.mxu0 %v14402_v22  ;;  %19054 = vst [vmem:[#allocation61_spill] sm:$0xff] %v16290_v2  ;;  %19055 = vst [vmem:[#allocation62_spill] sm:$0xff] %v16294_v44  ;;  %v3820_v22 = vrot.slane %v3819_v55, 4  ;;  %v14416_v33 = vld [vmem:[%s18743_s1 + $0xf70] ss:$8 sps:$4 sm:$0xff]   ;;  %v3867_v45 = vor.u32 %v3866_v42, %v3848_v21 }
  0xe4   : > { %19056 = vst [vmem:[#allocation63_spill] sm:$0xff] %v16303_v54  ;;  %v15083_v59 = vld [vmem:[%s15446_s17 + $0x1b0] sm:$0xff]  ;;  %v14423_v55 = vld [vmem:[%s18743_s1 + $0x684] ss:$8 sps:$4 sm:$0xff]  }
  0xe5   : > { %1899 = vmatpush1.bf16.msra.mxu1 %v14397_v20  ;;  %v16323_v20 = vsel %vm15489_vm2, %v3796_v61, %v3800_v32  ;;  %v14426_v28 = vld [vmem:[%s18743_s1 + $0xf84] ss:$8 sps:$4 sm:$0xff]   ;;  %v3825_v31 = vsel %vm15489_vm2, %v3820_v22, %v3824_v0  ;;  %v14421_v0 = vld [vmem:[%s18743_s1 + $0x680] ss:$8 sps:$4 sm:$0xff]  }
  0xe6   : > { %7119 = vmatpush1.bf16.msra.mxu0 %v14400_v46  ;;  %1900 = vmatprep.subr.bf16.mxu1 %v14407_v57  ;;  %v3843_v46 = vor.u32 %v3842_v47, %v3839_v3  ;;  %v3885_v57 = vshrl.u32 %v15083_v59, 16  ;;  %v15084_v32 = vld [vmem:[%s15446_s17 + $0x1c0] sm:$0xff]  ;;  %v279_v3 = vld [vmem:[%s15446_s17 + $0x1d0] sm:$0x11]  ;;  %v16336_v47 = vcombine.low %v15081_v62, %v15082_v19 }
  0xe7   : > { %7120 = vmatprep.subr.bf16.mxu0 %v14410_v4  ;;  %1289 = vmatmul.mubr.bf16.gmra.mrb[12].mxu1 %v16288_v58  ;;  %v3888_v4 = vshll.u32 %v15083_v59, 16  ;;  %v3894_v14 = vshll.u32 %v15084_v32, 16  ;;  %v3912_v61 = vshrl.u32 %v15084_v32, 16  ;;  %v16339_v59 = vcombine.low %v16275_v17, %v3777_v13  ;;  %v14431_v13 = vld [vmem:[%s18743_s1 + $0x694] ss:$8 sps:$4 sm:$0xff]  }
  0xe8   : > { %6978 = vmatmul.mubr.bf16.gmra.mrb[12].mxu0 %v16290_v2  ;;  %1298 = vmatprep.mubr.bf16.mxu1 %v16294_v44  ;;  %19057 = vst [vmem:[#allocation64_spill] sm:$0xff] %v16336_v47  ;;  %v15086_v2 = vld [vmem:[%s15446_s17 + $0x108] sm:$0xff]  ;;  %v3872_v58 = vrot.slane %v3870_v56, 5  ;;  %v3844_v19 = vrot.slane %v3843_v46, 4  ;;  %v3887_v62 = vrot.slane %v3885_v57, 4  ;;  %v3918_v56 = vshll.u32 %v279_v3, 16 }
  0xe9   : > { %6987 = vmatprep.mubr.bf16.mxu0 %v16303_v54  ;;  %1901 = vmatpush1.bf16.msra.mxu1 %v14405_v25  ;;  %19058 = vst [vmem:[#allocation65_spill] sm:$0xff] %v16339_v59  ;;  %v15085_v54 = vld [vmem:[%s15446_s17 + $0xf8] sm:$0xff]  ;;  %v14424_v25 = vld [vmem:[%s18743_s1 + $0xf80] ss:$8 sps:$4 sm:$0xff]   ;;  %v3890_v17 = vrot.slane %v3888_v4, 5  ;;  %v3896_v22 = vrot.slane %v3894_v14, 5 }
  0xea   : > { %7121 = vmatpush1.bf16.msra.mxu0 %v14408_v15  ;;  %1902 = vmatprep.subr.bf16.mxu1 %v14415_v30  ;;  %v16343_v44 = vcombine.high %v15085_v54, %v15086_v2  ;;  %v16352_v15 = vcombine.high %v16323_v20, %v3825_v31  ;;  %v14434_v30 = vld [vmem:[%s18743_s1 + $0xf94] ss:$8 sps:$4 sm:$0xff]   ;;  %v3914_v42 = vrot.slane %v3912_v61, 4  ;;  %v14429_v46 = vld [vmem:[%s18743_s1 + $0x690] ss:$8 sps:$4 sm:$0xff]   ;;  %v15087_v4 = vld [vmem:[%s15446_s17 + $0x1e0] sm:$0xff] }
  0xeb   : > { %7122 = vmatprep.subr.bf16.mxu0 %v14418_v26  ;;  %v3868_v26 = vrot.slane %v3867_v45, 4  ;;  %v14432_v57 = vld [vmem:[%s18743_s1 + $0xf90] ss:$8 sps:$4 sm:$0xff]   ;;  %v14439_v45 = vld [vmem:[%s18743_s1 + $0x6a4] ss:$8 sps:$4 sm:$0xff]  }
  0xec   : > { %19059 = vst [vmem:[#allocation66_spill] sm:$0xff] %v16343_v44  ;;  %19060 = vst [vmem:[#allocation67_spill] sm:$0xff] %v16352_v15  ;;  %v14442_v32 = vld [vmem:[%s18743_s1 + $0xfa4] ss:$8 sps:$4 sm:$0xff]   ;;  %v3915_v61 = vor.u32 %v3914_v42, %v3896_v22 }
  0xed   : > { %1903 = vmatpush1.bf16.msra.mxu1 %v14413_v63  ;;  %v16372_v63 = vsel %vm15489_vm2, %v3844_v19, %v3848_v21  ;;  %v3873_v14 = vsel %vm15489_vm2, %v3868_v26, %v3872_v58  ;;  %v15088_v21 = vld [vmem:[%s15446_s17 + $0x1f0] sm:$0xff]  ;;  %v14437_v58 = vld [vmem:[%s18743_s1 + $0x6a0] ss:$8 sps:$4 sm:$0xff]  }
  0xee   : > { %7123 = vmatpush1.bf16.msra.mxu0 %v14416_v33  ;;  %1904 = vmatprep.subr.bf16.mxu1 %v14423_v55  ;;  %v3891_v33 = vor.u32 %v3890_v17, %v3887_v62  ;;  %v3933_v55 = vshrl.u32 %v15087_v4, 16  ;;  %v3942_v3 = vshll.u32 %v15088_v21, 16  ;;  %v3960_v19 = vshrl.u32 %v15088_v21, 16  ;;  %v285_v62 = vld [vmem:[%s15446_s17 + $0x200] sm:$0x11] }
  0xef   : > { %7124 = vmatprep.subr.bf16.mxu0 %v14426_v28  ;;  %1299 = vmatmul.mubr.bf16.gmra.mrb[16].mxu1 %v16336_v47  ;;  %v3936_v28 = vshll.u32 %v15087_v4, 16  ;;  %v16385_v17 = vcombine.low %v15085_v54, %v15086_v2  ;;  %v16388_v4 = vcombine.low %v16323_v20, %v3825_v31  ;;  %v3920_v47 = vrot.slane %v3918_v56, 5  ;;  %v14447_v31 = vld [vmem:[%s18743_s1 + $0x6b4] ss:$8 sps:$4 sm:$0xff]   ;;  %v14458_v21 = vld [vmem:[%s18743_s1 + $0xfc4] ss:$8 sps:$4 sm:$0xff]  }
  0xf0   : > { %6988 = vmatmul.mubr.bf16.gmra.mrb[16].mxu0 %v16339_v59  ;;  %1308 = vmatprep.mubr.bf16.mxu1 %v16343_v44  ;;  %v15090_v59 = vld [vmem:[%s15446_s17 + $0x138] sm:$0xff]  ;;  %v3892_v2 = vrot.slane %v3891_v33, 4  ;;  %v3935_v54 = vrot.slane %v3933_v55, 4  ;;  %v3944_v26 = vrot.slane %v3942_v3, 5  ;;  %v3962_v42 = vrot.slane %v3960_v19, 4 }
  0xf1   : > { %6997 = vmatprep.mubr.bf16.mxu0 %v16352_v15  ;;  %1905 = vmatpush1.bf16.msra.mxu1 %v14421_v0  ;;  %19061 = vst [vmem:[#allocation68_spill] sm:$0xff] %v16385_v17  ;;  %19062 = vst [vmem:[#allocation69_spill] sm:$0xff] %v16388_v4  ;;  %v15089_v15 = vld [vmem:[%s15446_s17 + $0x128] sm:$0xff]  ;;  %v3938_v20 = vrot.slane %v3936_v28, 5  ;;  %v3966_v56 = vshll.u32 %v285_v62, 16  ;;  %v15091_v28 = vld [vmem:[%s15446_s17 + $0x210] sm:$0xff] }
  0xf2   : > { %7125 = vmatpush1.bf16.msra.mxu0 %v14424_v25  ;;  %1906 = vmatprep.subr.bf16.mxu1 %v14431_v13  ;;  %v16392_v44 = vcombine.high %v15089_v15, %v15090_v59  ;;  %v14440_v0 = vld [vmem:[%s18743_s1 + $0xfa0] ss:$8 sps:$4 sm:$0xff]   ;;  %v16401_v25 = vcombine.high %v16372_v63, %v3873_v14  ;;  %v14450_v13 = vld [vmem:[%s18743_s1 + $0xfb4] ss:$8 sps:$4 sm:$0xff]   ;;  %v14445_v33 = vld [vmem:[%s18743_s1 + $0x6b0] ss:$8 sps:$4 sm:$0xff]   ;;  %v3963_v19 = vor.u32 %v3962_v42, %v3944_v26 }
  0xf3   : > { %7126 = vmatprep.subr.bf16.mxu0 %v14434_v30  ;;  %v3916_v30 = vrot.slane %v3915_v61, 4  ;;  %v14448_v55 = vld [vmem:[%s18743_s1 + $0xfb0] ss:$8 sps:$4 sm:$0xff]   ;;  %v14455_v61 = vld [vmem:[%s18743_s1 + $0x6c4] ss:$8 sps:$4 sm:$0xff]  }
  0xf4   : > { %19063 = vst [vmem:[#allocation70_spill] sm:$0xff] %v16392_v44  ;;  %19064 = vst [vmem:[#allocation71_spill] sm:$0xff] %v16401_v25 }
  0xf5   : > { %1907 = vmatpush1.bf16.msra.mxu1 %v14429_v46  ;;  %v16421_v46 = vsel %vm15489_vm2, %v3892_v2, %v3896_v22  ;;  %v3921_v3 = vsel %vm15489_vm2, %v3916_v30, %v3920_v47  ;;  %v15092_v22 = vld [vmem:[%s15446_s17 + $0x220] sm:$0xff] }
  0xf6   : > { %7127 = vmatpush1.bf16.msra.mxu0 %v14432_v57  ;;  %1908 = vmatprep.subr.bf16.mxu1 %v14439_v45  ;;  %v3939_v57 = vor.u32 %v3938_v20, %v3935_v54  ;;  %v3981_v45 = vshrl.u32 %v15091_v28, 16  ;;  %v3990_v62 = vshll.u32 %v15092_v22, 16  ;;  %v4008_v2 = vshrl.u32 %v15092_v22, 16  ;;  %v291_v54 = vld [vmem:[%s15446_s17 + $0x230] sm:$0x11] }
  0xf7   : > { %7128 = vmatprep.subr.bf16.mxu0 %v14442_v32  ;;  %1309 = vmatmul.mubr.bf16.gmra.mrb[20].mxu1 %v16385_v17  ;;  %v3984_v32 = vshll.u32 %v15091_v28, 16  ;;  %v16434_v20 = vcombine.low %v15089_v15, %v15090_v59  ;;  %v16437_v28 = vcombine.low %v16372_v63, %v3873_v14  ;;  %v3968_v17 = vrot.slane %v3966_v56, 5  ;;  %v14453_v47 = vld [vmem:[%s18743_s1 + $0x6c0] ss:$8 sps:$4 sm:$0xff]   ;;  %v14463_v14 = vld [vmem:[%s18743_s1 + $0x6d4] ss:$8 sps:$4 sm:$0xff]  }
  0xf8   : > { %6998 = vmatmul.mubr.bf16.gmra.mrb[20].mxu0 %v16388_v4  ;;  %1318 = vmatprep.mubr.bf16.mxu1 %v16392_v44  ;;  %v15094_v4 = vld [vmem:[%s15446_s17 + $0x168] sm:$0xff]  ;;  %v3940_v59 = vrot.slane %v3939_v57, 4  ;;  %v3983_v15 = vrot.slane %v3981_v45, 4  ;;  %v3992_v30 = vrot.slane %v3990_v62, 5  ;;  %v4010_v42 = vrot.slane %v4008_v2, 4 }
  0xf9   : > { %7007 = vmatprep.mubr.bf16.mxu0 %v16401_v25  ;;  %1909 = vmatpush1.bf16.msra.mxu1 %v14437_v58  ;;  %19065 = vst [vmem:[#allocation72_spill] sm:$0xff] %v16434_v20  ;;  %19066 = vst [vmem:[#allocation73_spill] sm:$0xff] %v16437_v28  ;;  %v15093_v25 = vld [vmem:[%s15446_s17 + $0x158] sm:$0xff]  ;;  %v14456_v58 = vld [vmem:[%s18743_s1 + $0xfc0] ss:$8 sps:$4 sm:$0xff]   ;;  %v3986_v63 = vrot.slane %v3984_v32, 5 }
  0xfa   : > { %7129 = vmatpush1.bf16.msra.mxu0 %v14440_v0  ;;  %1910 = vmatprep.subr.bf16.mxu1 %v14447_v31  ;;  %v16441_v44 = vcombine.high %v15093_v25, %v15094_v4  ;;  %v16450_v0 = vcombine.high %v16421_v46, %v3921_v3  ;;  %v14466_v31 = vld [vmem:[%s18743_s1 + $0xfd4] ss:$8 sps:$4 sm:$0xff]   ;;  %v4014_v56 = vshll.u32 %v291_v54, 16  ;;  %v14461_v57 = vld [vmem:[%s18743_s1 + $0x6d0] ss:$8 sps:$4 sm:$0xff]   ;;  %v15095_v32 = vld [vmem:[%s15446_s17 + $0x240] sm:$0xff]  ;;  %v4011_v2 = vor.u32 %v4010_v42, %v3992_v30 }
  0xfb   : > { %7130 = vmatprep.subr.bf16.mxu0 %v14450_v13  ;;  %v3964_v13 = vrot.slane %v3963_v19, 4  ;;  %v14464_v45 = vld [vmem:[%s18743_s1 + $0xfd0] ss:$8 sps:$4 sm:$0xff]   ;;  %v14471_v19 = vld [vmem:[%s18743_s1 + $0x6e4] ss:$8 sps:$4 sm:$0xff]  }
  0xfc   : > { %19067 = vst [vmem:[#allocation74_spill] sm:$0xff] %v16441_v44  ;;  %19068 = vst [vmem:[#allocation75_spill] sm:$0xff] %v16450_v0  ;;  %v14474_v22 = vld [vmem:[%s18743_s1 + $0xfe4] ss:$8 sps:$4 sm:$0xff]  }
  0xfd   : > { %1911 = vmatpush1.bf16.msra.mxu1 %v14445_v33  ;;  %v16470_v33 = vsel %vm15489_vm2, %v3940_v59, %v3944_v26  ;;  %v3969_v62 = vsel %vm15489_vm2, %v3964_v13, %v3968_v17  ;;  %v15096_v26 = vld [vmem:[%s15446_s17 + $0x250] sm:$0xff]  ;;  %v14469_v17 = vld [vmem:[%s18743_s1 + $0x6e0] ss:$8 sps:$4 sm:$0xff]  }
  0xfe   : > { %7131 = vmatpush1.bf16.msra.mxu0 %v14448_v55  ;;  %1912 = vmatprep.subr.bf16.mxu1 %v14455_v61  ;;  %v3987_v55 = vor.u32 %v3986_v63, %v3983_v15  ;;  %v4029_v61 = vshrl.u32 %v15095_v32, 16  ;;  %v4038_v54 = vshll.u32 %v15096_v26, 16  ;;  %v4056_v59 = vshrl.u32 %v15096_v26, 16  ;;  %v297_v15 = vld [vmem:[%s15446_s17 + $0x260] sm:$0x11] }
  0xff   : > { %7132 = vmatprep.subr.bf16.mxu0 %v14458_v21  ;;  %1319 = vmatmul.mubr.bf16.gmra.mrb[24].mxu1 %v16434_v20  ;;  %v4032_v21 = vshll.u32 %v15095_v32, 16  ;;  %v16483_v63 = vcombine.low %v15093_v25, %v15094_v4  ;;  %v16486_v32 = vcombine.low %v16421_v46, %v3921_v3  ;;  %v4016_v20 = vrot.slane %v4014_v56, 5  ;;  %v14479_v3 = vld [vmem:[%s18743_s1 + $0x6f4] ss:$8 sps:$4 sm:$0xff]   ;;  %v14488_v26 = vld [vmem:[%s18743_s1 + $0x404] ss:$8 sps:$4 sm:$0xff]  }
 0x100   : > { %7008 = vmatmul.mubr.bf16.gmra.mrb[24].mxu0 %v16437_v28  ;;  %1328 = vmatprep.mubr.bf16.mxu1 %v16441_v44  ;;  %v15098_v28 = vld [vmem:[%s15446_s17 + $0x198] sm:$0xff]  ;;  %v3988_v4 = vrot.slane %v3987_v55, 4  ;;  %v4031_v25 = vrot.slane %v4029_v61, 4  ;;  %v4040_v13 = vrot.slane %v4038_v54, 5  ;;  %v4058_v42 = vrot.slane %v4056_v59, 4 }
 0x101   : > { %7017 = vmatprep.mubr.bf16.mxu0 %v16450_v0  ;;  %1913 = vmatpush1.bf16.msra.mxu1 %v14453_v47  ;;  %19069 = vst [vmem:[#allocation76_spill] sm:$0xff] %v16483_v63  ;;  %19070 = vst [vmem:[#allocation77_spill] sm:$0xff] %v16486_v32  ;;  %v15097_v0 = vld [vmem:[%s15446_s17 + $0x188] sm:$0xff]  ;;  %v4034_v46 = vrot.slane %v4032_v21, 5  ;;  %v4062_v56 = vshll.u32 %v297_v15, 16  ;;  %v15099_v21 = vld [vmem:[%s15446_s17 + $0x270] sm:$0xff] }
 0x102   : > { %7133 = vmatpush1.bf16.msra.mxu0 %v14456_v58  ;;  %1914 = vmatprep.subr.bf16.mxu1 %v14463_v14  ;;  %v16490_v44 = vcombine.high %v15097_v0, %v15098_v28  ;;  %v14472_v47 = vld [vmem:[%s18743_s1 + $0xfe0] ss:$8 sps:$4 sm:$0xff]   ;;  %v16499_v58 = vcombine.high %v16470_v33, %v3969_v62  ;;  %v14482_v14 = vld [vmem:[%s18743_s1 + $0xff4] ss:$8 sps:$4 sm:$0xff]   ;;  %v14477_v55 = vld [vmem:[%s18743_s1 + $0x6f0] ss:$8 sps:$4 sm:$0xff]   ;;  %v4059_v59 = vor.u32 %v4058_v42, %v4040_v13 }
 0x103   : > { %7134 = vmatprep.subr.bf16.mxu0 %v14466_v31  ;;  %v4012_v31 = vrot.slane %v4011_v2, 4  ;;  %v14480_v61 = vld [vmem:[%s18743_s1 + $0xff0] ss:$8 sps:$4 sm:$0xff]   ;;  %v14485_v2 = vld [vmem:[%s18743_s1 + $0x704] ss:$8 sps:$4 sm:$0xff]  }
 0x104   : > { %19071 = vst [vmem:[#allocation78_spill] sm:$0xff] %v16490_v44  ;;  %19072 = vst [vmem:[#allocation79_spill] sm:$0xff] %v16499_v58  ;;  %v15100_v15 = vld [vmem:[%s15446_s17 + $0x280] sm:$0xff] }
 0x105   : > { %1915 = vmatpush1.bf16.msra.mxu1 %v14461_v57  ;;  %v3993_v57 = vsel %vm15489_vm2, %v3988_v4, %v3992_v30  ;;  %v4017_v54 = vsel %vm15489_vm2, %v4012_v31, %v4016_v20  ;;  %v4086_v30 = vshll.u32 %v15100_v15, 16  ;;  %v4104_v4 = vshrl.u32 %v15100_v15, 16 }
 0x106   : > { %7135 = vmatpush1.bf16.msra.mxu0 %v14464_v45  ;;  %1916 = vmatprep.subr.bf16.mxu1 %v14471_v19  ;;  %v4035_v45 = vor.u32 %v4034_v46, %v4031_v25  ;;  %v4077_v19 = vshrl.u32 %v15099_v21, 16  ;;  %v303_v25 = vld [vmem:[%s15446_s17 + $0x290] sm:$0x11]  ;;  %v16530_v46 = vcombine.low %v15097_v0, %v15098_v28  ;;  %v16539_v20 = vcombine.high %v3993_v57, %v4017_v54 }
 0x107   : > { %7136 = vmatprep.subr.bf16.mxu0 %v14474_v22  ;;  %1329 = vmatmul.mubr.bf16.gmra.mrb[28].mxu1 %v16483_v63  ;;  %v4080_v22 = vshll.u32 %v15099_v21, 16  ;;  %v16533_v21 = vcombine.low %v16470_v33, %v3969_v62  ;;  %v4064_v63 = vrot.slane %v4062_v56, 5  ;;  %v4088_v15 = vrot.slane %v4086_v30, 5  ;;  %v15103_v62 = vld [vmem:[%s15446_s17 + $0x2a0] sm:$0xff]  ;;  %v15106_v30 = vld [vmem:[%s15446_s17 + $0x1f8] sm:$0xff] }
 0x108   : > { %7018 = vmatmul.mubr.bf16.gmra.mrb[28].mxu0 %v16486_v32  ;;  %1338 = vmatprep.mubr.bf16.mxu1 %v16490_v44  ;;  %v15102_v32 = vld [vmem:[%s15446_s17 + $0x1c8] sm:$0xff]  ;;  %19075 = vst [vmem:[#allocation82_spill] sm:$0xff] %v16539_v20  ;;  %v4036_v31 = vrot.slane %v4035_v45, 4  ;;  %v4079_v42 = vrot.slane %v4077_v19, 4  ;;  %v4110_v28 = vshll.u32 %v303_v25, 16  ;;  %v4128_v56 = vshll.u32 %v15103_v62, 16 }
 0x109   : > { %7027 = vmatprep.mubr.bf16.mxu0 %v16499_v58  ;;  %1917 = vmatpush1.bf16.msra.mxu1 %v14469_v17  ;;  %19073 = vst [vmem:[#allocation80_spill] sm:$0xff] %v16533_v21  ;;  %v15101_v58 = vld [vmem:[%s15446_s17 + $0x1b8] sm:$0xff]  ;;  %v4082_v17 = vrot.slane %v4080_v22, 5  ;;  %v15104_v45 = vld [vmem:[%s15446_s17 + $0x2b0] sm:$0xff]  ;;  %v309_v25 = vld [vmem:[%s15446_s17 + $0x2c0] sm:$0x11] }
 0x10a   : > { %7137 = vmatpush1.bf16.msra.mxu0 %v14472_v47  ;;  %1918 = vmatprep.subr.bf16.mxu1 %v14479_v3  ;;  %v16537_v44 = vcombine.high %v15101_v58, %v15102_v32  ;;  %v4060_v47 = vrot.slane %v4059_v59, 4  ;;  %v4106_v3 = vrot.slane %v4104_v4, 4  ;;  %v4041_v0 = vsel %vm15489_vm2, %v4036_v31, %v4040_v13  ;;  %v15105_v59 = vld [vmem:[%s15446_s17 + $0x1e8] sm:$0xff] }
 0x10b   : > { %7138 = vmatprep.subr.bf16.mxu0 %v14482_v14  ;;  %v4083_v33 = vor.u32 %v4082_v17, %v4079_v42  ;;  %v4125_v14 = vshrl.u32 %v15103_v62, 16  ;;  %v4134_v19 = vshll.u32 %v15104_v45, 16  ;;  %v4152_v22 = vshrl.u32 %v15104_v45, 16 }
 0x10c   : > { %19074 = vst [vmem:[#allocation81_spill] sm:$0xff] %v16537_v44  ;;  %v16557_v13 = vcombine.high %v15105_v59, %v15106_v30  ;;  %v4112_v4 = vrot.slane %v4110_v28, 5 }
 0x10d   : > { %1919 = vmatpush1.bf16.msra.mxu1 %v14477_v55  ;;  %v4065_v55 = vsel %vm15489_vm2, %v4060_v47, %v4064_v63  ;;  %v4084_v42 = vrot.slane %v4083_v33, 4  ;;  %v4127_v17 = vrot.slane %v4125_v14, 4  ;;  %v4130_v63 = vrot.slane %v4128_v56, 5 }
 0x10e   : > { %7139 = vmatpush1.bf16.msra.mxu0 %v14480_v61  ;;  %2081 = vmatprep.subr.bf16.mxu1 %v14485_v2  ;;  %v4107_v61 = vor.u32 %v4106_v3, %v4088_v15  ;;  %v16551_v2 = vcombine.low %v15101_v58, %v15102_v32  ;;  %19078 = vst [vmem:[#allocation85_spill] sm:$0xff] %v16557_v13  ;;  %v4136_v3 = vrot.slane %v4134_v19, 5  ;;  %v4154_v62 = vrot.slane %v4152_v22, 4  ;;  %v15107_v32 = vld [vmem:[%s15446_s17 + $0x2d0] sm:$0xff]  ;;  %v16573_v22 = vld [vmem:[%s15446_s17 + $0x300] sm:$0xff] }
 0x10f   : > { %8425 = vmatprep.subr.bf16.mxu0 %v14488_v26  ;;  %1339 = vmatmul.mubr.bf16.gmra.mrb[32].mxu1 %v16530_v46  ;;  %v16553_v26 = vcombine.low %v3993_v57, %v4017_v54  ;;  %v16560_v31 = vcombine.high %v4041_v0, %v4065_v55  ;;  %v4173_v58 = vshrl.u32 %v15107_v32, 16  ;;  %v4176_v57 = vshll.u32 %v15107_v32, 16 }
 0x110   : > { %7028 = vmatmul.mubr.bf16.gmra.mrb[32].mxu0 %v16533_v21  ;;  %1348 = vmatprep.mubr.bf16.mxu1 %v16537_v44  ;;  %19076 = vst [vmem:[#allocation83_spill] sm:$0xff] %v16551_v2  ;;  %v4108_v47 = vrot.slane %v4107_v61, 4  ;;  %v4089_v54 = vsel %vm15489_vm2, %v4084_v42, %v4088_v15  ;;  %v4131_v28 = vor.u32 %v4130_v63, %v4127_v17  ;;  %v4158_v33 = vshll.u32 %v309_v25, 16  ;;  %v15108_v61 = vld [vmem:[%s15446_s17 + $0x2e0] sm:$0xff]  ;;  %v16580_v21 = vld [vmem:[%s15446_s17 + $0x310] sm:$0xff]  ;;  %v15109_v15 = vld [vmem:[%s15446_s17 + $0x218] sm:$0xff] }
 0x111   : > { %7037 = vmatprep.mubr.bf16.mxu0 %v16539_v20  ;;  %19077 = vst [vmem:[#allocation84_spill] sm:$0xff] %v16553_v26  ;;  %19079 = vst [vmem:[#allocation86_spill] sm:$0xff] %v16560_v31  ;;  %v4155_v56 = vor.u32 %v4154_v62, %v4136_v3  ;;  %v4182_v45 = vshll.u32 %v15108_v61, 16  ;;  %v4200_v19 = vshrl.u32 %v15108_v61, 16  ;;  %v16575_v32 = vcombine.low %v15105_v59, %v15106_v30  ;;  %v15110_v25 = vld [vmem:[%s15446_s17 + $0x228] sm:$0xff] }
 0x112   : > { %v4113_v14 = vsel %vm15489_vm2, %v4108_v47, %v4112_v4  ;;  %v4178_v20 = vrot.slane %v4176_v57, 5  ;;  %v16584_v42 = vcombine.high %v15109_v15, %v15110_v25  ;;  %v4132_v17 = vrot.slane %v4131_v28, 4  ;;  %v315_v47 = vld [vmem:[%s15446_s17 + $0x2f0] sm:$0x11] }
 0x113   : > { %19080 = vst [vmem:[#allocation87_spill] sm:$0xff] %v16575_v32  ;;  %v16586_v4 = vcombine.high %v4089_v54, %v4113_v14  ;;  %v4160_v63 = vrot.slane %v4158_v33, 5  ;;  %v4156_v62 = vrot.slane %v4155_v56, 4  ;;  %v4184_v61 = vrot.slane %v4182_v45, 5  ;;  %v321_v45 = vld [vmem:[%s15446_s17 + $0x320] sm:$0x11] }
 0x114   : > { %19082 = vst [vmem:[#allocation89_spill] sm:$0xff] %v16584_v42  ;;  %v4202_v59 = vrot.slane %v4200_v19, 4  ;;  %v4224_v30 = vshll.u32 %v16573_v22, 16  ;;  %v4248_v57 = vshrl.u32 %v16580_v21, 16  ;;  %v4137_v28 = vsel %vm15489_vm2, %v4132_v17, %v4136_v3 }
 0x115   : > { %19083 = vst [vmem:[#allocation90_spill] sm:$0xff] %v16586_v4  ;;  %v4161_v33 = vsel %vm15489_vm2, %v4156_v62, %v4160_v63  ;;  %v16601_v56 = vcombine.low %v15109_v15, %v15110_v25  ;;  %v16604_v19 = vcombine.low %v4089_v54, %v4113_v14  ;;  %v325_v62 = vld [vmem:[%s15446_s17 + $0x340] sm:$0xff]  ;;  %v4254_v54 = vshll.u32 %v321_v45, 16  ;;  %v15113_v45 = vld [vmem:[%s15446_s17 + $0x278] sm:$0xff] }
 0x116   : > { %v16611_v44 = vcombine.high %v4137_v28, %v4161_v33  ;;  %v4226_v3 = vrot.slane %v4224_v30, 5  ;;  %v4250_v63 = vrot.slane %v4248_v57, 4  ;;  %v4296_v57 = vshrl.u32 %v325_v62, 16 }
 0x117   : > { %1349 = vmatmul.mubr.bf16.gmra.mrb[36].mxu1 %v16551_v2  ;;  %19084 = vst [vmem:[#allocation91_spill] sm:$0xff] %v16601_v56  ;;  %19085 = vst [vmem:[#allocation92_spill] sm:$0xff] %v16604_v19  ;;  %v323_v2 = vld [vmem:[%s15446_s17 + $0x330] sm:$0xff] }
 0x118   : > { %7038 = vmatmul.mubr.bf16.gmra.mrb[36].mxu0 %v16553_v26  ;;  %1358 = vmatprep.mubr.bf16.mxu1 %v16557_v13  ;;  %v16577_v26 = vcombine.low %v4041_v0, %v4065_v55  ;;  %v4221_v55 = vshrl.u32 %v16573_v22, 16  ;;  %19087 = vst [vmem:[#allocation94_spill] sm:$0xff] %v16611_v44  ;;  %v4272_v30 = vshll.u32 %v323_v2, 16 }
 0x119   : > { %7047 = vmatprep.mubr.bf16.mxu0 %v16560_v31  ;;  %v4175_v31 = vrot.slane %v4173_v58, 4  ;;  %v4230_v58 = vshll.u32 %v16580_v21, 16 }
 0x11a   : > { %19081 = vst [vmem:[#allocation88_spill] sm:$0xff] %v16577_v26  ;;  %v4223_v13 = vrot.slane %v4221_v55, 4 }
 0x11b   : > { %v4179_v0 = vor.u32 %v4178_v20, %v4175_v31  ;;  %v4203_v20 = vor.u32 %v4202_v59, %v4184_v61  ;;  %v4206_v31 = vshll.u32 %v315_v47, 16  ;;  %v4232_v17 = vrot.slane %v4230_v58, 5 }
 0x11c   : > { %v4227_v15 = vor.u32 %v4226_v3, %v4223_v13  ;;  %v4278_v58 = vshll.u32 %v325_v62, 16  ;;  %v4298_v62 = vrot.slane %v4296_v57, 4  ;;  %v15117_v57 = vld [vmem:[%s15446_s17 + $0x2d8] sm:$0xff] }
 0x11d   : > { %v4204_v59 = vrot.slane %v4203_v20, 4  ;;  %v4208_v47 = vrot.slane %v4206_v31, 5  ;;  %v4251_v25 = vor.u32 %v4250_v63, %v4232_v17  ;;  %v16624_v31 = vcombine.low %v4137_v28, %v4161_v33 }
 0x11e   : > { %v4228_v13 = vrot.slane %v4227_v15, 4  ;;  %v4280_v63 = vrot.slane %v4278_v58, 5  ;;  %v15115_v15 = vld [vmem:[%s15446_s17 + $0x2a8] sm:$0xff] }
 0x11f   : > { %1359 = vmatmul.mubr.bf16.gmra.mrb[40].mxu1 %v16575_v32  ;;  %v4180_v32 = vrot.slane %v4179_v0, 4  ;;  %v4269_v0 = vshrl.u32 %v323_v2, 16  ;;  %v4209_v55 = vsel %vm15489_vm2, %v4204_v59, %v4208_v47  ;;  %19088 = vst [vmem:[#allocation95_spill] sm:$0xff] %v16624_v31  ;;  %v4274_v2 = vrot.slane %v4272_v30, 5 }
 0x120   : > { %7048 = vmatmul.mubr.bf16.gmra.mrb[40].mxu0 %v16577_v26  ;;  %1368 = vmatprep.mubr.bf16.mxu1 %v16584_v42  ;;  %v15112_v26 = vld [vmem:[%s15446_s17 + $0x258] sm:$0xff]  ;;  %v4299_v59 = vor.u32 %v4298_v62, %v4280_v63  ;;  %v14486_v62 = vld [vmem:[%s18743_s1 + $0x400] ss:$8 sps:$4 sm:$0xff]  }
 0x121   : > { %7057 = vmatprep.mubr.bf16.mxu0 %v16586_v4  ;;  %v15111_v4 = vld [vmem:[%s15446_s17 + $0x248] sm:$0xff]  ;;  %v4185_v14 = vsel %vm15489_vm2, %v4180_v32, %v4184_v61  ;;  %v4252_v61 = vrot.slane %v4251_v25, 4  ;;  %v4271_v3 = vrot.slane %v4269_v0, 4  ;;  %v15116_v25 = vld [vmem:[%s15446_s17 + $0x2b8] sm:$0xff] }
 0x122   : > { %v16608_v42 = vcombine.high %v15111_v4, %v15112_v26  ;;  %v16622_v20 = vcombine.low %v15111_v4, %v15112_v26  ;;  %v16631_v32 = vcombine.high %v4185_v14, %v4209_v55  ;;  %v4233_v4 = vsel %vm15489_vm2, %v4228_v13, %v4232_v17 }
 0x123   : > { %v4275_v33 = vor.u32 %v4274_v2, %v4271_v3  ;;  %v16647_v0 = vcombine.high %v15115_v15, %v15116_v25  ;;  %v4300_v58 = vrot.slane %v4299_v59, 4  ;;  %v14495_v59 = vld [vmem:[%s18743_s1 + $0x720] ss:$8 sps:$4 sm:$0xff]  }
 0x124   : > { %19086 = vst [vmem:[#allocation93_spill] sm:$0xff] %v16608_v42  ;;  %19090 = vst [vmem:[#allocation97_spill] sm:$0xff] %v16631_v32 }
 0x125   : > { %19092 = vst [vmem:[#allocation99_spill] sm:$0xff] %v16647_v0 }
 0x127   : > { %1369 = vmatmul.mubr.bf16.gmra.mrb[44].mxu1 %v16601_v56  ;;  %v327_v56 = vld [vmem:[%s15446_s17 + $0x350] sm:$0x11] }
 0x128   : > { %7058 = vmatmul.mubr.bf16.gmra.mrb[44].mxu0 %v16604_v19  ;;  %1378 = vmatprep.mubr.bf16.mxu1 %v16608_v42  ;;  %v15114_v19 = vld [vmem:[%s15446_s17 + $0x288] sm:$0xff]  ;;  %v4302_v26 = vshll.u32 %v327_v56, 16  ;;  %v4276_v56 = vrot.slane %v4275_v33, 4 }
 0x129   : > { %7067 = vmatprep.mubr.bf16.mxu0 %v16611_v44  ;;  %v16628_v42 = vcombine.high %v15113_v45, %v15114_v19  ;;  %v4256_v44 = vrot.slane %v4254_v54, 5  ;;  %v16641_v47 = vcombine.low %v15113_v45, %v15114_v19  ;;  %v16643_v54 = vcombine.low %v4185_v14, %v4209_v55  ;;  %v15118_v45 = vld [vmem:[%s15446_s17 + $0x2e8] sm:$0xff] }
 0x12a   : > { %v4304_v17 = vrot.slane %v4302_v26, 5  ;;  %v16659_v14 = vcombine.low %v15115_v15, %v15116_v25  ;;  %v16665_v13 = vcombine.high %v15117_v57, %v15118_v45  ;;  %v16670_v3 = vcombine.low %v15117_v57, %v15118_v45  ;;  %v14491_v26 = vld [vmem:[%s18743_s1 + $0x714] ss:$8 sps:$4 sm:$0xff]   ;;  %v14497_v33 = vld [vmem:[%s18743_s1 + $0x724] ss:$8 sps:$4 sm:$0xff]  }
 0x12b   : > { %19089 = vst [vmem:[#allocation96_spill] sm:$0xff] %v16628_v42  ;;  %v4257_v28 = vsel %vm15489_vm2, %v4252_v61, %v4256_v44  ;;  %19091 = vst [vmem:[#allocation98_spill] sm:$0xff] %v16643_v54  ;;  %v4281_v44 = vsel %vm15489_vm2, %v4276_v56, %v4280_v63  ;;  %v14483_v63 = vld [vmem:[%s18743_s1 + $0x700] ss:$8 sps:$4 sm:$0xff]   ;;  %v14503_v25 = vld [vmem:[%s18743_s1 + $0x734] ss:$8 sps:$4 sm:$0xff]  }
 0x12c   : > { %v16649_v30 = vcombine.high %v4233_v4, %v4257_v28  ;;  %v4305_v19 = vsel %vm15489_vm2, %v4300_v58, %v4304_v17  ;;  %19094 = vst [vmem:[#allocation101_spill] sm:$0xff] %v16659_v14  ;;  %v16661_v55 = vcombine.low %v4233_v4, %v4257_v28  ;;  %19096 = vst [vmem:[#allocation103_spill] sm:$0xff] %v16665_v13  ;;  %v14494_v4 = vld [vmem:[%s18743_s1 + $0x414] ss:$8 sps:$4 sm:$0xff]   ;;  %v14492_v28 = vld [vmem:[%s18743_s1 + $0x410] ss:$8 sps:$4 sm:$0xff]  }
 0x12d   : > { %v12390_v61 = vcombine.high %v4281_v44, %v4305_v19  ;;  %19097 = vst [vmem:[#allocation104_spill] sm:$0xff] %v16670_v3  ;;  %v12389_v2 = vcombine.low %v4281_v44, %v4305_v19  ;;  %v14498_v15 = vld [vmem:[%s18743_s1 + $0x420] ss:$8 sps:$4 sm:$0xff]   ;;  %v14506_v56 = vld [vmem:[%s18743_s1 + $0x434] ss:$8 sps:$4 sm:$0xff]  }
 0x12e   : > { %19093 = vst [vmem:[#allocation100_spill] sm:$0xff] %v16649_v30  ;;  %19095 = vst [vmem:[#allocation102_spill] sm:$0xff] %v16661_v55  ;;  %v14501_v58 = vld [vmem:[%s18743_s1 + $0x730] ss:$8 sps:$4 sm:$0xff]   ;;  %v14509_v44 = vld [vmem:[%s18743_s1 + $0x744] ss:$8 sps:$4 sm:$0xff]  }
 0x12f   : > { %1379 = vmatmul.mubr.bf16.gmra.mrb[48].mxu1 %v16622_v20  ;;  %v14504_v17 = vld [vmem:[%s18743_s1 + $0x430] ss:$8 sps:$4 sm:$0xff]   ;;  %v14512_v19 = vld [vmem:[%s18743_s1 + $0x444] ss:$8 sps:$4 sm:$0xff]   ;;  %v14507_v57 = vld [vmem:[%s18743_s1 + $0x740] ss:$8 sps:$4 sm:$0xff]  }
 0x130   : > { %7068 = vmatmul.mubr.bf16.gmra.mrb[48].mxu0 %v16624_v31  ;;  %1388 = vmatprep.mubr.bf16.mxu1 %v16628_v42  ;;  %v14510_v45 = vld [vmem:[%s18743_s1 + $0x440] ss:$8 sps:$4 sm:$0xff]  }
 0x131   : > { %7077 = vmatprep.mubr.bf16.mxu0 %v16631_v32  ;;  %v14608_v31 = vld [vmem:[%s18743_s1 + $0x540] ss:$8 sps:$4 sm:$0xff]  }
 0x137   : > { %1389 = vmatmul.mubr.bf16.gmra.mrb[52].mxu1 %v16641_v47 }
 0x138   : > { %7078 = vmatmul.mubr.bf16.gmra.mrb[52].mxu0 %v16643_v54  ;;  %1398 = vmatprep.mubr.bf16.mxu1 %v16647_v0 }
 0x139   : > { %7087 = vmatprep.mubr.bf16.mxu0 %v16649_v30  ;;  %v324_v30 = vld [vmem:[%s15446_s17 + $0x338] sm:$0xff] }
 0x13f   : > { %1399 = vmatmul.mubr.bf16.gmra.mrb[56].mxu1 %v16659_v14 }
 0x140   : > { %7088 = vmatmul.mubr.bf16.gmra.mrb[56].mxu0 %v16661_v55  ;;  %1408 = vmatprep.mubr.bf16.mxu1 %v16665_v13  ;;  %v19118_v55 = vld [vmem:[#allocation38_spill] sm:$0xff] }
 0x141   : > { %7097 = vmatprep.mubr.bf16.mxu0 %v12390_v61  ;;  %v14515_v61 = vld [vmem:[%s18743_s1 + $0x754] ss:$8 sps:$4 sm:$0xff]  }
 0x147   : > { %1409 = vmatmul.mubr.bf16.gmra.mrb[60].mxu1 %v16670_v3 }
 0x148   : > { %7098 = vmatmul.mubr.bf16.gmra.mrb[60].mxu0 %v12389_v2  ;;  %1920 = vmatprep.mubr.bf16.mxu1 %v15562_v10  ;;  %v14489_v10 = vld [vmem:[%s18743_s1 + $0x710] ss:$8 sps:$4 sm:$0xff]   ;;  %v14518_v2 = vld [vmem:[%s18743_s1 + $0x454] ss:$8 sps:$4 sm:$0xff]  }
 0x149   : > { %7140 = vmatprep.mubr.bf16.mxu0 %v15571_v16 }
 0x14f   : > { %1921 = vmatmul.mubr.bf16.vlgmr.msra.gmra.mrb[0].mxu1 %v15599_v38  ;;  %v14500_v38 = vld [vmem:[%s18743_s1 + $0x424] ss:$8 sps:$4 sm:$0xff]  }
 0x150   : > { %7141 = vmatmul.mubr.bf16.vlgmr.msra.gmra.mrb[0].mxu0 %v15601_v39  ;;  %2082 = vmatpush1.bf16.msra.mxu1 %v14483_v63  ;;  %v14513_v63 = vld [vmem:[%s18743_s1 + $0x750] ss:$8 sps:$4 sm:$0xff]  }
 0x151   : > { %8426 = vmatpush1.bf16.msra.mxu0 %v14486_v62  ;;  %1930 = vmatprep.mubr.bf16.mxu1 %v15604_v40  ;;  %v14516_v62 = vld [vmem:[%s18743_s1 + $0x450] ss:$8 sps:$4 sm:$0xff]  }
 0x152   : > { %7150 = vmatprep.mubr.bf16.mxu0 %v15612_v43  ;;  %2083 = vmatprep.subr.bf16.mxu1 %v14491_v26  ;;  %v14521_v26 = vld [vmem:[%s18743_s1 + $0x764] ss:$8 sps:$4 sm:$0xff]   ;;  %v231_v43 = vld [vmem:[%s15446_s17 + $0x50] sm:$0x11] }
 0x153   : > { %8427 = vmatprep.subr.bf16.mxu0 %v14494_v4  ;;  %v14524_v4 = vld [vmem:[%s18743_s1 + $0x464] ss:$8 sps:$4 sm:$0xff]   ;;  %v7555_v54 = vrot.slane %v231_v43, 5  ;;  %v14581_v43 = vld [vmem:[%s18743_s1 + $0xc00] ss:$8 sps:$4 sm:$0xff]  }
 0x154   : > { %2084 = vmatpush1.bf16.msra.mxu1 %v14489_v10  ;;  %v14519_v10 = vld [vmem:[%s18743_s1 + $0x760] ss:$8 sps:$4 sm:$0xff]  }
 0x155   : > { %8428 = vmatpush1.bf16.msra.mxu0 %v14492_v28  ;;  %2085 = vmatprep.subr.bf16.mxu1 %v14497_v33  ;;  %v14522_v28 = vld [vmem:[%s18743_s1 + $0x460] ss:$8 sps:$4 sm:$0xff]   ;;  %v14527_v33 = vld [vmem:[%s18743_s1 + $0x774] ss:$8 sps:$4 sm:$0xff]  }
 0x156   : > { %8429 = vmatprep.subr.bf16.mxu0 %v14500_v38  ;;  %v14530_v38 = vld [vmem:[%s18743_s1 + $0x474] ss:$8 sps:$4 sm:$0xff]  }
 0x157   : > { %1931 = vmatmul.mubr.bf16.gmra.mrb[4].mxu1 %v15650_v48 }
 0x158   : > { %7151 = vmatmul.mubr.bf16.gmra.mrb[4].mxu0 %v15652_v50  ;;  %1940 = vmatprep.mubr.bf16.mxu1 %v15656_v12  ;;  %v19130_v50 = vld [vmem:[#allocation50_spill] sm:$0xff] }
 0x159   : > { %7160 = vmatprep.mubr.bf16.mxu0 %v15665_v18  ;;  %2086 = vmatpush1.bf16.msra.mxu1 %v14495_v59  ;;  %v14525_v59 = vld [vmem:[%s18743_s1 + $0x770] ss:$8 sps:$4 sm:$0xff]  }
 0x15a   : > { %8430 = vmatpush1.bf16.msra.mxu0 %v14498_v15  ;;  %2087 = vmatprep.subr.bf16.mxu1 %v14503_v25  ;;  %v14528_v15 = vld [vmem:[%s18743_s1 + $0x470] ss:$8 sps:$4 sm:$0xff]   ;;  %v14533_v25 = vld [vmem:[%s18743_s1 + $0x784] ss:$8 sps:$4 sm:$0xff]  }
 0x15b   : > { %8431 = vmatprep.subr.bf16.mxu0 %v14506_v56  ;;  %v14536_v56 = vld [vmem:[%s18743_s1 + $0x484] ss:$8 sps:$4 sm:$0xff]  }
 0x15d   : > { %2088 = vmatpush1.bf16.msra.mxu1 %v14501_v58  ;;  %v14531_v58 = vld [vmem:[%s18743_s1 + $0x780] ss:$8 sps:$4 sm:$0xff]  }
 0x15e   : > { %8432 = vmatpush1.bf16.msra.mxu0 %v14504_v17  ;;  %2089 = vmatprep.subr.bf16.mxu1 %v14509_v44  ;;  %v14534_v17 = vld [vmem:[%s18743_s1 + $0x480] ss:$8 sps:$4 sm:$0xff]   ;;  %v14539_v44 = vld [vmem:[%s18743_s1 + $0x794] ss:$8 sps:$4 sm:$0xff]  }
 0x15f   : > { %8433 = vmatprep.subr.bf16.mxu0 %v14512_v19  ;;  %1941 = vmatmul.mubr.bf16.gmra.mrb[8].mxu1 %v15704_v51  ;;  %v14542_v19 = vld [vmem:[%s18743_s1 + $0x494] ss:$8 sps:$4 sm:$0xff]  }
 0x160   : > { %7161 = vmatmul.mubr.bf16.gmra.mrb[8].mxu0 %v15706_v52  ;;  %1950 = vmatprep.mubr.bf16.mxu1 %v15709_v53 }
 0x161   : > { %7170 = vmatprep.mubr.bf16.mxu0 %v15716_v60  ;;  %2090 = vmatpush1.bf16.msra.mxu1 %v14507_v57  ;;  %v14537_v57 = vld [vmem:[%s18743_s1 + $0x790] ss:$8 sps:$4 sm:$0xff]  }
 0x162   : > { %8434 = vmatpush1.bf16.msra.mxu0 %v14510_v45  ;;  %2091 = vmatprep.subr.bf16.mxu1 %v14515_v61  ;;  %v14540_v45 = vld [vmem:[%s18743_s1 + $0x490] ss:$8 sps:$4 sm:$0xff]   ;;  %v14545_v61 = vld [vmem:[%s18743_s1 + $0x7a4] ss:$8 sps:$4 sm:$0xff]  }
 0x163   : > { %8435 = vmatprep.subr.bf16.mxu0 %v14518_v2  ;;  %v14548_v2 = vld [vmem:[%s18743_s1 + $0x4a4] ss:$8 sps:$4 sm:$0xff]   ;;  %v19125_v60 = vld [vmem:[#allocation45_spill] sm:$0xff] }
 0x165   : > { %2092 = vmatpush1.bf16.msra.mxu1 %v14513_v63  ;;  %v14543_v63 = vld [vmem:[%s18743_s1 + $0x7a0] ss:$8 sps:$4 sm:$0xff]  }
 0x166   : > { %8436 = vmatpush1.bf16.msra.mxu0 %v14516_v62  ;;  %2093 = vmatprep.subr.bf16.mxu1 %v14521_v26  ;;  %v14546_v62 = vld [vmem:[%s18743_s1 + $0x4a0] ss:$8 sps:$4 sm:$0xff]   ;;  %v14551_v26 = vld [vmem:[%s18743_s1 + $0x7b4] ss:$8 sps:$4 sm:$0xff]  }
 0x167   : > { %8437 = vmatprep.subr.bf16.mxu0 %v14524_v4  ;;  %1951 = vmatmul.mubr.bf16.gmra.mrb[12].mxu1 %v15757_v27  ;;  %v14554_v4 = vld [vmem:[%s18743_s1 + $0x4b4] ss:$8 sps:$4 sm:$0xff]  }
 0x168   : > { %7171 = vmatmul.mubr.bf16.gmra.mrb[12].mxu0 %v15759_v24  ;;  %1960 = vmatprep.mubr.bf16.mxu1 %v15768_v37  ;;  %v19124_v24 = vld [vmem:[#allocation44_spill] sm:$0xff] }
 0x169   : > { %7180 = vmatprep.mubr.bf16.mxu0 %v15770_v29  ;;  %2094 = vmatpush1.bf16.msra.mxu1 %v14519_v10  ;;  %v19098_v10 = vld [vmem:[#allocation17_spill] sm:$0xff]  ;;  %v328_v29 = vld [vmem:[%s15446_s17 + $0x358] sm:$0x11] }
 0x16a   : > { %8438 = vmatpush1.bf16.msra.mxu0 %v14522_v28  ;;  %2095 = vmatprep.subr.bf16.mxu1 %v14527_v33  ;;  %v19099_v28 = vld [vmem:[#allocation18_spill] sm:$0xff]  ;;  %v19100_v33 = vld [vmem:[#allocation19_spill] sm:$0xff] }
 0x16b   : > { %8439 = vmatprep.subr.bf16.mxu0 %v14530_v38  ;;  %v14549_v38 = vld [vmem:[%s18743_s1 + $0x7b0] ss:$8 sps:$4 sm:$0xff]  }
 0x16d   : > { %2096 = vmatpush1.bf16.msra.mxu1 %v14525_v59  ;;  %v14552_v59 = vld [vmem:[%s18743_s1 + $0x4b0] ss:$8 sps:$4 sm:$0xff]  }
 0x16e   : > { %8440 = vmatpush1.bf16.msra.mxu0 %v14528_v15  ;;  %2097 = vmatprep.subr.bf16.mxu1 %v14533_v25  ;;  %v14557_v15 = vld [vmem:[%s18743_s1 + $0x7c4] ss:$8 sps:$4 sm:$0xff]  }
 0x16f   : > { %8441 = vmatprep.subr.bf16.mxu0 %v14536_v56  ;;  %1961 = vmatmul.mubr.bf16.gmra.mrb[16].mxu1 %v15810_v6  ;;  %v14560_v25 = vld [vmem:[%s18743_s1 + $0x4c4] ss:$8 sps:$4 sm:$0xff]   ;;  %v14555_v56 = vld [vmem:[%s18743_s1 + $0x7c0] ss:$8 sps:$4 sm:$0xff]  }
 0x170   : > { %7181 = vmatmul.mubr.bf16.gmra.mrb[16].mxu0 %v15815_v9  ;;  %1970 = vmatprep.mubr.bf16.mxu1 %v15819_v11 }
 0x171   : > { %7190 = vmatprep.mubr.bf16.mxu0 %v15825_v23  ;;  %2098 = vmatpush1.bf16.msra.mxu1 %v14531_v58  ;;  %v14558_v58 = vld [vmem:[%s18743_s1 + $0x4c0] ss:$8 sps:$4 sm:$0xff]  }
 0x172   : > { %8442 = vmatpush1.bf16.msra.mxu0 %v14534_v17  ;;  %2099 = vmatprep.subr.bf16.mxu1 %v14539_v44  ;;  %v14563_v17 = vld [vmem:[%s18743_s1 + $0x7d4] ss:$8 sps:$4 sm:$0xff]  }
 0x173   : > { %8443 = vmatprep.subr.bf16.mxu0 %v14542_v19  ;;  %v14566_v44 = vld [vmem:[%s18743_s1 + $0x4d4] ss:$8 sps:$4 sm:$0xff]   ;;  %v19101_v19 = vld [vmem:[#allocation20_spill] sm:$0xff] }
 0x175   : > { %2100 = vmatpush1.bf16.msra.mxu1 %v14537_v57  ;;  %v19102_v57 = vld [vmem:[#allocation21_spill] sm:$0xff] }
 0x176   : > { %8444 = vmatpush1.bf16.msra.mxu0 %v14540_v45  ;;  %2101 = vmatprep.subr.bf16.mxu1 %v14545_v61  ;;  %v19103_v45 = vld [vmem:[#allocation22_spill] sm:$0xff]  ;;  %v19104_v61 = vld [vmem:[#allocation23_spill] sm:$0xff] }
 0x177   : > { %8445 = vmatprep.subr.bf16.mxu0 %v14548_v2  ;;  %1971 = vmatmul.mubr.bf16.gmra.mrb[20].mxu1 %v15867_v1  ;;  %v14561_v2 = vld [vmem:[%s18743_s1 + $0x7d0] ss:$8 sps:$4 sm:$0xff]  }
 0x178   : > { %7191 = vmatmul.mubr.bf16.gmra.mrb[20].mxu0 %v19098_v10  ;;  %1980 = vmatprep.mubr.bf16.mxu1 %v19099_v28 }
 0x179   : > { %7200 = vmatprep.mubr.bf16.mxu0 %v19100_v33  ;;  %2102 = vmatpush1.bf16.msra.mxu1 %v14543_v63  ;;  %v14564_v63 = vld [vmem:[%s18743_s1 + $0x4d0] ss:$8 sps:$4 sm:$0xff]  }
 0x17a   : > { %8446 = vmatpush1.bf16.msra.mxu0 %v14546_v62  ;;  %2103 = vmatprep.subr.bf16.mxu1 %v14551_v26  ;;  %v14569_v62 = vld [vmem:[%s18743_s1 + $0x7e4] ss:$8 sps:$4 sm:$0xff]  }
 0x17b   : > { %8447 = vmatprep.subr.bf16.mxu0 %v14554_v4  ;;  %v14572_v26 = vld [vmem:[%s18743_s1 + $0x4e4] ss:$8 sps:$4 sm:$0xff]   ;;  %v14567_v4 = vld [vmem:[%s18743_s1 + $0x7e0] ss:$8 sps:$4 sm:$0xff]  }
 0x17d   : > { %2104 = vmatpush1.bf16.msra.mxu1 %v14549_v38  ;;  %v14570_v38 = vld [vmem:[%s18743_s1 + $0x4e0] ss:$8 sps:$4 sm:$0xff]  }
 0x17e   : > { %8448 = vmatpush1.bf16.msra.mxu0 %v14552_v59  ;;  %2105 = vmatprep.subr.bf16.mxu1 %v14557_v15  ;;  %v14577_v59 = vld [vmem:[%s18743_s1 + $0x7f4] ss:$8 sps:$4 sm:$0xff]  }
 0x17f   : > { %8449 = vmatprep.subr.bf16.mxu0 %v14560_v25  ;;  %1981 = vmatmul.mubr.bf16.gmra.mrb[24].mxu1 %v19101_v19  ;;  %v14580_v15 = vld [vmem:[%s18743_s1 + $0x4f4] ss:$8 sps:$4 sm:$0xff]   ;;  %v19105_v25 = vld [vmem:[#allocation24_spill] sm:$0xff] }
 0x180   : > { %7201 = vmatmul.mubr.bf16.gmra.mrb[24].mxu0 %v19102_v57  ;;  %1990 = vmatprep.mubr.bf16.mxu1 %v19103_v45 }
 0x181   : > { %7210 = vmatprep.mubr.bf16.mxu0 %v19104_v61  ;;  %2106 = vmatpush1.bf16.msra.mxu1 %v14555_v56  ;;  %v19106_v56 = vld [vmem:[#allocation26_spill] sm:$0xff]  ;;  %v4286_v61 = vshll.u32 %v324_v30, 16 }
 0x182   : > { %8450 = vmatpush1.bf16.msra.mxu0 %v14558_v58  ;;  %2107 = vmatprep.subr.bf16.mxu1 %v14563_v17  ;;  %v14575_v58 = vld [vmem:[%s18743_s1 + $0x7f0] ss:$8 sps:$4 sm:$0xff]  }
 0x183   : > { %8451 = vmatprep.subr.bf16.mxu0 %v14566_v44  ;;  %v14578_v17 = vld [vmem:[%s18743_s1 + $0x4f0] ss:$8 sps:$4 sm:$0xff]   ;;  %v14583_v44 = vld [vmem:[%s18743_s1 + $0xc04] ss:$8 sps:$4 sm:$0xff]   ;;  %v4288_v10 = vrot.slane %v4286_v61, 5 }
 0x185   : > { %2108 = vmatpush1.bf16.msra.mxu1 %v14561_v2  ;;  %v14586_v2 = vld [vmem:[%s18743_s1 + $0x504] ss:$8 sps:$4 sm:$0xff]  }
 0x186   : > { %8452 = vmatpush1.bf16.msra.mxu0 %v14564_v63  ;;  %2109 = vmatprep.subr.bf16.mxu1 %v14569_v62  ;;  %v19107_v63 = vld [vmem:[#allocation27_spill] sm:$0xff]  ;;  %v19108_v62 = vld [vmem:[#allocation28_spill] sm:$0xff] }
 0x187   : > { %8453 = vmatprep.subr.bf16.mxu0 %v14572_v26  ;;  %1991 = vmatmul.mubr.bf16.gmra.mrb[28].mxu1 %v15963_v36  ;;  %v19109_v26 = vld [vmem:[#allocation29_spill] sm:$0xff] }
 0x188   : > { %7211 = vmatmul.mubr.bf16.gmra.mrb[28].mxu0 %v15970_v5  ;;  %2000 = vmatprep.mubr.bf16.mxu1 %v19105_v25  ;;  %v19122_v5 = vld [vmem:[#allocation42_spill] sm:$0xff] }
 0x189   : > { %7220 = vmatprep.mubr.bf16.mxu0 %v19106_v56  ;;  %2110 = vmatpush1.bf16.msra.mxu1 %v14567_v4  ;;  %v19110_v4 = vld [vmem:[#allocation30_spill] sm:$0xff]  ;;  %v19120_v56 = vld [vmem:[#allocation40_spill] sm:$0xff] }
 0x18a   : > { %8454 = vmatpush1.bf16.msra.mxu0 %v14570_v38  ;;  %2111 = vmatprep.subr.bf16.mxu1 %v14577_v59  ;;  %v19111_v38 = vld [vmem:[#allocation31_spill] sm:$0xff]  ;;  %v19112_v59 = vld [vmem:[#allocation32_spill] sm:$0xff] }
 0x18b   : > { %8455 = vmatprep.subr.bf16.mxu0 %v14580_v15  ;;  %v19113_v15 = vld [vmem:[#allocation33_spill] sm:$0xff] }
 0x18d   : > { %2112 = vmatpush1.bf16.msra.mxu1 %v14575_v58  ;;  %v19114_v58 = vld [vmem:[#allocation34_spill] sm:$0xff] }
 0x18e   : > { %8456 = vmatpush1.bf16.msra.mxu0 %v14578_v17  ;;  %2871 = vmatprep.subr.bf16.mxu1 %v14583_v44  ;;  %v19115_v17 = vld [vmem:[#allocation35_spill] sm:$0xff]  ;;  %v19116_v44 = vld [vmem:[#allocation36_spill] sm:$0xff] }
 0x18f   : > { %8618 = vmatprep.subr.bf16.mxu0 %v14586_v2  ;;  %2001 = vmatmul.mubr.bf16.gmra.mrb[32].mxu1 %v19107_v63  ;;  %v19117_v2 = vld [vmem:[#allocation37_spill] sm:$0xff] }
 0x190   : > { %7221 = vmatmul.mubr.bf16.gmra.mrb[32].mxu0 %v19108_v62  ;;  %2010 = vmatprep.mubr.bf16.mxu1 %v19109_v26  ;;  %v326_v62 = vld [vmem:[%s15446_s17 + $0x348] sm:$0xff] }
 0x191   : > { %7230 = vmatprep.mubr.bf16.mxu0 %v19110_v4  ;;  %v19119_v4 = vld [vmem:[#allocation39_spill] sm:$0xff]  ;;  %v4292_v57 = vshll.u32 %v326_v62, 16  ;;  %v4306_v33 = vshrl.u32 %v326_v62, 16 }
 0x193   : > { %v4294_v23 = vrot.slane %v4292_v57, 5  ;;  %v4308_v9 = vrot.slane %v4306_v33, 4  ;;  %v19127_v57 = vld [vmem:[#allocation47_spill] sm:$0xff]  ;;  %v19128_v33 = vld [vmem:[#allocation48_spill] sm:$0xff] }
 0x195   : > { %v4309_v52 = vor.u32 %v4308_v9, %v4294_v23  ;;  %v15119_v9 = vld [vmem:[%s15446_s17 + $0x10] sm:$0xff] }
 0x197   : > { %2011 = vmatmul.mubr.bf16.gmra.mrb[36].mxu1 %v19111_v38  ;;  %v4310_v62 = vrot.slane %v4309_v52, 4  ;;  %v16934_v52 = vcombine.high %v16573_v22, %v16580_v21 }
 0x198   : > { %7231 = vmatmul.mubr.bf16.gmra.mrb[36].mxu0 %v19112_v59  ;;  %2020 = vmatprep.mubr.bf16.mxu1 %v19113_v15  ;;  %v19121_v59 = vld [vmem:[#allocation41_spill] sm:$0xff] }
 0x199   : > { %7240 = vmatprep.mubr.bf16.mxu0 %v19114_v58  ;;  %v4283_v58 = vshrl.u32 %v324_v30, 16  ;;  %v4312_v30 = vshll.u32 %v328_v29, 16  ;;  %v7534_v29 = vrot.slane %v15119_v9, 5 }
 0x19b   : > { %v4314_v61 = vrot.slane %v4312_v30, 5 }
 0x19f   : > { %2021 = vmatmul.mubr.bf16.gmra.mrb[40].mxu1 %v19115_v17 }
 0x1a0   : > { %7241 = vmatmul.mubr.bf16.gmra.mrb[40].mxu0 %v19116_v44  ;;  %2030 = vmatprep.mubr.bf16.mxu1 %v19117_v2  ;;  %v4285_v44 = vrot.slane %v4283_v58, 4  ;;  %v19129_v58 = vld [vmem:[#allocation49_spill] sm:$0xff] }
 0x1a1   : > { %7250 = vmatprep.mubr.bf16.mxu0 %v19118_v55  ;;  %v19123_v55 = vld [vmem:[#allocation43_spill] sm:$0xff] }
 0x1a7   : > { %2031 = vmatmul.mubr.bf16.gmra.mrb[44].mxu1 %v19119_v4 }
 0x1a8   : > { %7251 = vmatmul.mubr.bf16.gmra.mrb[44].mxu0 %v19120_v56  ;;  %2040 = vmatprep.mubr.bf16.mxu1 %v19121_v59  ;;  %v19126_v56 = vld [vmem:[#allocation46_spill] sm:$0xff] }
 0x1a9   : > { %7260 = vmatprep.mubr.bf16.mxu0 %v19122_v5  ;;  %v4289_v5 = vor.u32 %v4288_v10, %v4285_v44  ;;  %v4315_v10 = vsel %vm15489_vm2, %v4310_v62, %v4314_v61  ;;  %v15121_v61 = vld [vmem:[%s15446_s17 + $0x40] sm:$0xff] }
 0x1aa   : > { %v7548_v9 = vrot.slane %v15121_v61, 5 }
 0x1ab   : > { %v4290_v18 = vrot.slane %v4289_v5, 4  ;;  %v225_v5 = vld [vmem:[%s15446_s17 + $0x20] sm:$0x11] }
 0x1af   : > { %2041 = vmatmul.mubr.bf16.gmra.mrb[48].mxu1 %v19123_v55 }
 0x1b0   : > { %7261 = vmatmul.mubr.bf16.gmra.mrb[48].mxu0 %v19124_v24  ;;  %2050 = vmatprep.mubr.bf16.mxu1 %v19125_v60  ;;  %v4295_v24 = vsel %vm15489_vm2, %v4290_v18, %v4294_v23  ;;  %v7540_v18 = vrot.slane %v7534_v29, 4  ;;  %v7541_v23 = vrot.slane %v225_v5, 5  ;;  %v15122_v5 = vld [vmem:[%s15446_s17 + $0x300] sm:$0xff] }
 0x1b1   : > { %7270 = vmatprep.mubr.bf16.mxu0 %v19126_v56  ;;  %v12392_v44 = vcombine.high %v4295_v24, %v4315_v10  ;;  %v12391_v56 = vcombine.low %v4295_v24, %v4315_v10 }
 0x1b2   : > { %v7542_v22 = vsel %vm16937_vm5, %v7540_v18, %v7541_v23 }
 0x1b7   : > { %2051 = vmatmul.mubr.bf16.gmra.mrb[52].mxu1 %v19127_v57 }
 0x1b8   : > { %7271 = vmatmul.mubr.bf16.gmra.mrb[52].mxu0 %v19128_v33  ;;  %2060 = vmatprep.mubr.bf16.mxu1 %v19129_v58 }
 0x1b9   : > { %7280 = vmatprep.mubr.bf16.mxu0 %v19130_v50  ;;  %v15120_v50 = vld [vmem:[%s15446_s17] sm:$0xff] }
 0x1ba   : > { %v12457_v30 = vrot.slane %v15120_v50, 9  ;;  %v15123_v50 = vld [vmem:[%s15446_s17 + $0x310] sm:$0xff] }
 0x1bb   : > { %v16951_v33 = vcombine.low %v15122_v5, %v15123_v50  ;;  %v15127_v5 = vld [vmem:[%s15446_s17 + $0x80] sm:$0x11] }
 0x1bc   : > { %v7535_v21 = vsel %vm16937_vm5, %v12457_v30, %v7534_v29  ;;  %v15125_v29 = vld [vmem:[%s15446_s17 + $0x70] sm:$0xff] }
 0x1bd   : > { %v12558_v39 = vcombine.high %v7535_v21, %v7542_v22  ;;  %v7562_v30 = vrot.slane %v15125_v29, 5  ;;  %v12557_v10 = vcombine.low %v7535_v21, %v7542_v22  ;;  %v14592_v21 = vld [vmem:[%s18743_s1 + $0x514] ss:$8 sps:$4 sm:$0xff]   ;;  %v14587_v22 = vld [vmem:[%s18743_s1 + $0xc10] ss:$8 sps:$4 sm:$0xff]   ;;  %v15128_v29 = vld [vmem:[%s15446_s17 + $0xa0] sm:$0xff] }
 0x1bf   : > { %2061 = vmatmul.mubr.bf16.gmra.mrb[56].mxu1 %v16131_v41  ;;  %v7568_v61 = vrot.slane %v7562_v30, 4 }
 0x1c0   : > { %7281 = vmatmul.mubr.bf16.gmra.mrb[56].mxu0 %v16133_v8  ;;  %2070 = vmatprep.mubr.bf16.mxu1 %v16934_v52  ;;  %v15124_v8 = vld [vmem:[%s15446_s17 + $0x30] sm:$0xff] }
 0x1c1   : > { %7290 = vmatprep.mubr.bf16.mxu0 %v12392_v44  ;;  %v12459_v16 = vrot.slane %v15124_v8, 9  ;;  %v7554_v44 = vrot.slane %v7548_v9, 4  ;;  %v14595_v8 = vld [vmem:[%s18743_s1 + $0xc24] ss:$8 sps:$4 sm:$0xff]  }
 0x1c3   : > { %v7549_v18 = vsel %vm16937_vm5, %v12459_v16, %v7548_v9  ;;  %v7556_v24 = vsel %vm16937_vm5, %v7554_v44, %v7555_v54  ;;  %v7569_v16 = vrot.slane %v15127_v5, 5  ;;  %v14589_v54 = vld [vmem:[%s18743_s1 + $0xc14] ss:$8 sps:$4 sm:$0xff]   ;;  %v14590_v9 = vld [vmem:[%s18743_s1 + $0x510] ss:$8 sps:$4 sm:$0xff]  }
 0x1c4   : > { %v16968_v23 = vcombine.high %v7549_v18, %v7556_v24  ;;  %v14598_v44 = vld [vmem:[%s18743_s1 + $0x524] ss:$8 sps:$4 sm:$0xff]  }
 0x1c7   : > { %2071 = vmatmul.mubr.bf16.gmra.mrb[60].mxu1 %v16951_v33 }
 0x1c8   : > { %7291 = vmatmul.mubr.bf16.gmra.mrb[60].mxu0 %v12391_v56  ;;  %2113 = vmatprep.mubr.bf16.mxu1 %v16159_v49  ;;  %v14584_v56 = vld [vmem:[%s18743_s1 + $0x500] ss:$8 sps:$4 sm:$0xff]  }
 0x1c9   : > { %8457 = vmatprep.mubr.bf16.mxu0 %v12558_v39  ;;  %v15126_v39 = vld [vmem:[%s15446_s17 + $0x60] sm:$0xff] }
 0x1ca   : > { %v12461_v49 = vrot.slane %v15126_v39, 9  ;;  %v14596_v39 = vld [vmem:[%s18743_s1 + $0x520] ss:$8 sps:$4 sm:$0xff]  }
 0x1cc   : > { %v7563_v50 = vsel %vm16937_vm5, %v12461_v49, %v7562_v30  ;;  %v15129_v49 = vld [vmem:[%s15446_s17 + $0x90] sm:$0xff] }
 0x1cf   : > { %2114 = vmatmul.mubr.bf16.vlgmr.msra.gmra.mrb[0].mxu1 %v16194_v34  ;;  %v7570_v34 = vsel %vm16937_vm5, %v7568_v61, %v7569_v16  ;;  %v12463_v61 = vrot.slane %v15129_v49, 9  ;;  %v14601_v16 = vld [vmem:[%s18743_s1 + $0xc34] ss:$8 sps:$4 sm:$0xff]  }
 0x1d0   : > { %8458 = vmatmul.mubr.bf16.vlgmr.msra.gmra.mrb[0].mxu0 %v12557_v10  ;;  %2872 = vmatpush1.bf16.msra.mxu1 %v14581_v43  ;;  %v7576_v10 = vrot.slane %v15128_v29, 5  ;;  %v16998_v43 = vcombine.low %v7549_v18, %v7556_v24  ;;  %v17000_v30 = vcombine.high %v7563_v50, %v7570_v34  ;;  %v15130_v18 = vld [vmem:[%s15446_s17 + $0xb0] sm:$0x11] }
 0x1d1   : > { %8619 = vmatpush1.bf16.msra.mxu0 %v14584_v56  ;;  %2123 = vmatprep.mubr.bf16.mxu1 %v16200_v35  ;;  %v14593_v56 = vld [vmem:[%s18743_s1 + $0xc20] ss:$8 sps:$4 sm:$0xff]   ;;  %v7583_v24 = vrot.slane %v15130_v18, 5  ;;  %v14602_v29 = vld [vmem:[%s18743_s1 + $0x530] ss:$8 sps:$4 sm:$0xff]  }
 0x1d2   : > { %8467 = vmatprep.mubr.bf16.mxu0 %v16968_v23  ;;  %2873 = vmatprep.subr.bf16.mxu1 %v14589_v54  ;;  %v7582_v5 = vrot.slane %v7576_v10, 4  ;;  %v14604_v54 = vld [vmem:[%s18743_s1 + $0x534] ss:$8 sps:$4 sm:$0xff]  }
 0x1d3   : > { %8620 = vmatprep.subr.bf16.mxu0 %v14592_v21  ;;  %v19133_v21 = vld [vmem:[#allocation56_spill] sm:$0xff]  ;;  %v15131_v49 = vld [vmem:[%s15446_s17 + $0xd0] sm:$0xff] }
 0x1d4   : > { %2874 = vmatpush1.bf16.msra.mxu1 %v14587_v22  ;;  %v19134_v22 = vld [vmem:[#allocation58_spill] sm:$0xff]  ;;  %v7590_v18 = vrot.slane %v15131_v49, 5  ;;  %v15133_v49 = vld [vmem:[%s15446_s17 + $0xe0] sm:$0x11] }
 0x1d5   : > { %8621 = vmatpush1.bf16.msra.mxu0 %v14590_v9  ;;  %2875 = vmatprep.subr.bf16.mxu1 %v14595_v8  ;;  %v7577_v9 = vsel %vm16937_vm5, %v12463_v61, %v7576_v10  ;;  %v7584_v8 = vsel %vm16937_vm5, %v7582_v5, %v7583_v24  ;;  %v14607_v10 = vld [vmem:[%s18743_s1 + $0xc44] ss:$8 sps:$4 sm:$0xff]  }
 0x1d6   : > { %8622 = vmatprep.subr.bf16.mxu0 %v14598_v44  ;;  %v14599_v44 = vld [vmem:[%s18743_s1 + $0xc30] ss:$8 sps:$4 sm:$0xff]   ;;  %v17039_v61 = vcombine.high %v7577_v9, %v7584_v8  ;;  %v15132_v5 = vld [vmem:[%s15446_s17 + $0xc0] sm:$0xff]  ;;  %v7596_v32 = vrot.slane %v7590_v18, 4 }
 0x1d7   : > { %2124 = vmatmul.mubr.bf16.gmra.mrb[4].mxu1 %v19133_v21  ;;  %v12465_v24 = vrot.slane %v15132_v5, 9  ;;  %v15134_v5 = vld [vmem:[%s15446_s17 + $0x100] sm:$0xff] }
 0x1d8   : > { %8468 = vmatmul.mubr.bf16.gmra.mrb[4].mxu0 %v16998_v43  ;;  %2133 = vmatprep.mubr.bf16.mxu1 %v19134_v22  ;;  %19136 = vst [vmem:[#allocation20_spill] sm:$0xff] %v17039_v61 }
 0x1d9   : > { %8477 = vmatprep.mubr.bf16.mxu0 %v17000_v30  ;;  %2876 = vmatpush1.bf16.msra.mxu1 %v14593_v56  ;;  %v14610_v56 = vld [vmem:[%s18743_s1 + $0x544] ss:$8 sps:$4 sm:$0xff]  }
 0x1da   : > { %8623 = vmatpush1.bf16.msra.mxu0 %v14596_v39  ;;  %2877 = vmatprep.subr.bf16.mxu1 %v14601_v16  ;;  %v17037_v39 = vcombine.low %v7563_v50, %v7570_v34  ;;  %v7597_v16 = vrot.slane %v15133_v49, 5  ;;  %v14613_v50 = vld [vmem:[%s18743_s1 + $0xc54] ss:$8 sps:$4 sm:$0xff]   ;;  %v7604_v49 = vrot.slane %v15134_v5, 5 }
 0x1db   : > { %8624 = vmatprep.subr.bf16.mxu0 %v14604_v54  ;;  %v14605_v54 = vld [vmem:[%s18743_s1 + $0xc40] ss:$8 sps:$4 sm:$0xff]   ;;  %v14616_v34 = vld [vmem:[%s18743_s1 + $0x554] ss:$8 sps:$4 sm:$0xff]  }
 0x1dc   : > { %19135 = vst [vmem:[#allocation18_spill] sm:$0xff] %v17037_v39  ;;  %v7610_v5 = vrot.slane %v7604_v49, 4 }
 0x1dd   : > { %2878 = vmatpush1.bf16.msra.mxu1 %v14599_v44  ;;  %v19137_v44 = vld [vmem:[#allocation60_spill] sm:$0xff] }
 0x1de   : > { %8625 = vmatpush1.bf16.msra.mxu0 %v14602_v29  ;;  %2879 = vmatprep.subr.bf16.mxu1 %v14607_v10  ;;  %v19138_v29 = vld [vmem:[#allocation62_spill] sm:$0xff]  ;;  %v7591_v10 = vsel %vm16937_vm5, %v12465_v24, %v7590_v18  ;;  %v14619_v18 = vld [vmem:[%s18743_s1 + $0xc64] ss:$8 sps:$4 sm:$0xff]  }
 0x1df   : > { %8626 = vmatprep.subr.bf16.mxu0 %v14610_v56  ;;  %2134 = vmatmul.mubr.bf16.gmra.mrb[8].mxu1 %v19137_v44  ;;  %v7598_v56 = vsel %vm16937_vm5, %v7596_v32, %v7597_v16  ;;  %v17076_v32 = vcombine.low %v7577_v9, %v7584_v8  ;;  %v15135_v16 = vld [vmem:[%s15446_s17 + $0xf0] sm:$0xff] }
 0x1e0   : > { %8478 = vmatmul.mubr.bf16.gmra.mrb[8].mxu0 %v17037_v39  ;;  %2143 = vmatprep.mubr.bf16.mxu1 %v19138_v29  ;;  %v14614_v29 = vld [vmem:[%s18743_s1 + $0x550] ss:$8 sps:$4 sm:$0xff]   ;;  %v17078_v24 = vcombine.high %v7591_v10, %v7598_v56  ;;  %v14625_v9 = vld [vmem:[%s18743_s1 + $0xc74] ss:$8 sps:$4 sm:$0xff]  }
 0x1e1   : > { %8487 = vmatprep.mubr.bf16.mxu0 %v17039_v61  ;;  %2880 = vmatpush1.bf16.msra.mxu1 %v14605_v54  ;;  %19139 = vst [vmem:[#allocation22_spill] sm:$0xff] %v17076_v32  ;;  %v12467_v54 = vrot.slane %v15135_v16, 9  ;;  %v15136_v61 = vld [vmem:[%s15446_s17 + $0x110] sm:$0x11] }
 0x1e2   : > { %8627 = vmatpush1.bf16.msra.mxu0 %v14608_v31  ;;  %2881 = vmatprep.subr.bf16.mxu1 %v14613_v50  ;;  %v14622_v31 = vld [vmem:[%s18743_s1 + $0x564] ss:$8 sps:$4 sm:$0xff]   ;;  %19140 = vst [vmem:[#allocation24_spill] sm:$0xff] %v17078_v24  ;;  %v7611_v39 = vrot.slane %v15136_v61, 5  ;;  %v14617_v50 = vld [vmem:[%s18743_s1 + $0xc60] ss:$8 sps:$4 sm:$0xff]  }
 0x1e3   : > { %8628 = vmatprep.subr.bf16.mxu0 %v14616_v34  ;;  %v14620_v34 = vld [vmem:[%s18743_s1 + $0x560] ss:$8 sps:$4 sm:$0xff]   ;;  %v14628_v8 = vld [vmem:[%s18743_s1 + $0x574] ss:$8 sps:$4 sm:$0xff]  }
 0x1e4   : > { %v19142_v61 = vld [vmem:[#allocation66_spill] sm:$0xff] }
 0x1e5   : > { %2882 = vmatpush1.bf16.msra.mxu1 %v14611_v7  ;;  %v19141_v7 = vld [vmem:[#allocation64_spill] sm:$0xff] }
 0x1e6   : > { %8629 = vmatpush1.bf16.msra.mxu0 %v14614_v29  ;;  %2883 = vmatprep.subr.bf16.mxu1 %v14619_v18  ;;  %v7605_v29 = vsel %vm16937_vm5, %v12467_v54, %v7604_v49  ;;  %v7612_v18 = vsel %vm16937_vm5, %v7610_v5, %v7611_v39  ;;  %v14631_v49 = vld [vmem:[%s18743_s1 + $0xc84] ss:$8 sps:$4 sm:$0xff]   ;;  %v17115_v54 = vcombine.low %v7591_v10, %v7598_v56  ;;  %v14637_v10 = vld [vmem:[%s18743_s1 + $0xc94] ss:$8 sps:$4 sm:$0xff]  }
 0x1e7   : > { %8630 = vmatprep.subr.bf16.mxu0 %v14622_v31  ;;  %2144 = vmatmul.mubr.bf16.gmra.mrb[12].mxu1 %v19141_v7  ;;  %v15137_v31 = vld [vmem:[%s15446_s17 + $0x130] sm:$0xff]  ;;  %v14634_v39 = vld [vmem:[%s18743_s1 + $0x584] ss:$8 sps:$4 sm:$0xff]   ;;  %v17117_v5 = vcombine.high %v7605_v29, %v7612_v18 }
 0x1e8   : > { %8488 = vmatmul.mubr.bf16.gmra.mrb[12].mxu0 %v17076_v32  ;;  %2153 = vmatprep.mubr.bf16.mxu1 %v19142_v61  ;;  %v7618_v16 = vrot.slane %v15137_v31, 5  ;;  %v14623_v32 = vld [vmem:[%s18743_s1 + $0xc70] ss:$8 sps:$4 sm:$0xff]   ;;  %19143 = vst [vmem:[#allocation27_spill] sm:$0xff] %v17115_v54  ;;  %v14640_v56 = vld [vmem:[%s18743_s1 + $0x594] ss:$8 sps:$4 sm:$0xff]  }
 0x1e9   : > { %8497 = vmatprep.mubr.bf16.mxu0 %v17078_v24  ;;  %2884 = vmatpush1.bf16.msra.mxu1 %v14617_v50  ;;  %v14626_v61 = vld [vmem:[%s18743_s1 + $0x570] ss:$8 sps:$4 sm:$0xff]   ;;  %19144 = vst [vmem:[#allocation29_spill] sm:$0xff] %v17117_v5  ;;  %v15138_v50 = vld [vmem:[%s15446_s17 + $0x120] sm:$0xff] }
 0x1ea   : > { %8631 = vmatpush1.bf16.msra.mxu0 %v14620_v34  ;;  %2885 = vmatprep.subr.bf16.mxu1 %v14625_v9  ;;  %v12469_v34 = vrot.slane %v15138_v50, 9  ;;  %v7624_v31 = vrot.slane %v7618_v16, 4  ;;  %v15139_v24 = vld [vmem:[%s15446_s17 + $0x140] sm:$0x11] }
 0x1eb   : > { %8632 = vmatprep.subr.bf16.mxu0 %v14628_v8  ;;  %v7625_v7 = vrot.slane %v15139_v24, 5  ;;  %v14629_v9 = vld [vmem:[%s18743_s1 + $0xc80] ss:$8 sps:$4 sm:$0xff]   ;;  %v19146_v24 = vld [vmem:[#allocation70_spill] sm:$0xff] }
 0x1ec   : > { %v14632_v8 = vld [vmem:[%s18743_s1 + $0x580] ss:$8 sps:$4 sm:$0xff]  }
 0x1ed   : > { %2886 = vmatpush1.bf16.msra.mxu1 %v14623_v32  ;;  %v19145_v32 = vld [vmem:[#allocation68_spill] sm:$0xff] }
 0x1ee   : > { %8633 = vmatpush1.bf16.msra.mxu0 %v14626_v61  ;;  %2887 = vmatprep.subr.bf16.mxu1 %v14631_v49  ;;  %v7619_v61 = vsel %vm16937_vm5, %v12469_v34, %v7618_v16  ;;  %v7626_v49 = vsel %vm16937_vm5, %v7624_v31, %v7625_v7  ;;  %v14643_v16 = vld [vmem:[%s18743_s1 + $0xca4] ss:$8 sps:$4 sm:$0xff]   ;;  %v17154_v34 = vcombine.low %v7605_v29, %v7612_v18  ;;  %v14649_v29 = vld [vmem:[%s18743_s1 + $0xcb4] ss:$8 sps:$4 sm:$0xff]  }
 0x1ef   : > { %8634 = vmatprep.subr.bf16.mxu0 %v14634_v39  ;;  %2154 = vmatmul.mubr.bf16.gmra.mrb[16].mxu1 %v19145_v32  ;;  %v15140_v39 = vld [vmem:[%s15446_s17 + $0x160] sm:$0xff]  ;;  %v17156_v31 = vcombine.high %v7619_v61, %v7626_v49  ;;  %v14652_v18 = vld [vmem:[%s18743_s1 + $0x5b4] ss:$8 sps:$4 sm:$0xff]  }
 0x1f0   : > { %8498 = vmatmul.mubr.bf16.gmra.mrb[16].mxu0 %v17115_v54  ;;  %2163 = vmatprep.mubr.bf16.mxu1 %v19146_v24  ;;  %v7632_v50 = vrot.slane %v15140_v39, 5  ;;  %v14635_v54 = vld [vmem:[%s18743_s1 + $0xc90] ss:$8 sps:$4 sm:$0xff]   ;;  %v14646_v7 = vld [vmem:[%s18743_s1 + $0x5a4] ss:$8 sps:$4 sm:$0xff]   ;;  %19147 = vst [vmem:[#allocation31_spill] sm:$0xff] %v17154_v34 }
 0x1f1   : > { %8507 = vmatprep.mubr.bf16.mxu0 %v17117_v5  ;;  %2888 = vmatpush1.bf16.msra.mxu1 %v14629_v9  ;;  %v14638_v24 = vld [vmem:[%s18743_s1 + $0x590] ss:$8 sps:$4 sm:$0xff]   ;;  %19148 = vst [vmem:[#allocation33_spill] sm:$0xff] %v17156_v31 }
 0x1f2   : > { %8635 = vmatpush1.bf16.msra.mxu0 %v14632_v8  ;;  %2889 = vmatprep.subr.bf16.mxu1 %v14637_v10  ;;  %v15141_v9 = vld [vmem:[%s15446_s17 + $0x150] sm:$0xff]  ;;  %v7638_v39 = vrot.slane %v7632_v50, 4  ;;  %v14641_v10 = vld [vmem:[%s18743_s1 + $0xca0] ss:$8 sps:$4 sm:$0xff]  }
 0x1f3   : > { %8636 = vmatprep.subr.bf16.mxu0 %v14640_v56  ;;  %v12471_v8 = vrot.slane %v15141_v9, 9  ;;  %v15142_v5 = vld [vmem:[%s15446_s17 + $0x170] sm:$0x11]  ;;  %v14644_v56 = vld [vmem:[%s18743_s1 + $0x5a0] ss:$8 sps:$4 sm:$0xff]  }
 0x1f4   : > { %v7639_v32 = vrot.slane %v15142_v5, 5  ;;  %v19150_v5 = vld [vmem:[#allocation74_spill] sm:$0xff] }
 0x1f5   : > { %2890 = vmatpush1.bf16.msra.mxu1 %v14635_v54  ;;  %v19149_v54 = vld [vmem:[#allocation72_spill] sm:$0xff] }
 0x1f6   : > { %8637 = vmatpush1.bf16.msra.mxu0 %v14638_v24  ;;  %2891 = vmatprep.subr.bf16.mxu1 %v14643_v16  ;;  %v7633_v24 = vsel %vm16937_vm5, %v12471_v8, %v7632_v50  ;;  %v7640_v16 = vsel %vm16937_vm5, %v7638_v39, %v7639_v32  ;;  %v14655_v50 = vld [vmem:[%s18743_s1 + $0xcc4] ss:$8 sps:$4 sm:$0xff]   ;;  %v17193_v8 = vcombine.low %v7619_v61, %v7626_v49  ;;  %v14661_v61 = vld [vmem:[%s18743_s1 + $0xcd4] ss:$8 sps:$4 sm:$0xff]  }
 0x1f7   : > { %8638 = vmatprep.subr.bf16.mxu0 %v14646_v7  ;;  %2164 = vmatmul.mubr.bf16.gmra.mrb[20].mxu1 %v19149_v54  ;;  %v15143_v7 = vld [vmem:[%s15446_s17 + $0x190] sm:$0xff]  ;;  %v14658_v32 = vld [vmem:[%s18743_s1 + $0x5c4] ss:$8 sps:$4 sm:$0xff]   ;;  %v17195_v39 = vcombine.high %v7633_v24, %v7640_v16 }
 0x1f8   : > { %8508 = vmatmul.mubr.bf16.gmra.mrb[20].mxu0 %v17154_v34  ;;  %2173 = vmatprep.mubr.bf16.mxu1 %v19150_v5  ;;  %v7646_v9 = vrot.slane %v15143_v7, 5  ;;  %v14647_v34 = vld [vmem:[%s18743_s1 + $0xcb0] ss:$8 sps:$4 sm:$0xff]   ;;  %19151 = vst [vmem:[#allocation35_spill] sm:$0xff] %v17193_v8  ;;  %v14664_v49 = vld [vmem:[%s18743_s1 + $0x5d4] ss:$8 sps:$4 sm:$0xff]  }
 0x1f9   : > { %8517 = vmatprep.mubr.bf16.mxu0 %v17156_v31  ;;  %2892 = vmatpush1.bf16.msra.mxu1 %v14641_v10  ;;  %v14650_v5 = vld [vmem:[%s18743_s1 + $0x5b0] ss:$8 sps:$4 sm:$0xff]   ;;  %19152 = vst [vmem:[#allocation37_spill] sm:$0xff] %v17195_v39  ;;  %v15144_v10 = vld [vmem:[%s15446_s17 + $0x180] sm:$0xff] }
 0x1fa   : > { %8639 = vmatpush1.bf16.msra.mxu0 %v14644_v56  ;;  %2893 = vmatprep.subr.bf16.mxu1 %v14649_v29  ;;  %v12473_v56 = vrot.slane %v15144_v10, 9  ;;  %v7652_v7 = vrot.slane %v7646_v9, 4  ;;  %v15145_v31 = vld [vmem:[%s15446_s17 + $0x1a0] sm:$0x11] }
 0x1fb   : > { %8640 = vmatprep.subr.bf16.mxu0 %v14652_v18  ;;  %v7653_v54 = vrot.slane %v15145_v31, 5  ;;  %v14653_v29 = vld [vmem:[%s18743_s1 + $0xcc0] ss:$8 sps:$4 sm:$0xff]   ;;  %v19154_v31 = vld [vmem:[#allocation78_spill] sm:$0xff] }
 0x1fc   : > { %v14656_v18 = vld [vmem:[%s18743_s1 + $0x5c0] ss:$8 sps:$4 sm:$0xff]  }
 0x1fd   : > { %2894 = vmatpush1.bf16.msra.mxu1 %v14647_v34  ;;  %v19153_v34 = vld [vmem:[#allocation76_spill] sm:$0xff] }
 0x1fe   : > { %8641 = vmatpush1.bf16.msra.mxu0 %v14650_v5  ;;  %2895 = vmatprep.subr.bf16.mxu1 %v14655_v50  ;;  %v7647_v5 = vsel %vm16937_vm5, %v12473_v56, %v7646_v9  ;;  %v7654_v50 = vsel %vm16937_vm5, %v7652_v7, %v7653_v54  ;;  %v14667_v9 = vld [vmem:[%s18743_s1 + $0xce4] ss:$8 sps:$4 sm:$0xff]   ;;  %v17232_v56 = vcombine.low %v7633_v24, %v7640_v16  ;;  %v14675_v24 = vld [vmem:[%s18743_s1 + $0xcf4] ss:$8 sps:$4 sm:$0xff]  }
 0x1ff   : > { %8642 = vmatprep.subr.bf16.mxu0 %v14658_v32  ;;  %2174 = vmatmul.mubr.bf16.gmra.mrb[24].mxu1 %v19153_v34  ;;  %v15146_v32 = vld [vmem:[%s15446_s17 + $0x1c0] sm:$0xff]  ;;  %v17234_v7 = vcombine.high %v7647_v5, %v7654_v50  ;;  %v14678_v16 = vld [vmem:[%s18743_s1 + $0x5f4] ss:$8 sps:$4 sm:$0xff]  }
 0x200   : > { %8518 = vmatmul.mubr.bf16.gmra.mrb[24].mxu0 %v17193_v8  ;;  %2183 = vmatprep.mubr.bf16.mxu1 %v19154_v31  ;;  %v7660_v10 = vrot.slane %v15146_v32, 5  ;;  %v14659_v8 = vld [vmem:[%s18743_s1 + $0xcd0] ss:$8 sps:$4 sm:$0xff]   ;;  %v14670_v54 = vld [vmem:[%s18743_s1 + $0x5e4] ss:$8 sps:$4 sm:$0xff]   ;;  %19155 = vst [vmem:[#allocation39_spill] sm:$0xff] %v17232_v56 }
 0x201   : > { %8527 = vmatprep.mubr.bf16.mxu0 %v17195_v39  ;;  %2896 = vmatpush1.bf16.msra.mxu1 %v14653_v29  ;;  %v14662_v31 = vld [vmem:[%s18743_s1 + $0x5d0] ss:$8 sps:$4 sm:$0xff]   ;;  %19156 = vst [vmem:[#allocation41_spill] sm:$0xff] %v17234_v7 }
 0x202   : > { %8643 = vmatpush1.bf16.msra.mxu0 %v14656_v18  ;;  %2897 = vmatprep.subr.bf16.mxu1 %v14661_v61  ;;  %v15147_v29 = vld [vmem:[%s15446_s17 + $0x1b0] sm:$0xff]  ;;  %v7666_v32 = vrot.slane %v7660_v10, 4  ;;  %v14665_v61 = vld [vmem:[%s18743_s1 + $0xce0] ss:$8 sps:$4 sm:$0xff]  }
 0x203   : > { %8644 = vmatprep.subr.bf16.mxu0 %v14664_v49  ;;  %v12475_v18 = vrot.slane %v15147_v29, 9  ;;  %v15148_v39 = vld [vmem:[%s15446_s17 + $0x1d0] sm:$0x11]  ;;  %v14668_v49 = vld [vmem:[%s18743_s1 + $0x5e0] ss:$8 sps:$4 sm:$0xff]  }
 0x204   : > { %v7667_v34 = vrot.slane %v15148_v39, 5  ;;  %v14673_v29 = vld [vmem:[%s18743_s1 + $0xcf0] ss:$8 sps:$4 sm:$0xff]  }
 0x205   : > { %2898 = vmatpush1.bf16.msra.mxu1 %v14659_v8  ;;  %v19157_v8 = vld [vmem:[#allocation81_spill] sm:$0xff]  ;;  %v7661_v39 = vsel %vm16937_vm5, %v12475_v18, %v7660_v10  ;;  %v14681_v10 = vld [vmem:[%s18743_s1 + $0xd04] ss:$8 sps:$4 sm:$0xff]   ;;  %v17271_v18 = vcombine.low %v7647_v5, %v7654_v50 }
 0x206   : > { %8645 = vmatpush1.bf16.msra.mxu0 %v14662_v31  ;;  %2899 = vmatprep.subr.bf16.mxu1 %v14667_v9  ;;  %v7668_v31 = vsel %vm16937_vm5, %v7666_v32, %v7667_v34  ;;  %v15149_v9 = vld [vmem:[%s15446_s17 + $0x1f0] sm:$0xff]  ;;  %v14684_v34 = vld [vmem:[%s18743_s1 + $0xa04] ss:$8 sps:$4 sm:$0xff]  }
 0x207   : > { %8646 = vmatprep.subr.bf16.mxu0 %v14670_v54  ;;  %2184 = vmatmul.mubr.bf16.gmra.mrb[28].mxu1 %v16530_v46  ;;  %v7674_v54 = vrot.slane %v15149_v9, 5  ;;  %19158 = vst [vmem:[#allocation43_spill] sm:$0xff] %v17271_v18  ;;  %v17273_v32 = vcombine.high %v7661_v39, %v7668_v31  ;;  %v19161_v5 = vld [vmem:[#allocation85_spill] sm:$0xff] }
 0x208   : > { %8528 = vmatmul.mubr.bf16.gmra.mrb[28].mxu0 %v17232_v56  ;;  %2193 = vmatprep.mubr.bf16.mxu1 %v19157_v8  ;;  %v14676_v8 = vld [vmem:[%s18743_s1 + $0x5f0] ss:$8 sps:$4 sm:$0xff]   ;;  %v19164_v56 = vld [vmem:[#allocation87_spill] sm:$0xff] }
 0x209   : > { %8537 = vmatprep.mubr.bf16.mxu0 %v17234_v7  ;;  %2900 = vmatpush1.bf16.msra.mxu1 %v14665_v61  ;;  %19159 = vst [vmem:[#allocation45_spill] sm:$0xff] %v17273_v32  ;;  %v15150_v61 = vld [vmem:[%s15446_s17 + $0x1e0] sm:$0xff]  ;;  %v7680_v9 = vrot.slane %v7674_v54, 4 }
 0x20a   : > { %8647 = vmatpush1.bf16.msra.mxu0 %v14668_v49  ;;  %2901 = vmatprep.subr.bf16.mxu1 %v14675_v24  ;;  %v12477_v49 = vrot.slane %v15150_v61, 9  ;;  %v15151_v7 = vld [vmem:[%s15446_s17 + $0x200] sm:$0x11] }
 0x20b   : > { %8648 = vmatprep.subr.bf16.mxu0 %v14678_v16  ;;  %v7681_v24 = vrot.slane %v15151_v7, 5  ;;  %v19160_v16 = vld [vmem:[#allocation83_spill] sm:$0xff] }
 0x20c   : > { %v7675_v50 = vsel %vm16937_vm5, %v12477_v49, %v7674_v54  ;;  %v15152_v7 = vld [vmem:[%s15446_s17 + $0x220] sm:$0xff]  ;;  %v19165_v54 = vld [vmem:[#allocation89_spill] sm:$0xff] }
 0x20d   : > { %2902 = vmatpush1.bf16.msra.mxu1 %v14673_v29  ;;  %v7682_v61 = vsel %vm16937_vm5, %v7680_v9, %v7681_v24  ;;  %v17286_v29 = vcombine.low %v7661_v39, %v7668_v31  ;;  %v15155_v49 = vld [vmem:[%s15446_s17 + $0x250] sm:$0xff] }
 0x20e   : > { %8649 = vmatpush1.bf16.msra.mxu0 %v14676_v8  ;;  %3064 = vmatprep.subr.bf16.mxu1 %v14681_v10  ;;  %v7688_v8 = vrot.slane %v15152_v7, 5  ;;  %v17288_v10 = vcombine.high %v7675_v50, %v7682_v61  ;;  %v7702_v9 = vrot.slane %v15155_v49, 5  ;;  %v17301_v24 = vcombine.low %v7675_v50, %v7682_v61  ;;  %v15156_v7 = vld [vmem:[%s15446_s17 + $0x240] sm:$0xff]  ;;  %v15159_v49 = vld [vmem:[%s15446_s17 + $0x270] sm:$0xff] }
 0x20f   : > { %9404 = vmatprep.subr.bf16.mxu0 %v14684_v34  ;;  %2194 = vmatmul.mubr.bf16.gmra.mrb[32].mxu1 %v19160_v16  ;;  %19162 = vst [vmem:[#allocation47_spill] sm:$0xff] %v17286_v29  ;;  %v15153_v34 = vld [vmem:[%s15446_s17 + $0x210] sm:$0xff]  ;;  %v15158_v50 = vld [vmem:[%s15446_s17 + $0x280] sm:$0xff] }
 0x210   : > { %8538 = vmatmul.mubr.bf16.gmra.mrb[32].mxu0 %v17271_v18  ;;  %2203 = vmatprep.mubr.bf16.mxu1 %v19161_v5  ;;  %19163 = vst [vmem:[#allocation49_spill] sm:$0xff] %v17288_v10  ;;  %v12479_v18 = vrot.slane %v15153_v34, 9  ;;  %v7694_v16 = vrot.slane %v7688_v8, 4  ;;  %v15154_v5 = vld [vmem:[%s15446_s17 + $0x230] sm:$0x11]  ;;  %19166 = vst [vmem:[#allocation50_spill] sm:$0xff] %v17301_v24 }
 0x211   : > { %8547 = vmatprep.mubr.bf16.mxu0 %v17273_v32  ;;  %v7695_v32 = vrot.slane %v15154_v5, 5  ;;  %v12481_v34 = vrot.slane %v15156_v7, 9  ;;  %v7716_v61 = vrot.slane %v15158_v50, 5  ;;  %v12483_v7 = vrot.slane %v15159_v49, 9 }
 0x212   : > { %v7689_v39 = vsel %vm16937_vm5, %v12479_v18, %v7688_v8  ;;  %v19169_v18 = vld [vmem:[#allocation93_spill] sm:$0xff] }
 0x213   : > { %v7696_v31 = vsel %vm16937_vm5, %v7694_v16, %v7695_v32  ;;  %v7703_v32 = vsel %vm16937_vm5, %v12481_v34, %v7702_v9 }
 0x214   : > { %v17303_v5 = vcombine.high %v7689_v39, %v7696_v31  ;;  %v17316_v8 = vcombine.low %v7689_v39, %v7696_v31  ;;  %v15161_v39 = vld [vmem:[%s15446_s17 + $0x2b0] sm:$0xff] }
 0x215   : > { %v7730_v31 = vrot.slane %v15161_v39, 5 }
 0x216   : > { %19167 = vst [vmem:[#allocation56_spill] sm:$0xff] %v17303_v5  ;;  %19170 = vst [vmem:[#allocation58_spill] sm:$0xff] %v17316_v8 }
 0x217   : > { %2204 = vmatmul.mubr.bf16.gmra.mrb[36].mxu1 %v19164_v56  ;;  %v19168_v56 = vld [vmem:[#allocation91_spill] sm:$0xff]  ;;  %v7736_v49 = vrot.slane %v7730_v31, 4 }
 0x218   : > { %8548 = vmatmul.mubr.bf16.gmra.mrb[36].mxu0 %v17286_v29  ;;  %2213 = vmatprep.mubr.bf16.mxu1 %v19165_v54  ;;  %v7708_v29 = vrot.slane %v7702_v9, 4  ;;  %v15157_v54 = vld [vmem:[%s15446_s17 + $0x260] sm:$0x11] }
 0x219   : > { %8557 = vmatprep.mubr.bf16.mxu0 %v17288_v10  ;;  %v7709_v10 = vrot.slane %v15157_v54, 5 }
 0x21b   : > { %v7710_v16 = vsel %vm16937_vm5, %v7708_v29, %v7709_v10  ;;  %v7717_v29 = vsel %vm16937_vm5, %v12483_v7, %v7716_v61  ;;  %v15165_v7 = vld [vmem:[%s15446_s17 + $0x2d0] sm:$0xff] }
 0x21c   : > { %v17318_v54 = vcombine.high %v7703_v32, %v7710_v16  ;;  %v17331_v9 = vcombine.low %v7703_v32, %v7710_v16  ;;  %v15164_v32 = vld [vmem:[%s15446_s17 + $0x2e0] sm:$0xff]  ;;  %v12487_v39 = vrot.slane %v15165_v7, 9 }
 0x21d   : > { %v7744_v16 = vrot.slane %v15164_v32, 5  ;;  %v15169_v32 = vld [vmem:[%s15446_s17 + $0x318] sm:$0xff] }
 0x21e   : > { %19171 = vst [vmem:[#allocation60_spill] sm:$0xff] %v17318_v54  ;;  %19172 = vst [vmem:[#allocation91_spill] sm:$0xff] %v17331_v9 }
 0x21f   : > { %2214 = vmatmul.mubr.bf16.gmra.mrb[40].mxu1 %v19168_v56 }
 0x220   : > { %8558 = vmatmul.mubr.bf16.gmra.mrb[40].mxu0 %v17301_v24  ;;  %2223 = vmatprep.mubr.bf16.mxu1 %v19169_v18  ;;  %v7722_v24 = vrot.slane %v7716_v61, 4  ;;  %v15160_v18 = vld [vmem:[%s15446_s17 + $0x290] sm:$0x11] }
 0x221   : > { %8567 = vmatprep.mubr.bf16.mxu0 %v17303_v5  ;;  %v7723_v5 = vrot.slane %v15160_v18, 5  ;;  %v15162_v18 = vld [vmem:[%s15446_s17 + $0x2a0] sm:$0xff] }
 0x222   : > { %v12485_v50 = vrot.slane %v15162_v18, 9  ;;  %v7750_v18 = vrot.slane %v7744_v16, 4 }
 0x223   : > { %v7724_v10 = vsel %vm16937_vm5, %v7722_v24, %v7723_v5 }
 0x224   : > { %v17333_v34 = vcombine.high %v7717_v29, %v7724_v10  ;;  %v7731_v24 = vsel %vm16937_vm5, %v12485_v50, %v7730_v31  ;;  %v17346_v61 = vcombine.low %v7717_v29, %v7724_v10  ;;  %v15167_v10 = vld [vmem:[%s15446_s17 + $0x18] sm:$0xff]  ;;  %v226_v50 = vld [vmem:[%s15446_s17 + $0x28] sm:$0x11] }
 0x225   : > { %v7538_v31 = vrot.slane %v15167_v10, 5 }
 0x226   : > { %19173 = vst [vmem:[#allocation105_spill] sm:$0xff] %v17333_v34  ;;  %19174 = vst [vmem:[#allocation106_spill] sm:$0xff] %v17346_v61 }
 0x227   : > { %2224 = vmatmul.mubr.bf16.gmra.mrb[44].mxu1 %v16622_v20 }
 0x228   : > { %8568 = vmatmul.mubr.bf16.gmra.mrb[44].mxu0 %v17316_v8  ;;  %2233 = vmatprep.mubr.bf16.mxu1 %v16628_v42  ;;  %v15163_v42 = vld [vmem:[%s15446_s17 + $0x2c0] sm:$0x11] }
 0x229   : > { %8577 = vmatprep.mubr.bf16.mxu0 %v17318_v54  ;;  %v7737_v54 = vrot.slane %v15163_v42, 5 }
 0x22b   : > { %v7738_v5 = vsel %vm16937_vm5, %v7736_v49, %v7737_v54  ;;  %v7745_v54 = vsel %vm16937_vm5, %v12487_v39, %v7744_v16  ;;  %v7544_v16 = vrot.slane %v226_v50, 5  ;;  %v15172_v50 = vld [vmem:[%s15446_s17 + $0x38] sm:$0xff] }
 0x22c   : > { %v17348_v42 = vcombine.high %v7731_v24, %v7738_v5  ;;  %v17362_v49 = vcombine.low %v7731_v24, %v7738_v5  ;;  %v15171_v5 = vld [vmem:[%s15446_s17 + $0x48] sm:$0xff] }
 0x22e   : > { %19175 = vst [vmem:[#allocation107_spill] sm:$0xff] %v17348_v42  ;;  %19176 = vst [vmem:[#allocation108_spill] sm:$0xff] %v17362_v49 }
 0x22f   : > { %2234 = vmatmul.mubr.bf16.gmra.mrb[48].mxu1 %v16641_v47 }
 0x230   : > { %8578 = vmatmul.mubr.bf16.gmra.mrb[48].mxu0 %v17331_v9  ;;  %2243 = vmatprep.mubr.bf16.mxu1 %v16647_v0 }
 0x231   : > { %8587 = vmatprep.mubr.bf16.mxu0 %v17333_v34  ;;  %v15166_v34 = vld [vmem:[%s15446_s17 + $0x2f0] sm:$0x11] }
 0x232   : > { %v7751_v0 = vrot.slane %v15166_v34, 5  ;;  %v15168_v34 = vld [vmem:[%s15446_s17 + $0x308] sm:$0xff] }
 0x233   : > { %v17366_v7 = vcombine.high %v15168_v34, %v15169_v32  ;;  %v17380_v39 = vcombine.low %v15168_v34, %v15169_v32  ;;  %v14682_v34 = vld [vmem:[%s18743_s1 + $0xa00] ss:$8 sps:$4 sm:$0xff]  }
 0x234   : > { %v7752_v29 = vsel %vm16937_vm5, %v7750_v18, %v7751_v0 }
 0x235   : > { %19177 = vst [vmem:[#allocation109_spill] sm:$0xff] %v17366_v7  ;;  %v17382_v18 = vcombine.low %v7745_v54, %v7752_v29 }
 0x237   : > { %2244 = vmatmul.mubr.bf16.gmra.mrb[52].mxu1 %v16659_v14  ;;  %v7543_v14 = vrot.slane %v7538_v31, 4  ;;  %19179 = vst [vmem:[#allocation111_spill] sm:$0xff] %v17382_v18 }
 0x238   : > { %8588 = vmatmul.mubr.bf16.gmra.mrb[52].mxu0 %v17346_v61  ;;  %2253 = vmatprep.mubr.bf16.mxu1 %v16665_v13  ;;  %v17368_v61 = vcombine.high %v7745_v54, %v7752_v29 }
 0x239   : > { %8597 = vmatprep.mubr.bf16.mxu0 %v17348_v42  ;;  %v15170_v42 = vld [vmem:[%s15446_s17 + $0x8] sm:$0xff]  ;;  %v7545_v24 = vsel %vm16937_vm5, %v7543_v14, %v7544_v16  ;;  %v15174_v14 = vld [vmem:[%s15446_s17 + $0x78] sm:$0xff] }
 0x23a   : > { %19178 = vst [vmem:[#allocation110_spill] sm:$0xff] %v17368_v61  ;;  %v12458_v13 = vrot.slane %v15170_v42, 9  ;;  %v7552_v42 = vrot.slane %v15171_v5, 5 }
 0x23c   : > { %v7539_v0 = vsel %vm16937_vm5, %v12458_v13, %v7538_v31  ;;  %v7566_v13 = vrot.slane %v15174_v14, 5  ;;  %v14696_v14 = vld [vmem:[%s18743_s1 + $0xa24] ss:$8 sps:$4 sm:$0xff]  }
 0x23d   : > { %v12560_v10 = vcombine.high %v7539_v0, %v7545_v24  ;;  %v12559_v31 = vcombine.low %v7539_v0, %v7545_v24  ;;  %v14685_v0 = vld [vmem:[%s18743_s1 + $0xd10] ss:$8 sps:$4 sm:$0xff]  }
 0x23e   : > { %v7571_v5 = vrot.slane %v7566_v13, 4  ;;  %v14688_v24 = vld [vmem:[%s18743_s1 + $0xa10] ss:$8 sps:$4 sm:$0xff]  }
 0x23f   : > { %2254 = vmatmul.mubr.bf16.gmra.mrb[56].mxu1 %v16670_v3  ;;  %v15173_v3 = vld [vmem:[%s15446_s17 + $0x58] sm:$0x11] }
 0x240   : > { %8598 = vmatmul.mubr.bf16.gmra.mrb[56].mxu0 %v17362_v49  ;;  %2263 = vmatprep.mubr.bf16.mxu1 %v17366_v7  ;;  %v12460_v49 = vrot.slane %v15172_v50, 9  ;;  %v7557_v7 = vrot.slane %v7552_v42, 4  ;;  %v14693_v50 = vld [vmem:[%s18743_s1 + $0xd24] ss:$8 sps:$4 sm:$0xff]  }
 0x241   : > { %8607 = vmatprep.mubr.bf16.mxu0 %v17368_v61  ;;  %v7558_v61 = vrot.slane %v15173_v3, 5  ;;  %v14679_v3 = vld [vmem:[%s18743_s1 + $0xd00] ss:$8 sps:$4 sm:$0xff]  }
 0x242   : > { %v7553_v54 = vsel %vm16937_vm5, %v12460_v49, %v7552_v42 }
 0x243   : > { %v7559_v29 = vsel %vm16937_vm5, %v7557_v7, %v7558_v61  ;;  %v14687_v61 = vld [vmem:[%s18743_s1 + $0xd14] ss:$8 sps:$4 sm:$0xff]  }
 0x244   : > { %v17400_v32 = vcombine.high %v7553_v54, %v7559_v29  ;;  %v14690_v7 = vld [vmem:[%s18743_s1 + $0xa14] ss:$8 sps:$4 sm:$0xff]  }
 0x247   : > { %2264 = vmatmul.mubr.bf16.gmra.mrb[60].mxu1 %v17380_v39 }
 0x248   : > { %8608 = vmatmul.mubr.bf16.gmra.mrb[60].mxu0 %v17382_v18  ;;  %2903 = vmatprep.mubr.bf16.mxu1 %v15604_v40  ;;  %v15175_v40 = vld [vmem:[%s15446_s17 + $0x68] sm:$0xff] }
 0x249   : > { %8650 = vmatprep.mubr.bf16.mxu0 %v12560_v10  ;;  %v12462_v16 = vrot.slane %v15175_v40, 9  ;;  %v15176_v10 = vld [vmem:[%s15446_s17 + $0x88] sm:$0x11] }
 0x24a   : > { %v7572_v49 = vrot.slane %v15176_v10, 5  ;;  %v14694_v40 = vld [vmem:[%s18743_s1 + $0xa20] ss:$8 sps:$4 sm:$0xff]  }
 0x24b   : > { %v7567_v42 = vsel %vm16937_vm5, %v12462_v16, %v7566_v13  ;;  %v15178_v16 = vld [vmem:[%s15446_s17 + $0x98] sm:$0xff] }
 0x24f   : > { %2904 = vmatmul.mubr.bf16.vlgmr.msra.gmra.mrb[0].mxu1 %v15650_v48  ;;  %v7573_v48 = vsel %vm16937_vm5, %v7571_v5, %v7572_v49  ;;  %v12464_v5 = vrot.slane %v15178_v16, 9  ;;  %v14699_v49 = vld [vmem:[%s18743_s1 + $0xd34] ss:$8 sps:$4 sm:$0xff]  }
 0x250   : > { %8651 = vmatmul.mubr.bf16.vlgmr.msra.gmra.mrb[0].mxu0 %v12559_v31  ;;  %3065 = vmatpush1.bf16.msra.mxu1 %v14679_v3  ;;  %v15177_v31 = vld [vmem:[%s15446_s17 + $0xa8] sm:$0xff]  ;;  %v17430_v3 = vcombine.low %v7553_v54, %v7559_v29  ;;  %v17432_v13 = vcombine.high %v7567_v42, %v7573_v48  ;;  %v15179_v54 = vld [vmem:[%s15446_s17 + $0xb8] sm:$0x11] }
 0x251   : > { %9405 = vmatpush1.bf16.msra.mxu0 %v14682_v34  ;;  %2913 = vmatprep.mubr.bf16.mxu1 %v15656_v12  ;;  %v7580_v12 = vrot.slane %v15177_v31, 5  ;;  %v14691_v34 = vld [vmem:[%s18743_s1 + $0xd20] ss:$8 sps:$4 sm:$0xff]   ;;  %v7586_v29 = vrot.slane %v15179_v54, 5  ;;  %v14708_v31 = vld [vmem:[%s18743_s1 + $0xa44] ss:$8 sps:$4 sm:$0xff]  }
 0x252   : > { %8660 = vmatprep.mubr.bf16.mxu0 %v17400_v32  ;;  %3066 = vmatprep.subr.bf16.mxu1 %v14687_v61  ;;  %v14702_v61 = vld [vmem:[%s18743_s1 + $0xa34] ss:$8 sps:$4 sm:$0xff]  }
 0x253   : > { %9406 = vmatprep.subr.bf16.mxu0 %v14690_v7  ;;  %v7585_v10 = vrot.slane %v7580_v12, 4  ;;  %v7581_v7 = vsel %vm16937_vm5, %v12464_v5, %v7580_v12  ;;  %v17469_v12 = vcombine.low %v7567_v42, %v7573_v48  ;;  %v14711_v42 = vld [vmem:[%s18743_s1 + $0xd54] ss:$8 sps:$4 sm:$0xff]  }
 0x254   : > { %3067 = vmatpush1.bf16.msra.mxu1 %v14685_v0  ;;  %v14714_v48 = vld [vmem:[%s18743_s1 + $0xa54] ss:$8 sps:$4 sm:$0xff]  }
 0x255   : > { %9407 = vmatpush1.bf16.msra.mxu0 %v14688_v24  ;;  %3068 = vmatprep.subr.bf16.mxu1 %v14693_v50  ;;  %v7587_v0 = vsel %vm16937_vm5, %v7585_v10, %v7586_v29  ;;  %v15180_v24 = vld [vmem:[%s15446_s17 + $0xd8] sm:$0xff]  ;;  %v15182_v10 = vld [vmem:[%s15446_s17 + $0xe8] sm:$0x11] }
 0x256   : > { %9408 = vmatprep.subr.bf16.mxu0 %v14696_v14  ;;  %v7594_v50 = vrot.slane %v15180_v24, 5  ;;  %v14705_v14 = vld [vmem:[%s18743_s1 + $0xd44] ss:$8 sps:$4 sm:$0xff]   ;;  %v7600_v54 = vrot.slane %v15182_v10, 5  ;;  %v14703_v29 = vld [vmem:[%s18743_s1 + $0xd40] ss:$8 sps:$4 sm:$0xff]  }
 0x257   : > { %2914 = vmatmul.mubr.bf16.gmra.mrb[4].mxu1 %v15704_v51  ;;  %v14697_v51 = vld [vmem:[%s18743_s1 + $0xd30] ss:$8 sps:$4 sm:$0xff]  }
 0x258   : > { %8661 = vmatmul.mubr.bf16.gmra.mrb[4].mxu0 %v17430_v3  ;;  %2923 = vmatprep.mubr.bf16.mxu1 %v15709_v53  ;;  %v14700_v53 = vld [vmem:[%s18743_s1 + $0xa30] ss:$8 sps:$4 sm:$0xff]   ;;  %v7599_v5 = vrot.slane %v7594_v50, 4 }
 0x259   : > { %8670 = vmatprep.mubr.bf16.mxu0 %v17432_v13  ;;  %3069 = vmatpush1.bf16.msra.mxu1 %v14691_v34  ;;  %v17471_v34 = vcombine.high %v7581_v7, %v7587_v0 }
 0x25a   : > { %9409 = vmatpush1.bf16.msra.mxu0 %v14694_v40  ;;  %3070 = vmatprep.subr.bf16.mxu1 %v14699_v49  ;;  %v15181_v40 = vld [vmem:[%s15446_s17 + $0xc8] sm:$0xff] }
 0x25b   : > { %9410 = vmatprep.subr.bf16.mxu0 %v14702_v61  ;;  %v12466_v16 = vrot.slane %v15181_v40, 9  ;;  %v14706_v49 = vld [vmem:[%s18743_s1 + $0xa40] ss:$8 sps:$4 sm:$0xff]  }
 0x25d   : > { %3071 = vmatpush1.bf16.msra.mxu1 %v14697_v51  ;;  %v7595_v61 = vsel %vm16937_vm5, %v12466_v16, %v7594_v50  ;;  %v7601_v51 = vsel %vm16937_vm5, %v7599_v5, %v7600_v54  ;;  %v14717_v50 = vld [vmem:[%s18743_s1 + $0xd64] ss:$8 sps:$4 sm:$0xff]   ;;  %v15184_v16 = vld [vmem:[%s15446_s17 + $0xf8] sm:$0xff] }
 0x25e   : > { %9411 = vmatpush1.bf16.msra.mxu0 %v14700_v53  ;;  %3072 = vmatprep.subr.bf16.mxu1 %v14705_v14  ;;  %v15183_v53 = vld [vmem:[%s15446_s17 + $0x108] sm:$0xff]  ;;  %v17510_v40 = vcombine.high %v7595_v61, %v7601_v51  ;;  %v12468_v5 = vrot.slane %v15184_v16, 9  ;;  %v15185_v54 = vld [vmem:[%s15446_s17 + $0x118] sm:$0x11] }
 0x25f   : > { %9412 = vmatprep.subr.bf16.mxu0 %v14708_v31  ;;  %2924 = vmatmul.mubr.bf16.gmra.mrb[8].mxu1 %v15757_v27  ;;  %v7608_v24 = vrot.slane %v15183_v53, 5  ;;  %v14709_v27 = vld [vmem:[%s18743_s1 + $0xd50] ss:$8 sps:$4 sm:$0xff]   ;;  %v14720_v14 = vld [vmem:[%s18743_s1 + $0xa64] ss:$8 sps:$4 sm:$0xff]   ;;  %v17508_v31 = vcombine.low %v7581_v7, %v7587_v0 }
 0x260   : > { %8671 = vmatmul.mubr.bf16.gmra.mrb[8].mxu0 %v17469_v12  ;;  %2933 = vmatprep.mubr.bf16.mxu1 %v15768_v37  ;;  %v14712_v37 = vld [vmem:[%s18743_s1 + $0xa50] ss:$8 sps:$4 sm:$0xff]   ;;  %v14723_v7 = vld [vmem:[%s18743_s1 + $0xd74] ss:$8 sps:$4 sm:$0xff]  }
 0x261   : > { %8680 = vmatprep.mubr.bf16.mxu0 %v17471_v34  ;;  %3073 = vmatpush1.bf16.msra.mxu1 %v14703_v29  ;;  %v7613_v10 = vrot.slane %v7608_v24, 4  ;;  %v7614_v29 = vrot.slane %v15185_v54, 5  ;;  %v14726_v0 = vld [vmem:[%s18743_s1 + $0xa74] ss:$8 sps:$4 sm:$0xff]  }
 0x262   : > { %9413 = vmatpush1.bf16.msra.mxu0 %v14706_v49  ;;  %3074 = vmatprep.subr.bf16.mxu1 %v14711_v42  ;;  %v14715_v49 = vld [vmem:[%s18743_s1 + $0xd60] ss:$8 sps:$4 sm:$0xff]  }
 0x263   : > { %9414 = vmatprep.subr.bf16.mxu0 %v14714_v48  ;;  %v14718_v42 = vld [vmem:[%s18743_s1 + $0xa60] ss:$8 sps:$4 sm:$0xff]   ;;  %v7609_v48 = vsel %vm16937_vm5, %v12468_v5, %v7608_v24  ;;  %v7615_v53 = vsel %vm16937_vm5, %v7613_v10, %v7614_v29  ;;  %v14729_v24 = vld [vmem:[%s18743_s1 + $0xd84] ss:$8 sps:$4 sm:$0xff]  }
 0x264   : > { %v17549_v16 = vcombine.high %v7609_v48, %v7615_v53  ;;  %v15187_v5 = vld [vmem:[%s15446_s17 + $0x128] sm:$0xff] }
 0x265   : > { %3075 = vmatpush1.bf16.msra.mxu1 %v14709_v27  ;;  %v15186_v27 = vld [vmem:[%s15446_s17 + $0x138] sm:$0xff]  ;;  %v12470_v10 = vrot.slane %v15187_v5, 9  ;;  %v15188_v29 = vld [vmem:[%s15446_s17 + $0x148] sm:$0x11] }
 0x266   : > { %9415 = vmatpush1.bf16.msra.mxu0 %v14712_v37  ;;  %3076 = vmatprep.subr.bf16.mxu1 %v14717_v50  ;;  %v7622_v37 = vrot.slane %v15186_v27, 5  ;;  %v14732_v50 = vld [vmem:[%s18743_s1 + $0xa84] ss:$8 sps:$4 sm:$0xff]  }
 0x267   : > { %9416 = vmatprep.subr.bf16.mxu0 %v14720_v14  ;;  %2934 = vmatmul.mubr.bf16.gmra.mrb[12].mxu1 %v15810_v6  ;;  %v14721_v6 = vld [vmem:[%s18743_s1 + $0xd70] ss:$8 sps:$4 sm:$0xff]   ;;  %v17547_v14 = vcombine.low %v7595_v61, %v7601_v51  ;;  %v14735_v61 = vld [vmem:[%s18743_s1 + $0xd94] ss:$8 sps:$4 sm:$0xff]  }
 0x268   : > { %8681 = vmatmul.mubr.bf16.gmra.mrb[12].mxu0 %v17508_v31  ;;  %2943 = vmatprep.mubr.bf16.mxu1 %v15819_v11  ;;  %v14724_v11 = vld [vmem:[%s18743_s1 + $0xa70] ss:$8 sps:$4 sm:$0xff]   ;;  %v7627_v54 = vrot.slane %v7622_v37, 4  ;;  %v14738_v51 = vld [vmem:[%s18743_s1 + $0xa94] ss:$8 sps:$4 sm:$0xff]  }
 0x269   : > { %8690 = vmatprep.mubr.bf16.mxu0 %v17510_v40  ;;  %3077 = vmatpush1.bf16.msra.mxu1 %v14715_v49  ;;  %v7628_v49 = vrot.slane %v15188_v29, 5 }
 0x26a   : > { %9417 = vmatpush1.bf16.msra.mxu0 %v14718_v42  ;;  %3078 = vmatprep.subr.bf16.mxu1 %v14723_v7  ;;  %v14727_v42 = vld [vmem:[%s18743_s1 + $0xd80] ss:$8 sps:$4 sm:$0xff]  }
 0x26b   : > { %9418 = vmatprep.subr.bf16.mxu0 %v14726_v0  ;;  %v14730_v7 = vld [vmem:[%s18743_s1 + $0xa80] ss:$8 sps:$4 sm:$0xff]   ;;  %v7623_v0 = vsel %vm16937_vm5, %v12470_v10, %v7622_v37  ;;  %v7629_v27 = vsel %vm16937_vm5, %v7627_v54, %v7628_v49  ;;  %v14741_v37 = vld [vmem:[%s18743_s1 + $0xda4] ss:$8 sps:$4 sm:$0xff]   ;;  %v15190_v10 = vld [vmem:[%s15446_s17 + $0x158] sm:$0xff] }
 0x26c   : > { %v17588_v5 = vcombine.high %v7623_v0, %v7629_v27  ;;  %v12472_v54 = vrot.slane %v15190_v10, 9  ;;  %v15191_v49 = vld [vmem:[%s15446_s17 + $0x178] sm:$0x11] }
 0x26d   : > { %3079 = vmatpush1.bf16.msra.mxu1 %v14721_v6  ;;  %v15189_v6 = vld [vmem:[%s15446_s17 + $0x168] sm:$0xff] }
 0x26e   : > { %9419 = vmatpush1.bf16.msra.mxu0 %v14724_v11  ;;  %3080 = vmatprep.subr.bf16.mxu1 %v14729_v24  ;;  %v7636_v11 = vrot.slane %v15189_v6, 5  ;;  %v14744_v24 = vld [vmem:[%s18743_s1 + $0xaa4] ss:$8 sps:$4 sm:$0xff]  }
 0x26f   : > { %9420 = vmatprep.subr.bf16.mxu0 %v14732_v50  ;;  %2944 = vmatmul.mubr.bf16.gmra.mrb[16].mxu1 %v15867_v1  ;;  %v14733_v1 = vld [vmem:[%s18743_s1 + $0xd90] ss:$8 sps:$4 sm:$0xff]   ;;  %v17586_v50 = vcombine.low %v7609_v48, %v7615_v53  ;;  %v14747_v48 = vld [vmem:[%s18743_s1 + $0xdb4] ss:$8 sps:$4 sm:$0xff]  }
 0x270   : > { %8691 = vmatmul.mubr.bf16.gmra.mrb[16].mxu0 %v17547_v14  ;;  %2953 = vmatprep.mubr.bf16.mxu1 %v19099_v28  ;;  %v14736_v28 = vld [vmem:[%s18743_s1 + $0xa90] ss:$8 sps:$4 sm:$0xff]   ;;  %v7641_v29 = vrot.slane %v7636_v11, 4  ;;  %v14750_v53 = vld [vmem:[%s18743_s1 + $0xab4] ss:$8 sps:$4 sm:$0xff]  }
 0x271   : > { %8700 = vmatprep.mubr.bf16.mxu0 %v17549_v16  ;;  %3081 = vmatpush1.bf16.msra.mxu1 %v14727_v42  ;;  %v7642_v42 = vrot.slane %v15191_v49, 5 }
 0x272   : > { %9421 = vmatpush1.bf16.msra.mxu0 %v14730_v7  ;;  %3082 = vmatprep.subr.bf16.mxu1 %v14735_v61  ;;  %v14739_v7 = vld [vmem:[%s18743_s1 + $0xda0] ss:$8 sps:$4 sm:$0xff]  }
 0x273   : > { %9422 = vmatprep.subr.bf16.mxu0 %v14738_v51  ;;  %v14742_v61 = vld [vmem:[%s18743_s1 + $0xaa0] ss:$8 sps:$4 sm:$0xff]   ;;  %v7637_v51 = vsel %vm16937_vm5, %v12472_v54, %v7636_v11  ;;  %v7643_v6 = vsel %vm16937_vm5, %v7641_v29, %v7642_v42  ;;  %v14753_v11 = vld [vmem:[%s18743_s1 + $0xdc4] ss:$8 sps:$4 sm:$0xff]  }
 0x274   : > { %v17627_v10 = vcombine.high %v7637_v51, %v7643_v6  ;;  %v15193_v54 = vld [vmem:[%s15446_s17 + $0x188] sm:$0xff] }
 0x275   : > { %3083 = vmatpush1.bf16.msra.mxu1 %v14733_v1  ;;  %v15192_v1 = vld [vmem:[%s15446_s17 + $0x198] sm:$0xff]  ;;  %v12474_v29 = vrot.slane %v15193_v54, 9  ;;  %v15194_v42 = vld [vmem:[%s15446_s17 + $0x1a8] sm:$0x11] }
 0x276   : > { %9423 = vmatpush1.bf16.msra.mxu0 %v14736_v28  ;;  %3084 = vmatprep.subr.bf16.mxu1 %v14741_v37  ;;  %v7650_v28 = vrot.slane %v15192_v1, 5  ;;  %v14756_v37 = vld [vmem:[%s18743_s1 + $0xac4] ss:$8 sps:$4 sm:$0xff]  }
 0x277   : > { %9424 = vmatprep.subr.bf16.mxu0 %v14744_v24  ;;  %2954 = vmatmul.mubr.bf16.gmra.mrb[20].mxu1 %v19101_v19  ;;  %v14745_v19 = vld [vmem:[%s18743_s1 + $0xdb0] ss:$8 sps:$4 sm:$0xff]   ;;  %v17625_v24 = vcombine.low %v7623_v0, %v7629_v27  ;;  %v14759_v0 = vld [vmem:[%s18743_s1 + $0xdd4] ss:$8 sps:$4 sm:$0xff]  }
 0x278   : > { %8701 = vmatmul.mubr.bf16.gmra.mrb[20].mxu0 %v17586_v50  ;;  %2963 = vmatprep.mubr.bf16.mxu1 %v19103_v45  ;;  %v14748_v45 = vld [vmem:[%s18743_s1 + $0xab0] ss:$8 sps:$4 sm:$0xff]   ;;  %v7655_v49 = vrot.slane %v7650_v28, 4  ;;  %v14762_v27 = vld [vmem:[%s18743_s1 + $0xad4] ss:$8 sps:$4 sm:$0xff]  }
 0x279   : > { %8710 = vmatprep.mubr.bf16.mxu0 %v17588_v5  ;;  %3085 = vmatpush1.bf16.msra.mxu1 %v14739_v7  ;;  %v7656_v7 = vrot.slane %v15194_v42, 5 }
 0x27a   : > { %9425 = vmatpush1.bf16.msra.mxu0 %v14742_v61  ;;  %3086 = vmatprep.subr.bf16.mxu1 %v14747_v48  ;;  %v14751_v61 = vld [vmem:[%s18743_s1 + $0xdc0] ss:$8 sps:$4 sm:$0xff]  }
 0x27b   : > { %9426 = vmatprep.subr.bf16.mxu0 %v14750_v53  ;;  %v14754_v48 = vld [vmem:[%s18743_s1 + $0xac0] ss:$8 sps:$4 sm:$0xff]   ;;  %v7651_v53 = vsel %vm16937_vm5, %v12474_v29, %v7650_v28  ;;  %v7657_v1 = vsel %vm16937_vm5, %v7655_v49, %v7656_v7  ;;  %v14765_v28 = vld [vmem:[%s18743_s1 + $0xde4] ss:$8 sps:$4 sm:$0xff]   ;;  %v15196_v29 = vld [vmem:[%s15446_s17 + $0x1b8] sm:$0xff] }
 0x27c   : > { %v17666_v54 = vcombine.high %v7651_v53, %v7657_v1  ;;  %v12476_v49 = vrot.slane %v15196_v29, 9  ;;  %v15197_v7 = vld [vmem:[%s15446_s17 + $0x1d8] sm:$0x11] }
 0x27d   : > { %3087 = vmatpush1.bf16.msra.mxu1 %v14745_v19  ;;  %v15195_v19 = vld [vmem:[%s15446_s17 + $0x1c8] sm:$0xff] }
 0x27e   : > { %9427 = vmatpush1.bf16.msra.mxu0 %v14748_v45  ;;  %3088 = vmatprep.subr.bf16.mxu1 %v14753_v11  ;;  %v7664_v45 = vrot.slane %v15195_v19, 5  ;;  %v14768_v11 = vld [vmem:[%s18743_s1 + $0xae4] ss:$8 sps:$4 sm:$0xff]  }
 0x27f   : > { %9428 = vmatprep.subr.bf16.mxu0 %v14756_v37  ;;  %2964 = vmatmul.mubr.bf16.gmra.mrb[24].mxu1 %v15963_v36  ;;  %v14757_v36 = vld [vmem:[%s18743_s1 + $0xdd0] ss:$8 sps:$4 sm:$0xff]   ;;  %v17664_v37 = vcombine.low %v7637_v51, %v7643_v6  ;;  %v14773_v51 = vld [vmem:[%s18743_s1 + $0xdf4] ss:$8 sps:$4 sm:$0xff]  }
 0x280   : > { %8711 = vmatmul.mubr.bf16.gmra.mrb[24].mxu0 %v17625_v24  ;;  %2973 = vmatprep.mubr.bf16.mxu1 %v19105_v25  ;;  %v14760_v25 = vld [vmem:[%s18743_s1 + $0xad0] ss:$8 sps:$4 sm:$0xff]   ;;  %v7669_v42 = vrot.slane %v7664_v45, 4  ;;  %v14776_v6 = vld [vmem:[%s18743_s1 + $0xaf4] ss:$8 sps:$4 sm:$0xff]  }
 0x281   : > { %8720 = vmatprep.mubr.bf16.mxu0 %v17627_v10  ;;  %3089 = vmatpush1.bf16.msra.mxu1 %v14751_v61  ;;  %v7670_v61 = vrot.slane %v15197_v7, 5 }
 0x282   : > { %9429 = vmatpush1.bf16.msra.mxu0 %v14754_v48  ;;  %3090 = vmatprep.subr.bf16.mxu1 %v14759_v0  ;;  %v14763_v48 = vld [vmem:[%s18743_s1 + $0xde0] ss:$8 sps:$4 sm:$0xff]  }
 0x283   : > { %9430 = vmatprep.subr.bf16.mxu0 %v14762_v27  ;;  %v14766_v0 = vld [vmem:[%s18743_s1 + $0xae0] ss:$8 sps:$4 sm:$0xff]   ;;  %v7665_v27 = vsel %vm16937_vm5, %v12476_v49, %v7664_v45  ;;  %v7671_v19 = vsel %vm16937_vm5, %v7669_v42, %v7670_v61  ;;  %v14779_v45 = vld [vmem:[%s18743_s1 + $0x204] ss:$8 sps:$4 sm:$0xff]  }
 0x284   : > { %v17705_v29 = vcombine.high %v7665_v27, %v7671_v19  ;;  %v15199_v49 = vld [vmem:[%s15446_s17 + $0x1e8] sm:$0xff] }
 0x285   : > { %3091 = vmatpush1.bf16.msra.mxu1 %v14757_v36  ;;  %v15198_v36 = vld [vmem:[%s15446_s17 + $0x1f8] sm:$0xff]  ;;  %v12478_v42 = vrot.slane %v15199_v49, 9  ;;  %v15200_v61 = vld [vmem:[%s15446_s17 + $0x208] sm:$0x11] }
 0x286   : > { %9431 = vmatpush1.bf16.msra.mxu0 %v14760_v25  ;;  %3092 = vmatprep.subr.bf16.mxu1 %v14765_v28  ;;  %v7678_v25 = vrot.slane %v15198_v36, 5  ;;  %v14782_v28 = vld [vmem:[%s18743_s1 + $0xb04] ss:$8 sps:$4 sm:$0xff]  }
 0x287   : > { %9432 = vmatprep.subr.bf16.mxu0 %v14768_v11  ;;  %2974 = vmatmul.mubr.bf16.gmra.mrb[28].mxu1 %v19107_v63  ;;  %v14771_v63 = vld [vmem:[%s18743_s1 + $0xdf0] ss:$8 sps:$4 sm:$0xff]   ;;  %v17703_v11 = vcombine.low %v7651_v53, %v7657_v1 }
 0x288   : > { %8721 = vmatmul.mubr.bf16.gmra.mrb[28].mxu0 %v17664_v37  ;;  %2983 = vmatprep.mubr.bf16.mxu1 %v19109_v26  ;;  %v14774_v26 = vld [vmem:[%s18743_s1 + $0xaf0] ss:$8 sps:$4 sm:$0xff]   ;;  %v7683_v7 = vrot.slane %v7678_v25, 4  ;;  %v7679_v53 = vsel %vm16937_vm5, %v12478_v42, %v7678_v25 }
 0x289   : > { %8730 = vmatprep.mubr.bf16.mxu0 %v17666_v54  ;;  %3093 = vmatpush1.bf16.msra.mxu1 %v14763_v48  ;;  %v7684_v48 = vrot.slane %v15200_v61, 5  ;;  %v15204_v25 = vld [vmem:[%s15446_s17 + $0x258] sm:$0xff] }
 0x28a   : > { %9433 = vmatpush1.bf16.msra.mxu0 %v14766_v0  ;;  %3094 = vmatprep.subr.bf16.mxu1 %v14773_v51  ;;  %v15201_v0 = vld [vmem:[%s15446_s17 + $0x228] sm:$0xff] }
 0x28b   : > { %9434 = vmatprep.subr.bf16.mxu0 %v14776_v6  ;;  %v7685_v1 = vsel %vm16937_vm5, %v7683_v7, %v7684_v48  ;;  %v7692_v51 = vrot.slane %v15201_v0, 5  ;;  %v17718_v6 = vcombine.low %v7665_v27, %v7671_v19  ;;  %v15207_v0 = vld [vmem:[%s15446_s17 + $0x288] sm:$0xff] }
 0x28c   : > { %v17720_v36 = vcombine.high %v7679_v53, %v7685_v1  ;;  %v17733_v49 = vcombine.low %v7679_v53, %v7685_v1 }
 0x28d   : > { %3095 = vmatpush1.bf16.msra.mxu1 %v14771_v63  ;;  %19180 = vst [vmem:[#allocation112_spill] sm:$0xff] %v17718_v6 }
 0x28e   : > { %9435 = vmatpush1.bf16.msra.mxu0 %v14774_v26  ;;  %4957 = vmatprep.subr.bf16.mxu1 %v14779_v45  ;;  %19181 = vst [vmem:[#allocation113_spill] sm:$0xff] %v17720_v36  ;;  %v7697_v26 = vrot.slane %v7692_v51, 4  ;;  %19182 = vst [vmem:[#allocation114_spill] sm:$0xff] %v17733_v49 }
 0x28f   : > { %9597 = vmatprep.subr.bf16.mxu0 %v14782_v28  ;;  %2984 = vmatmul.mubr.bf16.gmra.mrb[32].mxu1 %v19111_v38  ;;  %v15202_v38 = vld [vmem:[%s15446_s17 + $0x218] sm:$0xff]  ;;  %v7706_v28 = vrot.slane %v15204_v25, 5 }
 0x290   : > { %8731 = vmatmul.mubr.bf16.gmra.mrb[32].mxu0 %v17703_v11  ;;  %2993 = vmatprep.mubr.bf16.mxu1 %v19113_v15  ;;  %v12480_v63 = vrot.slane %v15202_v38, 9  ;;  %v15203_v15 = vld [vmem:[%s15446_s17 + $0x238] sm:$0x11] }
 0x291   : > { %8740 = vmatprep.mubr.bf16.mxu0 %v17705_v29  ;;  %v7698_v45 = vrot.slane %v15203_v15, 5  ;;  %v7711_v61 = vrot.slane %v7706_v28, 4  ;;  %v15210_v25 = vld [vmem:[%s15446_s17 + $0x2b8] sm:$0xff] }
 0x292   : > { %v7693_v27 = vsel %vm16937_vm5, %v12480_v63, %v7692_v51  ;;  %v7720_v51 = vrot.slane %v15207_v0, 5  ;;  %v15213_v0 = vld [vmem:[%s15446_s17 + $0x2e8] sm:$0xff] }
 0x293   : > { %v7699_v19 = vsel %vm16937_vm5, %v7697_v26, %v7698_v45 }
 0x294   : > { %v17735_v42 = vcombine.high %v7693_v27, %v7699_v19  ;;  %v17748_v38 = vcombine.low %v7693_v27, %v7699_v19  ;;  %v7725_v15 = vrot.slane %v7720_v51, 4 }
 0x296   : > { %19183 = vst [vmem:[#allocation115_spill] sm:$0xff] %v17735_v42  ;;  %19184 = vst [vmem:[#allocation116_spill] sm:$0xff] %v17748_v38 }
 0x297   : > { %2994 = vmatmul.mubr.bf16.gmra.mrb[36].mxu1 %v19115_v17  ;;  %v15205_v17 = vld [vmem:[%s15446_s17 + $0x248] sm:$0xff] }
 0x298   : > { %8741 = vmatmul.mubr.bf16.gmra.mrb[36].mxu0 %v17718_v6  ;;  %3003 = vmatprep.mubr.bf16.mxu1 %v19117_v2  ;;  %v12482_v7 = vrot.slane %v15205_v17, 9  ;;  %v15206_v2 = vld [vmem:[%s15446_s17 + $0x268] sm:$0x11] }
 0x299   : > { %8750 = vmatprep.mubr.bf16.mxu0 %v17720_v36  ;;  %v7712_v48 = vrot.slane %v15206_v2, 5 }
 0x29a   : > { %v7707_v53 = vsel %vm16937_vm5, %v12482_v7, %v7706_v28  ;;  %v7734_v28 = vrot.slane %v15210_v25, 5 }
 0x29b   : > { %v7713_v1 = vsel %vm16937_vm5, %v7711_v61, %v7712_v48 }
 0x29c   : > { %v17750_v63 = vcombine.high %v7707_v53, %v7713_v1  ;;  %v17763_v17 = vcombine.low %v7707_v53, %v7713_v1  ;;  %v7739_v2 = vrot.slane %v7734_v28, 4 }
 0x29e   : > { %19185 = vst [vmem:[#allocation117_spill] sm:$0xff] %v17750_v63  ;;  %19186 = vst [vmem:[#allocation118_spill] sm:$0xff] %v17763_v17 }
 0x29f   : > { %3004 = vmatmul.mubr.bf16.gmra.mrb[40].mxu1 %v19119_v4  ;;  %v15208_v4 = vld [vmem:[%s15446_s17 + $0x278] sm:$0xff] }
 0x2a0   : > { %8751 = vmatmul.mubr.bf16.gmra.mrb[40].mxu0 %v17733_v49  ;;  %3013 = vmatprep.mubr.bf16.mxu1 %v19121_v59  ;;  %v12484_v26 = vrot.slane %v15208_v4, 9  ;;  %v15209_v59 = vld [vmem:[%s15446_s17 + $0x298] sm:$0x11] }
 0x2a1   : > { %8760 = vmatprep.mubr.bf16.mxu0 %v17735_v42  ;;  %v7726_v45 = vrot.slane %v15209_v59, 5 }
 0x2a2   : > { %v7721_v27 = vsel %vm16937_vm5, %v12484_v26, %v7720_v51  ;;  %v7748_v51 = vrot.slane %v15213_v0, 5  ;;  %v14797_v0 = vld [vmem:[%s18743_s1 + $0x234] ss:$8 sps:$4 sm:$0xff]  }
 0x2a3   : > { %v7727_v19 = vsel %vm16937_vm5, %v7725_v15, %v7726_v45 }
 0x2a4   : > { %v17765_v7 = vcombine.high %v7721_v27, %v7727_v19  ;;  %v17778_v4 = vcombine.low %v7721_v27, %v7727_v19  ;;  %v7753_v59 = vrot.slane %v7748_v51, 4 }
 0x2a6   : > { %19187 = vst [vmem:[#allocation119_spill] sm:$0xff] %v17765_v7  ;;  %19188 = vst [vmem:[#allocation120_spill] sm:$0xff] %v17778_v4 }
 0x2a7   : > { %3014 = vmatmul.mubr.bf16.gmra.mrb[44].mxu1 %v19123_v55  ;;  %v15211_v55 = vld [vmem:[%s15446_s17 + $0x2a8] sm:$0xff] }
 0x2a8   : > { %8761 = vmatmul.mubr.bf16.gmra.mrb[44].mxu0 %v17748_v38  ;;  %3023 = vmatprep.mubr.bf16.mxu1 %v19125_v60  ;;  %v12486_v61 = vrot.slane %v15211_v55, 9  ;;  %v15212_v60 = vld [vmem:[%s15446_s17 + $0x2c8] sm:$0x11]  ;;  %v15217_v55 = vld [vmem:[%s15446_s17 + $0x340] sm:$0xff] }
 0x2a9   : > { %8770 = vmatprep.mubr.bf16.mxu0 %v17750_v63  ;;  %v7740_v48 = vrot.slane %v15212_v60, 5  ;;  %v14777_v60 = vld [vmem:[%s18743_s1 + $0x200] ss:$8 sps:$4 sm:$0xff]  }
 0x2aa   : > { %v7735_v53 = vsel %vm16937_vm5, %v12486_v61, %v7734_v28  ;;  %v15216_v28 = vld [vmem:[%s15446_s17 + $0x330] sm:$0xff] }
 0x2ab   : > { %v7741_v1 = vsel %vm16937_vm5, %v7739_v2, %v7740_v48  ;;  %v11934_v61 = vcombine.high %v15216_v28, %v15217_v55  ;;  %v14785_v48 = vld [vmem:[%s18743_s1 + $0x214] ss:$8 sps:$4 sm:$0xff]  }
 0x2ac   : > { %v17780_v26 = vcombine.high %v7735_v53, %v7741_v1  ;;  %v17792_v19 = vcombine.low %v7735_v53, %v7741_v1  ;;  %v14788_v53 = vld [vmem:[%s18743_s1 + $0xb14] ss:$8 sps:$4 sm:$0xff]   ;;  %v14789_v1 = vld [vmem:[%s18743_s1 + $0x220] ss:$8 sps:$4 sm:$0xff]  }
 0x2ae   : > { %19189 = vst [vmem:[#allocation121_spill] sm:$0xff] %v17780_v26  ;;  %19190 = vst [vmem:[#allocation122_spill] sm:$0xff] %v17792_v19 }
 0x2af   : > { %3024 = vmatmul.mubr.bf16.gmra.mrb[48].mxu1 %v19127_v57  ;;  %v15214_v57 = vld [vmem:[%s15446_s17 + $0x2d8] sm:$0xff] }
 0x2b0   : > { %8771 = vmatmul.mubr.bf16.gmra.mrb[48].mxu0 %v17763_v17  ;;  %3033 = vmatprep.mubr.bf16.mxu1 %v19129_v58  ;;  %v12488_v15 = vrot.slane %v15214_v57, 9  ;;  %v15215_v58 = vld [vmem:[%s15446_s17 + $0x2f8] sm:$0x11] }
 0x2b1   : > { %8780 = vmatprep.mubr.bf16.mxu0 %v17765_v7  ;;  %v7754_v45 = vrot.slane %v15215_v58, 5  ;;  %v19192_v57 = vld [vmem:[#allocation18_spill] sm:$0xff] }
 0x2b2   : > { %v7749_v25 = vsel %vm16937_vm5, %v12488_v15, %v7748_v51  ;;  %v14800_v51 = vld [vmem:[%s18743_s1 + $0xb34] ss:$8 sps:$4 sm:$0xff]   ;;  %v14795_v58 = vld [vmem:[%s18743_s1 + $0x230] ss:$8 sps:$4 sm:$0xff]  }
 0x2b3   : > { %v7755_v27 = vsel %vm16937_vm5, %v7753_v59, %v7754_v45  ;;  %v19193_v15 = vld [vmem:[#allocation62_spill] sm:$0xff]  ;;  %v19194_v59 = vld [vmem:[#allocation20_spill] sm:$0xff] }
 0x2b4   : > { %v17796_v2 = vcombine.high %v7749_v25, %v7755_v27  ;;  %v14798_v45 = vld [vmem:[%s18743_s1 + $0xb30] ss:$8 sps:$4 sm:$0xff]  }
 0x2b6   : > { %19191 = vst [vmem:[#allocation123_spill] sm:$0xff] %v17796_v2 }
 0x2b7   : > { %3034 = vmatmul.mubr.bf16.gmra.mrb[52].mxu1 %v16131_v41  ;;  %v11933_v41 = vcombine.low %v15216_v28, %v15217_v55  ;;  %v14804_v28 = vld [vmem:[%s18743_s1 + $0xb40] ss:$8 sps:$4 sm:$0xff]   ;;  %v14809_v55 = vld [vmem:[%s18743_s1 + $0x254] ss:$8 sps:$4 sm:$0xff]  }
 0x2b8   : > { %8781 = vmatmul.mubr.bf16.gmra.mrb[52].mxu0 %v17778_v4  ;;  %3043 = vmatprep.mubr.bf16.mxu1 %v16934_v52  ;;  %v17801_v52 = vcombine.low %v7749_v25, %v7755_v27  ;;  %v14806_v25 = vld [vmem:[%s18743_s1 + $0xb44] ss:$8 sps:$4 sm:$0xff]   ;;  %v14801_v27 = vld [vmem:[%s18743_s1 + $0x240] ss:$8 sps:$4 sm:$0xff]  }
 0x2b9   : > { %8790 = vmatprep.mubr.bf16.mxu0 %v17780_v26 }
 0x2bf   : > { %3044 = vmatmul.mubr.bf16.gmra.mrb[56].mxu1 %v16951_v33  ;;  %v14780_v33 = vld [vmem:[%s18743_s1 + $0xb00] ss:$8 sps:$4 sm:$0xff]  }
 0x2c0   : > { %8791 = vmatmul.mubr.bf16.gmra.mrb[56].mxu0 %v17792_v19  ;;  %3053 = vmatprep.mubr.bf16.mxu1 %v11934_v61  ;;  %v14812_v61 = vld [vmem:[%s18743_s1 + $0xb54] ss:$8 sps:$4 sm:$0xff]  }
 0x2c1   : > { %8800 = vmatprep.mubr.bf16.mxu0 %v17796_v2 }
 0x2c7   : > { %3054 = vmatmul.mubr.bf16.gmra.mrb[60].mxu1 %v11933_v41  ;;  %v19195_v41 = vld [vmem:[#allocation64_spill] sm:$0xff] }
 0x2c8   : > { %8801 = vmatmul.mubr.bf16.gmra.mrb[60].mxu0 %v17801_v52  ;;  %3096 = vmatprep.mubr.bf16.mxu1 %v16200_v35  ;;  %v14783_v35 = vld [vmem:[%s18743_s1 + $0x210] ss:$8 sps:$4 sm:$0xff]  }
 0x2c9   : > { %9436 = vmatprep.mubr.bf16.mxu0 %v16968_v23  ;;  %v14786_v23 = vld [vmem:[%s18743_s1 + $0xb10] ss:$8 sps:$4 sm:$0xff]  }
 0x2cf   : > { %3097 = vmatmul.mubr.bf16.vlgmr.msra.gmra.mrb[0].mxu1 %v19133_v21  ;;  %v14791_v21 = vld [vmem:[%s18743_s1 + $0x224] ss:$8 sps:$4 sm:$0xff]  }
 0x2d0   : > { %9437 = vmatmul.mubr.bf16.vlgmr.msra.gmra.mrb[0].mxu0 %v16998_v43  ;;  %4958 = vmatpush1.bf16.msra.mxu1 %v14777_v60  ;;  %v14794_v43 = vld [vmem:[%s18743_s1 + $0xb24] ss:$8 sps:$4 sm:$0xff]   ;;  %v19196_v60 = vld [vmem:[#allocation22_spill] sm:$0xff] }
 0x2d1   : > { %9598 = vmatpush1.bf16.msra.mxu0 %v14780_v33  ;;  %3106 = vmatprep.mubr.bf16.mxu1 %v19134_v22  ;;  %v14792_v22 = vld [vmem:[%s18743_s1 + $0xb20] ss:$8 sps:$4 sm:$0xff]   ;;  %v19197_v33 = vld [vmem:[#allocation66_spill] sm:$0xff] }
 0x2d2   : > { %9446 = vmatprep.mubr.bf16.mxu0 %v17000_v30  ;;  %4959 = vmatprep.subr.bf16.mxu1 %v14785_v48  ;;  %v19198_v48 = vld [vmem:[#allocation24_spill] sm:$0xff] }
 0x2d3   : > { %9599 = vmatprep.subr.bf16.mxu0 %v14788_v53  ;;  %v14807_v53 = vld [vmem:[%s18743_s1 + $0x250] ss:$8 sps:$4 sm:$0xff]  }
 0x2d4   : > { %4960 = vmatpush1.bf16.msra.mxu1 %v14783_v35  ;;  %v14810_v35 = vld [vmem:[%s18743_s1 + $0xb50] ss:$8 sps:$4 sm:$0xff]  }
 0x2d5   : > { %9600 = vmatpush1.bf16.msra.mxu0 %v14786_v23  ;;  %4961 = vmatprep.subr.bf16.mxu1 %v14791_v21  ;;  %v14815_v23 = vld [vmem:[%s18743_s1 + $0x264] ss:$8 sps:$4 sm:$0xff]  }
 0x2d6   : > { %9601 = vmatprep.subr.bf16.mxu0 %v14794_v43  ;;  %v14818_v21 = vld [vmem:[%s18743_s1 + $0xb64] ss:$8 sps:$4 sm:$0xff]   ;;  %v14813_v43 = vld [vmem:[%s18743_s1 + $0x260] ss:$8 sps:$4 sm:$0xff]  }
 0x2d7   : > { %3107 = vmatmul.mubr.bf16.gmra.mrb[4].mxu1 %v19137_v44  ;;  %v14803_v44 = vld [vmem:[%s18743_s1 + $0x244] ss:$8 sps:$4 sm:$0xff]  }
 0x2d8   : > { %9447 = vmatmul.mubr.bf16.gmra.mrb[4].mxu0 %v19192_v57  ;;  %3116 = vmatprep.mubr.bf16.mxu1 %v19193_v15  ;;  %v19200_v15 = vld [vmem:[#allocation27_spill] sm:$0xff] }
 0x2d9   : > { %9456 = vmatprep.mubr.bf16.mxu0 %v19194_v59  ;;  %4962 = vmatpush1.bf16.msra.mxu1 %v14789_v1  ;;  %v14816_v1 = vld [vmem:[%s18743_s1 + $0xb60] ss:$8 sps:$4 sm:$0xff]  }
 0x2da   : > { %9602 = vmatpush1.bf16.msra.mxu0 %v14792_v22  ;;  %4963 = vmatprep.subr.bf16.mxu1 %v14797_v0  ;;  %v14821_v22 = vld [vmem:[%s18743_s1 + $0x274] ss:$8 sps:$4 sm:$0xff]  }
 0x2db   : > { %9603 = vmatprep.subr.bf16.mxu0 %v14800_v51  ;;  %v14824_v0 = vld [vmem:[%s18743_s1 + $0xb74] ss:$8 sps:$4 sm:$0xff]   ;;  %v19199_v51 = vld [vmem:[#allocation68_spill] sm:$0xff] }
 0x2dd   : > { %4964 = vmatpush1.bf16.msra.mxu1 %v14795_v58  ;;  %v19201_v58 = vld [vmem:[#allocation70_spill] sm:$0xff] }
 0x2de   : > { %9604 = vmatpush1.bf16.msra.mxu0 %v14798_v45  ;;  %4965 = vmatprep.subr.bf16.mxu1 %v14803_v44  ;;  %v19202_v45 = vld [vmem:[#allocation29_spill] sm:$0xff] }
 0x2df   : > { %9605 = vmatprep.subr.bf16.mxu0 %v14806_v25  ;;  %3117 = vmatmul.mubr.bf16.gmra.mrb[8].mxu1 %v19195_v41  ;;  %v14819_v44 = vld [vmem:[%s18743_s1 + $0x270] ss:$8 sps:$4 sm:$0xff]   ;;  %v14833_v41 = vld [vmem:[%s18743_s1 + $0x294] ss:$8 sps:$4 sm:$0xff]  }
 0x2e0   : > { %9457 = vmatmul.mubr.bf16.gmra.mrb[8].mxu0 %v19196_v60  ;;  %3126 = vmatprep.mubr.bf16.mxu1 %v19197_v33  ;;  %v14822_v25 = vld [vmem:[%s18743_s1 + $0xb70] ss:$8 sps:$4 sm:$0xff]   ;;  %v14836_v33 = vld [vmem:[%s18743_s1 + $0xb94] ss:$8 sps:$4 sm:$0xff]  }
 0x2e1   : > { %9466 = vmatprep.mubr.bf16.mxu0 %v19198_v48  ;;  %4966 = vmatpush1.bf16.msra.mxu1 %v14801_v27  ;;  %v14827_v27 = vld [vmem:[%s18743_s1 + $0x284] ss:$8 sps:$4 sm:$0xff]  }
 0x2e2   : > { %9606 = vmatpush1.bf16.msra.mxu0 %v14804_v28  ;;  %4967 = vmatprep.subr.bf16.mxu1 %v14809_v55  ;;  %v14830_v28 = vld [vmem:[%s18743_s1 + $0xb84] ss:$8 sps:$4 sm:$0xff]   ;;  %v14825_v55 = vld [vmem:[%s18743_s1 + $0x280] ss:$8 sps:$4 sm:$0xff]  }
 0x2e3   : > { %9607 = vmatprep.subr.bf16.mxu0 %v14812_v61  ;;  %v14828_v61 = vld [vmem:[%s18743_s1 + $0xb80] ss:$8 sps:$4 sm:$0xff]  }
 0x2e5   : > { %4968 = vmatpush1.bf16.msra.mxu1 %v14807_v53  ;;  %v19203_v53 = vld [vmem:[#allocation72_spill] sm:$0xff] }
 0x2e6   : > { %9608 = vmatpush1.bf16.msra.mxu0 %v14810_v35  ;;  %4969 = vmatprep.subr.bf16.mxu1 %v14815_v23  ;;  %v19204_v35 = vld [vmem:[#allocation31_spill] sm:$0xff]  ;;  %v19205_v23 = vld [vmem:[#allocation74_spill] sm:$0xff] }
 0x2e7   : > { %9609 = vmatprep.subr.bf16.mxu0 %v14818_v21  ;;  %3127 = vmatmul.mubr.bf16.gmra.mrb[12].mxu1 %v19199_v51  ;;  %v19206_v21 = vld [vmem:[#allocation33_spill] sm:$0xff]  ;;  %v14837_v51 = vld [vmem:[%s18743_s1 + $0x2a0] ss:$8 sps:$4 sm:$0xff]  }
 0x2e8   : > { %9467 = vmatmul.mubr.bf16.gmra.mrb[12].mxu0 %v19200_v15  ;;  %3136 = vmatprep.mubr.bf16.mxu1 %v19201_v58  ;;  %v14840_v58 = vld [vmem:[%s18743_s1 + $0xba0] ss:$8 sps:$4 sm:$0xff]  }
 0x2e9   : > { %9476 = vmatprep.mubr.bf16.mxu0 %v19202_v45  ;;  %4970 = vmatpush1.bf16.msra.mxu1 %v14813_v43  ;;  %v14831_v43 = vld [vmem:[%s18743_s1 + $0x290] ss:$8 sps:$4 sm:$0xff]  }
 0x2ea   : > { %9610 = vmatpush1.bf16.msra.mxu0 %v14816_v1  ;;  %4971 = vmatprep.subr.bf16.mxu1 %v14821_v22  ;;  %v14834_v1 = vld [vmem:[%s18743_s1 + $0xb90] ss:$8 sps:$4 sm:$0xff]   ;;  %v14839_v22 = vld [vmem:[%s18743_s1 + $0x2a4] ss:$8 sps:$4 sm:$0xff]  }
 0x2eb   : > { %9611 = vmatprep.subr.bf16.mxu0 %v14824_v0  ;;  %v14842_v0 = vld [vmem:[%s18743_s1 + $0xba4] ss:$8 sps:$4 sm:$0xff]  }
 0x2ed   : > { %4972 = vmatpush1.bf16.msra.mxu1 %v14819_v44  ;;  %v14845_v44 = vld [vmem:[%s18743_s1 + $0x2b4] ss:$8 sps:$4 sm:$0xff]  }
 0x2ee   : > { %9612 = vmatpush1.bf16.msra.mxu0 %v14822_v25  ;;  %4973 = vmatprep.subr.bf16.mxu1 %v14827_v27  ;;  %v14848_v25 = vld [vmem:[%s18743_s1 + $0xbb4] ss:$8 sps:$4 sm:$0xff]   ;;  %v19207_v27 = vld [vmem:[#allocation76_spill] sm:$0xff] }
 0x2ef   : > { %9613 = vmatprep.subr.bf16.mxu0 %v14830_v28  ;;  %3137 = vmatmul.mubr.bf16.gmra.mrb[16].mxu1 %v19203_v53  ;;  %v19208_v28 = vld [vmem:[#allocation35_spill] sm:$0xff] }
 0x2f0   : > { %9477 = vmatmul.mubr.bf16.gmra.mrb[16].mxu0 %v19204_v35  ;;  %3146 = vmatprep.mubr.bf16.mxu1 %v19205_v23  ;;  %v14851_v53 = vld [vmem:[%s18743_s1 + $0x2c4] ss:$8 sps:$4 sm:$0xff]  }
 0x2f1   : > { %9486 = vmatprep.mubr.bf16.mxu0 %v19206_v21  ;;  %4974 = vmatpush1.bf16.msra.mxu1 %v14825_v55  ;;  %v19209_v55 = vld [vmem:[#allocation78_spill] sm:$0xff]  ;;  %v14854_v23 = vld [vmem:[%s18743_s1 + $0xbc4] ss:$8 sps:$4 sm:$0xff]  }
 0x2f2   : > { %9614 = vmatpush1.bf16.msra.mxu0 %v14828_v61  ;;  %4975 = vmatprep.subr.bf16.mxu1 %v14833_v41  ;;  %v19210_v61 = vld [vmem:[#allocation37_spill] sm:$0xff]  ;;  %v18067_v21 = vld [vmem:[%s15446_s17 + $0x338] sm:$0xff] }
 0x2f3   : > { %9615 = vmatprep.subr.bf16.mxu0 %v14836_v33  ;;  %v14843_v41 = vld [vmem:[%s18743_s1 + $0x2b0] ss:$8 sps:$4 sm:$0xff]   ;;  %19237 = vst [vmem:[#allocation18_spill] sm:$0xff] %v18067_v21 }
 0x2f4   : > { %v14846_v33 = vld [vmem:[%s18743_s1 + $0xbb0] ss:$8 sps:$4 sm:$0xff]  }
 0x2f5   : > { %4976 = vmatpush1.bf16.msra.mxu1 %v14831_v43  ;;  %v14849_v43 = vld [vmem:[%s18743_s1 + $0x2c0] ss:$8 sps:$4 sm:$0xff]  }
 0x2f6   : > { %9616 = vmatpush1.bf16.msra.mxu0 %v14834_v1  ;;  %4977 = vmatprep.subr.bf16.mxu1 %v14839_v22  ;;  %v14852_v1 = vld [vmem:[%s18743_s1 + $0xbc0] ss:$8 sps:$4 sm:$0xff]   ;;  %v14857_v22 = vld [vmem:[%s18743_s1 + $0x2d4] ss:$8 sps:$4 sm:$0xff]  }
 0x2f7   : > { %9617 = vmatprep.subr.bf16.mxu0 %v14842_v0  ;;  %3147 = vmatmul.mubr.bf16.gmra.mrb[20].mxu1 %v19207_v27  ;;  %v14860_v0 = vld [vmem:[%s18743_s1 + $0xbd4] ss:$8 sps:$4 sm:$0xff]   ;;  %v14858_v27 = vld [vmem:[%s18743_s1 + $0xbd0] ss:$8 sps:$4 sm:$0xff]  }
 0x2f8   : > { %9487 = vmatmul.mubr.bf16.gmra.mrb[20].mxu0 %v19208_v28  ;;  %3156 = vmatprep.mubr.bf16.mxu1 %v19209_v55  ;;  %v14866_v55 = vld [vmem:[%s18743_s1 + $0xbe4] ss:$8 sps:$4 sm:$0xff]  }
 0x2f9   : > { %9496 = vmatprep.mubr.bf16.mxu0 %v19210_v61  ;;  %4978 = vmatpush1.bf16.msra.mxu1 %v14837_v51  ;;  %v19211_v51 = vld [vmem:[#allocation39_spill] sm:$0xff] }
 0x2fa   : > { %9618 = vmatpush1.bf16.msra.mxu0 %v14840_v58  ;;  %4979 = vmatprep.subr.bf16.mxu1 %v14845_v44  ;;  %v19212_v58 = vld [vmem:[#allocation81_spill] sm:$0xff]  ;;  %v15225_v61 = vld [vmem:[%s15446_s17 + $0x40] sm:$0xff] }
 0x2fb   : > { %9619 = vmatprep.subr.bf16.mxu0 %v14848_v25  ;;  %v19213_v44 = vld [vmem:[#allocation41_spill] sm:$0xff]  ;;  %v3528_v28 = vshrl.u32 %v15225_v61, 16 }
 0x2fc   : > { %v14855_v25 = vld [vmem:[%s18743_s1 + $0x2d0] ss:$8 sps:$4 sm:$0xff]  }
 0x2fd   : > { %4980 = vmatpush1.bf16.msra.mxu1 %v14843_v41  ;;  %v14861_v41 = vld [vmem:[%s18743_s1 + $0x2e0] ss:$8 sps:$4 sm:$0xff]  }
 0x2fe   : > { %9620 = vmatpush1.bf16.msra.mxu0 %v14846_v33  ;;  %4981 = vmatprep.subr.bf16.mxu1 %v14851_v53  ;;  %v14864_v33 = vld [vmem:[%s18743_s1 + $0xbe0] ss:$8 sps:$4 sm:$0xff]   ;;  %v14871_v53 = vld [vmem:[%s18743_s1 + $0x2f4] ss:$8 sps:$4 sm:$0xff]  }
 0x2ff   : > { %9621 = vmatprep.subr.bf16.mxu0 %v14854_v23  ;;  %3157 = vmatmul.mubr.bf16.gmra.mrb[24].mxu1 %v16530_v46  ;;  %v14863_v46 = vld [vmem:[%s18743_s1 + $0x2e4] ss:$8 sps:$4 sm:$0xff]   ;;  %v14874_v23 = vld [vmem:[%s18743_s1 + $0xbf4] ss:$8 sps:$4 sm:$0xff]  }
 0x300   : > { %9497 = vmatmul.mubr.bf16.gmra.mrb[24].mxu0 %v19211_v51  ;;  %3166 = vmatprep.mubr.bf16.mxu1 %v19212_v58  ;;  %v14869_v58 = vld [vmem:[%s18743_s1 + $0x2f0] ss:$8 sps:$4 sm:$0xff]  }
 0x301   : > { %9506 = vmatprep.mubr.bf16.mxu0 %v19213_v44  ;;  %4982 = vmatpush1.bf16.msra.mxu1 %v14849_v43  ;;  %v19214_v43 = vld [vmem:[#allocation83_spill] sm:$0xff]  ;;  %v15224_v44 = vld [vmem:[%s15446_s17 + $0x30] sm:$0xff] }
 0x302   : > { %9622 = vmatpush1.bf16.msra.mxu0 %v14852_v1  ;;  %4983 = vmatprep.subr.bf16.mxu1 %v14857_v22  ;;  %v19215_v1 = vld [vmem:[#allocation43_spill] sm:$0xff]  ;;  %v19216_v22 = vld [vmem:[#allocation85_spill] sm:$0xff]  ;;  %v3504_v51 = vshll.u32 %v15224_v44, 16 }
 0x303   : > { %9623 = vmatprep.subr.bf16.mxu0 %v14860_v0  ;;  %v19217_v0 = vld [vmem:[#allocation45_spill] sm:$0xff] }
 0x305   : > { %4984 = vmatpush1.bf16.msra.mxu1 %v14855_v25  ;;  %v14872_v25 = vld [vmem:[%s18743_s1 + $0xbf0] ss:$8 sps:$4 sm:$0xff]  }
 0x306   : > { %9624 = vmatpush1.bf16.msra.mxu0 %v14858_v27  ;;  %4985 = vmatprep.subr.bf16.mxu1 %v14863_v46  ;;  %v14877_v27 = vld [vmem:[%s18743_s1 + $0x304] ss:$8 sps:$4 sm:$0xff]  }
 0x307   : > { %9625 = vmatprep.subr.bf16.mxu0 %v14866_v55  ;;  %3167 = vmatmul.mubr.bf16.gmra.mrb[28].mxu1 %v19214_v43  ;;  %v14880_v46 = vld [vmem:[%s18743_s1 + $0x1004] ss:$8 sps:$4 sm:$0xff]   ;;  %v19223_v43 = vld [vmem:[#allocation93_spill] sm:$0xff] }
 0x308   : > { %9507 = vmatmul.mubr.bf16.gmra.mrb[28].mxu0 %v19215_v1  ;;  %3176 = vmatprep.mubr.bf16.mxu1 %v19216_v22  ;;  %v19218_v55 = vld [vmem:[#allocation87_spill] sm:$0xff]  ;;  %v19224_v22 = vld [vmem:[#allocation56_spill] sm:$0xff] }
 0x309   : > { %9516 = vmatprep.mubr.bf16.mxu0 %v19217_v0  ;;  %4986 = vmatpush1.bf16.msra.mxu1 %v14861_v41  ;;  %v19219_v41 = vld [vmem:[#allocation47_spill] sm:$0xff]  ;;  %v19233_v1 = vld [vmem:[#allocation104_spill] sm:$0xff] }
 0x30a   : > { %9626 = vmatpush1.bf16.msra.mxu0 %v14864_v33  ;;  %4987 = vmatprep.subr.bf16.mxu1 %v14871_v53  ;;  %v19220_v33 = vld [vmem:[#allocation89_spill] sm:$0xff] }
 0x30b   : > { %9627 = vmatprep.subr.bf16.mxu0 %v14874_v23  ;;  %v19221_v53 = vld [vmem:[#allocation49_spill] sm:$0xff]  ;;  %v19222_v23 = vld [vmem:[#allocation50_spill] sm:$0xff] }
 0x30d   : > { %4988 = vmatpush1.bf16.msra.mxu1 %v14869_v58  ;;  %v19225_v58 = vld [vmem:[#allocation96_spill] sm:$0xff] }
 0x30e   : > { %9628 = vmatpush1.bf16.msra.mxu0 %v14872_v25  ;;  %5150 = vmatprep.subr.bf16.mxu1 %v14877_v27  ;;  %v19226_v25 = vld [vmem:[#allocation60_spill] sm:$0xff]  ;;  %v19228_v27 = vld [vmem:[#allocation105_spill] sm:$0xff] }
 0x30f   : > { %10383 = vmatprep.subr.bf16.mxu0 %v14880_v46  ;;  %3177 = vmatmul.mubr.bf16.gmra.mrb[32].mxu1 %v19218_v55  ;;  %v19229_v46 = vld [vmem:[#allocation101_spill] sm:$0xff]  ;;  %v19231_v55 = vld [vmem:[#allocation103_spill] sm:$0xff] }
 0x310   : > { %9517 = vmatmul.mubr.bf16.gmra.mrb[32].mxu0 %v19219_v41  ;;  %3186 = vmatprep.mubr.bf16.mxu1 %v19220_v33  ;;  %v19232_v33 = vld [vmem:[#allocation107_spill] sm:$0xff] }
 0x311   : > { %9526 = vmatprep.mubr.bf16.mxu0 %v19221_v53  ;;  %v15222_v41 = vld [vmem:[%s15446_s17 + $0x320] sm:$0x11] }
 0x317   : > { %3187 = vmatmul.mubr.bf16.gmra.mrb[36].mxu1 %v19168_v56  ;;  %v19227_v56 = vld [vmem:[#allocation99_spill] sm:$0xff] }
 0x318   : > { %9527 = vmatmul.mubr.bf16.gmra.mrb[36].mxu0 %v19222_v23  ;;  %3196 = vmatprep.mubr.bf16.mxu1 %v19223_v43  ;;  %v15218_v43 = vld [vmem:[%s15446_s17 + $0x310] sm:$0xff] }
 0x319   : > { %9536 = vmatprep.mubr.bf16.mxu0 %v19224_v22  ;;  %v15220_v22 = vld [vmem:[%s15446_s17 + $0x10] sm:$0xff] }
 0x31a   : > { %v3480_v23 = vshrl.u32 %v15220_v22, 16 }
 0x31f   : > { %3197 = vmatmul.mubr.bf16.gmra.mrb[40].mxu1 %v16622_v20  ;;  %v19230_v20 = vld [vmem:[#allocation106_spill] sm:$0xff] }
 0x320   : > { %9537 = vmatmul.mubr.bf16.gmra.mrb[40].mxu0 %v17316_v8  ;;  %3206 = vmatprep.mubr.bf16.mxu1 %v19225_v58  ;;  %v7758_v58 = vrot.slane %v15218_v43, 5  ;;  %v19234_v43 = vld [vmem:[#allocation108_spill] sm:$0xff] }
 0x321   : > { %9546 = vmatprep.mubr.bf16.mxu0 %v19226_v25  ;;  %v15219_v25 = vld [vmem:[%s15446_s17] sm:$0xff] }
 0x322   : > { %v3456_v8 = vshll.u32 %v15219_v25, 16 }
 0x324   : > { %v3458_v0 = vrot.slane %v3456_v8, 5 }
 0x327   : > { %3207 = vmatmul.mubr.bf16.gmra.mrb[44].mxu1 %v16641_v47  ;;  %v3453_v47 = vshrl.u32 %v15219_v25, 16  ;;  %v19235_v25 = vld [vmem:[#allocation109_spill] sm:$0xff] }
 0x328   : > { %9547 = vmatmul.mubr.bf16.gmra.mrb[44].mxu0 %v17331_v9  ;;  %3216 = vmatprep.mubr.bf16.mxu1 %v19227_v56  ;;  %v3462_v9 = vshll.u32 %v15220_v22, 16  ;;  %v15221_v56 = vld [vmem:[%s15446_s17 + $0x300] sm:$0xff]  ;;  %v19236_v22 = vld [vmem:[#allocation110_spill] sm:$0xff] }
 0x329   : > { %9556 = vmatprep.mubr.bf16.mxu0 %v19228_v27  ;;  %v12489_v53 = vrot.slane %v15221_v56, 9  ;;  %v7764_v27 = vrot.slane %v7758_v58, 4 }
 0x32b   : > { %v7759_v56 = vsel %vm16937_vm5, %v12489_v53, %v7758_v58 }
 0x32f   : > { %3217 = vmatmul.mubr.bf16.gmra.mrb[48].mxu1 %v19229_v46  ;;  %v7765_v46 = vrot.slane %v15222_v41, 5 }
 0x330   : > { %9557 = vmatmul.mubr.bf16.gmra.mrb[48].mxu0 %v19230_v20  ;;  %3226 = vmatprep.mubr.bf16.mxu1 %v19231_v55  ;;  %v3455_v20 = vrot.slane %v3453_v47, 4  ;;  %v3464_v55 = vrot.slane %v3462_v9, 5  ;;  %v15223_v9 = vld [vmem:[%s15446_s17 + $0x20] sm:$0x11] }
 0x331   : > { %9566 = vmatprep.mubr.bf16.mxu0 %v19232_v33  ;;  %v3482_v33 = vrot.slane %v3480_v23, 4  ;;  %v7766_v41 = vsel %vm16937_vm5, %v7764_v27, %v7765_v46  ;;  %v3486_v23 = vshll.u32 %v15223_v9, 16  ;;  %v3506_v46 = vrot.slane %v3504_v51, 5 }
 0x332   : > { %v3459_v8 = vor.u32 %v3458_v0, %v3455_v20  ;;  %v18074_v58 = vcombine.high %v7759_v56, %v7766_v41  ;;  %v18086_v51 = vcombine.low %v7759_v56, %v7766_v41  ;;  %v14875_v56 = vld [vmem:[%s18743_s1 + $0x300] ss:$8 sps:$4 sm:$0xff]  }
 0x333   : > { %v3483_v47 = vor.u32 %v3482_v33, %v3464_v55  ;;  %v3488_v20 = vrot.slane %v3486_v23, 5  ;;  %v15228_v23 = vld [vmem:[%s15446_s17 + $0x50] sm:$0x11]  ;;  %v14878_v41 = vld [vmem:[%s18743_s1 + $0x1000] ss:$8 sps:$4 sm:$0xff]  }
 0x334   : > { %v3460_v0 = vrot.slane %v3459_v8, 4 }
 0x335   : > { %v3484_v27 = vrot.slane %v3483_v47, 4 }
 0x337   : > { %3227 = vmatmul.mubr.bf16.gmra.mrb[52].mxu1 %v19233_v1  ;;  %v3501_v1 = vshrl.u32 %v15224_v44, 16  ;;  %v3530_v44 = vrot.slane %v3528_v28, 4  ;;  %v3489_v35 = vsel %vm15489_vm2, %v3484_v27, %v3488_v20 }
 0x338   : > { %9567 = vmatmul.mubr.bf16.gmra.mrb[52].mxu0 %v19234_v43  ;;  %3236 = vmatprep.mubr.bf16.mxu1 %v19235_v25  ;;  %v3510_v43 = vshll.u32 %v15225_v61, 16  ;;  %v18070_v25 = vld [vmem:[%s15446_s17 + $0x348] sm:$0xff] }
 0x339   : > { %9576 = vmatprep.mubr.bf16.mxu0 %v19236_v22  ;;  %19238 = vst [vmem:[#allocation62_spill] sm:$0xff] %v18070_v25  ;;  %v11936_v53 = vcombine.high %v18067_v21, %v18070_v25  ;;  %v3503_v33 = vrot.slane %v3501_v1, 4  ;;  %v3465_v22 = vsel %vm15489_vm2, %v3460_v0, %v3464_v55  ;;  %v3534_v1 = vshll.u32 %v15228_v23, 16  ;;  %v19240_v23 = vld [vmem:[#allocation51_spill] sm:$0xff] }
 0x33a   : > { %v3512_v9 = vrot.slane %v3510_v43, 5  ;;  %v11935_v28 = vcombine.low %v18067_v21, %v18070_v25  ;;  %v12065_v27 = vcombine.low %v3465_v22, %v3489_v35  ;;  %v19261_v21 = vld [vmem:[#allocation88_spill] sm:$0xff]  ;;  %v19262_v25 = vld [vmem:[#allocation90_spill] sm:$0xff] }
 0x33b   : > { %v3507_v8 = vor.u32 %v3506_v46, %v3503_v33  ;;  %v14886_v33 = vld [vmem:[%s18743_s1 + $0x1014] ss:$8 sps:$4 sm:$0xff]   ;;  %v14974_v61 = vld [vmem:[%s18743_s1 + $0x1100] ss:$8 sps:$4 sm:$0xff]  }
 0x33c   : > { %v3531_v47 = vor.u32 %v3530_v44, %v3512_v9  ;;  %v14890_v44 = vld [vmem:[%s18743_s1 + $0x1020] ss:$8 sps:$4 sm:$0xff]  }
 0x33d   : > { %v3508_v43 = vrot.slane %v3507_v8, 4  ;;  %v14895_v8 = vld [vmem:[%s18743_s1 + $0x334] ss:$8 sps:$4 sm:$0xff]  }
 0x33f   : > { %3237 = vmatmul.mubr.bf16.gmra.mrb[56].mxu1 %v17380_v39  ;;  %v12066_v39 = vcombine.high %v3465_v22, %v3489_v35  ;;  %v3513_v55 = vsel %vm15489_vm2, %v3508_v43, %v3512_v9  ;;  %v14884_v35 = vld [vmem:[%s18743_s1 + $0x1010] ss:$8 sps:$4 sm:$0xff]   ;;  %v14889_v22 = vld [vmem:[%s18743_s1 + $0x324] ss:$8 sps:$4 sm:$0xff]   ;;  %v14887_v9 = vld [vmem:[%s18743_s1 + $0x320] ss:$8 sps:$4 sm:$0xff]  }
 0x340   : > { %9577 = vmatmul.mubr.bf16.gmra.mrb[56].mxu0 %v17382_v18  ;;  %3246 = vmatprep.mubr.bf16.mxu1 %v11936_v53  ;;  %v3532_v53 = vrot.slane %v3531_v47, 4  ;;  %v3536_v18 = vrot.slane %v3534_v1, 5  ;;  %v14898_v47 = vld [vmem:[%s18743_s1 + $0x1034] ss:$8 sps:$4 sm:$0xff]   ;;  %v14893_v1 = vld [vmem:[%s18743_s1 + $0x330] ss:$8 sps:$4 sm:$0xff]  }
 0x341   : > { %9586 = vmatprep.mubr.bf16.mxu0 %v18074_v58  ;;  %v14904_v43 = vld [vmem:[%s18743_s1 + $0x1044] ss:$8 sps:$4 sm:$0xff]  }
 0x342   : > { %v3537_v0 = vsel %vm15489_vm2, %v3532_v53, %v3536_v18  ;;  %v14881_v18 = vld [vmem:[%s18743_s1 + $0x310] ss:$8 sps:$4 sm:$0xff]   ;;  %v14899_v53 = vld [vmem:[%s18743_s1 + $0x340] ss:$8 sps:$4 sm:$0xff]  }
 0x343   : > { %v18100_v20 = vcombine.high %v3513_v55, %v3537_v0  ;;  %v18123_v46 = vcombine.low %v3513_v55, %v3537_v0  ;;  %v14902_v55 = vld [vmem:[%s18743_s1 + $0x1040] ss:$8 sps:$4 sm:$0xff]   ;;  %v14907_v0 = vld [vmem:[%s18743_s1 + $0x354] ss:$8 sps:$4 sm:$0xff]  }
 0x347   : > { %3247 = vmatmul.mubr.bf16.gmra.mrb[60].mxu1 %v11935_v28  ;;  %v14896_v28 = vld [vmem:[%s18743_s1 + $0x1030] ss:$8 sps:$4 sm:$0xff]  }
 0x348   : > { %9587 = vmatmul.mubr.bf16.gmra.mrb[60].mxu0 %v18086_v51  ;;  %4989 = vmatprep.mubr.bf16.mxu1 %v12066_v39  ;;  %v14901_v39 = vld [vmem:[%s18743_s1 + $0x344] ss:$8 sps:$4 sm:$0xff]  }
 0x349   : > { %9629 = vmatprep.mubr.bf16.mxu0 %v17400_v32  ;;  %v14883_v32 = vld [vmem:[%s18743_s1 + $0x314] ss:$8 sps:$4 sm:$0xff]  }
 0x34f   : > { %4990 = vmatmul.mubr.bf16.vlgmr.msra.gmra.mrb[0].mxu1 %v12065_v27  ;;  %v14910_v27 = vld [vmem:[%s18743_s1 + $0x1054] ss:$8 sps:$4 sm:$0xff]  }
 0x350   : > { %9630 = vmatmul.mubr.bf16.vlgmr.msra.gmra.mrb[0].mxu0 %v17430_v3  ;;  %5151 = vmatpush1.bf16.msra.mxu1 %v14875_v56  ;;  %v14892_v3 = vld [vmem:[%s18743_s1 + $0x1024] ss:$8 sps:$4 sm:$0xff]  }
 0x351   : > { %10384 = vmatpush1.bf16.msra.mxu0 %v14878_v41  ;;  %4999 = vmatprep.mubr.bf16.mxu1 %v18100_v20  ;;  %v19241_v56 = vld [vmem:[#allocation52_spill] sm:$0xff]  ;;  %v19242_v41 = vld [vmem:[#allocation53_spill] sm:$0xff] }
 0x352   : > { %9639 = vmatprep.mubr.bf16.mxu0 %v17432_v13  ;;  %5152 = vmatprep.subr.bf16.mxu1 %v14883_v32  ;;  %v14905_v32 = vld [vmem:[%s18743_s1 + $0x350] ss:$8 sps:$4 sm:$0xff]  }
 0x353   : > { %10385 = vmatprep.subr.bf16.mxu0 %v14886_v33  ;;  %v14908_v33 = vld [vmem:[%s18743_s1 + $0x1050] ss:$8 sps:$4 sm:$0xff]  }
 0x354   : > { %5153 = vmatpush1.bf16.msra.mxu1 %v14881_v18  ;;  %v14913_v18 = vld [vmem:[%s18743_s1 + $0x364] ss:$8 sps:$4 sm:$0xff]  }
 0x355   : > { %10386 = vmatpush1.bf16.msra.mxu0 %v14884_v35  ;;  %5154 = vmatprep.subr.bf16.mxu1 %v14889_v22  ;;  %v14916_v35 = vld [vmem:[%s18743_s1 + $0x1064] ss:$8 sps:$4 sm:$0xff]   ;;  %v14911_v22 = vld [vmem:[%s18743_s1 + $0x360] ss:$8 sps:$4 sm:$0xff]  }
 0x356   : > { %10387 = vmatprep.subr.bf16.mxu0 %v14892_v3  ;;  %v14914_v3 = vld [vmem:[%s18743_s1 + $0x1060] ss:$8 sps:$4 sm:$0xff]  }
 0x357   : > { %5000 = vmatmul.mubr.bf16.gmra.mrb[4].mxu1 %v18123_v46 }
 0x358   : > { %9640 = vmatmul.mubr.bf16.gmra.mrb[4].mxu0 %v17469_v12  ;;  %5009 = vmatprep.mubr.bf16.mxu1 %v19240_v23 }
 0x359   : > { %9649 = vmatprep.mubr.bf16.mxu0 %v17471_v34  ;;  %5155 = vmatpush1.bf16.msra.mxu1 %v14887_v9  ;;  %v14919_v9 = vld [vmem:[%s18743_s1 + $0x374] ss:$8 sps:$4 sm:$0xff]  }
 0x35a   : > { %10388 = vmatpush1.bf16.msra.mxu0 %v14890_v44  ;;  %5156 = vmatprep.subr.bf16.mxu1 %v14895_v8  ;;  %v14922_v44 = vld [vmem:[%s18743_s1 + $0x1074] ss:$8 sps:$4 sm:$0xff]  }
 0x35b   : > { %10389 = vmatprep.subr.bf16.mxu0 %v14898_v47  ;;  %v19243_v8 = vld [vmem:[#allocation54_spill] sm:$0xff]  ;;  %v19244_v47 = vld [vmem:[#allocation55_spill] sm:$0xff] }
 0x35d   : > { %5157 = vmatpush1.bf16.msra.mxu1 %v14893_v1  ;;  %v14917_v1 = vld [vmem:[%s18743_s1 + $0x370] ss:$8 sps:$4 sm:$0xff]  }
 0x35e   : > { %10390 = vmatpush1.bf16.msra.mxu0 %v14896_v28  ;;  %5158 = vmatprep.subr.bf16.mxu1 %v14901_v39  ;;  %v14920_v28 = vld [vmem:[%s18743_s1 + $0x1070] ss:$8 sps:$4 sm:$0xff]   ;;  %v14925_v39 = vld [vmem:[%s18743_s1 + $0x384] ss:$8 sps:$4 sm:$0xff]  }
 0x35f   : > { %10391 = vmatprep.subr.bf16.mxu0 %v14904_v43  ;;  %5010 = vmatmul.mubr.bf16.gmra.mrb[8].mxu1 %v19241_v56  ;;  %v14928_v43 = vld [vmem:[%s18743_s1 + $0x1084] ss:$8 sps:$4 sm:$0xff]  }
 0x360   : > { %9650 = vmatmul.mubr.bf16.gmra.mrb[8].mxu0 %v17508_v31  ;;  %5019 = vmatprep.mubr.bf16.mxu1 %v19242_v41 }
 0x361   : > { %9659 = vmatprep.mubr.bf16.mxu0 %v17510_v40  ;;  %5159 = vmatpush1.bf16.msra.mxu1 %v14899_v53  ;;  %v14923_v53 = vld [vmem:[%s18743_s1 + $0x380] ss:$8 sps:$4 sm:$0xff]  }
 0x362   : > { %10392 = vmatpush1.bf16.msra.mxu0 %v14902_v55  ;;  %5160 = vmatprep.subr.bf16.mxu1 %v14907_v0  ;;  %v14926_v55 = vld [vmem:[%s18743_s1 + $0x1080] ss:$8 sps:$4 sm:$0xff]   ;;  %v14931_v0 = vld [vmem:[%s18743_s1 + $0x394] ss:$8 sps:$4 sm:$0xff]  }
 0x363   : > { %10393 = vmatprep.subr.bf16.mxu0 %v14910_v27  ;;  %v14934_v27 = vld [vmem:[%s18743_s1 + $0x1094] ss:$8 sps:$4 sm:$0xff]  }
 0x365   : > { %5161 = vmatpush1.bf16.msra.mxu1 %v14905_v32  ;;  %v19245_v32 = vld [vmem:[#allocation57_spill] sm:$0xff] }
 0x366   : > { %10394 = vmatpush1.bf16.msra.mxu0 %v14908_v33  ;;  %5162 = vmatprep.subr.bf16.mxu1 %v14913_v18  ;;  %v19246_v33 = vld [vmem:[#allocation59_spill] sm:$0xff]  ;;  %v14929_v18 = vld [vmem:[%s18743_s1 + $0x390] ss:$8 sps:$4 sm:$0xff]  }
 0x367   : > { %10395 = vmatprep.subr.bf16.mxu0 %v14916_v35  ;;  %5020 = vmatmul.mubr.bf16.gmra.mrb[12].mxu1 %v19243_v8  ;;  %v14932_v35 = vld [vmem:[%s18743_s1 + $0x1090] ss:$8 sps:$4 sm:$0xff]  }
 0x368   : > { %9660 = vmatmul.mubr.bf16.gmra.mrb[12].mxu0 %v17547_v14  ;;  %5029 = vmatprep.mubr.bf16.mxu1 %v19244_v47 }
 0x369   : > { %9669 = vmatprep.mubr.bf16.mxu0 %v17549_v16  ;;  %5163 = vmatpush1.bf16.msra.mxu1 %v14911_v22  ;;  %v14937_v22 = vld [vmem:[%s18743_s1 + $0x3a4] ss:$8 sps:$4 sm:$0xff]  }
 0x36a   : > { %10396 = vmatpush1.bf16.msra.mxu0 %v14914_v3  ;;  %5164 = vmatprep.subr.bf16.mxu1 %v14919_v9  ;;  %v14940_v3 = vld [vmem:[%s18743_s1 + $0x10a4] ss:$8 sps:$4 sm:$0xff]   ;;  %v14935_v9 = vld [vmem:[%s18743_s1 + $0x3a0] ss:$8 sps:$4 sm:$0xff]  }
 0x36b   : > { %10397 = vmatprep.subr.bf16.mxu0 %v14922_v44  ;;  %v14938_v44 = vld [vmem:[%s18743_s1 + $0x10a0] ss:$8 sps:$4 sm:$0xff]  }
 0x36d   : > { %5165 = vmatpush1.bf16.msra.mxu1 %v14917_v1  ;;  %v14943_v1 = vld [vmem:[%s18743_s1 + $0x3b4] ss:$8 sps:$4 sm:$0xff]  }
 0x36e   : > { %10398 = vmatpush1.bf16.msra.mxu0 %v14920_v28  ;;  %5166 = vmatprep.subr.bf16.mxu1 %v14925_v39  ;;  %v14946_v28 = vld [vmem:[%s18743_s1 + $0x10b4] ss:$8 sps:$4 sm:$0xff]  }
 0x36f   : > { %10399 = vmatprep.subr.bf16.mxu0 %v14928_v43  ;;  %5030 = vmatmul.mubr.bf16.gmra.mrb[16].mxu1 %v19245_v32  ;;  %v19247_v39 = vld [vmem:[#allocation61_spill] sm:$0xff]  ;;  %v19248_v43 = vld [vmem:[#allocation63_spill] sm:$0xff] }
 0x370   : > { %9670 = vmatmul.mubr.bf16.gmra.mrb[16].mxu0 %v17586_v50  ;;  %5039 = vmatprep.mubr.bf16.mxu1 %v19246_v33 }
 0x371   : > { %9679 = vmatprep.mubr.bf16.mxu0 %v17588_v5  ;;  %5167 = vmatpush1.bf16.msra.mxu1 %v14923_v53  ;;  %v14941_v53 = vld [vmem:[%s18743_s1 + $0x3b0] ss:$8 sps:$4 sm:$0xff]  }
 0x372   : > { %10400 = vmatpush1.bf16.msra.mxu0 %v14926_v55  ;;  %5168 = vmatprep.subr.bf16.mxu1 %v14931_v0  ;;  %v14944_v55 = vld [vmem:[%s18743_s1 + $0x10b0] ss:$8 sps:$4 sm:$0xff]   ;;  %v14949_v0 = vld [vmem:[%s18743_s1 + $0x3c4] ss:$8 sps:$4 sm:$0xff]  }
 0x373   : > { %10401 = vmatprep.subr.bf16.mxu0 %v14934_v27  ;;  %v14952_v27 = vld [vmem:[%s18743_s1 + $0x10c4] ss:$8 sps:$4 sm:$0xff]  }
 0x375   : > { %5169 = vmatpush1.bf16.msra.mxu1 %v14929_v18  ;;  %v14947_v18 = vld [vmem:[%s18743_s1 + $0x3c0] ss:$8 sps:$4 sm:$0xff]  }
 0x376   : > { %10402 = vmatpush1.bf16.msra.mxu0 %v14932_v35  ;;  %5170 = vmatprep.subr.bf16.mxu1 %v14937_v22  ;;  %v14950_v35 = vld [vmem:[%s18743_s1 + $0x10c0] ss:$8 sps:$4 sm:$0xff]   ;;  %v14955_v22 = vld [vmem:[%s18743_s1 + $0x3d4] ss:$8 sps:$4 sm:$0xff]  }
 0x377   : > { %10403 = vmatprep.subr.bf16.mxu0 %v14940_v3  ;;  %5040 = vmatmul.mubr.bf16.gmra.mrb[20].mxu1 %v19247_v39  ;;  %v14958_v3 = vld [vmem:[%s18743_s1 + $0x10d4] ss:$8 sps:$4 sm:$0xff]  }
 0x378   : > { %9680 = vmatmul.mubr.bf16.gmra.mrb[20].mxu0 %v17625_v24  ;;  %5049 = vmatprep.mubr.bf16.mxu1 %v19248_v43 }
 0x379   : > { %9689 = vmatprep.mubr.bf16.mxu0 %v17627_v10  ;;  %5171 = vmatpush1.bf16.msra.mxu1 %v14935_v9  ;;  %v19249_v9 = vld [vmem:[#allocation65_spill] sm:$0xff] }
 0x37a   : > { %10404 = vmatpush1.bf16.msra.mxu0 %v14938_v44  ;;  %5172 = vmatprep.subr.bf16.mxu1 %v14943_v1  ;;  %v19250_v44 = vld [vmem:[#allocation67_spill] sm:$0xff]  ;;  %v14953_v1 = vld [vmem:[%s18743_s1 + $0x3d0] ss:$8 sps:$4 sm:$0xff]  }
 0x37b   : > { %10405 = vmatprep.subr.bf16.mxu0 %v14946_v28  ;;  %v14956_v28 = vld [vmem:[%s18743_s1 + $0x10d0] ss:$8 sps:$4 sm:$0xff]  }
 0x37d   : > { %5173 = vmatpush1.bf16.msra.mxu1 %v14941_v53  ;;  %v14961_v53 = vld [vmem:[%s18743_s1 + $0x3e4] ss:$8 sps:$4 sm:$0xff]  }
 0x37e   : > { %10406 = vmatpush1.bf16.msra.mxu0 %v14944_v55  ;;  %5174 = vmatprep.subr.bf16.mxu1 %v14949_v0  ;;  %v14964_v55 = vld [vmem:[%s18743_s1 + $0x10e4] ss:$8 sps:$4 sm:$0xff]   ;;  %v14959_v0 = vld [vmem:[%s18743_s1 + $0x3e0] ss:$8 sps:$4 sm:$0xff]  }
 0x37f   : > { %10407 = vmatprep.subr.bf16.mxu0 %v14952_v27  ;;  %5050 = vmatmul.mubr.bf16.gmra.mrb[24].mxu1 %v19249_v9  ;;  %v14962_v27 = vld [vmem:[%s18743_s1 + $0x10e0] ss:$8 sps:$4 sm:$0xff]  }
 0x380   : > { %9690 = vmatmul.mubr.bf16.gmra.mrb[24].mxu0 %v17664_v37  ;;  %5059 = vmatprep.mubr.bf16.mxu1 %v19250_v44 }
 0x381   : > { %9699 = vmatprep.mubr.bf16.mxu0 %v17666_v54  ;;  %5175 = vmatpush1.bf16.msra.mxu1 %v14947_v18  ;;  %v14967_v18 = vld [vmem:[%s18743_s1 + $0x3f4] ss:$8 sps:$4 sm:$0xff]  }
 0x382   : > { %10408 = vmatpush1.bf16.msra.mxu0 %v14950_v35  ;;  %5176 = vmatprep.subr.bf16.mxu1 %v14955_v22  ;;  %v14970_v35 = vld [vmem:[%s18743_s1 + $0x10f4] ss:$8 sps:$4 sm:$0xff]  }
 0x383   : > { %10409 = vmatprep.subr.bf16.mxu0 %v14958_v3  ;;  %v19251_v22 = vld [vmem:[#allocation69_spill] sm:$0xff]  ;;  %v19252_v3 = vld [vmem:[#allocation71_spill] sm:$0xff] }
 0x385   : > { %5177 = vmatpush1.bf16.msra.mxu1 %v14953_v1  ;;  %v14965_v1 = vld [vmem:[%s18743_s1 + $0x3f0] ss:$8 sps:$4 sm:$0xff]  }
 0x386   : > { %10410 = vmatpush1.bf16.msra.mxu0 %v14956_v28  ;;  %5178 = vmatprep.subr.bf16.mxu1 %v14961_v53  ;;  %v14968_v28 = vld [vmem:[%s18743_s1 + $0x10f0] ss:$8 sps:$4 sm:$0xff]   ;;  %v14973_v53 = vld [vmem:[%s18743_s1 + $0x804] ss:$8 sps:$4 sm:$0xff]  }
 0x387   : > { %10411 = vmatprep.subr.bf16.mxu0 %v14964_v55  ;;  %5060 = vmatmul.mubr.bf16.gmra.mrb[28].mxu1 %v19251_v22  ;;  %v14976_v55 = vld [vmem:[%s18743_s1 + $0x1104] ss:$8 sps:$4 sm:$0xff]  }
 0x388   : > { %9700 = vmatmul.mubr.bf16.gmra.mrb[28].mxu0 %v17703_v11  ;;  %5069 = vmatprep.mubr.bf16.mxu1 %v19252_v3 }
 0x389   : > { %9709 = vmatprep.mubr.bf16.mxu0 %v17705_v29  ;;  %5179 = vmatpush1.bf16.msra.mxu1 %v14959_v0  ;;  %v19253_v0 = vld [vmem:[#allocation73_spill] sm:$0xff] }
 0x38a   : > { %10412 = vmatpush1.bf16.msra.mxu0 %v14962_v27  ;;  %5180 = vmatprep.subr.bf16.mxu1 %v14967_v18  ;;  %v19254_v27 = vld [vmem:[#allocation75_spill] sm:$0xff]  ;;  %v19255_v18 = vld [vmem:[#allocation77_spill] sm:$0xff] }
 0x38b   : > { %10413 = vmatprep.subr.bf16.mxu0 %v14970_v35  ;;  %v19256_v35 = vld [vmem:[#allocation79_spill] sm:$0xff] }
 0x38d   : > { %5181 = vmatpush1.bf16.msra.mxu1 %v14965_v1  ;;  %v19257_v1 = vld [vmem:[#allocation80_spill] sm:$0xff] }
 0x38e   : > { %10414 = vmatpush1.bf16.msra.mxu0 %v14968_v28  ;;  %5936 = vmatprep.subr.bf16.mxu1 %v14973_v53  ;;  %v19258_v28 = vld [vmem:[#allocation82_spill] sm:$0xff]  ;;  %v19259_v53 = vld [vmem:[#allocation84_spill] sm:$0xff] }
 0x38f   : > { %10576 = vmatprep.subr.bf16.mxu0 %v14976_v55  ;;  %5070 = vmatmul.mubr.bf16.gmra.mrb[32].mxu1 %v19253_v0  ;;  %v19260_v55 = vld [vmem:[#allocation86_spill] sm:$0xff] }
 0x390   : > { %9710 = vmatmul.mubr.bf16.gmra.mrb[32].mxu0 %v17718_v6  ;;  %5079 = vmatprep.mubr.bf16.mxu1 %v19254_v27  ;;  %v19263_v6 = vld [vmem:[#allocation92_spill] sm:$0xff] }
 0x391   : > { %9719 = vmatprep.mubr.bf16.mxu0 %v17720_v36 }
 0x397   : > { %5080 = vmatmul.mubr.bf16.gmra.mrb[36].mxu1 %v19255_v18  ;;  %v15233_v18 = vld [vmem:[%s15446_s17 + $0x328] sm:$0x11] }
 0x398   : > { %9720 = vmatmul.mubr.bf16.gmra.mrb[36].mxu0 %v17733_v49  ;;  %5089 = vmatprep.mubr.bf16.mxu1 %v19256_v35 }
 0x399   : > { %9729 = vmatprep.mubr.bf16.mxu0 %v17735_v42  ;;  %v15231_v42 = vld [vmem:[%s15446_s17 + $0x18] sm:$0xff] }
 0x39a   : > { %v3490_v35 = vshrl.u32 %v15231_v42, 16 }
 0x39f   : > { %5090 = vmatmul.mubr.bf16.gmra.mrb[40].mxu1 %v19257_v1 }
 0x3a0   : > { %9730 = vmatmul.mubr.bf16.gmra.mrb[40].mxu0 %v17748_v38  ;;  %5099 = vmatprep.mubr.bf16.mxu1 %v19258_v28  ;;  %v15229_v28 = vld [vmem:[%s15446_s17 + $0x318] sm:$0xff]  ;;  %v15230_v38 = vld [vmem:[%s15446_s17 + $0x8] sm:$0xff] }
 0x3a1   : > { %9739 = vmatprep.mubr.bf16.mxu0 %v17750_v63  ;;  %v7762_v63 = vrot.slane %v15229_v28, 5  ;;  %v3470_v1 = vshll.u32 %v15230_v38, 16  ;;  %v19264_v28 = vld [vmem:[#allocation94_spill] sm:$0xff] }
 0x3a7   : > { %5100 = vmatmul.mubr.bf16.gmra.mrb[44].mxu1 %v19259_v53  ;;  %v3467_v53 = vshrl.u32 %v15230_v38, 16 }
 0x3a8   : > { %9740 = vmatmul.mubr.bf16.gmra.mrb[44].mxu0 %v17763_v17  ;;  %5109 = vmatprep.mubr.bf16.mxu1 %v19260_v55  ;;  %v3476_v17 = vshll.u32 %v15231_v42, 16  ;;  %v15232_v55 = vld [vmem:[%s15446_s17 + $0x308] sm:$0xff] }
 0x3a9   : > { %9749 = vmatprep.mubr.bf16.mxu0 %v17765_v7  ;;  %v12490_v49 = vrot.slane %v15232_v55, 9  ;;  %v7767_v7 = vrot.slane %v7762_v63, 4  ;;  %v3469_v36 = vrot.slane %v3467_v53, 4  ;;  %v15234_v53 = vld [vmem:[%s15446_s17 + $0x28] sm:$0x11] }
 0x3aa   : > { %v3478_v27 = vrot.slane %v3476_v17, 5 }
 0x3ab   : > { %v7763_v42 = vsel %vm16937_vm5, %v12490_v49, %v7762_v63 }
 0x3af   : > { %5110 = vmatmul.mubr.bf16.gmra.mrb[48].mxu1 %v19261_v21  ;;  %v7768_v21 = vrot.slane %v15233_v18, 5 }
 0x3b0   : > { %9750 = vmatmul.mubr.bf16.gmra.mrb[48].mxu0 %v17778_v4  ;;  %5119 = vmatprep.mubr.bf16.mxu1 %v19262_v25  ;;  %v3472_v4 = vrot.slane %v3470_v1, 5  ;;  %v3492_v25 = vrot.slane %v3490_v35, 4  ;;  %v3496_v1 = vshll.u32 %v15234_v53, 16  ;;  %v14994_v53 = vld [vmem:[%s18743_s1 + $0x1134] ss:$8 sps:$4 sm:$0xff]  }
 0x3b1   : > { %9759 = vmatprep.mubr.bf16.mxu0 %v17780_v26  ;;  %v7769_v38 = vsel %vm16937_vm5, %v7767_v7, %v7768_v21 }
 0x3b2   : > { %v3473_v55 = vor.u32 %v3472_v4, %v3469_v36  ;;  %v3493_v18 = vor.u32 %v3492_v25, %v3478_v27  ;;  %v18355_v17 = vcombine.high %v7763_v42, %v7769_v38  ;;  %v3498_v26 = vrot.slane %v3496_v1, 5  ;;  %v19267_v4 = vld [vmem:[#allocation98_spill] sm:$0xff]  ;;  %v14971_v25 = vld [vmem:[%s18743_s1 + $0x800] ss:$8 sps:$4 sm:$0xff]   ;;  %v19269_v1 = vld [vmem:[#allocation5_spill] sm:$0xff] }
 0x3b3   : > { %v18365_v63 = vcombine.low %v7763_v42, %v7769_v38  ;;  %v19268_v42 = vld [vmem:[#allocation4_spill] sm:$0xff] }
 0x3b4   : > { %v3474_v35 = vrot.slane %v3473_v55, 4  ;;  %v14985_v38 = vld [vmem:[%s18743_s1 + $0x824] ss:$8 sps:$4 sm:$0xff]   ;;  %v14983_v55 = vld [vmem:[%s18743_s1 + $0x820] ss:$8 sps:$4 sm:$0xff]  }
 0x3b6   : > { %v3479_v49 = vsel %vm15489_vm2, %v3474_v35, %v3478_v27  ;;  %v14980_v27 = vld [vmem:[%s18743_s1 + $0x1110] ss:$8 sps:$4 sm:$0xff]  }
 0x3b7   : > { %5120 = vmatmul.mubr.bf16.gmra.mrb[52].mxu1 %v19263_v6  ;;  %v3494_v6 = vrot.slane %v3493_v18, 4  ;;  %v14991_v18 = vld [vmem:[%s18743_s1 + $0x834] ss:$8 sps:$4 sm:$0xff]  }
 0x3b8   : > { %9760 = vmatmul.mubr.bf16.gmra.mrb[52].mxu0 %v17792_v19  ;;  %5129 = vmatprep.mubr.bf16.mxu1 %v19264_v28  ;;  %v19265_v19 = vld [vmem:[#allocation95_spill] sm:$0xff]  ;;  %v19270_v35 = vld [vmem:[#allocation6_spill] sm:$0xff] }
 0x3b9   : > { %9769 = vmatprep.mubr.bf16.mxu0 %v17796_v2  ;;  %v19266_v2 = vld [vmem:[#allocation97_spill] sm:$0xff]  ;;  %v3499_v36 = vsel %vm15489_vm2, %v3494_v6, %v3498_v26 }
 0x3ba   : > { %v12068_v7 = vcombine.high %v3479_v49, %v3499_v36  ;;  %v12067_v21 = vcombine.low %v3479_v49, %v3499_v36  ;;  %v14979_v6 = vld [vmem:[%s18743_s1 + $0x814] ss:$8 sps:$4 sm:$0xff]   ;;  %v14989_v49 = vld [vmem:[%s18743_s1 + $0x830] ss:$8 sps:$4 sm:$0xff]  }
 0x3bb   : > { %v14982_v26 = vld [vmem:[%s18743_s1 + $0x1114] ss:$8 sps:$4 sm:$0xff]   ;;  %v14992_v36 = vld [vmem:[%s18743_s1 + $0x1130] ss:$8 sps:$4 sm:$0xff]  }
 0x3bf   : > { %5130 = vmatmul.mubr.bf16.gmra.mrb[56].mxu1 %v19265_v19 }
 0x3c0   : > { %9770 = vmatmul.mubr.bf16.gmra.mrb[56].mxu0 %v17801_v52  ;;  %5139 = vmatprep.mubr.bf16.mxu1 %v19266_v2 }
 0x3c1   : > { %9779 = vmatprep.mubr.bf16.mxu0 %v18355_v17 }
 0x3c7   : > { %5140 = vmatmul.mubr.bf16.gmra.mrb[60].mxu1 %v19267_v4 }
 0x3c8   : > { %9780 = vmatmul.mubr.bf16.gmra.mrb[60].mxu0 %v18365_v63  ;;  %5182 = vmatprep.mubr.bf16.mxu1 %v12068_v7  ;;  %v14995_v7 = vld [vmem:[%s18743_s1 + $0x840] ss:$8 sps:$4 sm:$0xff]  }
 0x3c9   : > { %10415 = vmatprep.mubr.bf16.mxu0 %v17000_v30  ;;  %v14977_v30 = vld [vmem:[%s18743_s1 + $0x810] ss:$8 sps:$4 sm:$0xff]  }
 0x3cf   : > { %5183 = vmatmul.mubr.bf16.vlgmr.msra.gmra.mrb[0].mxu1 %v12067_v21  ;;  %v14998_v21 = vld [vmem:[%s18743_s1 + $0x1140] ss:$8 sps:$4 sm:$0xff]  }
 0x3d0   : > { %10416 = vmatmul.mubr.bf16.vlgmr.msra.gmra.mrb[0].mxu0 %v19192_v57  ;;  %5937 = vmatpush1.bf16.msra.mxu1 %v14971_v25  ;;  %v14988_v57 = vld [vmem:[%s18743_s1 + $0x1124] ss:$8 sps:$4 sm:$0xff]   ;;  %v15003_v25 = vld [vmem:[%s18743_s1 + $0x854] ss:$8 sps:$4 sm:$0xff]  }
 0x3d1   : > { %10577 = vmatpush1.bf16.msra.mxu0 %v14974_v61  ;;  %5192 = vmatprep.mubr.bf16.mxu1 %v19268_v42  ;;  %v15006_v61 = vld [vmem:[%s18743_s1 + $0x1154] ss:$8 sps:$4 sm:$0xff]   ;;  %v15007_v42 = vld [vmem:[%s18743_s1 + $0x860] ss:$8 sps:$4 sm:$0xff]  }
 0x3d2   : > { %10425 = vmatprep.mubr.bf16.mxu0 %v19194_v59  ;;  %5938 = vmatprep.subr.bf16.mxu1 %v14979_v6  ;;  %v14986_v59 = vld [vmem:[%s18743_s1 + $0x1120] ss:$8 sps:$4 sm:$0xff]  }
 0x3d3   : > { %10578 = vmatprep.subr.bf16.mxu0 %v14982_v26  ;;  %v19271_v6 = vld [vmem:[#allocation7_spill] sm:$0xff]  ;;  %v19272_v26 = vld [vmem:[#allocation8_spill] sm:$0xff] }
 0x3d4   : > { %5939 = vmatpush1.bf16.msra.mxu1 %v14977_v30  ;;  %v15001_v30 = vld [vmem:[%s18743_s1 + $0x850] ss:$8 sps:$4 sm:$0xff]  }
 0x3d5   : > { %10579 = vmatpush1.bf16.msra.mxu0 %v14980_v27  ;;  %5940 = vmatprep.subr.bf16.mxu1 %v14985_v38  ;;  %v15004_v27 = vld [vmem:[%s18743_s1 + $0x1150] ss:$8 sps:$4 sm:$0xff]   ;;  %v15010_v38 = vld [vmem:[%s18743_s1 + $0x1160] ss:$8 sps:$4 sm:$0xff]  }
 0x3d6   : > { %10580 = vmatprep.subr.bf16.mxu0 %v14988_v57  ;;  %v15015_v57 = vld [vmem:[%s18743_s1 + $0x874] ss:$8 sps:$4 sm:$0xff]  }
 0x3d7   : > { %5193 = vmatmul.mubr.bf16.gmra.mrb[4].mxu1 %v19269_v1  ;;  %v19276_v1 = vld [vmem:[#allocation33_spill] sm:$0xff] }
 0x3d8   : > { %10426 = vmatmul.mubr.bf16.gmra.mrb[4].mxu0 %v19196_v60  ;;  %5202 = vmatprep.mubr.bf16.mxu1 %v19270_v35  ;;  %v14997_v60 = vld [vmem:[%s18743_s1 + $0x844] ss:$8 sps:$4 sm:$0xff]   ;;  %v15013_v35 = vld [vmem:[%s18743_s1 + $0x870] ss:$8 sps:$4 sm:$0xff]  }
 0x3d9   : > { %10435 = vmatprep.mubr.bf16.mxu0 %v19198_v48  ;;  %5941 = vmatpush1.bf16.msra.mxu1 %v14983_v55  ;;  %v15000_v48 = vld [vmem:[%s18743_s1 + $0x1144] ss:$8 sps:$4 sm:$0xff]   ;;  %v15018_v55 = vld [vmem:[%s18743_s1 + $0x1174] ss:$8 sps:$4 sm:$0xff]  }
 0x3da   : > { %10581 = vmatpush1.bf16.msra.mxu0 %v14986_v59  ;;  %5942 = vmatprep.subr.bf16.mxu1 %v14991_v18  ;;  %v19273_v59 = vld [vmem:[#allocation9_spill] sm:$0xff]  ;;  %v19274_v18 = vld [vmem:[#allocation31_spill] sm:$0xff] }
 0x3db   : > { %10582 = vmatprep.subr.bf16.mxu0 %v14994_v53  ;;  %v19275_v53 = vld [vmem:[#allocation10_spill] sm:$0xff] }
 0x3dd   : > { %5943 = vmatpush1.bf16.msra.mxu1 %v14989_v49  ;;  %v15016_v49 = vld [vmem:[%s18743_s1 + $0x1170] ss:$8 sps:$4 sm:$0xff]  }
 0x3de   : > { %10583 = vmatpush1.bf16.msra.mxu0 %v14992_v36  ;;  %5944 = vmatprep.subr.bf16.mxu1 %v14997_v60  ;;  %v15021_v36 = vld [vmem:[%s18743_s1 + $0x884] ss:$8 sps:$4 sm:$0xff]  }
 0x3df   : > { %10584 = vmatprep.subr.bf16.mxu0 %v15000_v48  ;;  %5203 = vmatmul.mubr.bf16.gmra.mrb[8].mxu1 %v19271_v6  ;;  %v15024_v60 = vld [vmem:[%s18743_s1 + $0x1184] ss:$8 sps:$4 sm:$0xff]   ;;  %v15019_v48 = vld [vmem:[%s18743_s1 + $0x880] ss:$8 sps:$4 sm:$0xff]  }
 0x3e0   : > { %10436 = vmatmul.mubr.bf16.gmra.mrb[8].mxu0 %v19200_v15  ;;  %5212 = vmatprep.mubr.bf16.mxu1 %v19272_v26  ;;  %v15009_v15 = vld [vmem:[%s18743_s1 + $0x864] ss:$8 sps:$4 sm:$0xff]  }
 0x3e1   : > { %10445 = vmatprep.mubr.bf16.mxu0 %v19202_v45  ;;  %5945 = vmatpush1.bf16.msra.mxu1 %v14995_v7  ;;  %v15012_v45 = vld [vmem:[%s18743_s1 + $0x1164] ss:$8 sps:$4 sm:$0xff]   ;;  %v15022_v7 = vld [vmem:[%s18743_s1 + $0x1180] ss:$8 sps:$4 sm:$0xff]  }
 0x3e2   : > { %10585 = vmatpush1.bf16.msra.mxu0 %v14998_v21  ;;  %5946 = vmatprep.subr.bf16.mxu1 %v15003_v25  ;;  %v15027_v21 = vld [vmem:[%s18743_s1 + $0x894] ss:$8 sps:$4 sm:$0xff]   ;;  %v19278_v6 = vld [vmem:[#allocation35_spill] sm:$0xff]  ;;  %v19279_v26 = vld [vmem:[#allocation12_spill] sm:$0xff] }
 0x3e3   : > { %10586 = vmatprep.subr.bf16.mxu0 %v15006_v61  ;;  %v15030_v25 = vld [vmem:[%s18743_s1 + $0x1194] ss:$8 sps:$4 sm:$0xff]   ;;  %v19277_v61 = vld [vmem:[#allocation11_spill] sm:$0xff] }
 0x3e5   : > { %5947 = vmatpush1.bf16.msra.mxu1 %v15001_v30  ;;  %v19280_v30 = vld [vmem:[#allocation37_spill] sm:$0xff] }
 0x3e6   : > { %10587 = vmatpush1.bf16.msra.mxu0 %v15004_v27  ;;  %5948 = vmatprep.subr.bf16.mxu1 %v15009_v15  ;;  %v15025_v27 = vld [vmem:[%s18743_s1 + $0x890] ss:$8 sps:$4 sm:$0xff]  }
 0x3e7   : > { %10588 = vmatprep.subr.bf16.mxu0 %v15012_v45  ;;  %5213 = vmatmul.mubr.bf16.gmra.mrb[12].mxu1 %v19273_v59  ;;  %v15028_v15 = vld [vmem:[%s18743_s1 + $0x1190] ss:$8 sps:$4 sm:$0xff]   ;;  %v15033_v45 = vld [vmem:[%s18743_s1 + $0x8a4] ss:$8 sps:$4 sm:$0xff]   ;;  %v15042_v59 = vld [vmem:[%s18743_s1 + $0x11b4] ss:$8 sps:$4 sm:$0xff]  }
 0x3e8   : > { %10446 = vmatmul.mubr.bf16.gmra.mrb[12].mxu0 %v19274_v18  ;;  %5222 = vmatprep.mubr.bf16.mxu1 %v19275_v53  ;;  %v19281_v18 = vld [vmem:[#allocation13_spill] sm:$0xff]  ;;  %v19282_v53 = vld [vmem:[#allocation39_spill] sm:$0xff] }
 0x3e9   : > { %10455 = vmatprep.mubr.bf16.mxu0 %v19276_v1  ;;  %5949 = vmatpush1.bf16.msra.mxu1 %v15007_v42  ;;  %v15036_v42 = vld [vmem:[%s18743_s1 + $0x11a4] ss:$8 sps:$4 sm:$0xff]   ;;  %v19283_v1 = vld [vmem:[#allocation14_spill] sm:$0xff] }
 0x3ea   : > { %10589 = vmatpush1.bf16.msra.mxu0 %v15010_v38  ;;  %5950 = vmatprep.subr.bf16.mxu1 %v15015_v57  ;;  %v15031_v38 = vld [vmem:[%s18743_s1 + $0x8a0] ss:$8 sps:$4 sm:$0xff]  }
 0x3eb   : > { %10590 = vmatprep.subr.bf16.mxu0 %v15018_v55  ;;  %v15034_v57 = vld [vmem:[%s18743_s1 + $0x11a0] ss:$8 sps:$4 sm:$0xff]   ;;  %v15039_v55 = vld [vmem:[%s18743_s1 + $0x8b4] ss:$8 sps:$4 sm:$0xff]  }
 0x3ed   : > { %5951 = vmatpush1.bf16.msra.mxu1 %v15013_v35  ;;  %v19284_v35 = vld [vmem:[#allocation41_spill] sm:$0xff] }
 0x3ee   : > { %10591 = vmatpush1.bf16.msra.mxu0 %v15016_v49  ;;  %5952 = vmatprep.subr.bf16.mxu1 %v15021_v36  ;;  %v15037_v49 = vld [vmem:[%s18743_s1 + $0x8b0] ss:$8 sps:$4 sm:$0xff]  }
 0x3ef   : > { %10592 = vmatprep.subr.bf16.mxu0 %v15024_v60  ;;  %5223 = vmatmul.mubr.bf16.gmra.mrb[16].mxu1 %v19277_v61  ;;  %v15040_v36 = vld [vmem:[%s18743_s1 + $0x11b0] ss:$8 sps:$4 sm:$0xff]   ;;  %v15045_v60 = vld [vmem:[%s18743_s1 + $0x8c4] ss:$8 sps:$4 sm:$0xff]   ;;  %v15054_v61 = vld [vmem:[%s18743_s1 + $0x11d4] ss:$8 sps:$4 sm:$0xff]  }
 0x3f0   : > { %10456 = vmatmul.mubr.bf16.gmra.mrb[16].mxu0 %v19278_v6  ;;  %5232 = vmatprep.mubr.bf16.mxu1 %v19279_v26  ;;  %v19285_v6 = vld [vmem:[#allocation15_spill] sm:$0xff] }
 0x3f1   : > { %10465 = vmatprep.mubr.bf16.mxu0 %v19280_v30  ;;  %5953 = vmatpush1.bf16.msra.mxu1 %v15019_v48  ;;  %v15048_v48 = vld [vmem:[%s18743_s1 + $0x11c4] ss:$8 sps:$4 sm:$0xff]  }
 0x3f2   : > { %10593 = vmatpush1.bf16.msra.mxu0 %v15022_v7  ;;  %5954 = vmatprep.subr.bf16.mxu1 %v15027_v21  ;;  %v15043_v7 = vld [vmem:[%s18743_s1 + $0x8c0] ss:$8 sps:$4 sm:$0xff]  }
 0x3f3   : > { %10594 = vmatprep.subr.bf16.mxu0 %v15030_v25  ;;  %v15046_v21 = vld [vmem:[%s18743_s1 + $0x11c0] ss:$8 sps:$4 sm:$0xff]   ;;  %v15051_v25 = vld [vmem:[%s18743_s1 + $0x8d4] ss:$8 sps:$4 sm:$0xff]  }
 0x3f4   : > { %v19286_v26 = vld [vmem:[#allocation43_spill] sm:$0xff]  ;;  %v19287_v30 = vld [vmem:[#allocation16_spill] sm:$0xff] }
 0x3f5   : > { %5955 = vmatpush1.bf16.msra.mxu1 %v15025_v27  ;;  %v19288_v27 = vld [vmem:[#allocation45_spill] sm:$0xff] }
 0x3f6   : > { %10595 = vmatpush1.bf16.msra.mxu0 %v15028_v15  ;;  %5956 = vmatprep.subr.bf16.mxu1 %v15033_v45  ;;  %v15049_v15 = vld [vmem:[%s18743_s1 + $0x8d0] ss:$8 sps:$4 sm:$0xff]  }
 0x3f7   : > { %10596 = vmatprep.subr.bf16.mxu0 %v15036_v42  ;;  %5233 = vmatmul.mubr.bf16.gmra.mrb[20].mxu1 %v19281_v18  ;;  %v15052_v45 = vld [vmem:[%s18743_s1 + $0x11d0] ss:$8 sps:$4 sm:$0xff]   ;;  %v15057_v42 = vld [vmem:[%s18743_s1 + $0x8e4] ss:$8 sps:$4 sm:$0xff]   ;;  %v15066_v18 = vld [vmem:[%s18743_s1 + $0x11f4] ss:$8 sps:$4 sm:$0xff]  }
 0x3f8   : > { %10466 = vmatmul.mubr.bf16.gmra.mrb[20].mxu0 %v19282_v53  ;;  %5242 = vmatprep.mubr.bf16.mxu1 %v19283_v1  ;;  %v19289_v53 = vld [vmem:[#allocation17_spill] sm:$0xff]  ;;  %v19290_v1 = vld [vmem:[#allocation47_spill] sm:$0xff] }
 0x3f9   : > { %10475 = vmatprep.mubr.bf16.mxu0 %v19284_v35  ;;  %5957 = vmatpush1.bf16.msra.mxu1 %v15031_v38  ;;  %v15060_v38 = vld [vmem:[%s18743_s1 + $0x11e4] ss:$8 sps:$4 sm:$0xff]  }
 0x3fa   : > { %10597 = vmatpush1.bf16.msra.mxu0 %v15034_v57  ;;  %5958 = vmatprep.subr.bf16.mxu1 %v15039_v55  ;;  %v15055_v57 = vld [vmem:[%s18743_s1 + $0x8e0] ss:$8 sps:$4 sm:$0xff]  }
 0x3fb   : > { %10598 = vmatprep.subr.bf16.mxu0 %v15042_v59  ;;  %v15058_v55 = vld [vmem:[%s18743_s1 + $0x11e0] ss:$8 sps:$4 sm:$0xff]   ;;  %v15063_v59 = vld [vmem:[%s18743_s1 + $0x8f4] ss:$8 sps:$4 sm:$0xff]  }
 0x3fc   : > { %v19291_v35 = vld [vmem:[#allocation19_spill] sm:$0xff] }
 0x3fd   : > { %5959 = vmatpush1.bf16.msra.mxu1 %v15037_v49  ;;  %v19292_v49 = vld [vmem:[#allocation49_spill] sm:$0xff] }
 0x3fe   : > { %10599 = vmatpush1.bf16.msra.mxu0 %v15040_v36  ;;  %5960 = vmatprep.subr.bf16.mxu1 %v15045_v60  ;;  %v15061_v36 = vld [vmem:[%s18743_s1 + $0x8f0] ss:$8 sps:$4 sm:$0xff]  }
 0x3ff   : > { %10600 = vmatprep.subr.bf16.mxu0 %v15048_v48  ;;  %5243 = vmatmul.mubr.bf16.gmra.mrb[24].mxu1 %v19285_v6  ;;  %v15064_v60 = vld [vmem:[%s18743_s1 + $0x11f0] ss:$8 sps:$4 sm:$0xff]  }
 0x400   : > { %10476 = vmatmul.mubr.bf16.gmra.mrb[24].mxu0 %v19286_v26  ;;  %5252 = vmatprep.mubr.bf16.mxu1 %v19287_v30  ;;  %v19293_v48 = vld [vmem:[#allocation21_spill] sm:$0xff]  ;;  %v19298_v6 = vld [vmem:[#allocation58_spill] sm:$0xff]  ;;  %v19300_v30 = vld [vmem:[#allocation60_spill] sm:$0xff] }
 0x401   : > { %10485 = vmatprep.mubr.bf16.mxu0 %v19288_v27  ;;  %5961 = vmatpush1.bf16.msra.mxu1 %v15043_v7  ;;  %v19294_v7 = vld [vmem:[#allocation50_spill] sm:$0xff]  ;;  %v19301_v27 = vld [vmem:[#allocation28_spill] sm:$0xff] }
 0x402   : > { %10601 = vmatpush1.bf16.msra.mxu0 %v15046_v21  ;;  %5962 = vmatprep.subr.bf16.mxu1 %v15051_v25  ;;  %v19295_v21 = vld [vmem:[#allocation23_spill] sm:$0xff]  ;;  %v19296_v25 = vld [vmem:[#allocation56_spill] sm:$0xff]  ;;  %v19299_v26 = vld [vmem:[#allocation26_spill] sm:$0xff] }
 0x403   : > { %10602 = vmatprep.subr.bf16.mxu0 %v15054_v61  ;;  %v19297_v61 = vld [vmem:[#allocation25_spill] sm:$0xff] }
 0x405   : > { %5963 = vmatpush1.bf16.msra.mxu1 %v15049_v15  ;;  %v19302_v15 = vld [vmem:[#allocation91_spill] sm:$0xff] }
 0x406   : > { %10603 = vmatpush1.bf16.msra.mxu0 %v15052_v45  ;;  %5964 = vmatprep.subr.bf16.mxu1 %v15057_v42  ;;  %v19303_v45 = vld [vmem:[#allocation30_spill] sm:$0xff]  ;;  %v19304_v42 = vld [vmem:[#allocation105_spill] sm:$0xff] }
 0x407   : > { %10604 = vmatprep.subr.bf16.mxu0 %v15060_v38  ;;  %5253 = vmatmul.mubr.bf16.gmra.mrb[28].mxu1 %v19289_v53  ;;  %v19305_v38 = vld [vmem:[#allocation32_spill] sm:$0xff] }
 0x408   : > { %10486 = vmatmul.mubr.bf16.gmra.mrb[28].mxu0 %v19290_v1  ;;  %5262 = vmatprep.mubr.bf16.mxu1 %v19291_v35  ;;  %v19310_v53 = vld [vmem:[#allocation108_spill] sm:$0xff]  ;;  %v19311_v1 = vld [vmem:[#allocation38_spill] sm:$0xff] }
 0x409   : > { %10495 = vmatprep.mubr.bf16.mxu0 %v19292_v49  ;;  %5965 = vmatpush1.bf16.msra.mxu1 %v15055_v57  ;;  %v19306_v57 = vld [vmem:[#allocation106_spill] sm:$0xff]  ;;  %v15235_v49 = vld [vmem:[%s15446_s17 + $0x340] sm:$0xff] }
 0x40a   : > { %10605 = vmatpush1.bf16.msra.mxu0 %v15058_v55  ;;  %5966 = vmatprep.subr.bf16.mxu1 %v15063_v59  ;;  %v19307_v55 = vld [vmem:[#allocation34_spill] sm:$0xff]  ;;  %v19308_v59 = vld [vmem:[#allocation107_spill] sm:$0xff] }
 0x40b   : > { %10606 = vmatprep.subr.bf16.mxu0 %v15066_v18  ;;  %v19309_v18 = vld [vmem:[#allocation36_spill] sm:$0xff]  ;;  %v19312_v35 = vld [vmem:[#allocation110_spill] sm:$0xff] }
 0x40d   : > { %5967 = vmatpush1.bf16.msra.mxu1 %v15061_v36  ;;  %v7772_v36 = vrot.slane %v15235_v49, 5 }
 0x40e   : > { %10607 = vmatpush1.bf16.msra.mxu0 %v15064_v60  ;;  %v15236_v60 = vld [vmem:[%s15446_s17 + $0x330] sm:$0xff] }
 0x40f   : > { %5263 = vmatmul.mubr.bf16.gmra.mrb[32].mxu1 %v19293_v48  ;;  %v12491_v48 = vrot.slane %v15236_v60, 9 }
 0x410   : > { %10496 = vmatmul.mubr.bf16.gmra.mrb[32].mxu0 %v19294_v7  ;;  %5272 = vmatprep.mubr.bf16.mxu1 %v19295_v21  ;;  %v7778_v7 = vrot.slane %v7772_v36, 4  ;;  %v15237_v21 = vld [vmem:[%s15446_s17 + $0x350] sm:$0x11] }
 0x411   : > { %10505 = vmatprep.mubr.bf16.mxu0 %v19296_v25  ;;  %v7779_v25 = vrot.slane %v15237_v21, 5 }
 0x417   : > { %5273 = vmatmul.mubr.bf16.gmra.mrb[36].mxu1 %v19297_v61  ;;  %v19313_v61 = vld [vmem:[#allocation40_spill] sm:$0xff] }
 0x418   : > { %10506 = vmatmul.mubr.bf16.gmra.mrb[36].mxu0 %v19298_v6  ;;  %5282 = vmatprep.mubr.bf16.mxu1 %v19299_v26  ;;  %v19314_v6 = vld [vmem:[#allocation111_spill] sm:$0xff]  ;;  %v19315_v26 = vld [vmem:[#allocation42_spill] sm:$0xff] }
 0x419   : > { %10515 = vmatprep.mubr.bf16.mxu0 %v19300_v30  ;;  %v7773_v30 = vsel %vm16937_vm5, %v12491_v48, %v7772_v36 }
 0x41f   : > { %5283 = vmatmul.mubr.bf16.gmra.mrb[40].mxu1 %v19301_v27  ;;  %v7780_v27 = vsel %vm16937_vm5, %v7778_v7, %v7779_v25 }
 0x420   : > { %10516 = vmatmul.mubr.bf16.gmra.mrb[40].mxu0 %v19302_v15  ;;  %5292 = vmatprep.mubr.bf16.mxu1 %v19303_v45  ;;  %v12882_v15 = vcombine.high %v7773_v30, %v7780_v27  ;;  %v19316_v45 = vld [vmem:[#allocation44_spill] sm:$0xff] }
 0x421   : > { %10525 = vmatprep.mubr.bf16.mxu0 %v19304_v42  ;;  %v19317_v42 = vld [vmem:[#allocation46_spill] sm:$0xff] }
 0x427   : > { %5293 = vmatmul.mubr.bf16.gmra.mrb[44].mxu1 %v19305_v38  ;;  %v12881_v38 = vcombine.low %v7773_v30, %v7780_v27 }
 0x428   : > { %10526 = vmatmul.mubr.bf16.gmra.mrb[44].mxu0 %v19306_v57  ;;  %5302 = vmatprep.mubr.bf16.mxu1 %v19307_v55  ;;  %v19318_v57 = vld [vmem:[#allocation48_spill] sm:$0xff] }
 0x429   : > { %10535 = vmatprep.mubr.bf16.mxu0 %v19308_v59 }
 0x42f   : > { %5303 = vmatmul.mubr.bf16.gmra.mrb[48].mxu1 %v19309_v18 }
 0x430   : > { %10536 = vmatmul.mubr.bf16.gmra.mrb[48].mxu0 %v19310_v53  ;;  %5312 = vmatprep.mubr.bf16.mxu1 %v19311_v1 }
 0x431   : > { %10545 = vmatprep.mubr.bf16.mxu0 %v19312_v35 }
 0x437   : > { %5313 = vmatmul.mubr.bf16.gmra.mrb[52].mxu1 %v19313_v61 }
 0x438   : > { %10546 = vmatmul.mubr.bf16.gmra.mrb[52].mxu0 %v19314_v6  ;;  %5322 = vmatprep.mubr.bf16.mxu1 %v19315_v26 }
 0x439   : > { %10555 = vmatprep.mubr.bf16.mxu0 %v18074_v58  ;;  %v19334_v58 = vld [vmem:[#allocation88_spill] sm:$0xff] }
 0x43f   : > { %5323 = vmatmul.mubr.bf16.gmra.mrb[56].mxu1 %v19316_v45 }
 0x440   : > { %10556 = vmatmul.mubr.bf16.gmra.mrb[56].mxu0 %v18086_v51  ;;  %5332 = vmatprep.mubr.bf16.mxu1 %v19317_v42  ;;  %v19335_v51 = vld [vmem:[#allocation120_spill] sm:$0xff] }
 0x441   : > { %10565 = vmatprep.mubr.bf16.mxu0 %v12882_v15 }
 0x447   : > { %5333 = vmatmul.mubr.bf16.gmra.mrb[60].mxu1 %v19318_v57 }
 0x448   : > { %10566 = vmatmul.mubr.bf16.gmra.mrb[60].mxu0 %v12881_v38  ;;  %5968 = vmatprep.mubr.bf16.mxu1 %v18100_v20  ;;  %v19336_v20 = vld [vmem:[#allocation90_spill] sm:$0xff] }
 0x449   : > { %10608 = vmatprep.mubr.bf16.mxu0 %v17432_v13  ;;  %v19319_v13 = vld [vmem:[#allocation112_spill] sm:$0xff] }
 0x44f   : > { %5969 = vmatmul.mubr.bf16.vlgmr.msra.gmra.mrb[0].mxu1 %v18123_v46  ;;  %v19337_v46 = vld [vmem:[#allocation121_spill] sm:$0xff] }
 0x450   : > { %10609 = vmatmul.mubr.bf16.vlgmr.msra.gmra.mrb[0].mxu0 %v17469_v12  ;;  %5978 = vmatprep.mubr.bf16.mxu1 %v19240_v23  ;;  %v19320_v12 = vld [vmem:[#allocation75_spill] sm:$0xff]  ;;  %v19338_v23 = vld [vmem:[#allocation92_spill] sm:$0xff] }
 0x451   : > { %10618 = vmatprep.mubr.bf16.mxu0 %v17471_v34  ;;  %v19321_v34 = vld [vmem:[#allocation113_spill] sm:$0xff] }
 0x457   : > { %5979 = vmatmul.mubr.bf16.gmra.mrb[4].mxu1 %v19241_v56  ;;  %v19339_v56 = vld [vmem:[#allocation122_spill] sm:$0xff] }
 0x458   : > { %10619 = vmatmul.mubr.bf16.gmra.mrb[4].mxu0 %v17508_v31  ;;  %5988 = vmatprep.mubr.bf16.mxu1 %v19242_v41  ;;  %v19322_v31 = vld [vmem:[#allocation77_spill] sm:$0xff]  ;;  %v19340_v41 = vld [vmem:[#allocation123_spill] sm:$0xff] }
 0x459   : > { %10628 = vmatprep.mubr.bf16.mxu0 %v17510_v40  ;;  %v19323_v40 = vld [vmem:[#allocation114_spill] sm:$0xff] }
 0x45f   : > { %5989 = vmatmul.mubr.bf16.gmra.mrb[8].mxu1 %v19243_v8  ;;  %v19341_v8 = vld [vmem:[#allocation62_spill] sm:$0xff] }
 0x460   : > { %10629 = vmatmul.mubr.bf16.gmra.mrb[8].mxu0 %v17547_v14  ;;  %5998 = vmatprep.mubr.bf16.mxu1 %v19244_v47  ;;  %v19324_v14 = vld [vmem:[#allocation79_spill] sm:$0xff]  ;;  %v7776_v47 = vrot.slane %v19341_v8, 5 }
 0x461   : > { %10638 = vmatprep.mubr.bf16.mxu0 %v17549_v16  ;;  %v19325_v16 = vld [vmem:[#allocation115_spill] sm:$0xff] }
 0x467   : > { %5999 = vmatmul.mubr.bf16.gmra.mrb[12].mxu1 %v19245_v32  ;;  %v19342_v32 = vld [vmem:[#allocation18_spill] sm:$0xff] }
 0x468   : > { %10639 = vmatmul.mubr.bf16.gmra.mrb[12].mxu0 %v17586_v50  ;;  %6008 = vmatprep.mubr.bf16.mxu1 %v19246_v33  ;;  %v19326_v50 = vld [vmem:[#allocation80_spill] sm:$0xff]  ;;  %v12492_v33 = vrot.slane %v19342_v32, 9 }
 0x469   : > { %10648 = vmatprep.mubr.bf16.mxu0 %v17588_v5  ;;  %v19327_v5 = vld [vmem:[#allocation116_spill] sm:$0xff] }
 0x46f   : > { %6009 = vmatmul.mubr.bf16.gmra.mrb[16].mxu1 %v19247_v39  ;;  %v7781_v39 = vrot.slane %v7776_v47, 4 }
 0x470   : > { %10649 = vmatmul.mubr.bf16.gmra.mrb[16].mxu0 %v17625_v24  ;;  %6018 = vmatprep.mubr.bf16.mxu1 %v19248_v43  ;;  %v19328_v24 = vld [vmem:[#allocation82_spill] sm:$0xff] }
 0x471   : > { %10658 = vmatprep.mubr.bf16.mxu0 %v17627_v10  ;;  %v19329_v10 = vld [vmem:[#allocation117_spill] sm:$0xff]  ;;  %v15238_v43 = vld [vmem:[%s15446_s17 + $0x358] sm:$0x11]  ;;  %s12984_s17 = sshll.u32 %s19350_s12, 8 }
 0x472   : > { %s18695_s26 = scalar_lea.vmem %s18744_s2, %s12984_s17 }
 0x477   : > { %6019 = vmatmul.mubr.bf16.gmra.mrb[20].mxu1 %v19249_v9  ;;  %v7782_v9 = vrot.slane %v15238_v43, 5 }
 0x478   : > { %10659 = vmatmul.mubr.bf16.gmra.mrb[20].mxu0 %v17664_v37  ;;  %6028 = vmatprep.mubr.bf16.mxu1 %v19250_v44  ;;  %v19330_v37 = vld [vmem:[#allocation84_spill] sm:$0xff]  ;;  %v7777_v44 = vsel %vm16937_vm5, %v12492_v33, %v7776_v47 }
 0x479   : > { %10668 = vmatprep.mubr.bf16.mxu0 %v17666_v54  ;;  %v19331_v54 = vld [vmem:[#allocation118_spill] sm:$0xff] }
 0x47f   : > { %6029 = vmatmul.mubr.bf16.gmra.mrb[24].mxu1 %v19251_v22  ;;  %v7783_v22 = vsel %vm16937_vm5, %v7781_v39, %v7782_v9 }
 0x480   : > { %10669 = vmatmul.mubr.bf16.gmra.mrb[24].mxu0 %v17703_v11  ;;  %6038 = vmatprep.mubr.bf16.mxu1 %v19252_v3  ;;  %v19332_v11 = vld [vmem:[#allocation86_spill] sm:$0xff]  ;;  %v12884_v3 = vcombine.high %v7777_v44, %v7783_v22 }
 0x481   : > { %10678 = vmatprep.mubr.bf16.mxu0 %v17705_v29  ;;  %v19333_v29 = vld [vmem:[#allocation119_spill] sm:$0xff] }
 0x487   : > { %6039 = vmatmul.mubr.bf16.gmra.mrb[28].mxu1 %v19253_v0  ;;  %v19343_v0 = vld [vmem:[#allocation100_spill] sm:$0xff] }
 0x488   : > { %10679 = vmatmul.mubr.bf16.gmra.mrb[28].mxu0 %v19319_v13  ;;  %6048 = vmatprep.mubr.bf16.mxu1 %v19320_v12 }
 0x489   : > { %10688 = vmatprep.mubr.bf16.mxu0 %v19321_v34 }
 0x48f   : > { %6049 = vmatmul.mubr.bf16.gmra.mrb[32].mxu1 %v19322_v31 }
 0x490   : > { %10689 = vmatmul.mubr.bf16.gmra.mrb[32].mxu0 %v19323_v40  ;;  %6058 = vmatprep.mubr.bf16.mxu1 %v19324_v14 }
 0x491   : > { %10698 = vmatprep.mubr.bf16.mxu0 %v19325_v16 }
 0x497   : > { %6059 = vmatmul.mubr.bf16.gmra.mrb[36].mxu1 %v19326_v50 }
 0x498   : > { %10699 = vmatmul.mubr.bf16.gmra.mrb[36].mxu0 %v19327_v5  ;;  %6068 = vmatprep.mubr.bf16.mxu1 %v19328_v24 }
 0x499   : > { %10708 = vmatprep.mubr.bf16.mxu0 %v19329_v10 }
 0x49f   : > { %6069 = vmatmul.mubr.bf16.gmra.mrb[40].mxu1 %v19330_v37 }
 0x4a0   : > { %10709 = vmatmul.mubr.bf16.gmra.mrb[40].mxu0 %v19331_v54  ;;  %6078 = vmatprep.mubr.bf16.mxu1 %v19332_v11 }
 0x4a1   : > { %10718 = vmatprep.mubr.bf16.mxu0 %v19333_v29 }
 0x4a7   : > { %6079 = vmatmul.mubr.bf16.gmra.mrb[44].mxu1 %v19334_v58 }
 0x4a8   : > { %10719 = vmatmul.mubr.bf16.gmra.mrb[44].mxu0 %v19335_v51  ;;  %6088 = vmatprep.mubr.bf16.mxu1 %v19336_v20 }
 0x4a9   : > { %10728 = vmatprep.mubr.bf16.mxu0 %v19337_v46 }
 0x4af   : > { %6089 = vmatmul.mubr.bf16.gmra.mrb[48].mxu1 %v19338_v23 }
 0x4b0   : > { %10729 = vmatmul.mubr.bf16.gmra.mrb[48].mxu0 %v19339_v56  ;;  %6098 = vmatprep.mubr.bf16.mxu1 %v19264_v28 }
 0x4b1   : > { %10738 = vmatprep.mubr.bf16.mxu0 %v19340_v41 }
 0x4b7   : > { %6099 = vmatmul.mubr.bf16.gmra.mrb[52].mxu1 %v19265_v19  ;;  %v12883_v19 = vcombine.low %v7777_v44, %v7783_v22 }
 0x4b8   : > { %10739 = vmatmul.mubr.bf16.gmra.mrb[52].mxu0 %v17801_v52  ;;  %6108 = vmatprep.mubr.bf16.mxu1 %v19266_v2  ;;  %v19344_v52 = vld [vmem:[#allocation102_spill] sm:$0xff] }
 0x4b9   : > { %10748 = vmatprep.mubr.bf16.mxu0 %v18355_v17 }
 0x4bf   : > { %6109 = vmatmul.mubr.bf16.gmra.mrb[56].mxu1 %v19267_v4 }
 0x4c0   : > { %10749 = vmatmul.mubr.bf16.gmra.mrb[56].mxu0 %v18365_v63  ;;  %6118 = vmatprep.mubr.bf16.mxu1 %v19343_v0 }
 0x4c1   : > { %10758 = vmatprep.mubr.bf16.mxu0 %v12884_v3 }
 0x4c7   : > { %6119 = vmatmul.mubr.bf16.gmra.mrb[60].mxu1 %v19344_v52 }
 0x4c8   : > { %10759 = vmatmul.mubr.bf16.gmra.mrb[60].mxu0 %v12883_v19 }
 0x522   : > { %v5970_v2 = vpop.f32.mrb[0].mxu1 }
 0x523   : > { %v10610_v28 = vpop.f32.mrb[0].mxu0  ;;  %v5972_v55 = vpop.f32.mrb[1].mxu1 }
 0x524   : > { %v13018_v17 = vadd.f32 %v10610_v28, %v5970_v2  ;;  %v10612_v59 = vpop.f32.mrb[1].mxu0  ;;  %v5974_v18 = vpop.f32.mrb[2].mxu1 }
 0x525   : > { %v13019_v62 = vadd.f32 %v10612_v59, %v5972_v55  ;;  %v10614_v53 = vpop.f32.mrb[2].mxu0  ;;  %v5976_v4 = vpop.f32.mrb[3].mxu1 }
 0x526   : > { %v13020_v63 = vadd.f32 %v10614_v53, %v5974_v18  ;;  %v10616_v1 = vpop.f32.mrb[3].mxu0  ;;  %v11099_v36 = vmul.f32 %v13018_v17, %v13018_v17 }
 0x527   : > { %v12986_v35 = vpack.c.bf16 %v13019_v62, %v13018_v17  ;;  %v13021_v49 = vadd.f32 %v10616_v1, %v5976_v4  ;;  %v11100_v7 = vmul.f32 %v13019_v62, %v13019_v62 }
 0x528   : > { %v11025_v60 = vadd.f32 %v13020_v63, %v13018_v17  ;;  %v11101_v48 = vmul.f32 %v13020_v63, %v13020_v63 }
 0x529   : > { %11444 = vst [vmem:[%s18695_s26] sm:$0xff] %v12986_v35  ;;  %v11062_v21 = vadd.f32 %v13021_v49, %v13019_v62  ;;  %v11102_v25 = vmul.f32 %v13021_v49, %v13021_v49  ;;  %v12987_v61 = vpack.c.bf16 %v13021_v49, %v13020_v63 }
 0x52a   : > { %v11163_v6 = vadd.f32 %v11101_v48, %v11099_v36  ;;  %v5980_v30 = vpop.f32.mrb[4].mxu1 }
 0x52b   : > { %v11200_v26 = vadd.f32 %v11102_v25, %v11100_v7  ;;  %11445 = vst [vmem:[%s18695_s26 + $0x8] sm:$0xff] %v12987_v61  ;;  %v10620_v27 = vpop.f32.mrb[4].mxu0  ;;  %v5982_v45 = vpop.f32.mrb[5].mxu1 }
 0x52c   : > { %v13022_v15 = vadd.f32 %v10620_v27, %v5980_v30  ;;  %v10622_v42 = vpop.f32.mrb[5].mxu0  ;;  %v5984_v57 = vpop.f32.mrb[6].mxu1 }
 0x52d   : > { %v13023_v38 = vadd.f32 %v10622_v42, %v5982_v45  ;;  %v10624_v13 = vpop.f32.mrb[6].mxu0  ;;  %v5986_v40 = vpop.f32.mrb[7].mxu1 }
 0x52e   : > { %v11026_v12 = vadd.f32 %v13022_v15, %v11025_v60  ;;  %v11103_v34 = vmul.f32 %v13022_v15, %v13022_v15  ;;  %v13024_v31 = vadd.f32 %v10624_v13, %v5984_v57  ;;  %v10626_v14 = vpop.f32.mrb[7].mxu0 }
 0x52f   : > { %v11063_v16 = vadd.f32 %v13023_v38, %v11062_v21  ;;  %v11104_v50 = vmul.f32 %v13023_v38, %v13023_v38  ;;  %v12988_v5 = vpack.c.bf16 %v13023_v38, %v13022_v15  ;;  %v13025_v24 = vadd.f32 %v10626_v14, %v5986_v40 }
 0x530   : > { %v11164_v10 = vadd.f32 %v11163_v6, %v11103_v34  ;;  %v11027_v37 = vadd.f32 %v13024_v31, %v11026_v12  ;;  %v11105_v54 = vmul.f32 %v13024_v31, %v13024_v31 }
 0x531   : > { %v11201_v11 = vadd.f32 %v11200_v26, %v11104_v50  ;;  %11446 = vst [vmem:[%s18695_s26 + $0x10] sm:$0xff] %v12988_v5  ;;  %v11064_v29 = vadd.f32 %v13025_v24, %v11063_v16  ;;  %v11106_v58 = vmul.f32 %v13025_v24, %v13025_v24  ;;  %v12989_v51 = vpack.c.bf16 %v13025_v24, %v13024_v31 }
 0x532   : > { %v11165_v20 = vadd.f32 %v11164_v10, %v11105_v54  ;;  %v5990_v23 = vpop.f32.mrb[8].mxu1 }
 0x533   : > { %v11202_v46 = vadd.f32 %v11201_v11, %v11106_v58  ;;  %11447 = vst [vmem:[%s18695_s26 + $0x18] sm:$0xff] %v12989_v51  ;;  %v10630_v56 = vpop.f32.mrb[8].mxu0  ;;  %v5992_v8 = vpop.f32.mrb[9].mxu1 }
 0x534   : > { %v13026_v41 = vadd.f32 %v10630_v56, %v5990_v23  ;;  %v10632_v47 = vpop.f32.mrb[9].mxu0  ;;  %v5994_v33 = vpop.f32.mrb[10].mxu1 }
 0x535   : > { %v13027_v32 = vadd.f32 %v10632_v47, %v5992_v8  ;;  %v10634_v39 = vpop.f32.mrb[10].mxu0  ;;  %v5996_v22 = vpop.f32.mrb[11].mxu1 }
 0x536   : > { %v11028_v43 = vadd.f32 %v13026_v41, %v11027_v37  ;;  %v11107_v9 = vmul.f32 %v13026_v41, %v13026_v41  ;;  %v13028_v44 = vadd.f32 %v10634_v39, %v5994_v33  ;;  %v10636_v3 = vpop.f32.mrb[11].mxu0 }
 0x537   : > { %v11065_v0 = vadd.f32 %v13027_v32, %v11064_v29  ;;  %v11108_v19 = vmul.f32 %v13027_v32, %v13027_v32  ;;  %v12990_v52 = vpack.c.bf16 %v13027_v32, %v13026_v41  ;;  %v13029_v2 = vadd.f32 %v10636_v3, %v5996_v22 }
 0x538   : > { %v11166_v28 = vadd.f32 %v11165_v20, %v11107_v9  ;;  %v11029_v17 = vadd.f32 %v13028_v44, %v11028_v43  ;;  %v11109_v55 = vmul.f32 %v13028_v44, %v13028_v44 }
 0x539   : > { %v11203_v59 = vadd.f32 %v11202_v46, %v11108_v19  ;;  %11448 = vst [vmem:[%s18695_s26 + $0x20] sm:$0xff] %v12990_v52  ;;  %v11066_v62 = vadd.f32 %v13029_v2, %v11065_v0  ;;  %v11110_v18 = vmul.f32 %v13029_v2, %v13029_v2  ;;  %v12991_v53 = vpack.c.bf16 %v13029_v2, %v13028_v44 }
 0x53a   : > { %v11167_v63 = vadd.f32 %v11166_v28, %v11109_v55  ;;  %v6000_v1 = vpop.f32.mrb[12].mxu1 }
 0x53b   : > { %v11204_v4 = vadd.f32 %v11203_v59, %v11110_v18  ;;  %11449 = vst [vmem:[%s18695_s26 + $0x28] sm:$0xff] %v12991_v53  ;;  %v10640_v35 = vpop.f32.mrb[12].mxu0  ;;  %v6002_v36 = vpop.f32.mrb[13].mxu1 }
 0x53c   : > { %v13030_v49 = vadd.f32 %v10640_v35, %v6000_v1  ;;  %v10642_v60 = vpop.f32.mrb[13].mxu0  ;;  %v6004_v7 = vpop.f32.mrb[14].mxu1 }
 0x53d   : > { %v13031_v48 = vadd.f32 %v10642_v60, %v6002_v36  ;;  %v10644_v21 = vpop.f32.mrb[14].mxu0  ;;  %v6006_v26 = vpop.f32.mrb[15].mxu1 }
 0x53e   : > { %v11030_v25 = vadd.f32 %v13030_v49, %v11029_v17  ;;  %v11111_v61 = vmul.f32 %v13030_v49, %v13030_v49  ;;  %v13032_v6 = vadd.f32 %v10644_v21, %v6004_v7  ;;  %v10646_v30 = vpop.f32.mrb[15].mxu0 }
 0x53f   : > { %v11067_v27 = vadd.f32 %v13031_v48, %v11066_v62  ;;  %v11112_v15 = vmul.f32 %v13031_v48, %v13031_v48  ;;  %v12992_v45 = vpack.c.bf16 %v13031_v48, %v13030_v49  ;;  %v13033_v42 = vadd.f32 %v10646_v30, %v6006_v26 }
 0x540   : > { %v11168_v38 = vadd.f32 %v11167_v63, %v11111_v61  ;;  %v11031_v57 = vadd.f32 %v13032_v6, %v11030_v25  ;;  %v11113_v13 = vmul.f32 %v13032_v6, %v13032_v6 }
 0x541   : > { %v11205_v12 = vadd.f32 %v11204_v4, %v11112_v15  ;;  %11450 = vst [vmem:[%s18695_s26 + $0x30] sm:$0xff] %v12992_v45  ;;  %v11068_v34 = vadd.f32 %v13033_v42, %v11067_v27  ;;  %v11114_v31 = vmul.f32 %v13033_v42, %v13033_v42  ;;  %v12993_v40 = vpack.c.bf16 %v13033_v42, %v13032_v6 }
 0x542   : > { %v11169_v14 = vadd.f32 %v11168_v38, %v11113_v13  ;;  %v6010_v50 = vpop.f32.mrb[16].mxu1 }
 0x543   : > { %v11206_v16 = vadd.f32 %v11205_v12, %v11114_v31  ;;  %11451 = vst [vmem:[%s18695_s26 + $0x38] sm:$0xff] %v12993_v40  ;;  %v10650_v5 = vpop.f32.mrb[16].mxu0  ;;  %v6012_v10 = vpop.f32.mrb[17].mxu1 }
 0x544   : > { %v13034_v24 = vadd.f32 %v10650_v5, %v6010_v50  ;;  %v10652_v37 = vpop.f32.mrb[17].mxu0  ;;  %v6014_v11 = vpop.f32.mrb[18].mxu1 }
 0x545   : > { %v13035_v54 = vadd.f32 %v10652_v37, %v6012_v10  ;;  %v10654_v29 = vpop.f32.mrb[18].mxu0  ;;  %v6016_v46 = vpop.f32.mrb[19].mxu1 }
 0x546   : > { %v11032_v58 = vadd.f32 %v13034_v24, %v11031_v57  ;;  %v11115_v51 = vmul.f32 %v13034_v24, %v13034_v24  ;;  %v13036_v20 = vadd.f32 %v10654_v29, %v6014_v11  ;;  %v10656_v23 = vpop.f32.mrb[19].mxu0 }
 0x547   : > { %v11069_v56 = vadd.f32 %v13035_v54, %v11068_v34  ;;  %v11116_v41 = vmul.f32 %v13035_v54, %v13035_v54  ;;  %v12994_v8 = vpack.c.bf16 %v13035_v54, %v13034_v24  ;;  %v13037_v47 = vadd.f32 %v10656_v23, %v6016_v46 }
 0x548   : > { %v11170_v32 = vadd.f32 %v11169_v14, %v11115_v51  ;;  %v11033_v33 = vadd.f32 %v13036_v20, %v11032_v58  ;;  %v11117_v39 = vmul.f32 %v13036_v20, %v13036_v20 }
 0x549   : > { %v11207_v43 = vadd.f32 %v11206_v16, %v11116_v41  ;;  %11452 = vst [vmem:[%s18695_s26 + $0x40] sm:$0xff] %v12994_v8  ;;  %v11070_v9 = vadd.f32 %v13037_v47, %v11069_v56  ;;  %v11118_v44 = vmul.f32 %v13037_v47, %v13037_v47  ;;  %v12995_v22 = vpack.c.bf16 %v13037_v47, %v13036_v20 }
 0x54a   : > { %v11171_v3 = vadd.f32 %v11170_v32, %v11117_v39  ;;  %v6020_v19 = vpop.f32.mrb[20].mxu1 }
 0x54b   : > { %v11208_v0 = vadd.f32 %v11207_v43, %v11118_v44  ;;  %11453 = vst [vmem:[%s18695_s26 + $0x48] sm:$0xff] %v12995_v22  ;;  %v10660_v52 = vpop.f32.mrb[20].mxu0  ;;  %v6022_v28 = vpop.f32.mrb[21].mxu1 }
 0x54c   : > { %v13038_v2 = vadd.f32 %v10660_v52, %v6020_v19  ;;  %v10662_v17 = vpop.f32.mrb[21].mxu0  ;;  %v6024_v59 = vpop.f32.mrb[22].mxu1 }
 0x54d   : > { %v13039_v55 = vadd.f32 %v10662_v17, %v6022_v28  ;;  %v10664_v62 = vpop.f32.mrb[22].mxu0  ;;  %v6026_v4 = vpop.f32.mrb[23].mxu1 }
 0x54e   : > { %v11034_v18 = vadd.f32 %v13038_v2, %v11033_v33  ;;  %v11119_v53 = vmul.f32 %v13038_v2, %v13038_v2  ;;  %v13040_v63 = vadd.f32 %v10664_v62, %v6024_v59  ;;  %v10666_v1 = vpop.f32.mrb[23].mxu0 }
 0x54f   : > { %v11071_v35 = vadd.f32 %v13039_v55, %v11070_v9  ;;  %v11120_v49 = vmul.f32 %v13039_v55, %v13039_v55  ;;  %v12996_v36 = vpack.c.bf16 %v13039_v55, %v13038_v2  ;;  %v13041_v60 = vadd.f32 %v10666_v1, %v6026_v4 }
 0x550   : > { %v11172_v48 = vadd.f32 %v11171_v3, %v11119_v53  ;;  %v11035_v7 = vadd.f32 %v13040_v63, %v11034_v18  ;;  %v11121_v21 = vmul.f32 %v13040_v63, %v13040_v63 }
 0x551   : > { %v11209_v25 = vadd.f32 %v11208_v0, %v11120_v49  ;;  %11454 = vst [vmem:[%s18695_s26 + $0x50] sm:$0xff] %v12996_v36  ;;  %v11072_v61 = vadd.f32 %v13041_v60, %v11071_v35  ;;  %v11122_v6 = vmul.f32 %v13041_v60, %v13041_v60  ;;  %v12997_v26 = vpack.c.bf16 %v13041_v60, %v13040_v63 }
 0x552   : > { %v11173_v30 = vadd.f32 %v11172_v48, %v11121_v21  ;;  %v6030_v15 = vpop.f32.mrb[24].mxu1 }
 0x553   : > { %v11210_v27 = vadd.f32 %v11209_v25, %v11122_v6  ;;  %11455 = vst [vmem:[%s18695_s26 + $0x58] sm:$0xff] %v12997_v26  ;;  %v10670_v45 = vpop.f32.mrb[24].mxu0  ;;  %v6032_v38 = vpop.f32.mrb[25].mxu1 }
 0x554   : > { %v13042_v42 = vadd.f32 %v10670_v45, %v6030_v15  ;;  %v10672_v57 = vpop.f32.mrb[25].mxu0  ;;  %v6034_v12 = vpop.f32.mrb[26].mxu1 }
 0x555   : > { %v13043_v13 = vadd.f32 %v10672_v57, %v6032_v38  ;;  %v10674_v34 = vpop.f32.mrb[26].mxu0  ;;  %v6036_v16 = vpop.f32.mrb[27].mxu1 }
 0x556   : > { %v11036_v31 = vadd.f32 %v13042_v42, %v11035_v7  ;;  %v11123_v40 = vmul.f32 %v13042_v42, %v13042_v42  ;;  %v13044_v14 = vadd.f32 %v10674_v34, %v6034_v12  ;;  %v10676_v50 = vpop.f32.mrb[27].mxu0 }
 0x557   : > { %v11073_v5 = vadd.f32 %v13043_v13, %v11072_v61  ;;  %v11124_v24 = vmul.f32 %v13043_v13, %v13043_v13  ;;  %v12998_v10 = vpack.c.bf16 %v13043_v13, %v13042_v42  ;;  %v13045_v37 = vadd.f32 %v10676_v50, %v6036_v16 }
 0x558   : > { %v11174_v54 = vadd.f32 %v11173_v30, %v11123_v40  ;;  %v11037_v11 = vadd.f32 %v13044_v14, %v11036_v31  ;;  %v11125_v29 = vmul.f32 %v13044_v14, %v13044_v14 }
 0x559   : > { %v11211_v58 = vadd.f32 %v11210_v27, %v11124_v24  ;;  %11456 = vst [vmem:[%s18695_s26 + $0x60] sm:$0xff] %v12998_v10  ;;  %v11074_v51 = vadd.f32 %v13045_v37, %v11073_v5  ;;  %v11126_v20 = vmul.f32 %v13045_v37, %v13045_v37  ;;  %v12999_v46 = vpack.c.bf16 %v13045_v37, %v13044_v14 }
 0x55a   : > { %v11175_v23 = vadd.f32 %v11174_v54, %v11125_v29  ;;  %v6040_v41 = vpop.f32.mrb[28].mxu1 }
 0x55b   : > { %v11212_v56 = vadd.f32 %v11211_v58, %v11126_v20  ;;  %11457 = vst [vmem:[%s18695_s26 + $0x68] sm:$0xff] %v12999_v46  ;;  %v10680_v8 = vpop.f32.mrb[28].mxu0  ;;  %v6042_v32 = vpop.f32.mrb[29].mxu1 }
 0x55c   : > { %v13046_v47 = vadd.f32 %v10680_v8, %v6040_v41  ;;  %v10682_v33 = vpop.f32.mrb[29].mxu0  ;;  %v6044_v43 = vpop.f32.mrb[30].mxu1 }
 0x55d   : > { %v13047_v39 = vadd.f32 %v10682_v33, %v6042_v32  ;;  %v10684_v9 = vpop.f32.mrb[30].mxu0  ;;  %v6046_v0 = vpop.f32.mrb[31].mxu1 }
 0x55e   : > { %v11038_v44 = vadd.f32 %v13046_v47, %v11037_v11  ;;  %v11127_v22 = vmul.f32 %v13046_v47, %v13046_v47  ;;  %v13048_v3 = vadd.f32 %v10684_v9, %v6044_v43  ;;  %v10686_v19 = vpop.f32.mrb[31].mxu0 }
 0x55f   : > { %v11075_v52 = vadd.f32 %v13047_v39, %v11074_v51  ;;  %v11128_v2 = vmul.f32 %v13047_v39, %v13047_v39  ;;  %v13000_v28 = vpack.c.bf16 %v13047_v39, %v13046_v47  ;;  %v13049_v17 = vadd.f32 %v10686_v19, %v6046_v0 }
 0x560   : > { %v11176_v55 = vadd.f32 %v11175_v23, %v11127_v22  ;;  %v11039_v59 = vadd.f32 %v13048_v3, %v11038_v44  ;;  %v11129_v62 = vmul.f32 %v13048_v3, %v13048_v3 }
 0x561   : > { %v11213_v18 = vadd.f32 %v11212_v56, %v11128_v2  ;;  %11458 = vst [vmem:[%s18695_s26 + $0x70] sm:$0xff] %v13000_v28  ;;  %v11076_v53 = vadd.f32 %v13049_v17, %v11075_v52  ;;  %v11130_v63 = vmul.f32 %v13049_v17, %v13049_v17  ;;  %v13001_v4 = vpack.c.bf16 %v13049_v17, %v13048_v3 }
 0x562   : > { %v11177_v1 = vadd.f32 %v11176_v55, %v11129_v62  ;;  %v6050_v49 = vpop.f32.mrb[32].mxu1 }
 0x563   : > { %v11214_v35 = vadd.f32 %v11213_v18, %v11130_v63  ;;  %11459 = vst [vmem:[%s18695_s26 + $0x78] sm:$0xff] %v13001_v4  ;;  %v10690_v36 = vpop.f32.mrb[32].mxu0  ;;  %v6052_v48 = vpop.f32.mrb[33].mxu1 }
 0x564   : > { %v13050_v60 = vadd.f32 %v10690_v36, %v6050_v49  ;;  %v10692_v7 = vpop.f32.mrb[33].mxu0  ;;  %v6054_v25 = vpop.f32.mrb[34].mxu1 }
 0x565   : > { %v13051_v21 = vadd.f32 %v10692_v7, %v6052_v48  ;;  %v10694_v61 = vpop.f32.mrb[34].mxu0  ;;  %v6056_v27 = vpop.f32.mrb[35].mxu1 }
 0x566   : > { %v11040_v6 = vadd.f32 %v13050_v60, %v11039_v59  ;;  %v11131_v26 = vmul.f32 %v13050_v60, %v13050_v60  ;;  %v13052_v30 = vadd.f32 %v10694_v61, %v6054_v25  ;;  %v10696_v15 = vpop.f32.mrb[35].mxu0 }
 0x567   : > { %v11077_v45 = vadd.f32 %v13051_v21, %v11076_v53  ;;  %v11132_v42 = vmul.f32 %v13051_v21, %v13051_v21  ;;  %v13002_v38 = vpack.c.bf16 %v13051_v21, %v13050_v60  ;;  %v13053_v57 = vadd.f32 %v10696_v15, %v6056_v27 }
 0x568   : > { %v11178_v13 = vadd.f32 %v11177_v1, %v11131_v26  ;;  %v11041_v12 = vadd.f32 %v13052_v30, %v11040_v6  ;;  %v11133_v34 = vmul.f32 %v13052_v30, %v13052_v30 }
 0x569   : > { %v11215_v31 = vadd.f32 %v11214_v35, %v11132_v42  ;;  %11460 = vst [vmem:[%s18695_s26 + $0x80] sm:$0xff] %v13002_v38  ;;  %v11078_v40 = vadd.f32 %v13053_v57, %v11077_v45  ;;  %v11134_v14 = vmul.f32 %v13053_v57, %v13053_v57  ;;  %v13003_v16 = vpack.c.bf16 %v13053_v57, %v13052_v30 }
 0x56a   : > { %v11179_v50 = vadd.f32 %v11178_v13, %v11133_v34  ;;  %v6060_v24 = vpop.f32.mrb[36].mxu1 }
 0x56b   : > { %v11216_v5 = vadd.f32 %v11215_v31, %v11134_v14  ;;  %11461 = vst [vmem:[%s18695_s26 + $0x88] sm:$0xff] %v13003_v16  ;;  %v10700_v10 = vpop.f32.mrb[36].mxu0  ;;  %v6062_v54 = vpop.f32.mrb[37].mxu1 }
 0x56c   : > { %v13054_v37 = vadd.f32 %v10700_v10, %v6060_v24  ;;  %v10702_v11 = vpop.f32.mrb[37].mxu0  ;;  %v6064_v58 = vpop.f32.mrb[38].mxu1 }
 0x56d   : > { %v13055_v29 = vadd.f32 %v10702_v11, %v6062_v54  ;;  %v10704_v51 = vpop.f32.mrb[38].mxu0  ;;  %v6066_v56 = vpop.f32.mrb[39].mxu1 }
 0x56e   : > { %v11042_v20 = vadd.f32 %v13054_v37, %v11041_v12  ;;  %v11135_v46 = vmul.f32 %v13054_v37, %v13054_v37  ;;  %v13056_v23 = vadd.f32 %v10704_v51, %v6064_v58  ;;  %v10706_v41 = vpop.f32.mrb[39].mxu0 }
 0x56f   : > { %v11079_v8 = vadd.f32 %v13055_v29, %v11078_v40  ;;  %v11136_v47 = vmul.f32 %v13055_v29, %v13055_v29  ;;  %v13004_v32 = vpack.c.bf16 %v13055_v29, %v13054_v37  ;;  %v13057_v33 = vadd.f32 %v10706_v41, %v6066_v56 }
 0x570   : > { %v11180_v39 = vadd.f32 %v11179_v50, %v11135_v46  ;;  %v11043_v43 = vadd.f32 %v13056_v23, %v11042_v20  ;;  %v11137_v9 = vmul.f32 %v13056_v23, %v13056_v23 }
 0x571   : > { %v11217_v44 = vadd.f32 %v11216_v5, %v11136_v47  ;;  %11462 = vst [vmem:[%s18695_s26 + $0x90] sm:$0xff] %v13004_v32  ;;  %v11080_v22 = vadd.f32 %v13057_v33, %v11079_v8  ;;  %v11138_v3 = vmul.f32 %v13057_v33, %v13057_v33  ;;  %v13005_v0 = vpack.c.bf16 %v13057_v33, %v13056_v23 }
 0x572   : > { %v11181_v19 = vadd.f32 %v11180_v39, %v11137_v9  ;;  %v6070_v2 = vpop.f32.mrb[40].mxu1 }
 0x573   : > { %v11218_v52 = vadd.f32 %v11217_v44, %v11138_v3  ;;  %11463 = vst [vmem:[%s18695_s26 + $0x98] sm:$0xff] %v13005_v0  ;;  %v10710_v28 = vpop.f32.mrb[40].mxu0  ;;  %v6072_v55 = vpop.f32.mrb[41].mxu1 }
 0x574   : > { %v13058_v17 = vadd.f32 %v10710_v28, %v6070_v2  ;;  %v10712_v59 = vpop.f32.mrb[41].mxu0  ;;  %v6074_v18 = vpop.f32.mrb[42].mxu1 }
 0x575   : > { %v13059_v62 = vadd.f32 %v10712_v59, %v6072_v55  ;;  %v10714_v53 = vpop.f32.mrb[42].mxu0  ;;  %v6076_v35 = vpop.f32.mrb[43].mxu1 }
 0x576   : > { %v11044_v63 = vadd.f32 %v13058_v17, %v11043_v43  ;;  %v11139_v4 = vmul.f32 %v13058_v17, %v13058_v17  ;;  %v13060_v1 = vadd.f32 %v10714_v53, %v6074_v18  ;;  %v10716_v49 = vpop.f32.mrb[43].mxu0 }
 0x577   : > { %v11081_v36 = vadd.f32 %v13059_v62, %v11080_v22  ;;  %v11140_v60 = vmul.f32 %v13059_v62, %v13059_v62  ;;  %v13006_v48 = vpack.c.bf16 %v13059_v62, %v13058_v17  ;;  %v13061_v7 = vadd.f32 %v10716_v49, %v6076_v35 }
 0x578   : > { %v11182_v21 = vadd.f32 %v11181_v19, %v11139_v4  ;;  %v11045_v25 = vadd.f32 %v13060_v1, %v11044_v63  ;;  %v11141_v61 = vmul.f32 %v13060_v1, %v13060_v1 }
 0x579   : > { %v11219_v6 = vadd.f32 %v11218_v52, %v11140_v60  ;;  %11464 = vst [vmem:[%s18695_s26 + $0xa0] sm:$0xff] %v13006_v48  ;;  %v11082_v26 = vadd.f32 %v13061_v7, %v11081_v36  ;;  %v11142_v30 = vmul.f32 %v13061_v7, %v13061_v7  ;;  %v13007_v27 = vpack.c.bf16 %v13061_v7, %v13060_v1 }
 0x57a   : > { %v11183_v15 = vadd.f32 %v11182_v21, %v11141_v61  ;;  %v6080_v42 = vpop.f32.mrb[44].mxu1 }
 0x57b   : > { %v11220_v45 = vadd.f32 %v11219_v6, %v11142_v30  ;;  %11465 = vst [vmem:[%s18695_s26 + $0xa8] sm:$0xff] %v13007_v27  ;;  %v10720_v38 = vpop.f32.mrb[44].mxu0  ;;  %v6082_v13 = vpop.f32.mrb[45].mxu1 }
 0x57c   : > { %v13062_v57 = vadd.f32 %v10720_v38, %v6080_v42  ;;  %v10722_v12 = vpop.f32.mrb[45].mxu0  ;;  %v6084_v31 = vpop.f32.mrb[46].mxu1 }
 0x57d   : > { %v13063_v34 = vadd.f32 %v10722_v12, %v6082_v13  ;;  %v10724_v40 = vpop.f32.mrb[46].mxu0  ;;  %v6086_v5 = vpop.f32.mrb[47].mxu1 }
 0x57e   : > { %v11046_v14 = vadd.f32 %v13062_v57, %v11045_v25  ;;  %v11143_v16 = vmul.f32 %v13062_v57, %v13062_v57  ;;  %v13064_v50 = vadd.f32 %v10724_v40, %v6084_v31  ;;  %v10726_v24 = vpop.f32.mrb[47].mxu0 }
 0x57f   : > { %v11083_v10 = vadd.f32 %v13063_v34, %v11082_v26  ;;  %v11144_v37 = vmul.f32 %v13063_v34, %v13063_v34  ;;  %v13008_v54 = vpack.c.bf16 %v13063_v34, %v13062_v57  ;;  %v13065_v11 = vadd.f32 %v10726_v24, %v6086_v5 }
 0x580   : > { %v11184_v29 = vadd.f32 %v11183_v15, %v11143_v16  ;;  %v11047_v58 = vadd.f32 %v13064_v50, %v11046_v14  ;;  %v11145_v51 = vmul.f32 %v13064_v50, %v13064_v50 }
 0x581   : > { %v11221_v20 = vadd.f32 %v11220_v45, %v11144_v37  ;;  %11466 = vst [vmem:[%s18695_s26 + $0xb0] sm:$0xff] %v13008_v54  ;;  %v11084_v46 = vadd.f32 %v13065_v11, %v11083_v10  ;;  %v11146_v23 = vmul.f32 %v13065_v11, %v13065_v11  ;;  %v13009_v56 = vpack.c.bf16 %v13065_v11, %v13064_v50 }
 0x582   : > { %v11185_v41 = vadd.f32 %v11184_v29, %v11145_v51  ;;  %v6090_v47 = vpop.f32.mrb[48].mxu1 }
 0x583   : > { %v11222_v8 = vadd.f32 %v11221_v20, %v11146_v23  ;;  %11467 = vst [vmem:[%s18695_s26 + $0xb8] sm:$0xff] %v13009_v56  ;;  %v10730_v32 = vpop.f32.mrb[48].mxu0  ;;  %v6092_v39 = vpop.f32.mrb[49].mxu1 }
 0x584   : > { %v13066_v33 = vadd.f32 %v10730_v32, %v6090_v47  ;;  %v10732_v43 = vpop.f32.mrb[49].mxu0  ;;  %v6094_v44 = vpop.f32.mrb[50].mxu1 }
 0x585   : > { %v13067_v9 = vadd.f32 %v10732_v43, %v6092_v39  ;;  %v10734_v22 = vpop.f32.mrb[50].mxu0  ;;  %v6096_v52 = vpop.f32.mrb[51].mxu1 }
 0x586   : > { %v11048_v3 = vadd.f32 %v13066_v33, %v11047_v58  ;;  %v11147_v0 = vmul.f32 %v13066_v33, %v13066_v33  ;;  %v13068_v19 = vadd.f32 %v10734_v22, %v6094_v44  ;;  %v10736_v2 = vpop.f32.mrb[51].mxu0 }
 0x587   : > { %v11085_v28 = vadd.f32 %v13067_v9, %v11084_v46  ;;  %v11148_v17 = vmul.f32 %v13067_v9, %v13067_v9  ;;  %v13010_v55 = vpack.c.bf16 %v13067_v9, %v13066_v33  ;;  %v13069_v59 = vadd.f32 %v10736_v2, %v6096_v52 }
 0x588   : > { %v11186_v62 = vadd.f32 %v11185_v41, %v11147_v0  ;;  %v11049_v18 = vadd.f32 %v13068_v19, %v11048_v3  ;;  %v11149_v53 = vmul.f32 %v13068_v19, %v13068_v19 }
 0x589   : > { %v11223_v63 = vadd.f32 %v11222_v8, %v11148_v17  ;;  %11468 = vst [vmem:[%s18695_s26 + $0xc0] sm:$0xff] %v13010_v55  ;;  %v11086_v4 = vadd.f32 %v13069_v59, %v11085_v28  ;;  %v11150_v1 = vmul.f32 %v13069_v59, %v13069_v59  ;;  %v13011_v35 = vpack.c.bf16 %v13069_v59, %v13068_v19 }
 0x58a   : > { %v11187_v49 = vadd.f32 %v11186_v62, %v11149_v53  ;;  %v6100_v60 = vpop.f32.mrb[52].mxu1 }
 0x58b   : > { %v11224_v36 = vadd.f32 %v11223_v63, %v11150_v1  ;;  %11469 = vst [vmem:[%s18695_s26 + $0xc8] sm:$0xff] %v13011_v35  ;;  %v10740_v48 = vpop.f32.mrb[52].mxu0  ;;  %v6102_v21 = vpop.f32.mrb[53].mxu1 }
 0x58c   : > { %v13070_v7 = vadd.f32 %v10740_v48, %v6100_v60  ;;  %v10742_v25 = vpop.f32.mrb[53].mxu0  ;;  %v6104_v6 = vpop.f32.mrb[54].mxu1 }
 0x58d   : > { %v13071_v61 = vadd.f32 %v10742_v25, %v6102_v21  ;;  %v10744_v26 = vpop.f32.mrb[54].mxu0  ;;  %v6106_v45 = vpop.f32.mrb[55].mxu1 }
 0x58e   : > { %v11050_v30 = vadd.f32 %v13070_v7, %v11049_v18  ;;  %v11151_v27 = vmul.f32 %v13070_v7, %v13070_v7  ;;  %v13072_v15 = vadd.f32 %v10744_v26, %v6104_v6  ;;  %v10746_v42 = vpop.f32.mrb[55].mxu0 }
 0x58f   : > { %v11087_v38 = vadd.f32 %v13071_v61, %v11086_v4  ;;  %v11152_v57 = vmul.f32 %v13071_v61, %v13071_v61  ;;  %v13012_v13 = vpack.c.bf16 %v13071_v61, %v13070_v7  ;;  %v13073_v12 = vadd.f32 %v10746_v42, %v6106_v45 }
 0x590   : > { %v11188_v34 = vadd.f32 %v11187_v49, %v11151_v27  ;;  %v11051_v31 = vadd.f32 %v13072_v15, %v11050_v30  ;;  %v11153_v40 = vmul.f32 %v13072_v15, %v13072_v15 }
 0x591   : > { %v11225_v14 = vadd.f32 %v11224_v36, %v11152_v57  ;;  %11470 = vst [vmem:[%s18695_s26 + $0xd0] sm:$0xff] %v13012_v13  ;;  %v11088_v16 = vadd.f32 %v13073_v12, %v11087_v38  ;;  %v11154_v50 = vmul.f32 %v13073_v12, %v13073_v12  ;;  %v13013_v5 = vpack.c.bf16 %v13073_v12, %v13072_v15 }
 0x592   : > { %v11189_v24 = vadd.f32 %v11188_v34, %v11153_v40  ;;  %v6110_v37 = vpop.f32.mrb[56].mxu1 }
 0x593   : > { %v11226_v10 = vadd.f32 %v11225_v14, %v11154_v50  ;;  %11471 = vst [vmem:[%s18695_s26 + $0xd8] sm:$0xff] %v13013_v5  ;;  %v10750_v54 = vpop.f32.mrb[56].mxu0  ;;  %v6112_v29 = vpop.f32.mrb[57].mxu1 }
 0x594   : > { %v13074_v11 = vadd.f32 %v10750_v54, %v6110_v37  ;;  %v10752_v58 = vpop.f32.mrb[57].mxu0  ;;  %v6114_v20 = vpop.f32.mrb[58].mxu1 }
 0x595   : > { %v13075_v51 = vadd.f32 %v10752_v58, %v6112_v29  ;;  %v10754_v46 = vpop.f32.mrb[58].mxu0  ;;  %v6116_v8 = vpop.f32.mrb[59].mxu1 }
 0x596   : > { %v11052_v23 = vadd.f32 %v13074_v11, %v11051_v31  ;;  %v11155_v56 = vmul.f32 %v13074_v11, %v13074_v11  ;;  %v13076_v41 = vadd.f32 %v10754_v46, %v6114_v20  ;;  %v10756_v47 = vpop.f32.mrb[59].mxu0 }
 0x597   : > { %v11089_v32 = vadd.f32 %v13075_v51, %v11088_v16  ;;  %v11156_v33 = vmul.f32 %v13075_v51, %v13075_v51  ;;  %v13014_v39 = vpack.c.bf16 %v13075_v51, %v13074_v11  ;;  %v13077_v43 = vadd.f32 %v10756_v47, %v6116_v8 }
 0x598   : > { %v11190_v9 = vadd.f32 %v11189_v24, %v11155_v56  ;;  %v11053_v44 = vadd.f32 %v13076_v41, %v11052_v23  ;;  %v11157_v22 = vmul.f32 %v13076_v41, %v13076_v41 }
 0x599   : > { %v11227_v3 = vadd.f32 %v11226_v10, %v11156_v33  ;;  %11472 = vst [vmem:[%s18695_s26 + $0xe0] sm:$0xff] %v13014_v39  ;;  %v11090_v0 = vadd.f32 %v13077_v43, %v11089_v32  ;;  %v11158_v19 = vmul.f32 %v13077_v43, %v13077_v43  ;;  %v13015_v52 = vpack.c.bf16 %v13077_v43, %v13076_v41 }
 0x59a   : > { %v11191_v2 = vadd.f32 %v11190_v9, %v11157_v22  ;;  %v6120_v17 = vpop.f32.mrb[60].mxu1 }
 0x59b   : > { %v11228_v28 = vadd.f32 %v11227_v3, %v11158_v19  ;;  %11473 = vst [vmem:[%s18695_s26 + $0xe8] sm:$0xff] %v13015_v52  ;;  %v10760_v55 = vpop.f32.mrb[60].mxu0  ;;  %v6122_v62 = vpop.f32.mrb[61].mxu1 }
 0x59c   : > { %v13078_v59 = vadd.f32 %v10760_v55, %v6120_v17  ;;  %v10762_v18 = vpop.f32.mrb[61].mxu0  ;;  %v6124_v63 = vpop.f32.mrb[62].mxu1 }
 0x59d   : > { %v13079_v53 = vadd.f32 %v10762_v18, %v6122_v62  ;;  %v10764_v4 = vpop.f32.mrb[62].mxu0  ;;  %v6126_v36 = vpop.f32.mrb[63].mxu1 }
 0x59e   : > { %v11054_v1 = vadd.f32 %v13078_v59, %v11053_v44  ;;  %v11159_v35 = vmul.f32 %v13078_v59, %v13078_v59  ;;  %v13080_v49 = vadd.f32 %v10764_v4, %v6124_v63  ;;  %v10766_v60 = vpop.f32.mrb[63].mxu0 }
 0x59f   : > { %v11091_v48 = vadd.f32 %v13079_v53, %v11090_v0  ;;  %v11160_v7 = vmul.f32 %v13079_v53, %v13079_v53  ;;  %v13016_v21 = vpack.c.bf16 %v13079_v53, %v13078_v59  ;;  %v13081_v25 = vadd.f32 %v10766_v60, %v6126_v36 }
 0x5a0   : > { %v11192_v61 = vadd.f32 %v11191_v2, %v11159_v35  ;;  %v11055_v6 = vadd.f32 %v13080_v49, %v11054_v1  ;;  %v11161_v26 = vmul.f32 %v13080_v49, %v13080_v49 }
 0x5a1   : > { %v11229_v30 = vadd.f32 %v11228_v28, %v11160_v7  ;;  %11474 = vst [vmem:[%s18695_s26 + $0xf0] sm:$0xff] %v13016_v21  ;;  %v11092_v27 = vadd.f32 %v13081_v25, %v11091_v48  ;;  %v11162_v15 = vmul.f32 %v13081_v25, %v13081_v25  ;;  %v13017_v45 = vpack.c.bf16 %v13081_v25, %v13080_v49 }
 0x5a2   : > { %v11056_v42 = vrot.slane %v11055_v6, 4  ;;  %v11193_v38 = vadd.f32 %v11192_v61, %v11161_v26 }
 0x5a3   : > { %v11093_v57 = vrot.slane %v11092_v27, 4  ;;  %v11230_v13 = vadd.f32 %v11229_v30, %v11162_v15  ;;  %11475 = vst [vmem:[%s18695_s26 + $0xf8] sm:$0xff] %v13017_v45 }
 0x5a4   : > { %v11057_v12 = vadd.f32 %v11056_v42, %v11055_v6  ;;  %v11194_v34 = vrot.slane %v11193_v38, 4 }
 0x5a5   : > { %v11094_v31 = vadd.f32 %v11093_v57, %v11092_v27  ;;  %v11231_v40 = vrot.slane %v11230_v13, 4 }
 0x5a6   : > { %v11058_v14 = vrot.slane %v11057_v12, 2  ;;  %v11195_v16 = vadd.f32 %v11194_v34, %v11193_v38 }
 0x5a7   : > { %v11095_v50 = vrot.slane %v11094_v31, 2  ;;  %v11232_v5 = vadd.f32 %v11231_v40, %v11230_v13 }
 0x5a8   : > { %v11059_v24 = vadd.f32 %v11058_v14, %v11057_v12  ;;  %v11196_v10 = vrot.slane %v11195_v16, 2 }
 0x5a9   : > { %v11096_v37 = vadd.f32 %v11095_v50, %v11094_v31  ;;  %v11233_v54 = vrot.slane %v11232_v5, 2 }
 0x5aa   : > { %v11060_v11 = vrot.slane %v11059_v24, 1  ;;  %v11197_v29 = vadd.f32 %v11196_v10, %v11195_v16 }
 0x5ab   : > { %v11097_v58 = vrot.slane %v11096_v37, 1  ;;  %v11234_v51 = vadd.f32 %v11233_v54, %v11232_v5 }
 0x5ac   : > { %v11198_v20 = vrot.slane %v11197_v29, 1  ;;  %v11061_v23 = vadd.f32 %v11060_v11, %v11059_v24 }
 0x5ad   : > { %v11235_v46 = vrot.slane %v11234_v51, 1  ;;  %v11098_v41 = vadd.f32 %v11097_v58, %v11096_v37 }
 0x5ae   : > { %v11199_v56 = vadd.f32 %v11198_v20, %v11197_v29 }
 0x5af   : > { %v11236_v8 = vadd.f32 %v11235_v46, %v11234_v51 }
 0x5b0   : > { %v11238_v47 = vsel %vm11237_vm6, %v11061_v23, %v11199_v56 }
 0x5b1   : > { %v11239_v32 = vsel %vm11237_vm6, %v11098_v41, %v11236_v8 }
 0x5b2   : > { %v11242_v33 = vcombine.low %v11238_v47, %v11239_v32 }
 0x5b4   : > { %12949 = vst.sshfl [vmem:[%s219_s30] sm:$0x33 pattern:$0x76325410] %v11242_v33 }
 0x5b5 PF: > { %s14_s14 = sadd.s32 1, %s15261_s14   ;;  %s19345_s12 = smov %s15257_s13 }
 0x5b6   : > { %p11_p5 = scmp.ge.s32.totalorder %s14_s14, 4   ;;  %s19346_s13 = smov %s19348_s15 }
 0x5b8   :  { %13 = sbr.rel (!%p11_p5) target bundleno = 2 (0x2), region = 78 }

</bundles_post_ra>
